<compile_context>
chip_gen: v5e
topology: v5e:2x2
jax: 0.10.0
libtpu: 0.0.40
codegen_flags: <defaults>
</compile_context>

<pallas_src>
import jax
import jax.numpy as jnp
from jax import lax
from jax.experimental import pallas as pl
from jax.experimental.pallas import tpu as pltpu

BN_EPS = 1e-5
N_CLASSES = 63
N_CLASSES_PAD = 128        # lane-aligned fc width (zero-padded columns)


# ---------------------------------------------------------------------------
# Fused kernel
# ---------------------------------------------------------------------------

def _bn_train(acc, gamma, beta):
    """Training-mode (biased) BatchNorm over the rows of acc [M, C], f32."""
    mean = jnp.mean(acc, axis=0, keepdims=True)
    var = jnp.mean(jnp.square(acc - mean), axis=0, keepdims=True)
    scale = gamma * lax.rsqrt(var + BN_EPS)
    return acc * scale + (beta - mean * scale)


def _conv_fused_kernel(x_ref,
                       w31_hbm, w32_hbm, w33_hbm, wf_hbm,
                       g31_ref, b31_ref, g32_ref, b32_ref, g33_ref, b33_ref,
                       bf_ref,
                       o_ref,
                       w31_v, w32_v, w33_v, wf_v, sem):
    bf16 = jnp.bfloat16
    batch, n_classes = o_ref.shape          # (B, 63); x rows are (d, b) ordered

    # Kick off ALL weight DMAs up front (single-buffered VMEM scratch): every
    # transfer after the first overlaps the previous stage's MXU work.
    cp31 = pltpu.make_async_copy(w31_hbm, w31_v, sem.at[0]); cp31.start()
    cp32 = pltpu.make_async_copy(w32_hbm, w32_v, sem.at[1]); cp32.start()
    cp33 = pltpu.make_async_copy(w33_hbm, w33_v, sem.at[2]); cp33.start()
    cpf = pltpu.make_async_copy(wf_hbm, wf_v, sem.at[3]); cpf.start()

    rows = x_ref[...].astype(bf16)                        # (2B, 1024), (d, b)

    # ---- conv31 (1x1x1, no bias) + bn31 ------------------------------------
    cp31.wait()
    y = jnp.dot(rows, w31_v[...], preferred_element_type=jnp.float32)
    y = _bn_train(y, g31_ref[...], b31_ref[...]).astype(bf16)      # (2B, 512)

    # ---- conv32 (3x3x3, pad 1) + bn32 ---------------------------------------
    # With H = W = 1 only the kh = kw = 1 taps touch data; with D = 2 each
    # output depth sees 2 valid depth taps:
    #   z_d0 = y_d0 @ W_k1 + y_d1 @ W_k2
    #   z_d1 = y_d0 @ W_k0 + y_d1 @ W_k1
    # The shared middle tap is one M = 2B matmul so W_k1 is pushed once.
    cp32.wait()
    t_mid = jnp.dot(y, w32_v[pl.ds(512, 512), :],
                    preferred_element_type=jnp.float32)            # (2B, 512)
    z_d0 = t_mid[0:batch] + jnp.dot(
        y[batch:2 * batch], w32_v[pl.ds(1024, 512), :],
        preferred_element_type=jnp.float32)
    z_d1 = t_mid[batch:2 * batch] + jnp.dot(
        y[0:batch], w32_v[pl.ds(0, 512), :],
        preferred_element_type=jnp.float32)
    z = jnp.concatenate([z_d0, z_d1], axis=0)                       # (2B, 512)
    z = _bn_train(z, g32_ref[...], b32_ref[...]).astype(bf16)

    # ---- conv33 (1x1x1) + bn33 + ReLU ---------------------------------------
    cp33.wait()
    u = jnp.dot(z, w33_v[...], preferred_element_type=jnp.float32)  # (2B,1024)
    u = _bn_train(u, g33_ref[...], b33_ref[...])
    u = jnp.maximum(u, 0.0)

    # ---- AvgPool3d((2,1,1)) over depth + view(B, -1) ------------------------
    pooled = ((u[0:batch] + u[batch:2 * batch]) * 0.5).astype(bf16)  # (B,1024)

    # ---- fc + ReLU + Softmax (lane-padded to 128 classes) -------------------
    cpf.wait()
    logits = jnp.dot(pooled, wf_v[...],
                     preferred_element_type=jnp.float32) + bf_ref[...]
    logits = jnp.maximum(logits, 0.0)                                # ReLU
    col = lax.broadcasted_iota(jnp.int32, logits.shape, 1)
    logits = jnp.where(col < n_classes, logits, -1e30)   # mask padded classes
    m = jnp.max(logits, axis=-1, keepdims=True)
    e = jnp.exp(logits - m)
    probs = e / jnp.sum(e, axis=-1, keepdims=True)
    o_ref[...] = probs[:, :n_classes].astype(o_ref.dtype)


# ---------------------------------------------------------------------------
# Forward pass wrapper
# ---------------------------------------------------------------------------

def conv_fused_forward(x, p):
    """x: [B, 1024, D, H, W] NCDHW with (D, H, W) == (2, 1, 1) (forced by fc)."""
    B, Cin, D, H, W = x.shape
    assert Cin == 1024 and D == 2 and H == 1 and W == 1, (
        "fc(1024, 63) after view(B, -1) forces (D, H, W) == (2, 1, 1)")
    M = B * D

    # The ONLY remaining XLA glue: depth-major row layout (16 KB copy).
    # TODO(synk): could be folded into the kernel with strided DMAs from a
    # pl.ANY input, but the lane-dim-2 relayout is not worth the lowering risk.
    xr = jnp.transpose(x.reshape(B, Cin, D), (2, 0, 1)).reshape(M, Cin)

    flops = 2 * (M * 1024 * 512            # conv31
                 + M * 512 * 512           # conv32 middle tap (both depths)
                 + 2 * B * 512 * 512       # conv32 edge taps
                 + M * 512 * 1024          # conv33
                 + B * 1024 * N_CLASSES_PAD)               # fc
    bytes_accessed = (int(xr.size) * 4 + B * N_CLASSES * 4
                      + sum(int(v.size) * v.dtype.itemsize for v in p.values()))
    cost = pl.CostEstimate(flops=flops,
                           transcendentals=B * N_CLASSES_PAD + 4 * 1024,
                           bytes_accessed=bytes_accessed)

    def vspec(shape):
        return pl.BlockSpec(shape, lambda i: (0, 0))
    any_spec = pl.BlockSpec(memory_space=pl.ANY)

    return pl.pallas_call(
        _conv_fused_kernel,
        out_shape=jax.ShapeDtypeStruct((B, N_CLASSES), jnp.float32),
        grid=(1,),
        in_specs=[
            vspec(xr.shape),
            any_spec, any_spec, any_spec, any_spec,        # w31, w32, w33, wf
            vspec(p["g31"].shape), vspec(p["b31"].shape),
            vspec(p["g32"].shape), vspec(p["b32"].shape),
            vspec(p["g33"].shape), vspec(p["b33"].shape),
            vspec(p["bf"].shape),
        ],
        out_specs=pl.BlockSpec((B, N_CLASSES), lambda i: (0, 0)),
        scratch_shapes=[
            pltpu.VMEM((1024, 512), jnp.bfloat16),          # w31
            pltpu.VMEM((1536, 512), jnp.bfloat16),          # w32 (3 depth taps)
            pltpu.VMEM((512, 1024), jnp.bfloat16),          # w33
            pltpu.VMEM((1024, N_CLASSES_PAD), jnp.bfloat16),  # wf (lane padded)
            pltpu.SemaphoreType.DMA((4,)),
        ],
        compiler_params=pltpu.CompilerParams(
            dimension_semantics=("arbitrary",),
            vmem_limit_bytes=12 * 1024 * 1024),
        cost_estimate=cost,
    )(xr, p["w31"], p["w32"], p["w33"], p["wf"],
      p["g31"], p["b31"], p["g32"], p["b32"], p["g33"], p["b33"], p["bf"])


# ---------------------------------------------------------------------------
# Parameters: PyTorch-shaped init, then one-time matmul-ready preparation
# ---------------------------------------------------------------------------

def init_params(key):
    ks = jax.random.split(key, 11)
    f32 = jnp.float32
    return {
        "w31": 0.02 * jax.random.normal(ks[0], (512, 1024, 1, 1, 1), f32),
        "g31": 1.0 + 0.1 * jax.random.normal(ks[1], (512,), f32),
        "b31": 0.1 * jax.random.normal(ks[2], (512,), f32),
        "w32": 0.02 * jax.random.normal(ks[3], (512, 512, 3, 3, 3), f32),
        "g32": 1.0 + 0.1 * jax.random.normal(ks[4], (512,), f32),
        "b32": 0.1 * jax.random.normal(ks[5], (512,), f32),
        "w33": 0.02 * jax.random.normal(ks[6], (1024, 512, 1, 1, 1), f32),
        "g33": 1.0 + 0.1 * jax.random.normal(ks[7], (1024,), f32),
        "b33": 0.1 * jax.random.normal(ks[8], (1024,), f32),
        "wf": 0.02 * jax.random.normal(ks[9], (63, 1024), f32),
        "bf": 0.1 * jax.random.normal(ks[10], (63,), f32),
    }


def prepare_params(params):
    """One-time (OUTSIDE the jitted forward) layout + dtype preparation:
    matmul-ready [K, Cout] bf16 weights, (1, C) f32 BN/bias vectors, the
    padding-tap-pruned conv32 weight (only kh = kw = 1 taps survive H = W = 1)
    and the lane-padded (1024, 128) fc weight."""
    bf16, f32 = jnp.bfloat16, jnp.float32
    w32 = params["w32"][:, :, :, 1, 1]                          # [Cout, Cin, kd]
    w32 = jnp.transpose(w32, (2, 1, 0)).reshape(3 * 512, 512)   # [(kd,cin), Cout]
    wf = jnp.zeros((1024, N_CLASSES_PAD), f32).at[:, :N_CLASSES].set(
        params["wf"].T)
    bf = jnp.zeros((1, N_CLASSES_PAD), f32).at[:, :N_CLASSES].set(
        params["bf"][None, :])
    return {
        "w31": params["w31"].reshape(512, 1024).T.astype(bf16),   # [1024, 512]
        "w32": w32.astype(bf16),                                   # [1536, 512]
        "w33": params["w33"].reshape(1024, 512).T.astype(bf16),   # [512, 1024]
        "wf": wf.astype(bf16),                                     # [1024, 128]
        "g31": params["g31"].reshape(1, 512).astype(f32),
        "b31": params["b31"].reshape(1, 512).astype(f32),
        "g32": params["g32"].reshape(1, 512).astype(f32),
        "b32": params["b32"].reshape(1, 512).astype(f32),
        "g33": params["g33"].reshape(1, 1024).astype(f32),
        "b33": params["b33"].reshape(1, 1024).astype(f32),
        "bf": bf.astype(f32),
    }


# ---------------------------------------------------------------------------
# Pure-JAX f32 reference (mirrors the PyTorch forward in train mode)
# ---------------------------------------------------------------------------

def reference_forward(x, raw):
    def bn(y, g, b):
        mean = jnp.mean(y, axis=(0, 2, 3, 4), keepdims=True)
        var = jnp.mean(jnp.square(y - mean), axis=(0, 2, 3, 4), keepdims=True)
        gg = g.reshape(1, -1, 1, 1, 1)
        bb = b.reshape(1, -1, 1, 1, 1)
        return (y - mean) * lax.rsqrt(var + BN_EPS) * gg + bb

    y = lax.conv_general_dilated(x, raw["w31"], (1, 1, 1), "VALID")
    y = bn(y, raw["g31"], raw["b31"])
    y = lax.conv_general_dilated(y, raw["w32"], (1, 1, 1),
                                 [(1, 1), (1, 1), (1, 1)])
    y = bn(y, raw["g32"], raw["b32"])
    y = lax.conv_general_dilated(y, raw["w33"], (1, 1, 1), "VALID")
    y = bn(y, raw["g33"], raw["b33"])
    y = jnp.maximum(y, 0.0)
    y = jnp.mean(y, axis=2)                      # AvgPool3d((2,1,1)) with D = 2
    feat = y.reshape(y.shape[0], -1)             # [B, 1024]
    logits = feat @ raw["wf"].T + raw["bf"]
    logits = jnp.maximum(logits, 0.0)
    return jax.nn.softmax(logits, axis=-1)


if __name__ == "__main__":
    key = jax.random.PRNGKey(0)
    pkey, xkey = jax.random.split(key)
    raw = init_params(pkey)
    prepared = prepare_params(raw)    # one-time, outside the jitted forward

    # Input spatial sizes implied by fc(1024 -> 63) after view(B, -1):
    # C*(D/2)*H*W == 1024 with C == 1024  =>  (D, H, W) == (2, 1, 1).
    x = jax.random.normal(xkey, (2, 1024, 2, 1, 1), jnp.float32)

    fwd = jax.jit(conv_fused_forward)
    out = jax.block_until_ready(fwd(x, prepared))

    assert out.shape == (2, N_CLASSES), out.shape
    row_sums = jnp.sum(out, axis=-1)
    assert bool(jnp.all(jnp.abs(row_sums - 1.0) < 1e-3)), row_sums

    ref = reference_forward(x, raw)              # f32 reference
    err = float(jnp.max(jnp.abs(out - ref)))
    assert err < 3e-2, f"max |pallas - ref| = {err}"

    print("KERNEL_OK")
</pallas_src>

<mosaic_0001>
module attributes {stable_mosaic.version = 11 : i64} {
  func.func @_conv_fused_kernel(%arg0: i32, %arg1: memref<4x1024xf32, #tpu.memory_space<vmem>>, %arg2: memref<1024x512xbf16, #tpu.memory_space<any>>, %arg3: memref<1536x512xbf16, #tpu.memory_space<any>>, %arg4: memref<512x1024xbf16, #tpu.memory_space<any>>, %arg5: memref<1024x128xbf16, #tpu.memory_space<any>>, %arg6: memref<1x512xf32, #tpu.memory_space<vmem>>, %arg7: memref<1x512xf32, #tpu.memory_space<vmem>>, %arg8: memref<1x512xf32, #tpu.memory_space<vmem>>, %arg9: memref<1x512xf32, #tpu.memory_space<vmem>>, %arg10: memref<1x1024xf32, #tpu.memory_space<vmem>>, %arg11: memref<1x1024xf32, #tpu.memory_space<vmem>>, %arg12: memref<1x128xf32, #tpu.memory_space<vmem>>, %arg13: memref<2x63xf32, #tpu.memory_space<vmem>>, %arg14: memref<1024x512xbf16, #tpu.memory_space<vmem>>, %arg15: memref<1536x512xbf16, #tpu.memory_space<vmem>>, %arg16: memref<512x1024xbf16, #tpu.memory_space<vmem>>, %arg17: memref<1024x128xbf16, #tpu.memory_space<vmem>>, %arg18: memref<4x!tpu.dma_semaphore, #tpu.memory_space<semaphore_mem>>) attributes {dimension_semantics = [#tpu.dimension_semantics<arbitrary>], iteration_bounds = array<i64: 1>, scalar_prefetch = 0 : i64, scratch_operands = 5 : i64, tpu.core_type = #tpu.core_type<tc>, window_params = [{pipeline_mode = #tpu.pipeline_mode<synchronous>, transform_indices = @transform_0, window_bounds = array<i64: 4, 1024>}, {}, {}, {}, {}, {pipeline_mode = #tpu.pipeline_mode<synchronous>, transform_indices = @transform_5, window_bounds = array<i64: 1, 512>}, {pipeline_mode = #tpu.pipeline_mode<synchronous>, transform_indices = @transform_6, window_bounds = array<i64: 1, 512>}, {pipeline_mode = #tpu.pipeline_mode<synchronous>, transform_indices = @transform_7, window_bounds = array<i64: 1, 512>}, {pipeline_mode = #tpu.pipeline_mode<synchronous>, transform_indices = @transform_8, window_bounds = array<i64: 1, 512>}, {pipeline_mode = #tpu.pipeline_mode<synchronous>, transform_indices = @transform_9, window_bounds = array<i64: 1, 1024>}, {pipeline_mode = #tpu.pipeline_mode<synchronous>, transform_indices = @transform_10, window_bounds = array<i64: 1, 1024>}, {pipeline_mode = #tpu.pipeline_mode<synchronous>, transform_indices = @transform_11, window_bounds = array<i64: 1, 128>}, {pipeline_mode = #tpu.pipeline_mode<synchronous>, transform_indices = @transform_12, window_bounds = array<i64: 2, 63>}]} {
    %c0_i32 = arith.constant 0 : i32
    %0 = tpu.memref_slice %arg18[%c0_i32] : memref<4x!tpu.dma_semaphore, #tpu.memory_space<semaphore_mem>> -> memref<1x!tpu.dma_semaphore, #tpu.memory_space<semaphore_mem>>
    %1 = tpu.memref_squeeze %0 : memref<1x!tpu.dma_semaphore, #tpu.memory_space<semaphore_mem>> -> memref<!tpu.dma_semaphore, #tpu.memory_space<semaphore_mem>>
    tpu.enqueue_dma source(%arg2 : memref<1024x512xbf16, #tpu.memory_space<any>>) target(%arg14 : memref<1024x512xbf16, #tpu.memory_space<vmem>>) target_semaphore(%1 : memref<!tpu.dma_semaphore, #tpu.memory_space<semaphore_mem>>)
    %c1_i32 = arith.constant 1 : i32
    %2 = tpu.memref_slice %arg18[%c1_i32] : memref<4x!tpu.dma_semaphore, #tpu.memory_space<semaphore_mem>> -> memref<1x!tpu.dma_semaphore, #tpu.memory_space<semaphore_mem>>
    %3 = tpu.memref_squeeze %2 : memref<1x!tpu.dma_semaphore, #tpu.memory_space<semaphore_mem>> -> memref<!tpu.dma_semaphore, #tpu.memory_space<semaphore_mem>>
    tpu.enqueue_dma source(%arg3 : memref<1536x512xbf16, #tpu.memory_space<any>>) target(%arg15 : memref<1536x512xbf16, #tpu.memory_space<vmem>>) target_semaphore(%3 : memref<!tpu.dma_semaphore, #tpu.memory_space<semaphore_mem>>)
    %c2_i32 = arith.constant 2 : i32
    %4 = tpu.memref_slice %arg18[%c2_i32] : memref<4x!tpu.dma_semaphore, #tpu.memory_space<semaphore_mem>> -> memref<1x!tpu.dma_semaphore, #tpu.memory_space<semaphore_mem>>
    %5 = tpu.memref_squeeze %4 : memref<1x!tpu.dma_semaphore, #tpu.memory_space<semaphore_mem>> -> memref<!tpu.dma_semaphore, #tpu.memory_space<semaphore_mem>>
    tpu.enqueue_dma source(%arg4 : memref<512x1024xbf16, #tpu.memory_space<any>>) target(%arg16 : memref<512x1024xbf16, #tpu.memory_space<vmem>>) target_semaphore(%5 : memref<!tpu.dma_semaphore, #tpu.memory_space<semaphore_mem>>)
    %c3_i32 = arith.constant 3 : i32
    %6 = tpu.memref_slice %arg18[%c3_i32] : memref<4x!tpu.dma_semaphore, #tpu.memory_space<semaphore_mem>> -> memref<1x!tpu.dma_semaphore, #tpu.memory_space<semaphore_mem>>
    %7 = tpu.memref_squeeze %6 : memref<1x!tpu.dma_semaphore, #tpu.memory_space<semaphore_mem>> -> memref<!tpu.dma_semaphore, #tpu.memory_space<semaphore_mem>>
    tpu.enqueue_dma source(%arg5 : memref<1024x128xbf16, #tpu.memory_space<any>>) target(%arg17 : memref<1024x128xbf16, #tpu.memory_space<vmem>>) target_semaphore(%7 : memref<!tpu.dma_semaphore, #tpu.memory_space<semaphore_mem>>)
    %c0 = arith.constant 0 : index
    %c0_0 = arith.constant 0 : index
    %8 = vector.load %arg1[%c0, %c0_0] : memref<4x1024xf32, #tpu.memory_space<vmem>>, vector<4x1024xf32>
    %9 = arith.truncf %8 : vector<4x1024xf32> to vector<4x1024xbf16>
    %c0_i32_1 = arith.constant 0 : i32
    %10 = tpu.memref_slice %arg18[%c0_i32_1] : memref<4x!tpu.dma_semaphore, #tpu.memory_space<semaphore_mem>> -> memref<1x!tpu.dma_semaphore, #tpu.memory_space<semaphore_mem>>
    %11 = tpu.memref_squeeze %10 : memref<1x!tpu.dma_semaphore, #tpu.memory_space<semaphore_mem>> -> memref<!tpu.dma_semaphore, #tpu.memory_space<semaphore_mem>>
    tpu.wait_dma2 semaphore(%11 : memref<!tpu.dma_semaphore, #tpu.memory_space<semaphore_mem>>) src(%arg2 : memref<1024x512xbf16, #tpu.memory_space<any>>) dst(%arg14 : memref<1024x512xbf16, #tpu.memory_space<vmem>>)
    %c0_2 = arith.constant 0 : index
    %c0_3 = arith.constant 0 : index
    %12 = vector.load %arg14[%c0_2, %c0_3] : memref<1024x512xbf16, #tpu.memory_space<vmem>>, vector<1024x512xbf16>
    %cst = arith.constant dense<0.000000e+00> : vector<4x512xf32>
    %13 = tpu.matmul %9, %12, %cst {dimension_numbers = #tpu.dot_dimension_numbers<[1], [0], [0], [1], [0, 0, 1, 1], [], []>} : vector<4x1024xbf16>, vector<1024x512xbf16>, vector<4x512xf32> -> vector<4x512xf32>
    %c0_4 = arith.constant 0 : index
    %c0_5 = arith.constant 0 : index
    %14 = vector.load %arg6[%c0_4, %c0_5] : memref<1x512xf32, #tpu.memory_space<vmem>>, vector<1x512xf32>
    %c0_6 = arith.constant 0 : index
    %c0_7 = arith.constant 0 : index
    %15 = vector.load %arg7[%c0_6, %c0_7] : memref<1x512xf32, #tpu.memory_space<vmem>>, vector<1x512xf32>
    %cst_8 = arith.constant dense<0.000000e+00> : vector<512xf32>
    %16 = vector.multi_reduction <add>, %13, %cst_8 [0] : vector<4x512xf32> to vector<512xf32>
    %17 = vector.shape_cast %16 : vector<512xf32> to vector<1x512xf32>
    %cst_9 = arith.constant 4.000000e+00 : f32
    %18 = vector.broadcast %cst_9 : f32 to vector<1x512xf32>
    %19 = arith.divf %17, %18 : vector<1x512xf32>
    %20 = vector.broadcast %19 : vector<1x512xf32> to vector<4x512xf32>
    %21 = arith.subf %13, %20 : vector<4x512xf32>
    %22 = arith.mulf %21, %21 : vector<4x512xf32>
    %cst_10 = arith.constant dense<0.000000e+00> : vector<512xf32>
    %23 = vector.multi_reduction <add>, %22, %cst_10 [0] : vector<4x512xf32> to vector<512xf32>
    %24 = vector.shape_cast %23 : vector<512xf32> to vector<1x512xf32>
    %cst_11 = arith.constant 4.000000e+00 : f32
    %25 = vector.broadcast %cst_11 : f32 to vector<1x512xf32>
    %26 = arith.divf %24, %25 : vector<1x512xf32>
    %cst_12 = arith.constant 9.99999974E-6 : f32
    %27 = vector.broadcast %cst_12 : f32 to vector<1x512xf32>
    %28 = arith.addf %26, %27 : vector<1x512xf32>
    %29 = math.rsqrt %28 : vector<1x512xf32>
    %30 = arith.mulf %14, %29 : vector<1x512xf32>
    %31 = vector.broadcast %30 : vector<1x512xf32> to vector<4x512xf32>
    %32 = arith.mulf %13, %31 : vector<4x512xf32>
    %33 = arith.mulf %19, %30 : vector<1x512xf32>
    %34 = arith.subf %15, %33 : vector<1x512xf32>
    %35 = vector.broadcast %34 : vector<1x512xf32> to vector<4x512xf32>
    %36 = arith.addf %32, %35 : vector<4x512xf32>
    %37 = arith.truncf %36 : vector<4x512xf32> to vector<4x512xbf16>
    %c1_i32_13 = arith.constant 1 : i32
    %38 = tpu.memref_slice %arg18[%c1_i32_13] : memref<4x!tpu.dma_semaphore, #tpu.memory_space<semaphore_mem>> -> memref<1x!tpu.dma_semaphore, #tpu.memory_space<semaphore_mem>>
    %39 = tpu.memref_squeeze %38 : memref<1x!tpu.dma_semaphore, #tpu.memory_space<semaphore_mem>> -> memref<!tpu.dma_semaphore, #tpu.memory_space<semaphore_mem>>
    tpu.wait_dma2 semaphore(%39 : memref<!tpu.dma_semaphore, #tpu.memory_space<semaphore_mem>>) src(%arg3 : memref<1536x512xbf16, #tpu.memory_space<any>>) dst(%arg15 : memref<1536x512xbf16, #tpu.memory_space<vmem>>)
    %c512 = arith.constant 512 : index
    %c0_14 = arith.constant 0 : index
    %40 = vector.load %arg15[%c512, %c0_14] : memref<1536x512xbf16, #tpu.memory_space<vmem>>, vector<512x512xbf16>
    %cst_15 = arith.constant dense<0.000000e+00> : vector<4x512xf32>
    %41 = tpu.matmul %37, %40, %cst_15 {dimension_numbers = #tpu.dot_dimension_numbers<[1], [0], [0], [1], [0, 0, 1, 1], [], []>} : vector<4x512xbf16>, vector<512x512xbf16>, vector<4x512xf32> -> vector<4x512xf32>
    %42 = vector.extract_strided_slice %41 {offsets = [0, 0], sizes = [2, 512], strides = [1, 1]} : vector<4x512xf32> to vector<2x512xf32>
    %43 = vector.extract_strided_slice %37 {offsets = [2, 0], sizes = [2, 512], strides = [1, 1]} : vector<4x512xbf16> to vector<2x512xbf16>
    %c1024 = arith.constant 1024 : index
    %c0_16 = arith.constant 0 : index
    %44 = vector.load %arg15[%c1024, %c0_16] : memref<1536x512xbf16, #tpu.memory_space<vmem>>, vector<512x512xbf16>
    %cst_17 = arith.constant dense<0.000000e+00> : vector<2x512xf32>
    %45 = tpu.matmul %43, %44, %cst_17 {dimension_numbers = #tpu.dot_dimension_numbers<[1], [0], [0], [1], [0, 0, 1, 1], [], []>} : vector<2x512xbf16>, vector<512x512xbf16>, vector<2x512xf32> -> vector<2x512xf32>
    %46 = arith.addf %42, %45 : vector<2x512xf32>
    %47 = vector.extract_strided_slice %41 {offsets = [2, 0], sizes = [2, 512], strides = [1, 1]} : vector<4x512xf32> to vector<2x512xf32>
    %48 = vector.extract_strided_slice %37 {offsets = [0, 0], sizes = [2, 512], strides = [1, 1]} : vector<4x512xbf16> to vector<2x512xbf16>
    %c0_18 = arith.constant 0 : index
    %c0_19 = arith.constant 0 : index
    %49 = vector.load %arg15[%c0_18, %c0_19] : memref<1536x512xbf16, #tpu.memory_space<vmem>>, vector<512x512xbf16>
    %cst_20 = arith.constant dense<0.000000e+00> : vector<2x512xf32>
    %50 = tpu.matmul %48, %49, %cst_20 {dimension_numbers = #tpu.dot_dimension_numbers<[1], [0], [0], [1], [0, 0, 1, 1], [], []>} : vector<2x512xbf16>, vector<512x512xbf16>, vector<2x512xf32> -> vector<2x512xf32>
    %51 = arith.addf %47, %50 : vector<2x512xf32>
    %52 = tpu.concatenate %46, %51 in 0 : vector<2x512xf32>, vector<2x512xf32> -> vector<4x512xf32>
    %c0_21 = arith.constant 0 : index
    %c0_22 = arith.constant 0 : index
    %53 = vector.load %arg8[%c0_21, %c0_22] : memref<1x512xf32, #tpu.memory_space<vmem>>, vector<1x512xf32>
    %c0_23 = arith.constant 0 : index
    %c0_24 = arith.constant 0 : index
    %54 = vector.load %arg9[%c0_23, %c0_24] : memref<1x512xf32, #tpu.memory_space<vmem>>, vector<1x512xf32>
    %cst_25 = arith.constant dense<0.000000e+00> : vector<512xf32>
    %55 = vector.multi_reduction <add>, %52, %cst_25 [0] : vector<4x512xf32> to vector<512xf32>
    %56 = vector.shape_cast %55 : vector<512xf32> to vector<1x512xf32>
    %cst_26 = arith.constant 4.000000e+00 : f32
    %57 = vector.broadcast %cst_26 : f32 to vector<1x512xf32>
    %58 = arith.divf %56, %57 : vector<1x512xf32>
    %59 = vector.broadcast %58 : vector<1x512xf32> to vector<4x512xf32>
    %60 = arith.subf %52, %59 : vector<4x512xf32>
    %61 = arith.mulf %60, %60 : vector<4x512xf32>
    %cst_27 = arith.constant dense<0.000000e+00> : vector<512xf32>
    %62 = vector.multi_reduction <add>, %61, %cst_27 [0] : vector<4x512xf32> to vector<512xf32>
    %63 = vector.shape_cast %62 : vector<512xf32> to vector<1x512xf32>
    %cst_28 = arith.constant 4.000000e+00 : f32
    %64 = vector.broadcast %cst_28 : f32 to vector<1x512xf32>
    %65 = arith.divf %63, %64 : vector<1x512xf32>
    %cst_29 = arith.constant 9.99999974E-6 : f32
    %66 = vector.broadcast %cst_29 : f32 to vector<1x512xf32>
    %67 = arith.addf %65, %66 : vector<1x512xf32>
    %68 = math.rsqrt %67 : vector<1x512xf32>
    %69 = arith.mulf %53, %68 : vector<1x512xf32>
    %70 = vector.broadcast %69 : vector<1x512xf32> to vector<4x512xf32>
    %71 = arith.mulf %52, %70 : vector<4x512xf32>
    %72 = arith.mulf %58, %69 : vector<1x512xf32>
    %73 = arith.subf %54, %72 : vector<1x512xf32>
    %74 = vector.broadcast %73 : vector<1x512xf32> to vector<4x512xf32>
    %75 = arith.addf %71, %74 : vector<4x512xf32>
    %76 = arith.truncf %75 : vector<4x512xf32> to vector<4x512xbf16>
    %c2_i32_30 = arith.constant 2 : i32
    %77 = tpu.memref_slice %arg18[%c2_i32_30] : memref<4x!tpu.dma_semaphore, #tpu.memory_space<semaphore_mem>> -> memref<1x!tpu.dma_semaphore, #tpu.memory_space<semaphore_mem>>
    %78 = tpu.memref_squeeze %77 : memref<1x!tpu.dma_semaphore, #tpu.memory_space<semaphore_mem>> -> memref<!tpu.dma_semaphore, #tpu.memory_space<semaphore_mem>>
    tpu.wait_dma2 semaphore(%78 : memref<!tpu.dma_semaphore, #tpu.memory_space<semaphore_mem>>) src(%arg4 : memref<512x1024xbf16, #tpu.memory_space<any>>) dst(%arg16 : memref<512x1024xbf16, #tpu.memory_space<vmem>>)
    %c0_31 = arith.constant 0 : index
    %c0_32 = arith.constant 0 : index
    %79 = vector.load %arg16[%c0_31, %c0_32] : memref<512x1024xbf16, #tpu.memory_space<vmem>>, vector<512x1024xbf16>
    %cst_33 = arith.constant dense<0.000000e+00> : vector<4x1024xf32>
    %80 = tpu.matmul %76, %79, %cst_33 {dimension_numbers = #tpu.dot_dimension_numbers<[1], [0], [0], [1], [0, 0, 1, 1], [], []>} : vector<4x512xbf16>, vector<512x1024xbf16>, vector<4x1024xf32> -> vector<4x1024xf32>
    %c0_34 = arith.constant 0 : index
    %c0_35 = arith.constant 0 : index
    %81 = vector.load %arg10[%c0_34, %c0_35] : memref<1x1024xf32, #tpu.memory_space<vmem>>, vector<1x1024xf32>
    %c0_36 = arith.constant 0 : index
    %c0_37 = arith.constant 0 : index
    %82 = vector.load %arg11[%c0_36, %c0_37] : memref<1x1024xf32, #tpu.memory_space<vmem>>, vector<1x1024xf32>
    %cst_38 = arith.constant dense<0.000000e+00> : vector<1024xf32>
    %83 = vector.multi_reduction <add>, %80, %cst_38 [0] : vector<4x1024xf32> to vector<1024xf32>
    %84 = vector.shape_cast %83 : vector<1024xf32> to vector<1x1024xf32>
    %cst_39 = arith.constant 4.000000e+00 : f32
    %85 = vector.broadcast %cst_39 : f32 to vector<1x1024xf32>
    %86 = arith.divf %84, %85 : vector<1x1024xf32>
    %87 = vector.broadcast %86 : vector<1x1024xf32> to vector<4x1024xf32>
    %88 = arith.subf %80, %87 : vector<4x1024xf32>
    %89 = arith.mulf %88, %88 : vector<4x1024xf32>
    %cst_40 = arith.constant dense<0.000000e+00> : vector<1024xf32>
    %90 = vector.multi_reduction <add>, %89, %cst_40 [0] : vector<4x1024xf32> to vector<1024xf32>
    %91 = vector.shape_cast %90 : vector<1024xf32> to vector<1x1024xf32>
    %cst_41 = arith.constant 4.000000e+00 : f32
    %92 = vector.broadcast %cst_41 : f32 to vector<1x1024xf32>
    %93 = arith.divf %91, %92 : vector<1x1024xf32>
    %cst_42 = arith.constant 9.99999974E-6 : f32
    %94 = vector.broadcast %cst_42 : f32 to vector<1x1024xf32>
    %95 = arith.addf %93, %94 : vector<1x1024xf32>
    %96 = math.rsqrt %95 : vector<1x1024xf32>
    %97 = arith.mulf %81, %96 : vector<1x1024xf32>
    %98 = vector.broadcast %97 : vector<1x1024xf32> to vector<4x1024xf32>
    %99 = arith.mulf %80, %98 : vector<4x1024xf32>
    %100 = arith.mulf %86, %97 : vector<1x1024xf32>
    %101 = arith.subf %82, %100 : vector<1x1024xf32>
    %102 = vector.broadcast %101 : vector<1x1024xf32> to vector<4x1024xf32>
    %103 = arith.addf %99, %102 : vector<4x1024xf32>
    %cst_43 = arith.constant 0.000000e+00 : f32
    %104 = vector.broadcast %cst_43 : f32 to vector<4x1024xf32>
    %105 = arith.maximumf %103, %104 : vector<4x1024xf32>
    %106 = vector.extract_strided_slice %105 {offsets = [0, 0], sizes = [2, 1024], strides = [1, 1]} : vector<4x1024xf32> to vector<2x1024xf32>
    %107 = vector.extract_strided_slice %105 {offsets = [2, 0], sizes = [2, 1024], strides = [1, 1]} : vector<4x1024xf32> to vector<2x1024xf32>
    %108 = arith.addf %106, %107 : vector<2x1024xf32>
    %cst_44 = arith.constant 5.000000e-01 : f32
    %109 = vector.broadcast %cst_44 : f32 to vector<2x1024xf32>
    %110 = arith.mulf %108, %109 : vector<2x1024xf32>
    %111 = arith.truncf %110 : vector<2x1024xf32> to vector<2x1024xbf16>
    %c3_i32_45 = arith.constant 3 : i32
    %112 = tpu.memref_slice %arg18[%c3_i32_45] : memref<4x!tpu.dma_semaphore, #tpu.memory_space<semaphore_mem>> -> memref<1x!tpu.dma_semaphore, #tpu.memory_space<semaphore_mem>>
    %113 = tpu.memref_squeeze %112 : memref<1x!tpu.dma_semaphore, #tpu.memory_space<semaphore_mem>> -> memref<!tpu.dma_semaphore, #tpu.memory_space<semaphore_mem>>
    tpu.wait_dma2 semaphore(%113 : memref<!tpu.dma_semaphore, #tpu.memory_space<semaphore_mem>>) src(%arg5 : memref<1024x128xbf16, #tpu.memory_space<any>>) dst(%arg17 : memref<1024x128xbf16, #tpu.memory_space<vmem>>)
    %c0_46 = arith.constant 0 : index
    %c0_47 = arith.constant 0 : index
    %114 = vector.load %arg17[%c0_46, %c0_47] : memref<1024x128xbf16, #tpu.memory_space<vmem>>, vector<1024x128xbf16>
    %cst_48 = arith.constant dense<0.000000e+00> : vector<2x128xf32>
    %115 = tpu.matmul %111, %114, %cst_48 {dimension_numbers = #tpu.dot_dimension_numbers<[1], [0], [0], [1], [0, 0, 1, 1], [], []>} : vector<2x1024xbf16>, vector<1024x128xbf16>, vector<2x128xf32> -> vector<2x128xf32>
    %c0_49 = arith.constant 0 : index
    %c0_50 = arith.constant 0 : index
    %116 = vector.load %arg12[%c0_49, %c0_50] : memref<1x128xf32, #tpu.memory_space<vmem>>, vector<1x128xf32>
    %117 = vector.broadcast %116 : vector<1x128xf32> to vector<2x128xf32>
    %118 = arith.addf %115, %117 : vector<2x128xf32>
    %cst_51 = arith.constant 0.000000e+00 : f32
    %119 = vector.broadcast %cst_51 : f32 to vector<2x128xf32>
    %120 = arith.maximumf %118, %119 : vector<2x128xf32>
    %121 = tpu.iota {dimensions = array<i32: 1>} : vector<2x128xi32>
    %c63_i32 = arith.constant 63 : i32
    %122 = vector.broadcast %c63_i32 : i32 to vector<2x128xi32>
    %123 = arith.cmpi slt, %121, %122 : vector<2x128xi32>
    %cst_52 = arith.constant -1.000000e+30 : f32
    %124 = vector.broadcast %cst_52 : f32 to vector<2x128xf32>
    %125 = arith.select %123, %120, %124 : vector<2x128xi1>, vector<2x128xf32>
    %cst_53 = arith.constant dense<0xFF800000> : vector<2xf32>
    %126 = vector.multi_reduction <maximumf>, %125, %cst_53 [1] : vector<2x128xf32> to vector<2xf32>
    %127 = vector.shape_cast %126 : vector<2xf32> to vector<2x1xf32>
    %128 = vector.broadcast %127 : vector<2x1xf32> to vector<2x128xf32>
    %129 = arith.subf %125, %128 : vector<2x128xf32>
    %130 = math.exp %129 : vector<2x128xf32>
    %cst_54 = arith.constant dense<0.000000e+00> : vector<2xf32>
    %131 = vector.multi_reduction <add>, %130, %cst_54 [1] : vector<2x128xf32> to vector<2xf32>
    %132 = vector.shape_cast %131 : vector<2xf32> to vector<2x1xf32>
    %133 = vector.broadcast %132 : vector<2x1xf32> to vector<2x128xf32>
    %134 = arith.divf %130, %133 : vector<2x128xf32>
    %135 = vector.extract_strided_slice %134 {offsets = [0, 0], sizes = [2, 63], strides = [1, 1]} : vector<2x128xf32> to vector<2x63xf32>
    %c0_55 = arith.constant 0 : index
    %c0_56 = arith.constant 0 : index
    %136 = vector.load %arg13[%c0_55, %c0_56] : memref<2x63xf32, #tpu.memory_space<vmem>>, vector<2x63xf32>
    tpu.vector_store %arg13[%c0_55, %c0_56], %135 {strides = array<i32>} : memref<2x63xf32, #tpu.memory_space<vmem>>, vector<2x63xf32>,
    return
  }
  func.func @transform_0(%arg0: i32) -> (i32, i32) {
    %c0_i32 = arith.constant 0 : i32
    %c0_i32_0 = arith.constant 0 : i32
    %c0_i32_1 = arith.constant 0 : i32
    return %c0_i32, %c0_i32_0 : i32, i32
  }
  func.func @transform_5(%arg0: i32) -> (i32, i32) {
    %c0_i32 = arith.constant 0 : i32
    %c0_i32_0 = arith.constant 0 : i32
    %c0_i32_1 = arith.constant 0 : i32
    return %c0_i32, %c0_i32_0 : i32, i32
  }
  func.func @transform_6(%arg0: i32) -> (i32, i32) {
    %c0_i32 = arith.constant 0 : i32
    %c0_i32_0 = arith.constant 0 : i32
    %c0_i32_1 = arith.constant 0 : i32
    return %c0_i32, %c0_i32_0 : i32, i32
  }
  func.func @transform_7(%arg0: i32) -> (i32, i32) {
    %c0_i32 = arith.constant 0 : i32
    %c0_i32_0 = arith.constant 0 : i32
    %c0_i32_1 = arith.constant 0 : i32
    return %c0_i32, %c0_i32_0 : i32, i32
  }
  func.func @transform_8(%arg0: i32) -> (i32, i32) {
    %c0_i32 = arith.constant 0 : i32
    %c0_i32_0 = arith.constant 0 : i32
    %c0_i32_1 = arith.constant 0 : i32
    return %c0_i32, %c0_i32_0 : i32, i32
  }
  func.func @transform_9(%arg0: i32) -> (i32, i32) {
    %c0_i32 = arith.constant 0 : i32
    %c0_i32_0 = arith.constant 0 : i32
    %c0_i32_1 = arith.constant 0 : i32
    return %c0_i32, %c0_i32_0 : i32, i32
  }
  func.func @transform_10(%arg0: i32) -> (i32, i32) {
    %c0_i32 = arith.constant 0 : i32
    %c0_i32_0 = arith.constant 0 : i32
    %c0_i32_1 = arith.constant 0 : i32
    return %c0_i32, %c0_i32_0 : i32, i32
  }
  func.func @transform_11(%arg0: i32) -> (i32, i32) {
    %c0_i32 = arith.constant 0 : i32
    %c0_i32_0 = arith.constant 0 : i32
    %c0_i32_1 = arith.constant 0 : i32
    return %c0_i32, %c0_i32_0 : i32, i32
  }
  func.func @transform_12(%arg0: i32) -> (i32, i32) {
    %c0_i32 = arith.constant 0 : i32
    %c0_i32_0 = arith.constant 0 : i32
    %c0_i32_1 = arith.constant 0 : i32
    return %c0_i32, %c0_i32_0 : i32, i32
  }
}

</mosaic_0001>

<bundles_post_ra>
// kernel: conv_fused_forward.1
= control target key start
LH: loop header
LB: loop body
LE: loop exit
PB: predicated region body
PF: predicated region fallthrough
CT: control target
= control target key end

     0   :  { %17 = vsyncpa [#allocation8], 0  ;;  %s14471_s0 = inlined_call_operand.vmem [shape: f32[4,1024], index: 0, kind: input, shape index: {}]   ;;  %s14472_s1 = inlined_call_operand.hbm [shape: bf16[1024,512], index: 1, kind: input, shape index: {}]   ;;  %s14473_s2 = inlined_call_operand.hbm [shape: bf16[1536,512], index: 2, kind: input, shape index: {}]   ;;  %s14474_s3 = inlined_call_operand.hbm [shape: bf16[512,1024], index: 3, kind: input, shape index: {}]   ;;  %s14475_s4 = inlined_call_operand.hbm [shape: bf16[1024,128], index: 4, kind: input, shape index: {}]   ;;  %s14476_s5 = inlined_call_operand.hbm [shape: f32[1,512], index: 5, kind: input, shape index: {}]   ;;  %s14477_s6 = inlined_call_operand.hbm [shape: f32[1,512], index: 6, kind: input, shape index: {}]   ;;  %s14478_s7 = inlined_call_operand.hbm [shape: f32[1,512], index: 7, kind: input, shape index: {}]   ;;  %s14479_s8 = inlined_call_operand.hbm [shape: f32[1,512], index: 8, kind: input, shape index: {}]   ;;  %s14480_s9 = inlined_call_operand.hbm [shape: f32[1,1024], index: 9, kind: input, shape index: {}]   ;;  %s14481_s10 = inlined_call_operand.hbm [shape: f32[1,1024], index: 10, kind: input, shape index: {}]   ;;  %s14482_s11 = inlined_call_operand.hbm [shape: f32[1,128], index: 11, kind: input, shape index: {}]   ;;  %s14483_s12 = inlined_call_operand.hbm [shape: f32[2,63], index: 12, kind: output, shape index: {}]  }
   0x1   :  { %18 = vsyncpa [#allocation11], 0 }
   0x2   :  { %19 = vsyncpa [#allocation14], 0 }
   0x3   :  { %20 = vsyncpa [#allocation17], 0  ;;  %s40_s23 = sshll.u32 %s14477_s6, 4  ;;  %s41_s23 = int_to_ptr.hbm [resolvable:$true] %s40_s23 }
   0x4   :  { %21 = vsyncpa [#allocation9], 0  ;;  %s13736_s24 = smov [#allocation10]   ;;  %s62_s28 = sshll.u32 %s14479_s8, 4  ;;  %s63_s28 = int_to_ptr.hbm [resolvable:$true] %s62_s28 }
   0x5   :  { %s42_s25 = sshll.u32 %s13736_s24, 4  ;;  %s13737_s29 = smov [#allocation13]   ;;  %s43_s25 = int_to_ptr.vmem [resolvable:$true] %s42_s25 }
   0x6   :  { %45 = dma.hbm_to_vmem [thread:$0]  %s41_s23, 64, %s43_s25, [#allocation11]  }
   0x7   :  { %s64_s30 = sshll.u32 %s13737_s29, 4  ;;  %s84_s15 = sshll.u32 %s14481_s10, 4  ;;  %s65_s30 = int_to_ptr.vmem [resolvable:$true] %s64_s30  ;;  %s85_s15 = int_to_ptr.hbm [resolvable:$true] %s84_s15 }
   0x8   :  { %67 = dma.hbm_to_vmem [thread:$0]  %s63_s28, 64, %s65_s30, [#allocation14]  }
   0x9   :  { %s29_s17 = sshll.u32 %s14476_s5, 4  ;;  %s13738_s18 = smov [#allocation16]   ;;  %s30_s17 = int_to_ptr.hbm [resolvable:$true] %s29_s17 }
   0xa   :  { %s86_s19 = sshll.u32 %s13738_s18, 4  ;;  %s13739_s8 = smov [#allocation7]   ;;  %s87_s19 = int_to_ptr.vmem [resolvable:$true] %s86_s19 }
   0xb   :  { %89 = dma.hbm_to_vmem [thread:$0]  %s85_s15, 128, %s87_s19, [#allocation17]  }
   0xc   :  { %s31_s20 = sshll.u32 %s13739_s8, 4  ;;  %s51_s23 = sshll.u32 %s14478_s7, 4  ;;  %s32_s20 = int_to_ptr.vmem [resolvable:$true] %s31_s20  ;;  %s52_s23 = int_to_ptr.hbm [resolvable:$true] %s51_s23 }
   0xd   :  { %34 = dma.hbm_to_vmem [thread:$0]  %s30_s17, 64, %s32_s20, [#allocation8]  }
   0xe   :  { %s73_s25 = sshll.u32 %s14480_s9, 4  ;;  %s13740_s26 = smov [#allocation12]   ;;  %s74_s25 = int_to_ptr.hbm [resolvable:$true] %s73_s25 }
   0xf   :  { %s53_s5 = sshll.u32 %s13740_s26, 4  ;;  %s13741_s27 = smov [#allocation15]   ;;  %s54_s5 = int_to_ptr.vmem [resolvable:$true] %s53_s5 }
  0x10   :  { %56 = dma.hbm_to_vmem [thread:$0]  %s52_s23, 64, %s54_s5, [#allocation11]  }
  0x11   :  { %s75_s28 = sshll.u32 %s13741_s27, 4  ;;  %s95_s13 = sshll.u32 %s14482_s11, 4  ;;  %s76_s28 = int_to_ptr.vmem [resolvable:$true] %s75_s28  ;;  %s96_s13 = int_to_ptr.hbm [resolvable:$true] %s95_s13 }
  0x12   :  { %78 = dma.hbm_to_vmem [thread:$0]  %s74_s25, 128, %s76_s28, [#allocation14]  }
  0x13   :  { %s13742_s7 = smov [#allocation18]  }
  0x14   :  { %s97_s14 = sshll.u32 %s13742_s7, 4  ;;  %s98_s14 = int_to_ptr.vmem [resolvable:$true] %s97_s14 }
  0x15   :  { %100 = dma.hbm_to_vmem [thread:$0]  %s96_s13, 16, %s98_s14, [#allocation17]  }
  0x16   :  { %13718 = dma.done.wait [#allocation8], 64  }
  0x17   :  { %13719 = vsyncadd [#allocation8], 4294967232 }
  0x18   :  { %13720 = dma.done.wait [#allocation11], 128  }
  0x19   :  { %13721 = vsyncadd [#allocation11], 4294967168 }
  0x1a   :  { %13722 = dma.done.wait [#allocation14], 192  }
  0x1b   :  { %13723 = vsyncadd [#allocation14], 4294967104 }
  0x1c   :  { %13724 = dma.done.wait [#allocation17], 144  }
  0x1d   :  { %13725 = vsyncadd [#allocation17], 4294967152  ;;  %s136_s6 = sshll.u32 %s14472_s1, 4  ;;  %s13743_s11 = smov [#allocation2]   ;;  %v184_v0 = vld [vmem:[%s14471_s0] sm:$0xff]  ;;  %v185_v1 = vld [vmem:[%s14471_s0 + $0x8] sm:$0xff]  ;;  %s137_s6 = int_to_ptr.hbm [resolvable:$true] %s136_s6 }
  0x1e   :  { %s138_s16 = sshll.u32 %s13743_s11, 4  ;;  %s150_s19 = sshll.u32 %s14473_s2, 4  ;;  %v186_v2 = vld [vmem:[%s14471_s0 + $0x10] sm:$0xff]  ;;  %192 = vst [vmem:[#allocation1] ss:$2 sm:$0xff] %v184_v0  ;;  %v187_v3 = vld [vmem:[%s14471_s0 + $0x18] sm:$0xff]  ;;  %s139_s16 = int_to_ptr.vmem [resolvable:$true] %s138_s16  ;;  %s151_s19 = int_to_ptr.hbm [resolvable:$true] %s150_s19 }
  0x1f   :  { %141 = dma.hbm_to_vmem [thread:$0]  %s137_s6, 32768, %s139_s16, [#allocation6]  ;;  %194 = vst [vmem:[#allocation1 + $0x10] ss:$2 sm:$0xff] %v185_v1 }
  0x20   :  { %s13744_s8 = smov [#allocation3]   ;;  %s164_s23 = sshll.u32 %s14474_s3, 4  ;;  %196 = vst [vmem:[#allocation1 + $0x20] ss:$2 sm:$0xff] %v186_v2  ;;  %s165_s23 = int_to_ptr.hbm [resolvable:$true] %s164_s23 }
  0x21   :  { %s152_s20 = sshll.u32 %s13744_s8, 4  ;;  %s178_s29 = sshll.u32 %s14475_s4, 4  ;;  %198 = vst [vmem:[#allocation1 + $0x30] ss:$2 sm:$0xff] %v187_v3  ;;  %s153_s20 = int_to_ptr.vmem [resolvable:$true] %s152_s20  ;;  %s179_s29 = int_to_ptr.hbm [resolvable:$true] %s178_s29 }
  0x22   :  { %155 = dma.hbm_to_vmem [thread:$0]  %s151_s19, 49152, %s153_s20, [#allocation6 + $0x1] }
  0x23   :  { %s13745_s30 = smov [#allocation4]   ;;  %s13746_s7 = smov [#allocation5]  }
  0x24   :  { %s166_s13 = sshll.u32 %s13745_s30, 4  ;;  %s180_s14 = sshll.u32 %s13746_s7, 4  ;;  %s167_s13 = int_to_ptr.vmem [resolvable:$true] %s166_s13  ;;  %s181_s14 = int_to_ptr.vmem [resolvable:$true] %s180_s14 }
  0x25   :  { %169 = dma.hbm_to_vmem [thread:$0]  %s165_s23, 32768, %s167_s13, [#allocation6 + $0x2]  ;;  %v199_v4 = vld.sshfl [vmem:[#allocation1] sm:$0xff pattern:$0x75316420] }
  0x26   :  { %183 = dma.hbm_to_vmem [thread:$0]  %s179_s29, 8192, %s181_s14, [#allocation6 + $0x3]  ;;  %v200_v5 = vld.sshfl [vmem:[#allocation1 + $0x8] sm:$0xff pattern:$0x75316420]  ;;  %v13859_v6 = vpack.c.bf16 %v199_v4, %v199_v4 }
  0x27   :  { %v13861_v7 = vpack.c.bf16 %v200_v5, %v200_v5  ;;  %v201_v8 = vld.sshfl [vmem:[#allocation1 + $0x10] sm:$0xff pattern:$0x75316420]  ;;  %v202_v9 = vld.sshfl [vmem:[#allocation1 + $0x18] sm:$0xff pattern:$0x75316420] }
  0x28   :  { %v13863_v10 = vpack.c.bf16 %v201_v8, %v201_v8  ;;  %v13865_v11 = vpack.c.bf16 %v202_v9, %v202_v9  ;;  %v203_v12 = vld.sshfl [vmem:[#allocation1 + $0x20] sm:$0xff pattern:$0x75316420]  ;;  %v204_v13 = vld.sshfl [vmem:[#allocation1 + $0x28] sm:$0xff pattern:$0x75316420] }
  0x29   :  { %v13867_v14 = vpack.c.bf16 %v203_v12, %v203_v12  ;;  %v13869_v15 = vpack.c.bf16 %v204_v13, %v204_v13  ;;  %v205_v16 = vld.sshfl [vmem:[#allocation1 + $0x30] sm:$0xff pattern:$0x75316420]  ;;  %v206_v17 = vld.sshfl [vmem:[#allocation1 + $0x38] sm:$0xff pattern:$0x75316420] }
  0x2a   :  { %v13871_v18 = vpack.c.bf16 %v205_v16, %v205_v16  ;;  %v13873_v19 = vpack.c.bf16 %v206_v17, %v206_v17 }
  0x2b   :  { %13726 = dma.done.wait [#allocation6], 32768 }
  0x2c   :  { %13727 = vsyncadd [#allocation6], 4294934528  ;;  %v8688_v20 = vld [vmem:[#allocation2 + $0xe0] sm:$0xf]  ;;  %v12448_v21 = vld [vmem:[#allocation2 + $0xec] sm:$0xf0] }
  0x2d   :  { %v8816_v22 = vld [vmem:[#allocation2 + $0x1e0] sm:$0xf]  ;;  %v8689_v23 = vor.u32 %v12448_v21, %v8688_v20  ;;  %v12480_v24 = vld [vmem:[#allocation2 + $0x1ec] sm:$0xf0]  ;;  %vm2181_vm0 = vcmask 1043456   ;;  %vm2312_vm13 = vcmask 1040384  }
  0x2e   :  { %v8944_v25 = vld [vmem:[#allocation2 + $0x2e0] sm:$0xf]  ;;  %v12512_v26 = vld [vmem:[#allocation2 + $0x2ec] sm:$0xf0]  ;;  %v8817_v27 = vor.u32 %v12480_v24, %v8816_v22  ;;  %vm2314_vm14 = vcmask 1042434  }
  0x2f   :  { %v8945_v28 = vor.u32 %v12512_v26, %v8944_v25  ;;  %v9072_v29 = vld [vmem:[#allocation2 + $0x3e0] sm:$0xf]  ;;  %v12544_v30 = vld [vmem:[#allocation2 + $0x3ec] sm:$0xf0]  ;;  %1763 = vmatpush.bf16.msra.mxu0 %v8689_v23 }
  0x30   :  { %v8672_v31 = vld [vmem:[#allocation2 + $0xc0] sm:$0xf]  ;;  %v9073_v32 = vor.u32 %v12544_v30, %v9072_v29  ;;  %v12444_v33 = vld [vmem:[#allocation2 + $0xcc] sm:$0xf0]  ;;  %1776 = vmatpush.bf16.msra.mxu1 %v8817_v27 }
  0x31   :  { %v8800_v34 = vld [vmem:[#allocation2 + $0x1c0] sm:$0xf]  ;;  %v12476_v35 = vld [vmem:[#allocation2 + $0x1cc] sm:$0xf0]  ;;  %1789 = vmatpush.bf16.msra.mxu2 %v8945_v28  ;;  %v8673_v36 = vor.u32 %v12444_v33, %v8672_v31 }
  0x32   :  { %v8801_v37 = vor.u32 %v12476_v35, %v8800_v34  ;;  %v8928_v38 = vld [vmem:[#allocation2 + $0x2c0] sm:$0xf]  ;;  %v12508_v39 = vld [vmem:[#allocation2 + $0x2cc] sm:$0xf0]  ;;  %1802 = vmatpush.bf16.msra.mxu3 %v9073_v32 }
  0x33   :  { %v9056_v40 = vld [vmem:[#allocation2 + $0x3c0] sm:$0xf]  ;;  %v8929_v41 = vor.u32 %v12508_v39, %v8928_v38  ;;  %v12540_v42 = vld [vmem:[#allocation2 + $0x3cc] sm:$0xf0]  ;;  %1764 = vmatpush.bf16.msra.mxu0 %v8673_v36 }
  0x34   :  { %v8656_v43 = vld [vmem:[#allocation2 + $0xa0] sm:$0xf]  ;;  %v12440_v44 = vld [vmem:[#allocation2 + $0xac] sm:$0xf0]  ;;  %v9057_v45 = vor.u32 %v12540_v42, %v9056_v40  ;;  %1777 = vmatpush.bf16.msra.mxu1 %v8801_v37 }
  0x35   :  { %v8784_v46 = vld [vmem:[#allocation2 + $0x1a0] sm:$0xf]  ;;  %v12472_v47 = vld [vmem:[#allocation2 + $0x1ac] sm:$0xf0]  ;;  %v8657_v49 = vor.u32 %v12440_v44, %v8656_v43  ;;  %1790 = vmatpush.bf16.msra.mxu2 %v8929_v41 }
  0x36   :  { %v8912_v48 = vld [vmem:[#allocation2 + $0x2a0] sm:$0xf]  ;;  %v12504_v50 = vld [vmem:[#allocation2 + $0x2ac] sm:$0xf0]  ;;  %v8785_v53 = vor.u32 %v12472_v47, %v8784_v46  ;;  %1803 = vmatpush.bf16.msra.mxu3 %v9057_v45 }
  0x37   :  { %v9040_v51 = vld [vmem:[#allocation2 + $0x3a0] sm:$0xf]  ;;  %v12536_v52 = vld [vmem:[#allocation2 + $0x3ac] sm:$0xf0]  ;;  %v8913_v54 = vor.u32 %v12504_v50, %v8912_v48  ;;  %1765 = vmatpush.bf16.msra.mxu0 %v8657_v49 }
  0x38   :  { %v8640_v55 = vld [vmem:[#allocation2 + $0x80] sm:$0xf]  ;;  %v12436_v56 = vld [vmem:[#allocation2 + $0x8c] sm:$0xf0]  ;;  %v9041_v58 = vor.u32 %v12536_v52, %v9040_v51  ;;  %1778 = vmatpush.bf16.msra.mxu1 %v8785_v53 }
  0x39   :  { %v8768_v57 = vld [vmem:[#allocation2 + $0x180] sm:$0xf]  ;;  %v12468_v59 = vld [vmem:[#allocation2 + $0x18c] sm:$0xf0]  ;;  %v8641_v0 = vor.u32 %v12436_v56, %v8640_v55  ;;  %1791 = vmatpush.bf16.msra.mxu2 %v8913_v54 }
  0x3a   :  { %v8896_v60 = vld [vmem:[#allocation2 + $0x280] sm:$0xf]  ;;  %v12500_v61 = vld [vmem:[#allocation2 + $0x28c] sm:$0xf0]  ;;  %v8769_v1 = vor.u32 %v12468_v59, %v8768_v57  ;;  %1804 = vmatpush.bf16.msra.mxu3 %v9041_v58 }
  0x3b   :  { %v9024_v62 = vld [vmem:[#allocation2 + $0x380] sm:$0xf]  ;;  %v12532_v63 = vld [vmem:[#allocation2 + $0x38c] sm:$0xf0]  ;;  %v8897_v2 = vor.u32 %v12500_v61, %v8896_v60  ;;  %1766 = vmatpush.bf16.msra.mxu0 %v8641_v0 }
  0x3c   :  { %v8624_v3 = vld [vmem:[#allocation2 + $0x60] sm:$0xf]  ;;  %v12432_v4 = vld [vmem:[#allocation2 + $0x6c] sm:$0xf0]  ;;  %v9025_v8 = vor.u32 %v12532_v63, %v9024_v62  ;;  %1779 = vmatpush.bf16.msra.mxu1 %v8769_v1 }
  0x3d   :  { %v8752_v5 = vld [vmem:[#allocation2 + $0x160] sm:$0xf]  ;;  %v12464_v9 = vld [vmem:[#allocation2 + $0x16c] sm:$0xf0]  ;;  %v8625_v20 = vor.u32 %v12432_v4, %v8624_v3  ;;  %1792 = vmatpush.bf16.msra.mxu2 %v8897_v2 }
  0x3e   :  { %v8880_v12 = vld [vmem:[#allocation2 + $0x260] sm:$0xf]  ;;  %v12496_v13 = vld [vmem:[#allocation2 + $0x26c] sm:$0xf0]  ;;  %v8753_v21 = vor.u32 %v12464_v9, %v8752_v5  ;;  %1805 = vmatpush.bf16.msra.mxu3 %v9025_v8 }
  0x3f   :  { %v9008_v16 = vld [vmem:[#allocation2 + $0x360] sm:$0xf]  ;;  %v12528_v17 = vld [vmem:[#allocation2 + $0x36c] sm:$0xf0]  ;;  %v8881_v22 = vor.u32 %v12496_v13, %v8880_v12  ;;  %1767 = vmatpush.bf16.msra.mxu0 %v8625_v20 }
  0x40   :  { %v8608_v23 = vld [vmem:[#allocation2 + $0x40] sm:$0xf]  ;;  %v12428_v24 = vld [vmem:[#allocation2 + $0x4c] sm:$0xf0]  ;;  %v9009_v26 = vor.u32 %v12528_v17, %v9008_v16  ;;  %1780 = vmatpush.bf16.msra.mxu1 %v8753_v21 }
  0x41   :  { %v8736_v25 = vld [vmem:[#allocation2 + $0x140] sm:$0xf]  ;;  %v12460_v27 = vld [vmem:[#allocation2 + $0x14c] sm:$0xf0]  ;;  %v8609_v32 = vor.u32 %v12428_v24, %v8608_v23  ;;  %1793 = vmatpush.bf16.msra.mxu2 %v8881_v22 }
  0x42   :  { %v8864_v28 = vld [vmem:[#allocation2 + $0x240] sm:$0xf]  ;;  %v12492_v29 = vld [vmem:[#allocation2 + $0x24c] sm:$0xf0]  ;;  %v8737_v33 = vor.u32 %v12460_v27, %v8736_v25  ;;  %1806 = vmatpush.bf16.msra.mxu3 %v9009_v26 }
  0x43   :  { %v8992_v30 = vld [vmem:[#allocation2 + $0x340] sm:$0xf]  ;;  %v12524_v31 = vld [vmem:[#allocation2 + $0x34c] sm:$0xf0]  ;;  %v8865_v34 = vor.u32 %v12492_v29, %v8864_v28  ;;  %1768 = vmatpush.bf16.msra.mxu0 %v8609_v32 }
  0x44   :  { %v8592_v35 = vld [vmem:[#allocation2 + $0x20] sm:$0xf]  ;;  %v12424_v36 = vld [vmem:[#allocation2 + $0x2c] sm:$0xf0]  ;;  %v8993_v38 = vor.u32 %v12524_v31, %v8992_v30  ;;  %1781 = vmatpush.bf16.msra.mxu1 %v8737_v33 }
  0x45   :  { %v8720_v37 = vld [vmem:[#allocation2 + $0x120] sm:$0xf]  ;;  %v12456_v39 = vld [vmem:[#allocation2 + $0x12c] sm:$0xf0]  ;;  %v8593_v44 = vor.u32 %v12424_v36, %v8592_v35  ;;  %1794 = vmatpush.bf16.msra.mxu2 %v8865_v34 }
  0x46   :  { %v8848_v40 = vld [vmem:[#allocation2 + $0x220] sm:$0xf]  ;;  %v12488_v41 = vld [vmem:[#allocation2 + $0x22c] sm:$0xf0]  ;;  %v8721_v47 = vor.u32 %v12456_v39, %v8720_v37  ;;  %1807 = vmatpush.bf16.msra.mxu3 %v8993_v38 }
  0x47   :  { %v8976_v42 = vld [vmem:[#allocation2 + $0x320] sm:$0xf]  ;;  %v12520_v43 = vld [vmem:[#allocation2 + $0x32c] sm:$0xf0]  ;;  %v8849_v48 = vor.u32 %v12488_v41, %v8848_v40  ;;  %1769 = vmatpush.bf16.msra.mxu0 %v8593_v44 }
  0x48   :  { %v8576_v45 = vld [vmem:[#allocation2] sm:$0xf]  ;;  %v12420_v46 = vld [vmem:[#allocation2 + $0xc] sm:$0xf0]  ;;  %v8977_v52 = vor.u32 %v12520_v43, %v8976_v42  ;;  %1782 = vmatpush.bf16.msra.mxu1 %v8721_v47 }
  0x49   :  { %v8704_v49 = vld [vmem:[#allocation2 + $0x100] sm:$0xf]  ;;  %v12452_v50 = vld [vmem:[#allocation2 + $0x10c] sm:$0xf0]  ;;  %v8577_v59 = vor.u32 %v12420_v46, %v8576_v45  ;;  %1795 = vmatpush.bf16.msra.mxu2 %v8849_v48 }
  0x4a   :  { %v8832_v51 = vld [vmem:[#allocation2 + $0x200] sm:$0xf]  ;;  %v12484_v53 = vld [vmem:[#allocation2 + $0x20c] sm:$0xf0]  ;;  %v8705_v63 = vor.u32 %v12452_v50, %v8704_v49  ;;  %1808 = vmatpush.bf16.msra.mxu3 %v8977_v52 }
  0x4b   :  { %v8960_v54 = vld [vmem:[#allocation2 + $0x300] sm:$0xf]  ;;  %v12516_v55 = vld [vmem:[#allocation2 + $0x30c] sm:$0xf0]  ;;  %v8833_v0 = vor.u32 %v12484_v53, %v8832_v51  ;;  %1770 = vmatpush.bf16.msra.mxu0 %v8577_v59 }
  0x4c   :  { %v9200_v56 = vld [vmem:[#allocation2 + $0x4e0] sm:$0xf]  ;;  %v12576_v57 = vld [vmem:[#allocation2 + $0x4ec] sm:$0xf0]  ;;  %v8961_v3 = vor.u32 %v12516_v55, %v8960_v54  ;;  %1783 = vmatpush.bf16.msra.mxu1 %v8705_v63 }
  0x4d   :  { %v9328_v58 = vld [vmem:[#allocation2 + $0x5e0] sm:$0xf]  ;;  %v12608_v60 = vld [vmem:[#allocation2 + $0x5ec] sm:$0xf0]  ;;  %v9201_v4 = vor.u32 %v12576_v57, %v9200_v56  ;;  %1796 = vmatpush.bf16.msra.mxu2 %v8833_v0 }
  0x4e   :  { %v9456_v61 = vld [vmem:[#allocation2 + $0x6e0] sm:$0xf]  ;;  %v12640_v62 = vld [vmem:[#allocation2 + $0x6ec] sm:$0xf0]  ;;  %v9329_v5 = vor.u32 %v12608_v60, %v9328_v58  ;;  %1809 = vmatpush.bf16.msra.mxu3 %v8961_v3  ;;  %1771 = vmatmul.bf16.vlgmr.msra.gmra.mxu0 %v13859_v6 }
  0x4f   :  { %v9584_v1 = vld [vmem:[#allocation2 + $0x7e0] sm:$0xf]  ;;  %v12672_v2 = vld [vmem:[#allocation2 + $0x7ec] sm:$0xf0]  ;;  %v9457_v8 = vor.u32 %v12640_v62, %v9456_v61  ;;  %1815 = vmatpush.bf16.msrb.mxu0 %v9201_v4  ;;  %1784 = vmatmul.bf16.vlgmr.msra.gmra.mxu1 %v13861_v7 }
  0x50   :  { %v9184_v9 = vld [vmem:[#allocation2 + $0x4c0] sm:$0xf]  ;;  %v12572_v12 = vld [vmem:[#allocation2 + $0x4cc] sm:$0xf0]  ;;  %v9585_v16 = vor.u32 %v12672_v2, %v9584_v1  ;;  %1828 = vmatpush.bf16.msrb.mxu1 %v9329_v5  ;;  %1797 = vmatmul.bf16.vlgmr.msra.gmra.mxu2 %v13863_v10 }
  0x51   :  { %v9312_v13 = vld [vmem:[#allocation2 + $0x5c0] sm:$0xf]  ;;  %v12604_v17 = vld [vmem:[#allocation2 + $0x5cc] sm:$0xf0]  ;;  %v9185_v24 = vor.u32 %v12572_v12, %v9184_v9  ;;  %1841 = vmatpush.bf16.msrb.mxu2 %v9457_v8  ;;  %1810 = vmatmul.bf16.vlgmr.msra.gmra.mxu3 %v13865_v11 }
  0x52   :  { %v9440_v20 = vld [vmem:[#allocation2 + $0x6c0] sm:$0xf]  ;;  %v12636_v21 = vld [vmem:[#allocation2 + $0x6cc] sm:$0xf0]  ;;  %v9313_v25 = vor.u32 %v12604_v17, %v9312_v13  ;;  %1854 = vmatpush.bf16.msrb.mxu3 %v9585_v16 }
  0x53   :  { %v9568_v22 = vld [vmem:[#allocation2 + $0x7c0] sm:$0xf]  ;;  %v12668_v23 = vld [vmem:[#allocation2 + $0x7cc] sm:$0xf0]  ;;  %v9441_v26 = vor.u32 %v12636_v21, %v9440_v20  ;;  %1816 = vmatpush.bf16.msrb.mxu0 %v9185_v24 }
  0x54   :  { %v9168_v27 = vld [vmem:[#allocation2 + $0x4a0] sm:$0xf]  ;;  %v12568_v28 = vld [vmem:[#allocation2 + $0x4ac] sm:$0xf0]  ;;  %v9569_v30 = vor.u32 %v12668_v23, %v9568_v22  ;;  %1829 = vmatpush.bf16.msrb.mxu1 %v9313_v25 }
  0x55   :  { %v9296_v29 = vld [vmem:[#allocation2 + $0x5a0] sm:$0xf]  ;;  %v12600_v31 = vld [vmem:[#allocation2 + $0x5ac] sm:$0xf0]  ;;  %v9169_v36 = vor.u32 %v12568_v28, %v9168_v27  ;;  %1842 = vmatpush.bf16.msrb.mxu2 %v9441_v26 }
  0x56   :  { %v9424_v32 = vld [vmem:[#allocation2 + $0x6a0] sm:$0xf]  ;;  %v12632_v33 = vld [vmem:[#allocation2 + $0x6ac] sm:$0xf0]  ;;  %v9297_v37 = vor.u32 %v12600_v31, %v9296_v29  ;;  %1855 = vmatpush.bf16.msrb.mxu3 %v9569_v30 }
  0x57   :  { %v9552_v34 = vld [vmem:[#allocation2 + $0x7a0] sm:$0xf]  ;;  %v12664_v35 = vld [vmem:[#allocation2 + $0x7ac] sm:$0xf0]  ;;  %v9425_v38 = vor.u32 %v12632_v33, %v9424_v32  ;;  %1817 = vmatpush.bf16.msrb.mxu0 %v9169_v36 }
  0x58   :  { %v9152_v39 = vld [vmem:[#allocation2 + $0x480] sm:$0xf]  ;;  %v12564_v40 = vld [vmem:[#allocation2 + $0x48c] sm:$0xf0]  ;;  %v9553_v42 = vor.u32 %v12664_v35, %v9552_v34  ;;  %1830 = vmatpush.bf16.msrb.mxu1 %v9297_v37 }
  0x59   :  { %v9280_v41 = vld [vmem:[#allocation2 + $0x580] sm:$0xf]  ;;  %v12596_v43 = vld [vmem:[#allocation2 + $0x58c] sm:$0xf0]  ;;  %v9153_v48 = vor.u32 %v12564_v40, %v9152_v39  ;;  %1843 = vmatpush.bf16.msrb.mxu2 %v9425_v38  ;;  %v12446_v40 = vld [vmem:[#allocation2 + $0xe4] sm:$0xf] }
  0x5a   :  { %v9408_v44 = vld [vmem:[#allocation2 + $0x680] sm:$0xf]  ;;  %v12628_v45 = vld [vmem:[#allocation2 + $0x68c] sm:$0xf0]  ;;  %v9281_v49 = vor.u32 %v12596_v43, %v9280_v41  ;;  %1856 = vmatpush.bf16.msrb.mxu3 %v9553_v42  ;;  %v8690_v41 = vld [vmem:[#allocation2 + $0xf0] sm:$0xf0] }
  0x5b   :  { %v9536_v46 = vld [vmem:[#allocation2 + $0x780] sm:$0xf]  ;;  %v12660_v47 = vld [vmem:[#allocation2 + $0x78c] sm:$0xf0]  ;;  %v9409_v50 = vor.u32 %v12628_v45, %v9408_v44  ;;  %1818 = vmatpush.bf16.msrb.mxu0 %v9153_v48  ;;  %v12478_v42 = vld [vmem:[#allocation2 + $0x1e4] sm:$0xf] }
  0x5c   :  { %v9136_v51 = vld [vmem:[#allocation2 + $0x460] sm:$0xf]  ;;  %v12560_v52 = vld [vmem:[#allocation2 + $0x46c] sm:$0xf0]  ;;  %v9537_v54 = vor.u32 %v12660_v47, %v9536_v46  ;;  %1831 = vmatpush.bf16.msrb.mxu1 %v9281_v49  ;;  %v8818_v44 = vld [vmem:[#allocation2 + $0x1f0] sm:$0xf0] }
  0x5d   :  { %v9264_v53 = vld [vmem:[#allocation2 + $0x560] sm:$0xf]  ;;  %v12592_v55 = vld [vmem:[#allocation2 + $0x56c] sm:$0xf0]  ;;  %v9137_v60 = vor.u32 %v12560_v52, %v9136_v51  ;;  %1844 = vmatpush.bf16.msrb.mxu2 %v9409_v50  ;;  %v12510_v45 = vld [vmem:[#allocation2 + $0x2e4] sm:$0xf]  ;;  %v8693_v52 = vor.u32 %v12446_v40, %v8690_v41 }
  0x5e   :  { %v9392_v56 = vld [vmem:[#allocation2 + $0x660] sm:$0xf]  ;;  %v12624_v57 = vld [vmem:[#allocation2 + $0x66c] sm:$0xf0]  ;;  %v9265_v61 = vor.u32 %v12592_v55, %v9264_v53  ;;  %1857 = vmatpush.bf16.msrb.mxu3 %v9537_v54  ;;  %v8946_v46 = vld [vmem:[#allocation2 + $0x2f0] sm:$0xf0]  ;;  %v8821_v53 = vor.u32 %v12478_v42, %v8818_v44 }
  0x5f   :  { %v9520_v58 = vld [vmem:[#allocation2 + $0x760] sm:$0xf]  ;;  %v12656_v59 = vld [vmem:[#allocation2 + $0x76c] sm:$0xf0]  ;;  %v9393_v62 = vor.u32 %v12624_v57, %v9392_v56  ;;  %1819 = vmatpush.bf16.msrb.mxu0 %v9137_v60  ;;  %v12542_v49 = vld [vmem:[#allocation2 + $0x3e4] sm:$0xf]  ;;  %v8949_v54 = vor.u32 %v12510_v45, %v8946_v46 }
  0x60   :  { %v9120_v63 = vld [vmem:[#allocation2 + $0x440] sm:$0xf]  ;;  %v12556_v0 = vld [vmem:[#allocation2 + $0x44c] sm:$0xf0]  ;;  %v9521_v2 = vor.u32 %v12656_v59, %v9520_v58  ;;  %1832 = vmatpush.bf16.msrb.mxu1 %v9265_v61  ;;  %v9074_v50 = vld [vmem:[#allocation2 + $0x3f0] sm:$0xf0] }
  0x61   :  { %v9248_v1 = vld [vmem:[#allocation2 + $0x540] sm:$0xf]  ;;  %v12588_v3 = vld [vmem:[#allocation2 + $0x54c] sm:$0xf0]  ;;  %v9121_v12 = vor.u32 %v12556_v0, %v9120_v63  ;;  %1845 = vmatpush.bf16.msrb.mxu2 %v9393_v62  ;;  %v12442_v55 = vld [vmem:[#allocation2 + $0xc4] sm:$0xf]  ;;  %v9077_v58 = vor.u32 %v12542_v49, %v9074_v50 }
  0x62   :  { %v9376_v4 = vld [vmem:[#allocation2 + $0x640] sm:$0xf]  ;;  %v12620_v5 = vld [vmem:[#allocation2 + $0x64c] sm:$0xf0]  ;;  %v9249_v13 = vor.u32 %v12588_v3, %v9248_v1  ;;  %1858 = vmatpush.bf16.msrb.mxu3 %v9521_v2  ;;  %v8674_v56 = vld [vmem:[#allocation2 + $0xd0] sm:$0xf0] }
  0x63   :  { %v9504_v8 = vld [vmem:[#allocation2 + $0x740] sm:$0xf]  ;;  %v12652_v9 = vld [vmem:[#allocation2 + $0x74c] sm:$0xf0]  ;;  %v9377_v16 = vor.u32 %v12620_v5, %v9376_v4  ;;  %1820 = vmatpush.bf16.msrb.mxu0 %v9121_v12  ;;  %v12474_v57 = vld [vmem:[#allocation2 + $0x1c4] sm:$0xf]  ;;  %v8677_v0 = vor.u32 %v12442_v55, %v8674_v56 }
  0x64   :  { %v9104_v17 = vld [vmem:[#allocation2 + $0x420] sm:$0xf]  ;;  %v12552_v20 = vld [vmem:[#allocation2 + $0x42c] sm:$0xf0]  ;;  %v9505_v22 = vor.u32 %v12652_v9, %v9504_v8  ;;  %1833 = vmatpush.bf16.msrb.mxu1 %v9249_v13  ;;  %v8802_v59 = vld [vmem:[#allocation2 + $0x1d0] sm:$0xf0] }
  0x65   :  { %v9232_v21 = vld [vmem:[#allocation2 + $0x520] sm:$0xf]  ;;  %v12584_v23 = vld [vmem:[#allocation2 + $0x52c] sm:$0xf0]  ;;  %v9105_v28 = vor.u32 %v12552_v20, %v9104_v17  ;;  %1846 = vmatpush.bf16.msrb.mxu2 %v9377_v16  ;;  %v12506_v60 = vld [vmem:[#allocation2 + $0x2c4] sm:$0xf]  ;;  %v8805_v1 = vor.u32 %v12474_v57, %v8802_v59 }
  0x66   :  { %v9360_v24 = vld [vmem:[#allocation2 + $0x620] sm:$0xf]  ;;  %v12616_v25 = vld [vmem:[#allocation2 + $0x62c] sm:$0xf0]  ;;  %v9233_v31 = vor.u32 %v12584_v23, %v9232_v21  ;;  %1859 = vmatpush.bf16.msrb.mxu3 %v9505_v22  ;;  %v8930_v61 = vld [vmem:[#allocation2 + $0x2d0] sm:$0xf0] }
  0x67   :  { %v9488_v26 = vld [vmem:[#allocation2 + $0x720] sm:$0xf]  ;;  %v12648_v27 = vld [vmem:[#allocation2 + $0x72c] sm:$0xf0]  ;;  %v9361_v32 = vor.u32 %v12616_v25, %v9360_v24  ;;  %1821 = vmatpush.bf16.msrb.mxu0 %v9105_v28  ;;  %v12538_v62 = vld [vmem:[#allocation2 + $0x3c4] sm:$0xf]  ;;  %v8933_v2 = vor.u32 %v12506_v60, %v8930_v61 }
  0x68   :  { %v9088_v29 = vld [vmem:[#allocation2 + $0x400] sm:$0xf]  ;;  %v12548_v30 = vld [vmem:[#allocation2 + $0x40c] sm:$0xf0]  ;;  %v9489_v36 = vor.u32 %v12648_v27, %v9488_v26  ;;  %1834 = vmatpush.bf16.msrb.mxu1 %v9233_v31  ;;  %v9058_v63 = vld [vmem:[#allocation2 + $0x3d0] sm:$0xf0] }
  0x69   :  { %v9216_v33 = vld [vmem:[#allocation2 + $0x500] sm:$0xf]  ;;  %v12580_v34 = vld [vmem:[#allocation2 + $0x50c] sm:$0xf0]  ;;  %v9089_v43 = vor.u32 %v12548_v30, %v9088_v29  ;;  %1847 = vmatpush.bf16.msrb.mxu2 %v9361_v32  ;;  %v12438_v3 = vld [vmem:[#allocation2 + $0xa4] sm:$0xf]  ;;  %v9061_v8 = vor.u32 %v12538_v62, %v9058_v63 }
  0x6a   :  { %v9344_v35 = vld [vmem:[#allocation2 + $0x600] sm:$0xf]  ;;  %v12612_v37 = vld [vmem:[#allocation2 + $0x60c] sm:$0xf0]  ;;  %v9217_v47 = vor.u32 %v12580_v34, %v9216_v33  ;;  %1860 = vmatpush.bf16.msrb.mxu3 %v9489_v36  ;;  %v8658_v4 = vld [vmem:[#allocation2 + $0xb0] sm:$0xf0] }
  0x6b   :  { %v9472_v38 = vld [vmem:[#allocation2 + $0x700] sm:$0xf]  ;;  %v12644_v39 = vld [vmem:[#allocation2 + $0x70c] sm:$0xf0]  ;;  %v9345_v48 = vor.u32 %v12612_v37, %v9344_v35  ;;  %1822 = vmatpush.bf16.msrb.mxu0 %v9089_v43  ;;  %v12470_v5 = vld [vmem:[#allocation2 + $0x1a4] sm:$0xf]  ;;  %v8661_v20 = vor.u32 %v12438_v3, %v8658_v4 }
  0x6c   :  { %v9473_v51 = vor.u32 %v12644_v39, %v9472_v38  ;;  %1835 = vmatpush.bf16.msrb.mxu1 %v9217_v47  ;;  %v8786_v9 = vld [vmem:[#allocation2 + $0x1b0] sm:$0xf0]  ;;  %v12502_v12 = vld [vmem:[#allocation2 + $0x2a4] sm:$0xf] }
  0x6d   :  { %1848 = vmatpush.bf16.msrb.mxu2 %v9345_v48  ;;  %v8914_v13 = vld [vmem:[#allocation2 + $0x2b0] sm:$0xf0]  ;;  %v12534_v16 = vld [vmem:[#allocation2 + $0x3a4] sm:$0xf]  ;;  %v8789_v21 = vor.u32 %v12470_v5, %v8786_v9 }
  0x6e   :  { %1861 = vmatpush.bf16.msrb.mxu3 %v9473_v51  ;;  %1823 = vmatmul.bf16.vlgmr.msrb.gmra.mxu0 %v13867_v14  ;;  %v9042_v17 = vld [vmem:[#allocation2 + $0x3b0] sm:$0xf0]  ;;  %v8917_v22 = vor.u32 %v12502_v12, %v8914_v13  ;;  %v12434_v23 = vld [vmem:[#allocation2 + $0x84] sm:$0xf] }
  0x6f   :  { %1867 = vmatpush.bf16.msra.mxu0 %v8693_v52  ;;  %1836 = vmatmul.bf16.vlgmr.msrb.gmra.mxu1 %v13869_v15  ;;  %v8642_v24 = vld [vmem:[#allocation2 + $0x90] sm:$0xf0]  ;;  %v12466_v25 = vld [vmem:[#allocation2 + $0x184] sm:$0xf]  ;;  %v9045_v26 = vor.u32 %v12534_v16, %v9042_v17 }
  0x70   :  { %1880 = vmatpush.bf16.msra.mxu1 %v8821_v53  ;;  %1849 = vmatmul.bf16.vlgmr.msrb.gmra.mxu2 %v13871_v18  ;;  %v8770_v27 = vld [vmem:[#allocation2 + $0x190] sm:$0xf0]  ;;  %v12498_v28 = vld [vmem:[#allocation2 + $0x284] sm:$0xf]  ;;  %v8645_v32 = vor.u32 %v12434_v23, %v8642_v24 }
  0x71   :  { %1893 = vmatpush.bf16.msra.mxu2 %v8949_v54  ;;  %1862 = vmatmul.bf16.vlgmr.msrb.gmra.mxu3 %v13873_v19  ;;  %v8898_v29 = vld [vmem:[#allocation2 + $0x290] sm:$0xf0]  ;;  %v12530_v30 = vld [vmem:[#allocation2 + $0x384] sm:$0xf]  ;;  %v8773_v33 = vor.u32 %v12466_v25, %v8770_v27 }
  0x72   :  { %1906 = vmatpush.bf16.msra.mxu3 %v9077_v58  ;;  %v9026_v31 = vld [vmem:[#allocation2 + $0x390] sm:$0xf0]  ;;  %v8901_v34 = vor.u32 %v12498_v28, %v8898_v29  ;;  %v12430_v35 = vld [vmem:[#allocation2 + $0x64] sm:$0xf] }
  0x73   :  { %1868 = vmatpush.bf16.msra.mxu0 %v8677_v0  ;;  %v8626_v36 = vld [vmem:[#allocation2 + $0x70] sm:$0xf0]  ;;  %v12462_v37 = vld [vmem:[#allocation2 + $0x164] sm:$0xf]  ;;  %v9029_v38 = vor.u32 %v12530_v30, %v9026_v31 }
  0x74   :  { %1881 = vmatpush.bf16.msra.mxu1 %v8805_v1  ;;  %v8754_v39 = vld [vmem:[#allocation2 + $0x170] sm:$0xf0]  ;;  %v12494_v40 = vld [vmem:[#allocation2 + $0x264] sm:$0xf]  ;;  %v8629_v44 = vor.u32 %v12430_v35, %v8626_v36 }
  0x75   :  { %1894 = vmatpush.bf16.msra.mxu2 %v8933_v2  ;;  %v8882_v41 = vld [vmem:[#allocation2 + $0x270] sm:$0xf0]  ;;  %v12526_v42 = vld [vmem:[#allocation2 + $0x364] sm:$0xf]  ;;  %v8757_v45 = vor.u32 %v12462_v37, %v8754_v39 }
  0x76   :  { %1907 = vmatpush.bf16.msra.mxu3 %v9061_v8  ;;  %v9010_v43 = vld [vmem:[#allocation2 + $0x370] sm:$0xf0]  ;;  %v8885_v46 = vor.u32 %v12494_v40, %v8882_v41  ;;  %v12426_v47 = vld [vmem:[#allocation2 + $0x44] sm:$0xf] }
  0x77   :  { %1869 = vmatpush.bf16.msra.mxu0 %v8661_v20  ;;  %v8610_v48 = vld [vmem:[#allocation2 + $0x50] sm:$0xf0]  ;;  %v12458_v49 = vld [vmem:[#allocation2 + $0x144] sm:$0xf]  ;;  %v9013_v50 = vor.u32 %v12526_v42, %v9010_v43 }
  0x78   :  { %1882 = vmatpush.bf16.msra.mxu1 %v8789_v21  ;;  %v8738_v51 = vld [vmem:[#allocation2 + $0x150] sm:$0xf0]  ;;  %v12490_v52 = vld [vmem:[#allocation2 + $0x244] sm:$0xf]  ;;  %v8613_v56 = vor.u32 %v12426_v47, %v8610_v48 }
  0x79   :  { %1895 = vmatpush.bf16.msra.mxu2 %v8917_v22  ;;  %v8866_v53 = vld [vmem:[#allocation2 + $0x250] sm:$0xf0]  ;;  %v12522_v54 = vld [vmem:[#allocation2 + $0x344] sm:$0xf]  ;;  %v8741_v57 = vor.u32 %v12458_v49, %v8738_v51 }
  0x7a   :  { %1908 = vmatpush.bf16.msra.mxu3 %v9045_v26  ;;  %v8994_v55 = vld [vmem:[#allocation2 + $0x350] sm:$0xf0]  ;;  %v8869_v58 = vor.u32 %v12490_v52, %v8866_v53  ;;  %v12422_v59 = vld [vmem:[#allocation2 + $0x24] sm:$0xf] }
  0x7b   :  { %1870 = vmatpush.bf16.msra.mxu0 %v8645_v32  ;;  %v8594_v60 = vld [vmem:[#allocation2 + $0x30] sm:$0xf0]  ;;  %v12454_v61 = vld [vmem:[#allocation2 + $0x124] sm:$0xf]  ;;  %v8997_v62 = vor.u32 %v12522_v54, %v8994_v55 }
  0x7c   :  { %1883 = vmatpush.bf16.msra.mxu1 %v8773_v33  ;;  %v8722_v63 = vld [vmem:[#allocation2 + $0x130] sm:$0xf0]  ;;  %v12486_v0 = vld [vmem:[#allocation2 + $0x224] sm:$0xf]  ;;  %v8597_v4 = vor.u32 %v12422_v59, %v8594_v60 }
  0x7d   :  { %1896 = vmatpush.bf16.msra.mxu2 %v8901_v34  ;;  %v8850_v1 = vld [vmem:[#allocation2 + $0x230] sm:$0xf0]  ;;  %v12518_v2 = vld [vmem:[#allocation2 + $0x324] sm:$0xf]  ;;  %v8725_v9 = vor.u32 %v12454_v61, %v8722_v63 }
  0x7e   :  { %1909 = vmatpush.bf16.msra.mxu3 %v9029_v38  ;;  %v8978_v3 = vld [vmem:[#allocation2 + $0x330] sm:$0xf0]  ;;  %v12418_v5 = vld [vmem:[#allocation2 + $0x4] sm:$0xf]  ;;  %v8853_v12 = vor.u32 %v12486_v0, %v8850_v1 }
  0x7f   :  { %1871 = vmatpush.bf16.msra.mxu0 %v8629_v44  ;;  %v8578_v8 = vld [vmem:[#allocation2 + $0x10] sm:$0xf0]  ;;  %v12450_v13 = vld [vmem:[#allocation2 + $0x104] sm:$0xf]  ;;  %v8981_v20 = vor.u32 %v12518_v2, %v8978_v3 }
  0x80   :  { %1884 = vmatpush.bf16.msra.mxu1 %v8757_v45  ;;  %v8706_v16 = vld [vmem:[#allocation2 + $0x110] sm:$0xf0]  ;;  %v12482_v17 = vld [vmem:[#allocation2 + $0x204] sm:$0xf]  ;;  %v8581_v27 = vor.u32 %v12418_v5, %v8578_v8 }
  0x81   :  { %1897 = vmatpush.bf16.msra.mxu2 %v8885_v46  ;;  %v8834_v21 = vld [vmem:[#allocation2 + $0x210] sm:$0xf0]  ;;  %v12514_v22 = vld [vmem:[#allocation2 + $0x304] sm:$0xf]  ;;  %v8709_v31 = vor.u32 %v12450_v13, %v8706_v16 }
  0x82   :  { %1910 = vmatpush.bf16.msra.mxu3 %v9013_v50  ;;  %v8962_v23 = vld [vmem:[#allocation2 + $0x310] sm:$0xf0]  ;;  %v12574_v24 = vld [vmem:[#allocation2 + $0x4e4] sm:$0xf]  ;;  %v8837_v32 = vor.u32 %v12482_v17, %v8834_v21 }
  0x83   :  { %1872 = vmatpush.bf16.msra.mxu0 %v8613_v56  ;;  %v9202_v25 = vld [vmem:[#allocation2 + $0x4f0] sm:$0xf0]  ;;  %v12606_v26 = vld [vmem:[#allocation2 + $0x5e4] sm:$0xf]  ;;  %v8965_v35 = vor.u32 %v12514_v22, %v8962_v23 }
  0x84   :  { %1885 = vmatpush.bf16.msra.mxu1 %v8741_v57  ;;  %v9330_v28 = vld [vmem:[#allocation2 + $0x5f0] sm:$0xf0]  ;;  %v12638_v29 = vld [vmem:[#allocation2 + $0x6e4] sm:$0xf]  ;;  %v9205_v36 = vor.u32 %v12574_v24, %v9202_v25 }
  0x85   :  { %1898 = vmatpush.bf16.msra.mxu2 %v8869_v58  ;;  %v9458_v30 = vld [vmem:[#allocation2 + $0x6f0] sm:$0xf0]  ;;  %v12670_v33 = vld [vmem:[#allocation2 + $0x7e4] sm:$0xf]  ;;  %v9333_v37 = vor.u32 %v12606_v26, %v9330_v28 }
  0x86   :  { %1911 = vmatpush.bf16.msra.mxu3 %v8997_v62  ;;  %v9586_v34 = vld [vmem:[#allocation2 + $0x7f0] sm:$0xf0]  ;;  %v9461_v38 = vor.u32 %v12638_v29, %v9458_v30  ;;  %v12570_v39 = vld [vmem:[#allocation2 + $0x4c4] sm:$0xf] }
  0x87   :  { %1873 = vmatpush.bf16.msra.mxu0 %v8597_v4  ;;  %v9186_v40 = vld [vmem:[#allocation2 + $0x4d0] sm:$0xf0]  ;;  %v12602_v41 = vld [vmem:[#allocation2 + $0x5c4] sm:$0xf]  ;;  %v9589_v42 = vor.u32 %v12670_v33, %v9586_v34 }
  0x88   :  { %1886 = vmatpush.bf16.msra.mxu1 %v8725_v9  ;;  %v9314_v43 = vld [vmem:[#allocation2 + $0x5d0] sm:$0xf0]  ;;  %v12634_v44 = vld [vmem:[#allocation2 + $0x6c4] sm:$0xf]  ;;  %v9189_v48 = vor.u32 %v12570_v39, %v9186_v40 }
  0x89   :  { %1899 = vmatpush.bf16.msra.mxu2 %v8853_v12  ;;  %v9442_v45 = vld [vmem:[#allocation2 + $0x6d0] sm:$0xf0]  ;;  %v12666_v46 = vld [vmem:[#allocation2 + $0x7c4] sm:$0xf]  ;;  %v9317_v49 = vor.u32 %v12602_v41, %v9314_v43 }
  0x8a   :  { %1912 = vmatpush.bf16.msra.mxu3 %v8981_v20  ;;  %v9570_v47 = vld [vmem:[#allocation2 + $0x7d0] sm:$0xf0]  ;;  %v9445_v50 = vor.u32 %v12634_v44, %v9442_v45  ;;  %v12566_v51 = vld [vmem:[#allocation2 + $0x4a4] sm:$0xf] }
  0x8b   :  { %1874 = vmatpush.bf16.msra.mxu0 %v8581_v27  ;;  %v9170_v52 = vld [vmem:[#allocation2 + $0x4b0] sm:$0xf0]  ;;  %v12598_v53 = vld [vmem:[#allocation2 + $0x5a4] sm:$0xf]  ;;  %v9573_v54 = vor.u32 %v12666_v46, %v9570_v47 }
  0x8c   :  { %1887 = vmatpush.bf16.msra.mxu1 %v8709_v31  ;;  %v9298_v55 = vld [vmem:[#allocation2 + $0x5b0] sm:$0xf0]  ;;  %v12630_v56 = vld [vmem:[#allocation2 + $0x6a4] sm:$0xf]  ;;  %v9173_v60 = vor.u32 %v12566_v51, %v9170_v52 }
  0x8d   :  { %1900 = vmatpush.bf16.msra.mxu2 %v8837_v32  ;;  %v9426_v57 = vld [vmem:[#allocation2 + $0x6b0] sm:$0xf0]  ;;  %v12662_v58 = vld [vmem:[#allocation2 + $0x7a4] sm:$0xf]  ;;  %v9301_v61 = vor.u32 %v12598_v53, %v9298_v55 }
  0x8e   :  { %1913 = vmatpush.bf16.msra.mxu3 %v8965_v35  ;;  %v9554_v59 = vld [vmem:[#allocation2 + $0x7b0] sm:$0xf0]  ;;  %1875 = vmatmul.bf16.vlgmr.msra.gmra.mxu0 %v13859_v6  ;;  %v9429_v62 = vor.u32 %v12630_v56, %v9426_v57  ;;  %v12562_v63 = vld [vmem:[#allocation2 + $0x484] sm:$0xf] }
  0x8f   :  { %1919 = vmatpush.bf16.msrb.mxu0 %v9205_v36  ;;  %1888 = vmatmul.bf16.vlgmr.msra.gmra.mxu1 %v13861_v7  ;;  %v9154_v0 = vld [vmem:[#allocation2 + $0x490] sm:$0xf0]  ;;  %v12594_v1 = vld [vmem:[#allocation2 + $0x584] sm:$0xf]  ;;  %v9557_v2 = vor.u32 %v12662_v58, %v9554_v59 }
  0x90   :  { %1932 = vmatpush.bf16.msrb.mxu1 %v9333_v37  ;;  %1901 = vmatmul.bf16.vlgmr.msra.gmra.mxu2 %v13863_v10  ;;  %v9282_v3 = vld [vmem:[#allocation2 + $0x590] sm:$0xf0]  ;;  %v12626_v4 = vld [vmem:[#allocation2 + $0x684] sm:$0xf]  ;;  %v9157_v12 = vor.u32 %v12562_v63, %v9154_v0  ;;  %v8696_v0 = vld [vmem:[#allocation2 + $0xe8] sm:$0xf] }
  0x91   :  { %1945 = vmatpush.bf16.msrb.mxu2 %v9461_v38  ;;  %1914 = vmatmul.bf16.vlgmr.msra.gmra.mxu3 %v13865_v11  ;;  %v9410_v5 = vld [vmem:[#allocation2 + $0x690] sm:$0xf0]  ;;  %v12658_v8 = vld [vmem:[#allocation2 + $0x784] sm:$0xf]  ;;  %v9285_v13 = vor.u32 %v12594_v1, %v9282_v3  ;;  %v12449_v1 = vld [vmem:[#allocation2 + $0xf4] sm:$0xf0] }
  0x92   :  { %1958 = vmatpush.bf16.msrb.mxu3 %v9589_v42  ;;  %v9538_v9 = vld [vmem:[#allocation2 + $0x790] sm:$0xf0]  ;;  %v9413_v16 = vor.u32 %v12626_v4, %v9410_v5  ;;  %v12558_v17 = vld [vmem:[#allocation2 + $0x464] sm:$0xf]  ;;  %v12481_v4 = vld [vmem:[#allocation2 + $0x1f4] sm:$0xf0] }
  0x93   :  { %1920 = vmatpush.bf16.msrb.mxu0 %v9189_v48  ;;  %v9138_v20 = vld [vmem:[#allocation2 + $0x470] sm:$0xf0]  ;;  %v12590_v21 = vld [vmem:[#allocation2 + $0x564] sm:$0xf]  ;;  %v9541_v22 = vor.u32 %v12658_v8, %v9538_v9  ;;  %v8952_v5 = vld [vmem:[#allocation2 + $0x2e8] sm:$0xf] }
  0x94   :  { %1933 = vmatpush.bf16.msrb.mxu1 %v9317_v49  ;;  %v9266_v23 = vld [vmem:[#allocation2 + $0x570] sm:$0xf0]  ;;  %v12622_v24 = vld [vmem:[#allocation2 + $0x664] sm:$0xf]  ;;  %v9141_v28 = vor.u32 %v12558_v17, %v9138_v20  ;;  %v12513_v8 = vld [vmem:[#allocation2 + $0x2f4] sm:$0xf0]  ;;  %v8697_v20 = vor.u32 %v12449_v1, %v8696_v0 }
  0x95   :  { %1946 = vmatpush.bf16.msrb.mxu2 %v9445_v50  ;;  %v9394_v25 = vld [vmem:[#allocation2 + $0x670] sm:$0xf0]  ;;  %v12654_v26 = vld [vmem:[#allocation2 + $0x764] sm:$0xf]  ;;  %v9269_v29 = vor.u32 %v12590_v21, %v9266_v23  ;;  %v8680_v23 = vld [vmem:[#allocation2 + $0xc8] sm:$0xf] }
  0x96   :  { %1959 = vmatpush.bf16.msrb.mxu3 %v9573_v54  ;;  %v9522_v27 = vld [vmem:[#allocation2 + $0x770] sm:$0xf0]  ;;  %v9397_v30 = vor.u32 %v12622_v24, %v9394_v25  ;;  %v12554_v31 = vld [vmem:[#allocation2 + $0x444] sm:$0xf]  ;;  %v12445_v24 = vld [vmem:[#allocation2 + $0xd4] sm:$0xf0] }
  0x97   :  { %1921 = vmatpush.bf16.msrb.mxu0 %v9173_v60  ;;  %v9122_v32 = vld [vmem:[#allocation2 + $0x450] sm:$0xf0]  ;;  %v12586_v33 = vld [vmem:[#allocation2 + $0x544] sm:$0xf]  ;;  %v9525_v34 = vor.u32 %v12654_v26, %v9522_v27  ;;  %v8808_v25 = vld [vmem:[#allocation2 + $0x1c8] sm:$0xf] }
  0x98   :  { %1934 = vmatpush.bf16.msrb.mxu1 %v9301_v61  ;;  %v9250_v35 = vld [vmem:[#allocation2 + $0x550] sm:$0xf0]  ;;  %v12618_v36 = vld [vmem:[#allocation2 + $0x644] sm:$0xf]  ;;  %v9125_v40 = vor.u32 %v12554_v31, %v9122_v32  ;;  %v12477_v27 = vld [vmem:[#allocation2 + $0x1d4] sm:$0xf0]  ;;  %v8681_v32 = vor.u32 %v12445_v24, %v8680_v23 }
  0x99   :  { %1947 = vmatpush.bf16.msrb.mxu2 %v9429_v62  ;;  %v9378_v37 = vld [vmem:[#allocation2 + $0x650] sm:$0xf0]  ;;  %v12650_v38 = vld [vmem:[#allocation2 + $0x744] sm:$0xf]  ;;  %v9253_v41 = vor.u32 %v12586_v33, %v9250_v35  ;;  %v12541_v31 = vld [vmem:[#allocation2 + $0x3d4] sm:$0xf0]  ;;  %v8809_v33 = vor.u32 %v12477_v27, %v8808_v25 }
  0x9a   :  { %1960 = vmatpush.bf16.msrb.mxu3 %v9557_v2  ;;  %v9506_v39 = vld [vmem:[#allocation2 + $0x750] sm:$0xf0]  ;;  %v9381_v42 = vor.u32 %v12618_v36, %v9378_v37  ;;  %v12550_v43 = vld [vmem:[#allocation2 + $0x424] sm:$0xf]  ;;  %v8824_v2 = vld [vmem:[#allocation2 + $0x1e8] sm:$0xf] }
  0x9b   :  { %1922 = vmatpush.bf16.msrb.mxu0 %v9157_v12  ;;  %v9106_v44 = vld [vmem:[#allocation2 + $0x430] sm:$0xf0]  ;;  %v12582_v45 = vld [vmem:[#allocation2 + $0x524] sm:$0xf]  ;;  %v9509_v46 = vor.u32 %v12650_v38, %v9506_v39  ;;  %v8825_v21 = vor.u32 %v12481_v4, %v8824_v2  ;;  %v8664_v35 = vld [vmem:[#allocation2 + $0xa8] sm:$0xf] }
  0x9c   :  { %1935 = vmatpush.bf16.msrb.mxu1 %v9285_v13  ;;  %v9234_v47 = vld [vmem:[#allocation2 + $0x530] sm:$0xf0]  ;;  %v12614_v48 = vld [vmem:[#allocation2 + $0x624] sm:$0xf]  ;;  %v9109_v52 = vor.u32 %v12550_v43, %v9106_v44  ;;  %v9080_v13 = vld [vmem:[#allocation2 + $0x3e8] sm:$0xf] }
  0x9d   :  { %1948 = vmatpush.bf16.msrb.mxu2 %v9413_v16  ;;  %v9362_v49 = vld [vmem:[#allocation2 + $0x630] sm:$0xf0]  ;;  %v12646_v50 = vld [vmem:[#allocation2 + $0x724] sm:$0xf]  ;;  %v9237_v55 = vor.u32 %v12582_v45, %v9234_v47  ;;  %v12545_v16 = vld [vmem:[#allocation2 + $0x3f4] sm:$0xf0] }
  0x9e   :  { %1961 = vmatpush.bf16.msrb.mxu3 %v9541_v22  ;;  %v9490_v51 = vld [vmem:[#allocation2 + $0x730] sm:$0xf0]  ;;  %v12546_v53 = vld [vmem:[#allocation2 + $0x404] sm:$0xf]  ;;  %v9365_v56 = vor.u32 %v12614_v48, %v9362_v49  ;;  %v8953_v22 = vor.u32 %v12513_v8, %v8952_v5  ;;  %v9081_v26 = vor.u32 %v12545_v16, %v9080_v13  ;;  %v12441_v36 = vld [vmem:[#allocation2 + $0xb4] sm:$0xf0] }
  0x9f   :  { %1923 = vmatpush.bf16.msrb.mxu0 %v9141_v28  ;;  %v9090_v54 = vld [vmem:[#allocation2 + $0x410] sm:$0xf0]  ;;  %v12578_v57 = vld [vmem:[#allocation2 + $0x504] sm:$0xf]  ;;  %v9493_v60 = vor.u32 %v12646_v50, %v9490_v51  ;;  %v8936_v28 = vld [vmem:[#allocation2 + $0x2c8] sm:$0xf]  ;;  %v8665_v44 = vor.u32 %v12441_v36, %v8664_v35 }
  0xa0   :  { %1936 = vmatpush.bf16.msrb.mxu1 %v9269_v29  ;;  %v9218_v58 = vld [vmem:[#allocation2 + $0x510] sm:$0xf0]  ;;  %v12610_v59 = vld [vmem:[#allocation2 + $0x604] sm:$0xf]  ;;  %v9093_v3 = vor.u32 %v12546_v53, %v9090_v54  ;;  %v12509_v29 = vld [vmem:[#allocation2 + $0x2d4] sm:$0xf0] }
  0xa1   :  { %1949 = vmatpush.bf16.msrb.mxu2 %v9397_v30  ;;  %v9346_v61 = vld [vmem:[#allocation2 + $0x610] sm:$0xf0]  ;;  %v12642_v62 = vld [vmem:[#allocation2 + $0x704] sm:$0xf]  ;;  %v9221_v9 = vor.u32 %v12578_v57, %v9218_v58  ;;  %v9064_v30 = vld [vmem:[#allocation2 + $0x3c8] sm:$0xf] }
  0xa2   :  { %1962 = vmatpush.bf16.msrb.mxu3 %v9525_v34  ;;  %v9474_v63 = vld [vmem:[#allocation2 + $0x710] sm:$0xf0]  ;;  %v9349_v12 = vor.u32 %v12610_v59, %v9346_v61  ;;  %v8937_v34 = vor.u32 %v12509_v29, %v8936_v28  ;;  %v8792_v37 = vld [vmem:[#allocation2 + $0x1a8] sm:$0xf]  ;;  %v9065_v38 = vor.u32 %v12541_v31, %v9064_v30  ;;  %v12473_v39 = vld [vmem:[#allocation2 + $0x1b4] sm:$0xf0] }
  0xa3   :  { %1924 = vmatpush.bf16.msrb.mxu0 %v9125_v40  ;;  %v9477_v17 = vor.u32 %v12642_v62, %v9474_v63  ;;  %v8920_v40 = vld [vmem:[#allocation2 + $0x2a8] sm:$0xf]  ;;  %v12537_v43 = vld [vmem:[#allocation2 + $0x3b4] sm:$0xf0]  ;;  %v8793_v45 = vor.u32 %v12473_v39, %v8792_v37 }
  0xa4   :  { %1937 = vmatpush.bf16.msrb.mxu1 %v9253_v41  ;;  %v12505_v41 = vld [vmem:[#allocation2 + $0x2b4] sm:$0xf0]  ;;  %v8648_v47 = vld [vmem:[#allocation2 + $0x88] sm:$0xf] }
  0xa5   :  { %1950 = vmatpush.bf16.msrb.mxu2 %v9381_v42  ;;  %v9048_v42 = vld [vmem:[#allocation2 + $0x3a8] sm:$0xf]  ;;  %v12437_v48 = vld [vmem:[#allocation2 + $0x94] sm:$0xf0] }
  0xa6   :  { %1963 = vmatpush.bf16.msrb.mxu3 %v9509_v46  ;;  %v8921_v46 = vor.u32 %v12505_v41, %v8920_v40  ;;  %v8776_v49 = vld [vmem:[#allocation2 + $0x188] sm:$0xf]  ;;  %v9049_v50 = vor.u32 %v12537_v43, %v9048_v42  ;;  %v12469_v51 = vld [vmem:[#allocation2 + $0x194] sm:$0xf0] }
  0xa7   :  { %1925 = vmatpush.bf16.msrb.mxu0 %v9109_v52  ;;  %v8904_v52 = vld [vmem:[#allocation2 + $0x288] sm:$0xf]  ;;  %v12501_v53 = vld [vmem:[#allocation2 + $0x294] sm:$0xf0]  ;;  %v8777_v57 = vor.u32 %v12469_v51, %v8776_v49 }
  0xa8   :  { %1938 = vmatpush.bf16.msrb.mxu1 %v9237_v55  ;;  %v9032_v54 = vld [vmem:[#allocation2 + $0x388] sm:$0xf]  ;;  %v12533_v55 = vld [vmem:[#allocation2 + $0x394] sm:$0xf0]  ;;  %v8905_v58 = vor.u32 %v12501_v53, %v8904_v52 }
  0xa9   :  { %1951 = vmatpush.bf16.msrb.mxu2 %v9365_v56  ;;  %v8649_v56 = vor.u32 %v12437_v48, %v8648_v47  ;;  %v8632_v59 = vld [vmem:[#allocation2 + $0x68] sm:$0xf]  ;;  %v9033_v62 = vor.u32 %v12533_v55, %v9032_v54  ;;  %v12465_v63 = vld [vmem:[#allocation2 + $0x174] sm:$0xf0] }
  0xaa   :  { %1964 = vmatpush.bf16.msrb.mxu3 %v9493_v60  ;;  %v12433_v60 = vld [vmem:[#allocation2 + $0x74] sm:$0xf0]  ;;  %v8760_v61 = vld [vmem:[#allocation2 + $0x168] sm:$0xf] }
  0xab   :  { %1926 = vmatpush.bf16.msrb.mxu0 %v9093_v3  ;;  %v8888_v0 = vld [vmem:[#allocation2 + $0x268] sm:$0xf]  ;;  %v12497_v1 = vld [vmem:[#allocation2 + $0x274] sm:$0xf0]  ;;  %v8633_v4 = vor.u32 %v12433_v60, %v8632_v59  ;;  %v8761_v5 = vor.u32 %v12465_v63, %v8760_v61 }
  0xac   :  { %1939 = vmatpush.bf16.msrb.mxu1 %v9221_v9  ;;  %v9016_v2 = vld [vmem:[#allocation2 + $0x368] sm:$0xf]  ;;  %v12529_v3 = vld [vmem:[#allocation2 + $0x374] sm:$0xf0]  ;;  %v8889_v8 = vor.u32 %v12497_v1, %v8888_v0 }
  0xad   :  { %1952 = vmatpush.bf16.msrb.mxu2 %v9349_v12  ;;  %v8616_v9 = vld [vmem:[#allocation2 + $0x48] sm:$0xf]  ;;  %v12429_v12 = vld [vmem:[#allocation2 + $0x54] sm:$0xf0]  ;;  %v9017_v16 = vor.u32 %v12529_v3, %v9016_v2 }
  0xae   :  { %1965 = vmatpush.bf16.msrb.mxu3 %v9477_v17  ;;  %1927 = vmatmul.bf16.vlgmr.msrb.gmra.mxu0 %v13867_v14  ;;  %v8744_v13 = vld [vmem:[#allocation2 + $0x148] sm:$0xf]  ;;  %v12461_v17 = vld [vmem:[#allocation2 + $0x154] sm:$0xf0]  ;;  %v8617_v24 = vor.u32 %v12429_v12, %v8616_v9 }
  0xaf   :  { %1971 = vmatpush.bf16.msra.mxu0 %v8697_v20  ;;  %1940 = vmatmul.bf16.vlgmr.msrb.gmra.mxu1 %v13869_v15  ;;  %v8872_v20 = vld [vmem:[#allocation2 + $0x248] sm:$0xf]  ;;  %v12525_v23 = vld [vmem:[#allocation2 + $0x354] sm:$0xf0]  ;;  %v8745_v25 = vor.u32 %v12461_v17, %v8744_v13 }
  0xb0   :  { %1984 = vmatpush.bf16.msra.mxu1 %v8825_v21  ;;  %1953 = vmatmul.bf16.vlgmr.msrb.gmra.mxu2 %v13871_v18  ;;  %v12493_v21 = vld [vmem:[#allocation2 + $0x254] sm:$0xf0]  ;;  %v8600_v27 = vld [vmem:[#allocation2 + $0x28] sm:$0xf] }
  0xb1   :  { %1997 = vmatpush.bf16.msra.mxu2 %v8953_v22  ;;  %1966 = vmatmul.bf16.vlgmr.msrb.gmra.mxu3 %v13873_v19  ;;  %v9000_v22 = vld [vmem:[#allocation2 + $0x348] sm:$0xf]  ;;  %v12425_v28 = vld [vmem:[#allocation2 + $0x34] sm:$0xf0] }
  0xb2   :  { %2010 = vmatpush.bf16.msra.mxu3 %v9081_v26  ;;  %v8873_v26 = vor.u32 %v12493_v21, %v8872_v20  ;;  %v8728_v29 = vld [vmem:[#allocation2 + $0x128] sm:$0xf]  ;;  %v9001_v30 = vor.u32 %v12525_v23, %v9000_v22  ;;  %v12457_v31 = vld [vmem:[#allocation2 + $0x134] sm:$0xf0]  ;;  %v8601_v36 = vor.u32 %v12425_v28, %v8600_v27 }
  0xb3   :  { %1972 = vmatpush.bf16.msra.mxu0 %v8681_v32  ;;  %v8856_v32 = vld [vmem:[#allocation2 + $0x228] sm:$0xf]  ;;  %v12521_v35 = vld [vmem:[#allocation2 + $0x334] sm:$0xf0]  ;;  %v8729_v39 = vor.u32 %v12457_v31, %v8728_v29 }
  0xb4   :  { %1985 = vmatpush.bf16.msra.mxu1 %v8809_v33  ;;  %v12489_v33 = vld [vmem:[#allocation2 + $0x234] sm:$0xf0]  ;;  %v8584_v37 = vld [vmem:[#allocation2 + $0x8] sm:$0xf] }
  0xb5   :  { %1998 = vmatpush.bf16.msra.mxu2 %v8937_v34  ;;  %v8984_v34 = vld [vmem:[#allocation2 + $0x328] sm:$0xf]  ;;  %v8857_v40 = vor.u32 %v12489_v33, %v8856_v32  ;;  %v12453_v42 = vld [vmem:[#allocation2 + $0x114] sm:$0xf0] }
  0xb6   :  { %2011 = vmatpush.bf16.msra.mxu3 %v9065_v38  ;;  %v12421_v38 = vld [vmem:[#allocation2 + $0x14] sm:$0xf0]  ;;  %v8712_v41 = vld [vmem:[#allocation2 + $0x108] sm:$0xf] }
  0xb7   :  { %1973 = vmatpush.bf16.msra.mxu0 %v8665_v44  ;;  %v8840_v43 = vld [vmem:[#allocation2 + $0x208] sm:$0xf]  ;;  %v8985_v44 = vor.u32 %v12521_v35, %v8984_v34  ;;  %v12517_v47 = vld [vmem:[#allocation2 + $0x314] sm:$0xf0]  ;;  %v8585_v51 = vor.u32 %v12421_v38, %v8584_v37  ;;  %v8713_v55 = vor.u32 %v12453_v42, %v8712_v41 }
  0xb8   :  { %1986 = vmatpush.bf16.msra.mxu1 %v8793_v45  ;;  %v12485_v45 = vld [vmem:[#allocation2 + $0x214] sm:$0xf0]  ;;  %v9208_v48 = vld [vmem:[#allocation2 + $0x4e8] sm:$0xf] }
  0xb9   :  { %1999 = vmatpush.bf16.msra.mxu2 %v8921_v46  ;;  %v8968_v46 = vld [vmem:[#allocation2 + $0x308] sm:$0xf]  ;;  %v12577_v49 = vld [vmem:[#allocation2 + $0x4f4] sm:$0xf0] }
  0xba   :  { %2012 = vmatpush.bf16.msra.mxu3 %v9049_v50  ;;  %v9336_v50 = vld [vmem:[#allocation2 + $0x5e8] sm:$0xf]  ;;  %v12609_v52 = vld [vmem:[#allocation2 + $0x5f4] sm:$0xf0]  ;;  %v8969_v59 = vor.u32 %v12517_v47, %v8968_v46  ;;  %v9209_v60 = vor.u32 %v12577_v49, %v9208_v48 }
  0xbb   :  { %1974 = vmatpush.bf16.msra.mxu0 %v8649_v56  ;;  %v9464_v53 = vld [vmem:[#allocation2 + $0x6e8] sm:$0xf]  ;;  %v12641_v54 = vld [vmem:[#allocation2 + $0x6f4] sm:$0xf0]  ;;  %v8841_v56 = vor.u32 %v12485_v45, %v8840_v43  ;;  %v9337_v61 = vor.u32 %v12609_v52, %v9336_v50 }
  0xbc   :  { %1987 = vmatpush.bf16.msra.mxu1 %v8777_v57  ;;  %v9592_v57 = vld [vmem:[#allocation2 + $0x7e8] sm:$0xf]  ;;  %v12573_v0 = vld [vmem:[#allocation2 + $0x4d4] sm:$0xf0] }
  0xbd   :  { %2000 = vmatpush.bf16.msra.mxu2 %v8905_v58  ;;  %v12673_v58 = vld [vmem:[#allocation2 + $0x7f4] sm:$0xf0]  ;;  %v9192_v63 = vld [vmem:[#allocation2 + $0x4c8] sm:$0xf] }
  0xbe   :  { %2013 = vmatpush.bf16.msra.mxu3 %v9033_v62  ;;  %v9465_v62 = vor.u32 %v12641_v54, %v9464_v53  ;;  %v9320_v1 = vld [vmem:[#allocation2 + $0x5c8] sm:$0xf]  ;;  %v9593_v2 = vor.u32 %v12673_v58, %v9592_v57  ;;  %v12605_v3 = vld [vmem:[#allocation2 + $0x5d4] sm:$0xf0]  ;;  %v9193_v12 = vor.u32 %v12573_v0, %v9192_v63 }
  0xbf   :  { %1975 = vmatpush.bf16.msra.mxu0 %v8633_v4  ;;  %v9448_v4 = vld [vmem:[#allocation2 + $0x6c8] sm:$0xf]  ;;  %v12669_v9 = vld [vmem:[#allocation2 + $0x7d4] sm:$0xf0]  ;;  %v9321_v13 = vor.u32 %v12605_v3, %v9320_v1 }
  0xc0   :  { %1988 = vmatpush.bf16.msra.mxu1 %v8761_v5  ;;  %v12637_v5 = vld [vmem:[#allocation2 + $0x6d4] sm:$0xf0]  ;;  %v9176_v17 = vld [vmem:[#allocation2 + $0x4a8] sm:$0xf] }
  0xc1   :  { %2001 = vmatpush.bf16.msra.mxu2 %v8889_v8  ;;  %v9576_v8 = vld [vmem:[#allocation2 + $0x7c8] sm:$0xf]  ;;  %v12569_v20 = vld [vmem:[#allocation2 + $0x4b4] sm:$0xf0] }
  0xc2   :  { %2014 = vmatpush.bf16.msra.mxu3 %v9017_v16  ;;  %v9449_v16 = vor.u32 %v12637_v5, %v9448_v4  ;;  %v9304_v21 = vld [vmem:[#allocation2 + $0x5a8] sm:$0xf]  ;;  %v9577_v22 = vor.u32 %v12669_v9, %v9576_v8  ;;  %v12601_v23 = vld [vmem:[#allocation2 + $0x5b4] sm:$0xf0]  ;;  %v9177_v28 = vor.u32 %v12569_v20, %v9176_v17 }
  0xc3   :  { %1976 = vmatpush.bf16.msra.mxu0 %v8617_v24  ;;  %v9432_v24 = vld [vmem:[#allocation2 + $0x6a8] sm:$0xf]  ;;  %v12665_v27 = vld [vmem:[#allocation2 + $0x7b4] sm:$0xf0]  ;;  %v9305_v29 = vor.u32 %v12601_v23, %v9304_v21 }
  0xc4   :  { %1989 = vmatpush.bf16.msra.mxu1 %v8745_v25  ;;  %v12633_v25 = vld [vmem:[#allocation2 + $0x6b4] sm:$0xf0]  ;;  %v9160_v31 = vld [vmem:[#allocation2 + $0x488] sm:$0xf] }
  0xc5   :  { %2002 = vmatpush.bf16.msra.mxu2 %v8873_v26  ;;  %v9560_v26 = vld [vmem:[#allocation2 + $0x7a8] sm:$0xf]  ;;  %v12565_v32 = vld [vmem:[#allocation2 + $0x494] sm:$0xf0] }
  0xc6   :  { %2015 = vmatpush.bf16.msra.mxu3 %v9001_v30  ;;  %v9433_v30 = vor.u32 %v12633_v25, %v9432_v24  ;;  %v9288_v33 = vld [vmem:[#allocation2 + $0x588] sm:$0xf]  ;;  %v9561_v34 = vor.u32 %v12665_v27, %v9560_v26  ;;  %v12597_v35 = vld [vmem:[#allocation2 + $0x594] sm:$0xf0] }
  0xc7   :  { %1977 = vmatpush.bf16.msra.mxu0 %v8601_v36  ;;  %v9416_v36 = vld [vmem:[#allocation2 + $0x688] sm:$0xf]  ;;  %v12629_v37 = vld [vmem:[#allocation2 + $0x694] sm:$0xf0]  ;;  %v9289_v42 = vor.u32 %v12597_v35, %v9288_v33 }
  0xc8   :  { %1990 = vmatpush.bf16.msra.mxu1 %v8729_v39  ;;  %v9544_v38 = vld [vmem:[#allocation2 + $0x788] sm:$0xf]  ;;  %v12661_v39 = vld [vmem:[#allocation2 + $0x794] sm:$0xf0]  ;;  %v9417_v43 = vor.u32 %v12629_v37, %v9416_v36 }
  0xc9   :  { %2003 = vmatpush.bf16.msra.mxu2 %v8857_v40  ;;  %v9161_v40 = vor.u32 %v12565_v32, %v9160_v31  ;;  %v12561_v45 = vld [vmem:[#allocation2 + $0x474] sm:$0xf0]  ;;  %v9272_v46 = vld [vmem:[#allocation2 + $0x568] sm:$0xf]  ;;  %v9545_v48 = vor.u32 %v12661_v39, %v9544_v38 }
  0xca   :  { %2016 = vmatpush.bf16.msra.mxu3 %v8985_v44  ;;  %v9144_v44 = vld [vmem:[#allocation2 + $0x468] sm:$0xf]  ;;  %v12593_v49 = vld [vmem:[#allocation2 + $0x574] sm:$0xf0] }
  0xcb   :  { %1978 = vmatpush.bf16.msra.mxu0 %v8585_v51  ;;  %v1772_v41 = vpop.f32.mrf.mxu0  ;;  %v9400_v50 = vld [vmem:[#allocation2 + $0x668] sm:$0xf]  ;;  %v12625_v51 = vld [vmem:[#allocation2 + $0x674] sm:$0xf0] }
  0xcc   :  { %1991 = vmatpush.bf16.msra.mxu1 %v8713_v55  ;;  %v1785_v47 = vpop.f32.mrf.mxu1  ;;  %v9528_v53 = vld [vmem:[#allocation2 + $0x768] sm:$0xf]  ;;  %v12657_v54 = vld [vmem:[#allocation2 + $0x774] sm:$0xf0]  ;;  %v9145_v55 = vor.u32 %v12561_v45, %v9144_v44  ;;  %v9401_v57 = vor.u32 %v12625_v51, %v9400_v50  ;;  %v8698_v44 = vld [vmem:[#allocation2 + $0xf8] sm:$0xf0] }
  0xcd   :  { %2004 = vmatpush.bf16.msra.mxu2 %v8841_v56  ;;  %v1786_v52 = vadd.f32 %v1785_v47, %v1772_v41  ;;  %v9273_v56 = vor.u32 %v12593_v49, %v9272_v46  ;;  %v9128_v58 = vld [vmem:[#allocation2 + $0x448] sm:$0xf]  ;;  %v12589_v63 = vld [vmem:[#allocation2 + $0x554] sm:$0xf0]  ;;  %v12479_v45 = vld [vmem:[#allocation2 + $0x1ec] sm:$0xf] }
  0xce   :  { %2017 = vmatpush.bf16.msra.mxu3 %v8969_v59  ;;  %1979 = vmatmul.bf16.vlgmr.msra.gmra.mxu0 %v13859_v6  ;;  %v12557_v59 = vld [vmem:[#allocation2 + $0x454] sm:$0xf0]  ;;  %v9384_v0 = vld [vmem:[#allocation2 + $0x648] sm:$0xf]  ;;  %v8826_v47 = vld [vmem:[#allocation2 + $0x1f8] sm:$0xf0] }
  0xcf   :  { %2023 = vmatpush.bf16.msrb.mxu0 %v9209_v60  ;;  %1992 = vmatmul.bf16.vlgmr.msra.gmra.mxu1 %v13861_v7  ;;  %v9256_v60 = vld [vmem:[#allocation2 + $0x548] sm:$0xf]  ;;  %v12621_v1 = vld [vmem:[#allocation2 + $0x654] sm:$0xf0]  ;;  %v9129_v8 = vor.u32 %v12557_v59, %v9128_v58  ;;  %v8954_v49 = vld [vmem:[#allocation2 + $0x2f8] sm:$0xf0] }
  0xd0   :  { %2036 = vmatpush.bf16.msrb.mxu1 %v9337_v61  ;;  %2005 = vmatmul.bf16.vlgmr.msra.gmra.mxu2 %v13863_v10  ;;  %v9512_v4 = vld [vmem:[#allocation2 + $0x748] sm:$0xf]  ;;  %v12653_v5 = vld [vmem:[#allocation2 + $0x754] sm:$0xf0]  ;;  %v12443_v58 = vld [vmem:[#allocation2 + $0xcc] sm:$0xf] }
  0xd1   :  { %2049 = vmatpush.bf16.msrb.mxu2 %v9465_v62  ;;  %2018 = vmatmul.bf16.vlgmr.msra.gmra.mxu3 %v13865_v11  ;;  %v9529_v62 = vor.u32 %v12657_v54, %v9528_v53  ;;  %v9112_v17 = vld [vmem:[#allocation2 + $0x428] sm:$0xf]  ;;  %v12553_v20 = vld [vmem:[#allocation2 + $0x434] sm:$0xf0]  ;;  %v9513_v23 = vor.u32 %v12653_v5, %v9512_v4  ;;  %v9082_v53 = vld [vmem:[#allocation2 + $0x3f8] sm:$0xf0] }
  0xd2   :  { %2062 = vmatpush.bf16.msrb.mxu3 %v9593_v2  ;;  %v9240_v21 = vld [vmem:[#allocation2 + $0x528] sm:$0xf]  ;;  %v12585_v24 = vld [vmem:[#allocation2 + $0x534] sm:$0xf0]  ;;  %v8682_v59 = vld [vmem:[#allocation2 + $0xd8] sm:$0xf0] }
  0xd3   :  { %2024 = vmatpush.bf16.msrb.mxu0 %v9193_v12  ;;  %v1798_v61 = vpop.f32.mrf.mxu2  ;;  %v1774_v12 = vpop.f32.mrf.mxu0  ;;  %v9368_v25 = vld [vmem:[#allocation2 + $0x628] sm:$0xf]  ;;  %v12617_v26 = vld [vmem:[#allocation2 + $0x634] sm:$0xf0]  ;;  %v9241_v32 = vor.u32 %v12585_v24, %v9240_v21  ;;  %v8922_v21 = vld [vmem:[#allocation2 + $0x2b8] sm:$0xf0] }
  0xd4   :  { %2037 = vmatpush.bf16.msrb.mxu1 %v9321_v13  ;;  %v1799_v2 = vadd.f32 %v1798_v61, %v1786_v52  ;;  %v1811_v3 = vpop.f32.mrf.mxu3  ;;  %v9257_v13 = vor.u32 %v12589_v63, %v9256_v60  ;;  %v9496_v27 = vld [vmem:[#allocation2 + $0x728] sm:$0xf]  ;;  %v12549_v31 = vld [vmem:[#allocation2 + $0x414] sm:$0xf0]  ;;  %v9369_v33 = vor.u32 %v12617_v26, %v9368_v25  ;;  %v12543_v52 = vld [vmem:[#allocation2 + $0x3ec] sm:$0xf] }
  0xd5   :  { %2050 = vmatpush.bf16.msrb.mxu2 %v9449_v16  ;;  %v9385_v16 = vor.u32 %v12621_v1, %v9384_v0  ;;  %v12581_v35 = vld [vmem:[#allocation2 + $0x514] sm:$0xf0]  ;;  %v9352_v36 = vld [vmem:[#allocation2 + $0x608] sm:$0xf]  ;;  %v12475_v60 = vld [vmem:[#allocation2 + $0x1cc] sm:$0xf]  ;;  %v9085_v61 = vor.u32 %v12543_v52, %v9082_v53 }
  0xd6   :  { %2063 = vmatpush.bf16.msrb.mxu3 %v9577_v22  ;;  %v13895_v9 = vadd.f32 %v1811_v3, %v1799_v2  ;;  %v1787_v22 = vpop.f32.mrf.mxu1  ;;  %v12613_v39 = vld [vmem:[#allocation2 + $0x614] sm:$0xf0]  ;;  %v12507_v63 = vld [vmem:[#allocation2 + $0x2cc] sm:$0xf]  ;;  %v8938_v0 = vld [vmem:[#allocation2 + $0x2d8] sm:$0xf0]  ;;  %v8685_v3 = vor.u32 %v12443_v58, %v8682_v59 }
  0xd7   :  { %2025 = vmatpush.bf16.msrb.mxu0 %v9177_v28  ;;  %v12649_v28 = vld [vmem:[#allocation2 + $0x734] sm:$0xf0]  ;;  %v9353_v51 = vor.u32 %v12613_v39, %v9352_v36  ;;  %v12539_v1 = vld [vmem:[#allocation2 + $0x3cc] sm:$0xf]  ;;  %v9066_v2 = vld [vmem:[#allocation2 + $0x3d8] sm:$0xf0]  ;;  %v8941_v5 = vor.u32 %v12507_v63, %v8938_v0 }
  0xd8   :  { %2038 = vmatpush.bf16.msrb.mxu1 %v9305_v29  ;;  %v9113_v29 = vor.u32 %v12553_v20, %v9112_v17  ;;  %v9497_v38 = vor.u32 %v12649_v28, %v9496_v27  ;;  %v12645_v41 = vld [vmem:[#allocation2 + $0x714] sm:$0xf0]  ;;  %v8666_v12 = vld [vmem:[#allocation2 + $0xb8] sm:$0xf0]  ;;  %v12503_v20 = vld [vmem:[#allocation2 + $0x2ac] sm:$0xf] }
  0xd9   :  { %2051 = vmatpush.bf16.msrb.mxu2 %v9433_v30  ;;  %v9096_v30 = vld [vmem:[#allocation2 + $0x408] sm:$0xf]  ;;  %v8794_v17 = vld [vmem:[#allocation2 + $0x1b8] sm:$0xf0]  ;;  %v12535_v22 = vld [vmem:[#allocation2 + $0x3ac] sm:$0xf]  ;;  %v8925_v26 = vor.u32 %v12503_v20, %v8922_v21 }
  0xda   :  { %2064 = vmatpush.bf16.msrb.mxu3 %v9561_v34  ;;  %v9224_v34 = vld [vmem:[#allocation2 + $0x508] sm:$0xf]  ;;  %v9097_v46 = vor.u32 %v12549_v31, %v9096_v30  ;;  %v12435_v27 = vld [vmem:[#allocation2 + $0x8c] sm:$0xf]  ;;  %v8650_v28 = vld [vmem:[#allocation2 + $0x98] sm:$0xf0] }
  0xdb   :  { %2026 = vmatpush.bf16.msrb.mxu0 %v9161_v40  ;;  %v1800_v37 = vpop.f32.mrf.mxu2  ;;  %v9480_v40 = vld [vmem:[#allocation2 + $0x708] sm:$0xf]  ;;  %v9225_v50 = vor.u32 %v12581_v35, %v9224_v34  ;;  %v8778_v31 = vld [vmem:[#allocation2 + $0x198] sm:$0xf0]  ;;  %v12531_v34 = vld [vmem:[#allocation2 + $0x38c] sm:$0xf]  ;;  %v8653_v36 = vor.u32 %v12435_v27, %v8650_v28 }
  0xdc   :  { %2039 = vmatpush.bf16.msrb.mxu1 %v9289_v42  ;;  %v1813_v42 = vpop.f32.mrf.mxu3  ;;  %v9481_v54 = vor.u32 %v12645_v41, %v9480_v40  ;;  %v9034_v35 = vld [vmem:[#allocation2 + $0x398] sm:$0xf0]  ;;  %v12523_v0 = vld [vmem:[#allocation2 + $0x34c] sm:$0xf] }
  0xdd   :  { %2052 = vmatpush.bf16.msrb.mxu2 %v9417_v43  ;;  %v12447_v43 = vld [vmem:[#allocation2 + $0xec] sm:$0xf]  ;;  %v8874_v63 = vld [vmem:[#allocation2 + $0x258] sm:$0xf0] }
  0xde   :  { %2065 = vmatpush.bf16.msrb.mxu3 %v9545_v48  ;;  %v12511_v48 = vld [vmem:[#allocation2 + $0x2ec] sm:$0xf]  ;;  %v8730_v21 = vld [vmem:[#allocation2 + $0x138] sm:$0xf0] }
  0xdf   :  { %2027 = vmatpush.bf16.msrb.mxu0 %v9145_v55  ;;  %v8701_v55 = vor.u32 %v12447_v43, %v8698_v44  ;;  %v12431_v42 = vld [vmem:[#allocation2 + $0x6c] sm:$0xf]  ;;  %v8634_v43 = vld [vmem:[#allocation2 + $0x78] sm:$0xf0] }
  0xe0   :  { %2040 = vmatpush.bf16.msrb.mxu1 %v9273_v56  ;;  %v8829_v56 = vor.u32 %v12479_v45, %v8826_v47  ;;  %v12463_v44 = vld [vmem:[#allocation2 + $0x16c] sm:$0xf]  ;;  %v9037_v45 = vor.u32 %v12531_v34, %v9034_v35  ;;  %v8637_v52 = vor.u32 %v12431_v42, %v8634_v43  ;;  %v8586_v28 = vld [vmem:[#allocation2 + $0x18] sm:$0xf0] }
  0xe1   :  { %2053 = vmatpush.bf16.msrb.mxu2 %v9401_v57  ;;  %v8957_v57 = vor.u32 %v12511_v48, %v8954_v49  ;;  %v12495_v47 = vld [vmem:[#allocation2 + $0x26c] sm:$0xf]  ;;  %v8890_v48 = vld [vmem:[#allocation2 + $0x278] sm:$0xf0] }
  0xe2   :  { %2066 = vmatpush.bf16.msrb.mxu3 %v9529_v62  ;;  %v8810_v62 = vld [vmem:[#allocation2 + $0x1d8] sm:$0xf0]  ;;  %v12419_v27 = vld [vmem:[#allocation2 + $0xc] sm:$0xf] }
  0xe3   :  { %2028 = vmatpush.bf16.msrb.mxu0 %v9129_v8  ;;  %v8813_v4 = vor.u32 %v12475_v60, %v8810_v62  ;;  %v12439_v8 = vld [vmem:[#allocation2 + $0xac] sm:$0xf]  ;;  %v8589_v43 = vor.u32 %v12419_v27, %v8586_v28  ;;  %v9290_v27 = vld [vmem:[#allocation2 + $0x598] sm:$0xf0] }
  0xe4   :  { %2041 = vmatpush.bf16.msrb.mxu1 %v9257_v13  ;;  %v12471_v13 = vld [vmem:[#allocation2 + $0x1ac] sm:$0xf]  ;;  %v8669_v24 = vor.u32 %v12439_v8, %v8666_v12 }
  0xe5   :  { %2054 = vmatpush.bf16.msrb.mxu2 %v9385_v16  ;;  %v9069_v16 = vor.u32 %v12539_v1, %v9066_v2  ;;  %v8797_v25 = vor.u32 %v12471_v13, %v8794_v17  ;;  %v12491_v62 = vld [vmem:[#allocation2 + $0x24c] sm:$0xf]  ;;  %v9002_v1 = vld [vmem:[#allocation2 + $0x358] sm:$0xf0] }
  0xe6   :  { %2067 = vmatpush.bf16.msrb.mxu3 %v9513_v23  ;;  %v9050_v23 = vld [vmem:[#allocation2 + $0x3b8] sm:$0xf0]  ;;  %v8877_v8 = vor.u32 %v12491_v62, %v8874_v63  ;;  %v12423_v12 = vld [vmem:[#allocation2 + $0x2c] sm:$0xf]  ;;  %v9005_v20 = vor.u32 %v12523_v0, %v9002_v1 }
  0xe7   :  { %2029 = vmatpush.bf16.msrb.mxu0 %v9113_v29  ;;  %v12467_v29 = vld [vmem:[#allocation2 + $0x18c] sm:$0xf]  ;;  %v9053_v30 = vor.u32 %v12535_v22, %v9050_v23  ;;  %v8602_v13 = vld [vmem:[#allocation2 + $0x38] sm:$0xf0] }
  0xe8   :  { %2042 = vmatpush.bf16.msrb.mxu1 %v9241_v32  ;;  %v12499_v32 = vld [vmem:[#allocation2 + $0x28c] sm:$0xf]  ;;  %v8858_v23 = vld [vmem:[#allocation2 + $0x238] sm:$0xf0] }
  0xe9   :  { %2055 = vmatpush.bf16.msrb.mxu2 %v9369_v33  ;;  %v8906_v33 = vld [vmem:[#allocation2 + $0x298] sm:$0xf0]  ;;  %v12487_v22 = vld [vmem:[#allocation2 + $0x22c] sm:$0xf] }
  0xea   :  { %2068 = vmatpush.bf16.msrb.mxu3 %v9497_v38  ;;  %v8781_v38 = vor.u32 %v12467_v29, %v8778_v31  ;;  %v8909_v39 = vor.u32 %v12499_v32, %v8906_v33  ;;  %v12451_v31 = vld [vmem:[#allocation2 + $0x10c] sm:$0xf]  ;;  %v8714_v32 = vld [vmem:[#allocation2 + $0x118] sm:$0xf0] }
  0xeb   :  { %2030 = vmatpush.bf16.msrb.mxu0 %v9097_v46  ;;  %v1824_v37 = vpop.f32.mrf.mxu0  ;;  %v8762_v46 = vld [vmem:[#allocation2 + $0x178] sm:$0xf0]  ;;  %v12483_v33 = vld [vmem:[#allocation2 + $0x20c] sm:$0xf] }
  0xec   :  { %2043 = vmatpush.bf16.msrb.mxu1 %v9225_v50  ;;  %v1825_v40 = vadd.f32 %v1824_v37, %v13895_v9  ;;  %v1837_v41 = vpop.f32.mrf.mxu1  ;;  %v12527_v50 = vld [vmem:[#allocation2 + $0x36c] sm:$0xf]  ;;  %v8765_v53 = vor.u32 %v12463_v44, %v8762_v46  ;;  %v9338_v44 = vld [vmem:[#allocation2 + $0x5f8] sm:$0xf0] }
  0xed   :  { %2056 = vmatpush.bf16.msrb.mxu2 %v9353_v51  ;;  %v9018_v51 = vld [vmem:[#allocation2 + $0x378] sm:$0xf0]  ;;  %v12427_v9 = vld [vmem:[#allocation2 + $0x4c] sm:$0xf] }
  0xee   :  { %2069 = vmatpush.bf16.msrb.mxu3 %v9481_v54  ;;  %2031 = vmatmul.bf16.vlgmr.msrb.gmra.mxu0 %v13867_v14  ;;  %v1838_v49 = vadd.f32 %v1837_v41, %v1825_v40  ;;  %v8893_v54 = vor.u32 %v12495_v47, %v8890_v48  ;;  %v9021_v58 = vor.u32 %v12527_v50, %v9018_v51  ;;  %v12515_v37 = vld [vmem:[#allocation2 + $0x30c] sm:$0xf]  ;;  %v9210_v41 = vld [vmem:[#allocation2 + $0x4f8] sm:$0xf0] }
  0xef   :  { %2075 = vmatpush.bf16.msra.mxu0 %v8701_v55  ;;  %2044 = vmatmul.bf16.vlgmr.msrb.gmra.mxu1 %v13869_v15  ;;  %v12575_v40 = vld [vmem:[#allocation2 + $0x4ec] sm:$0xf]  ;;  %v9466_v46 = vld [vmem:[#allocation2 + $0x6f8] sm:$0xf0]  ;;  %v8717_v47 = vor.u32 %v12451_v31, %v8714_v32 }
  0xf0   :  { %2088 = vmatpush.bf16.msra.mxu1 %v8829_v56  ;;  %2057 = vmatmul.bf16.vlgmr.msrb.gmra.mxu2 %v13871_v18  ;;  %v8618_v56 = vld [vmem:[#allocation2 + $0x58] sm:$0xf0]  ;;  %v12607_v42 = vld [vmem:[#allocation2 + $0x5ec] sm:$0xf] }
  0xf1   :  { %2101 = vmatpush.bf16.msra.mxu2 %v8957_v57  ;;  %2070 = vmatmul.bf16.vlgmr.msrb.gmra.mxu3 %v13873_v19  ;;  %v12459_v57 = vld [vmem:[#allocation2 + $0x14c] sm:$0xf]  ;;  %v9594_v50 = vld [vmem:[#allocation2 + $0x7f8] sm:$0xf0] }
  0xf2   :  { %2114 = vmatpush.bf16.msra.mxu3 %v9085_v61  ;;  %v8746_v61 = vld [vmem:[#allocation2 + $0x158] sm:$0xf0]  ;;  %v12627_v28 = vld [vmem:[#allocation2 + $0x68c] sm:$0xf] }
  0xf3   :  { %2076 = vmatpush.bf16.msra.mxu0 %v8685_v3  ;;  %v1850_v55 = vpop.f32.mrf.mxu2  ;;  %v8621_v3 = vor.u32 %v12427_v9, %v8618_v56  ;;  %v9194_v9 = vld [vmem:[#allocation2 + $0x4d8] sm:$0xf0]  ;;  %v12603_v56 = vld [vmem:[#allocation2 + $0x5cc] sm:$0xf] }
  0xf4   :  { %2089 = vmatpush.bf16.msra.mxu1 %v8813_v4  ;;  %v1851_v59 = vadd.f32 %v1850_v55, %v1838_v49  ;;  %v1863_v60 = vpop.f32.mrf.mxu3  ;;  %v1826_v4 = vpop.f32.mrf.mxu0  ;;  %v12671_v49 = vld [vmem:[#allocation2 + $0x7ec] sm:$0xf]  ;;  %v9578_v62 = vld [vmem:[#allocation2 + $0x7d8] sm:$0xf0] }
  0xf5   :  { %2102 = vmatpush.bf16.msra.mxu2 %v8941_v5  ;;  %v8749_v5 = vor.u32 %v12459_v57, %v8746_v61  ;;  %v1839_v17 = vpop.f32.mrf.mxu1  ;;  %v12571_v55 = vld [vmem:[#allocation2 + $0x4cc] sm:$0xf]  ;;  %v9597_v57 = vor.u32 %v12671_v49, %v9594_v50  ;;  %v9178_v4 = vld [vmem:[#allocation2 + $0x4b8] sm:$0xf0] }
  0xf6   :  { %2115 = vmatpush.bf16.msra.mxu3 %v9069_v16  ;;  %v13902_v2 = vadd.f32 %v1863_v60, %v1851_v59  ;;  %v12455_v16 = vld [vmem:[#allocation2 + $0x12c] sm:$0xf]  ;;  %v9450_v60 = vld [vmem:[#allocation2 + $0x6d8] sm:$0xf0]  ;;  %v9197_v63 = vor.u32 %v12571_v55, %v9194_v9 }
  0xf7   :  { %2077 = vmatpush.bf16.msra.mxu0 %v8669_v24  ;;  %v12519_v24 = vld [vmem:[#allocation2 + $0x32c] sm:$0xf]  ;;  %v8733_v29 = vor.u32 %v12455_v16, %v8730_v21  ;;  %v9434_v16 = vld [vmem:[#allocation2 + $0x6b8] sm:$0xf0] }
  0xf8   :  { %2090 = vmatpush.bf16.msra.mxu1 %v8797_v25  ;;  %v8986_v25 = vld [vmem:[#allocation2 + $0x338] sm:$0xf0]  ;;  %v12635_v59 = vld [vmem:[#allocation2 + $0x6cc] sm:$0xf] }
  0xf9   :  { %2103 = vmatpush.bf16.msra.mxu2 %v8925_v26  ;;  %v8605_v26 = vor.u32 %v12423_v12, %v8602_v13  ;;  %v8989_v35 = vor.u32 %v12519_v24, %v8986_v25  ;;  %v12667_v61 = vld [vmem:[#allocation2 + $0x7cc] sm:$0xf]  ;;  %v9453_v1 = vor.u32 %v12635_v59, %v9450_v60  ;;  %v9306_v12 = vld [vmem:[#allocation2 + $0x5b8] sm:$0xf0] }
  0xfa   :  { %2116 = vmatpush.bf16.msra.mxu3 %v9053_v30  ;;  %v8861_v30 = vor.u32 %v12487_v22, %v8858_v23  ;;  %v12631_v13 = vld [vmem:[#allocation2 + $0x6ac] sm:$0xf]  ;;  %v9162_v25 = vld [vmem:[#allocation2 + $0x498] sm:$0xf0] }
  0xfb   :  { %2078 = vmatpush.bf16.msra.mxu0 %v8653_v36  ;;  %v1852_v34 = vpop.f32.mrf.mxu2  ;;  %v8842_v36 = vld [vmem:[#allocation2 + $0x218] sm:$0xf0]  ;;  %v12663_v17 = vld [vmem:[#allocation2 + $0x7ac] sm:$0xf]  ;;  %v9437_v23 = vor.u32 %v12631_v13, %v9434_v16 }
  0xfc   :  { %2091 = vmatpush.bf16.msra.mxu1 %v8781_v38  ;;  %v8970_v38 = vld [vmem:[#allocation2 + $0x318] sm:$0xf0]  ;;  %v8845_v48 = vor.u32 %v12483_v33, %v8842_v36  ;;  %v12563_v24 = vld [vmem:[#allocation2 + $0x48c] sm:$0xf] }
  0xfd   :  { %2104 = vmatpush.bf16.msra.mxu2 %v8909_v39  ;;  %v1865_v39 = vpop.f32.mrf.mxu3  ;;  %v8973_v51 = vor.u32 %v12515_v37, %v8970_v38  ;;  %v12559_v33 = vld [vmem:[#allocation2 + $0x46c] sm:$0xf]  ;;  %v9146_v34 = vld [vmem:[#allocation2 + $0x478] sm:$0xf0] }
  0xfe   :  { %2117 = vmatpush.bf16.msra.mxu3 %v9037_v45  ;;  %v12639_v45 = vld [vmem:[#allocation2 + $0x6ec] sm:$0xf]  ;;  %v9274_v38 = vld [vmem:[#allocation2 + $0x578] sm:$0xf0] }
  0xff   :  { %2079 = vmatpush.bf16.msra.mxu0 %v8637_v52  ;;  %v9213_v52 = vor.u32 %v12575_v40, %v9210_v41  ;;  %v12623_v39 = vld [vmem:[#allocation2 + $0x66c] sm:$0xf]  ;;  %v9402_v40 = vld [vmem:[#allocation2 + $0x678] sm:$0xf0] }
 0x100   :  { %2092 = vmatpush.bf16.msra.mxu1 %v8765_v53  ;;  %v9341_v53 = vor.u32 %v12607_v42, %v9338_v44  ;;  %v12655_v42 = vld [vmem:[#allocation2 + $0x76c] sm:$0xf]  ;;  %v9149_v44 = vor.u32 %v12559_v33, %v9146_v34  ;;  %v9498_v16 = vld [vmem:[#allocation2 + $0x738] sm:$0xf0] }
 0x101   :  { %2105 = vmatpush.bf16.msra.mxu2 %v8893_v54  ;;  %v9469_v54 = vor.u32 %v12639_v45, %v9466_v46  ;;  %v9405_v46 = vor.u32 %v12623_v39, %v9402_v40  ;;  %v12587_v49 = vld [vmem:[#allocation2 + $0x54c] sm:$0xf] }
 0x102   :  { %2118 = vmatpush.bf16.msra.mxu3 %v9021_v58  ;;  %v9322_v58 = vld [vmem:[#allocation2 + $0x5d8] sm:$0xf0]  ;;  %v12647_v13 = vld [vmem:[#allocation2 + $0x72c] sm:$0xf] }
 0x103   :  { %2080 = vmatpush.bf16.msra.mxu0 %v8621_v3  ;;  %v9325_v0 = vor.u32 %v12603_v56, %v9322_v58  ;;  %v12567_v3 = vld [vmem:[#allocation2 + $0x4ac] sm:$0xf] }
 0x104   :  { %2093 = vmatpush.bf16.msra.mxu1 %v8749_v5  ;;  %v12599_v5 = vld [vmem:[#allocation2 + $0x5ac] sm:$0xf]  ;;  %v9181_v21 = vor.u32 %v12567_v3, %v9178_v4 }
 0x105   :  { %2106 = vmatpush.bf16.msra.mxu2 %v8877_v8  ;;  %v9581_v8 = vor.u32 %v12667_v61, %v9578_v62  ;;  %v9309_v22 = vor.u32 %v12599_v5, %v9306_v12  ;;  %v12651_v56 = vld [vmem:[#allocation2 + $0x74c] sm:$0xf]  ;;  %v9242_v5 = vld [vmem:[#allocation2 + $0x538] sm:$0xf0] }
 0x106   :  { %2119 = vmatpush.bf16.msra.mxu3 %v9005_v20  ;;  %v9562_v20 = vld [vmem:[#allocation2 + $0x7b8] sm:$0xf0] }
 0x107   :  { %2081 = vmatpush.bf16.msra.mxu0 %v8605_v26  ;;  %v9565_v26 = vor.u32 %v12663_v17, %v9562_v20  ;;  %v9370_v12 = vld [vmem:[#allocation2 + $0x638] sm:$0xf0] }
 0x108   :  { %2094 = vmatpush.bf16.msra.mxu1 %v8733_v29  ;;  %v9418_v29 = vld [vmem:[#allocation2 + $0x698] sm:$0xf0] }
 0x109   :  { %2107 = vmatpush.bf16.msra.mxu2 %v8861_v30  ;;  %v12659_v30 = vld [vmem:[#allocation2 + $0x78c] sm:$0xf]  ;;  %v9421_v32 = vor.u32 %v12627_v28, %v9418_v29  ;;  %v9354_v28 = vld [vmem:[#allocation2 + $0x618] sm:$0xf0] }
 0x10a   :  { %2120 = vmatpush.bf16.msra.mxu3 %v8989_v35  ;;  %v12591_v35 = vld [vmem:[#allocation2 + $0x56c] sm:$0xf] }
 0x10b   :  { %2082 = vmatpush.bf16.msra.mxu0 %v8589_v43  ;;  %v1876_v31 = vpop.f32.mrf.mxu0  ;;  %v9530_v43 = vld [vmem:[#allocation2 + $0x778] sm:$0xf0]  ;;  %v9277_v45 = vor.u32 %v12591_v35, %v9274_v38 }
 0x10c   :  { %2095 = vmatpush.bf16.msra.mxu1 %v8717_v47  ;;  %v1889_v36 = vpop.f32.mrf.mxu1  ;;  %v12555_v47 = vld [vmem:[#allocation2 + $0x44c] sm:$0xf] }
 0x10d   :  { %2108 = vmatpush.bf16.msra.mxu2 %v8845_v48  ;;  %v1890_v41 = vadd.f32 %v1889_v36, %v1876_v31  ;;  %v9130_v48 = vld [vmem:[#allocation2 + $0x458] sm:$0xf0] }
 0x10e   :  { %2121 = vmatpush.bf16.msra.mxu3 %v8973_v51  ;;  %2083 = vmatmul.bf16.vlgmr.msra.gmra.mxu0 %v13859_v6  ;;  %v9546_v6 = vld [vmem:[#allocation2 + $0x798] sm:$0xf0]  ;;  %v9533_v51 = vor.u32 %v12655_v42, %v9530_v43  ;;  %v9133_v58 = vor.u32 %v12555_v47, %v9130_v48 }
 0x10f   :  { %2127 = vmatpush.bf16.msrb.mxu0 %v9213_v52  ;;  %2096 = vmatmul.bf16.vlgmr.msra.gmra.mxu1 %v13861_v7  ;;  %v9549_v37 = vor.u32 %v12659_v30, %v9546_v6  ;;  %v9258_v52 = vld [vmem:[#allocation2 + $0x558] sm:$0xf0]  ;;  %v12643_v30 = vld [vmem:[#allocation2 + $0x70c] sm:$0xf] }
 0x110   :  { %2140 = vmatpush.bf16.msrb.mxu1 %v9341_v53  ;;  %2109 = vmatmul.bf16.vlgmr.msra.gmra.mxu2 %v13863_v10  ;;  %v12595_v10 = vld [vmem:[#allocation2 + $0x58c] sm:$0xf]  ;;  %v9261_v61 = vor.u32 %v12587_v49, %v9258_v52  ;;  %v9482_v6 = vld [vmem:[#allocation2 + $0x718] sm:$0xf0] }
 0x111   :  { %2153 = vmatpush.bf16.msrb.mxu2 %v9469_v54  ;;  %2122 = vmatmul.bf16.vlgmr.msra.gmra.mxu3 %v13865_v11  ;;  %v9165_v11 = vor.u32 %v12563_v24, %v9162_v25  ;;  %v9293_v7 = vor.u32 %v12595_v10, %v9290_v27  ;;  %v12619_v53 = vld [vmem:[#allocation2 + $0x64c] sm:$0xf]  ;;  %v9386_v54 = vld [vmem:[#allocation2 + $0x658] sm:$0xf0]  ;;  %v9501_v10 = vor.u32 %v12647_v13, %v9498_v16 }
 0x112   :  { %2166 = vmatpush.bf16.msrb.mxu3 %v9597_v57  ;;  %v9514_v57 = vld [vmem:[#allocation2 + $0x758] sm:$0xf0]  ;;  %v9389_v62 = vor.u32 %v12619_v53, %v9386_v54  ;;  %v12579_v24 = vld [vmem:[#allocation2 + $0x50c] sm:$0xf] }
 0x113   :  { %2128 = vmatpush.bf16.msrb.mxu0 %v9197_v63  ;;  %v1902_v50 = vpop.f32.mrf.mxu2  ;;  %v1878_v60 = vpop.f32.mrf.mxu0  ;;  %v12551_v63 = vld [vmem:[#allocation2 + $0x42c] sm:$0xf]  ;;  %v9517_v4 = vor.u32 %v12651_v56, %v9514_v57 }
 0x114   :  { %2141 = vmatpush.bf16.msrb.mxu1 %v9325_v0  ;;  %v1903_v55 = vadd.f32 %v1902_v50, %v1890_v41  ;;  %v1915_v9 = vpop.f32.mrf.mxu3  ;;  %v9114_v0 = vld [vmem:[#allocation2 + $0x438] sm:$0xf0]  ;;  %v1891_v3 = vpop.f32.mrf.mxu1  ;;  %v12611_v27 = vld [vmem:[#allocation2 + $0x60c] sm:$0xf] }
 0x115   :  { %2154 = vmatpush.bf16.msrb.mxu2 %v9453_v1  ;;  %v12583_v1 = vld [vmem:[#allocation2 + $0x52c] sm:$0xf]  ;;  %v9117_v17 = vor.u32 %v12551_v63, %v9114_v0  ;;  %v13747_v0 = vmov 4.0  }
 0x116   :  { %2167 = vmatpush.bf16.msrb.mxu3 %v9581_v8  ;;  %v1916_v59 = vadd.f32 %v1915_v9, %v1903_v55  ;;  %v12615_v8 = vld [vmem:[#allocation2 + $0x62c] sm:$0xf]  ;;  %v9245_v20 = vor.u32 %v12583_v1, %v9242_v5  ;;  %13391 = vrcp.f32 %v13747_v0 }
 0x117   :  { %2129 = vmatpush.bf16.msrb.mxu0 %v9181_v21  ;;  %v9373_v21 = vor.u32 %v12615_v8, %v9370_v12 }
 0x118   :  { %2142 = vmatpush.bf16.msrb.mxu1 %v9309_v22  ;;  %v12547_v22 = vld [vmem:[#allocation2 + $0x40c] sm:$0xf] }
 0x119   :  { %2155 = vmatpush.bf16.msrb.mxu2 %v9437_v23  ;;  %v9098_v23 = vld [vmem:[#allocation2 + $0x418] sm:$0xf0] }
 0x11a   :  { %2168 = vmatpush.bf16.msrb.mxu3 %v9565_v26  ;;  %v9226_v26 = vld [vmem:[#allocation2 + $0x518] sm:$0xf0] }
 0x11b   :  { %2130 = vmatpush.bf16.msrb.mxu0 %v9165_v11  ;;  %v1904_v25 = vpop.f32.mrf.mxu2  ;;  %v9101_v11 = vor.u32 %v12547_v22, %v9098_v23  ;;  %v9229_v31 = vor.u32 %v12579_v24, %v9226_v26 }
 0x11c   :  { %2143 = vmatpush.bf16.msrb.mxu1 %v9293_v7  ;;  %v1917_v29 = vpop.f32.mrf.mxu3  ;;  %v9357_v7 = vor.u32 %v12611_v27, %v9354_v28  ;;  %v13392_v8 = vpop.eup %13391 }
 0x11d   :  { %2156 = vmatpush.bf16.msrb.mxu2 %v9421_v32  ;;  %v9485_v32 = vor.u32 %v12643_v30, %v9482_v6  ;;  %vm2215_vm1 = vweird.f32 %v13392_v8 }
 0x11e   :  { %2169 = vmatpush.bf16.msrb.mxu3 %v9549_v37 }
 0x11f   :  { %2131 = vmatpush.bf16.msrb.mxu0 %v9149_v44 }
 0x120   :  { %2144 = vmatpush.bf16.msrb.mxu1 %v9277_v45 }
 0x121   :  { %2157 = vmatpush.bf16.msrb.mxu2 %v9405_v46 }
 0x122   :  { %2170 = vmatpush.bf16.msrb.mxu3 %v9533_v51 }
 0x123   :  { %2132 = vmatpush.bf16.msrb.mxu0 %v9133_v58 }
 0x124   :  { %2145 = vmatpush.bf16.msrb.mxu1 %v9261_v61 }
 0x125   :  { %2158 = vmatpush.bf16.msrb.mxu2 %v9389_v62 }
 0x126   :  { %2171 = vmatpush.bf16.msrb.mxu3 %v9517_v4  ;;  %v2182_v4 = vsel %vm2181_vm0, %v13902_v2, 0.0 }
 0x127   :  { %2133 = vmatpush.bf16.msrb.mxu0 %v9117_v17  ;;  %v2183_v13 = vrot.slane %v2182_v4, 4  ;;  %v2211_v17 = vmul.f32 4.0, %v13392_v8 }
 0x128   :  { %2146 = vmatpush.bf16.msrb.mxu1 %v9245_v20 }
 0x129   :  { %2159 = vmatpush.bf16.msrb.mxu2 %v9373_v21  ;;  %v2184_v21 = vadd.f32 %v2183_v13, %v2182_v4  ;;  %v2212_v23 = vsub.f32 1.0, %v2211_v17 }
 0x12a   :  { %2172 = vmatpush.bf16.msrb.mxu3 %v9501_v10 }
 0x12b   :  { %2134 = vmatpush.bf16.msrb.mxu0 %v9101_v11  ;;  %v1928_v33 = vpop.f32.mrf.mxu0  ;;  %v2185_v26 = vrot.slane %v2184_v21, 2  ;;  %v2213_v28 = vmul.f32 %v13392_v8, %v2212_v23 }
 0x12c   :  { %2147 = vmatpush.bf16.msrb.mxu1 %v9229_v31  ;;  %v1929_v34 = vadd.f32 %v1928_v33, %v1916_v59  ;;  %v1941_v35 = vpop.f32.mrf.mxu1 }
 0x12d   :  { %2160 = vmatpush.bf16.msrb.mxu2 %v9357_v7  ;;  %v2186_v6 = vadd.f32 %v2185_v26, %v2184_v21  ;;  %v2214_v7 = vadd.f32 %v13392_v8, %v2213_v28 }
 0x12e   :  { %2173 = vmatpush.bf16.msrb.mxu3 %v9485_v32  ;;  %2135 = vmatmul.bf16.vlgmr.msrb.gmra.mxu0 %v13867_v14  ;;  %v1942_v36 = vadd.f32 %v1941_v35, %v1929_v34 }
 0x12f   :  { %2148 = vmatmul.bf16.vlgmr.msrb.gmra.mxu1 %v13869_v15  ;;  %v2187_v35 = vrot.slane %v2186_v6, 1 }
 0x130   :  { %2161 = vmatmul.bf16.vlgmr.msrb.gmra.mxu2 %v13871_v18 }
 0x131   :  { %2174 = vmatmul.bf16.vlgmr.msrb.gmra.mxu3 %v13873_v19 }
 0x133   :  { %v1954_v37 = vpop.f32.mrf.mxu2  ;;  %v1930_v41 = vpop.f32.mrf.mxu0 }
 0x134   :  { %v1955_v38 = vadd.f32 %v1954_v37, %v1942_v36  ;;  %v1967_v39 = vpop.f32.mrf.mxu3  ;;  %v1943_v42 = vpop.f32.mrf.mxu1  ;;  %v13922_v37 = vsel %vm2215_vm1, %v13392_v8, %v2214_v7  ;;  %v2188_v41 = vadd.f32 %v2187_v35, %v2186_v6  ;;  %vm2316_vm1 = vcmask 1041408  }
 0x136   :  { %v13912_v40 = vadd.f32 %v1967_v39, %v1955_v38 }
 0x138   :  { %v2189_v63 = vsel %vm2181_vm0, %v13912_v40, 0.0 }
 0x139   :  { %v2190_v3 = vrot.slane %v2189_v63, 4 }
 0x13b   :  { %v1956_v43 = vpop.f32.mrf.mxu2  ;;  %v2191_v12 = vadd.f32 %v2190_v3, %v2189_v63 }
 0x13c   :  { %v1969_v44 = vpop.f32.mrf.mxu3 }
 0x13d   :  { %v2192_v20 = vrot.slane %v2191_v12, 2 }
 0x13f   :  { %v2193_v25 = vadd.f32 %v2192_v20, %v2191_v12 }
 0x141   :  { %v2194_v29 = vrot.slane %v2193_v25, 1 }
 0x143   :  { %v2195_v33 = vadd.f32 %v2194_v29, %v2193_v25 }
 0x145   :  { %v13925_v38 = vmul.f32 %v13922_v37, %v2195_v33 }
 0x147   :  { %v2222_v44 = vsub.f32 %v13912_v40, %v13925_v38 }
 0x14b   :  { %v1980_v14 = vpop.f32.mrf.mxu0 }
 0x14c   :  { %v1993_v45 = vpop.f32.mrf.mxu1 }
 0x14d   :  { %v1994_v15 = vadd.f32 %v1993_v45, %v1980_v14  ;;  %v13933_v14 = vmul.f32 %v13922_v37, %v2188_v41 }
 0x153   :  { %v2006_v46 = vpop.f32.mrf.mxu2  ;;  %v1982_v48 = vpop.f32.mrf.mxu0 }
 0x154   :  { %v2007_v18 = vadd.f32 %v2006_v46, %v1994_v15  ;;  %v2019_v47 = vpop.f32.mrf.mxu3  ;;  %v1995_v49 = vpop.f32.mrf.mxu1  ;;  %v2226_v46 = vmul.f32 %v2222_v44, %v2222_v44 }
 0x156   :  { %v2020_v19 = vadd.f32 %v2019_v47, %v2007_v18  ;;  %v2221_v18 = vsub.f32 %v13902_v2, %v13933_v14  ;;  %v2236_v48 = vsel %vm2181_vm0, %v2226_v46, 0.0 }
 0x158   :  { %v2225_v49 = vmul.f32 %v2221_v18, %v2221_v18 }
 0x15b   :  { %v2008_v50 = vpop.f32.mrf.mxu2 }
 0x15c   :  { %v2021_v51 = vpop.f32.mrf.mxu3 }
 0x15d   :  { %v2237_v51 = vrot.slane %v2236_v48, 4 }
 0x16b   :  { %v2032_v52 = vpop.f32.mrf.mxu0 }
 0x16c   :  { %v2045_v53 = vpop.f32.mrf.mxu1  ;;  %v2033_v54 = vadd.f32 %v2032_v52, %v2020_v19 }
 0x16e   :  { %v2046_v9 = vadd.f32 %v2045_v53, %v2033_v54 }
 0x173   :  { %v2058_v55 = vpop.f32.mrf.mxu2  ;;  %v2034_v57 = vpop.f32.mrf.mxu0 }
 0x174   :  { %v2071_v56 = vpop.f32.mrf.mxu3  ;;  %v2047_v58 = vpop.f32.mrf.mxu1  ;;  %v2059_v59 = vadd.f32 %v2058_v55, %v2046_v9  ;;  %v2229_v55 = vsel %vm2181_vm0, %v2225_v49, 0.0  ;;  %v2238_v57 = vadd.f32 %v2237_v51, %v2236_v48 }
 0x175   :  { %v2230_v58 = vrot.slane %v2229_v55, 4 }
 0x176   :  { %v13914_v61 = vadd.f32 %v2071_v56, %v2059_v59  ;;  %v2239_v63 = vrot.slane %v2238_v57, 2 }
 0x177   :  { %v2231_v4 = vadd.f32 %v2230_v58, %v2229_v55 }
 0x178   :  { %v2196_v1 = vsel %vm2181_vm0, %v13914_v61, 0.0  ;;  %v2240_v13 = vadd.f32 %v2239_v63, %v2238_v57 }
 0x179   :  { %v2197_v5 = vrot.slane %v2196_v1, 4  ;;  %v2232_v17 = vrot.slane %v2231_v4, 2 }
 0x17b   :  { %v2060_v60 = vpop.f32.mrf.mxu2  ;;  %v2198_v16 = vadd.f32 %v2197_v5, %v2196_v1 }
 0x17c   :  { %v2073_v62 = vpop.f32.mrf.mxu3 }
 0x17d   :  { %v2199_v22 = vrot.slane %v2198_v16, 2 }
 0x17f   :  { %v2200_v27 = vadd.f32 %v2199_v22, %v2198_v16 }
 0x181   :  { %v2201_v31 = vrot.slane %v2200_v27, 1 }
 0x183   :  { %v2202_v36 = vadd.f32 %v2201_v31, %v2200_v27 }
 0x185   :  { %v13928_v43 = vmul.f32 %v13922_v37, %v2202_v36 }
 0x187   :  { %v2223_v45 = vsub.f32 %v13914_v61, %v13928_v43 }
 0x189   :  { %v2227_v47 = vmul.f32 %v2223_v45, %v2223_v45 }
 0x18b   :  { %v2084_v24 = vpop.f32.mrf.mxu0  ;;  %v2243_v50 = vsel %vm2181_vm0, %v2227_v47, 0.0 }
 0x18c   :  { %v2097_v10 = vpop.f32.mrf.mxu1  ;;  %v2244_v9 = vrot.slane %v2243_v50, 4 }
 0x18d   :  { %v2098_v15 = vadd.f32 %v2097_v10, %v2084_v24  ;;  %v2241_v24 = vrot.slane %v2240_v13, 1  ;;  %v2233_v10 = vadd.f32 %v2232_v17, %v2231_v4 }
 0x18e   :  { %v2245_v59 = vadd.f32 %v2244_v9, %v2243_v50 }
 0x18f   :  { %v2242_v29 = vadd.f32 %v2241_v24, %v2240_v13 }
 0x190   :  { %v2246_v8 = vrot.slane %v2245_v59, 2 }
 0x191   :  { %v2258_v7 = vmul.f32 %v2242_v29, %v13922_v37 }
 0x192   :  { %v2247_v21 = vadd.f32 %v2246_v8, %v2245_v59 }
 0x193   :  { %v2110_v30 = vpop.f32.mrf.mxu2  ;;  %v2086_v32 = vpop.f32.mrf.mxu0  ;;  %v2262_v36 = vadd.f32 1e-05, %v2258_v7 }
 0x194   :  { %v2123_v11 = vpop.f32.mrf.mxu3  ;;  %v2099_v34 = vpop.f32.mrf.mxu1  ;;  %v2111_v19 = vadd.f32 %v2110_v30, %v2098_v15  ;;  %v2248_v27 = vrot.slane %v2247_v21, 1  ;;  %v2234_v30 = vrot.slane %v2233_v10, 1 }
 0x195   :  { %13393 = vrsqrt.f32 %v2262_v36  ;;  %vm2281_vm3 = vweird.f32 %v2262_v36 }
 0x196   :  { %v2124_v52 = vadd.f32 %v2123_v11, %v2111_v19  ;;  %v2249_v11 = vadd.f32 %v2248_v27, %v2247_v21  ;;  %v2235_v32 = vadd.f32 %v2234_v30, %v2233_v10  ;;  %v2179_v27 = vld [vmem:[#allocation7] sm:$0xf] }
 0x198   :  { %v2259_v34 = vmul.f32 %v2249_v11, %v13922_v37 }
 0x19b   :  { %v2112_v39 = vpop.f32.mrf.mxu2  ;;  %v13394_v47 = vpop.eup %13393 }
 0x19c   :  { %v2125_v42 = vpop.f32.mrf.mxu3  ;;  %v2257_v39 = vmul.f32 %v2235_v32, %v13922_v37  ;;  %v2276_v50 = vmul.f32 %v13394_v47, %v2262_v36  ;;  %vm2282_vm2 = vweird.f32 %v13394_v47 }
 0x19d   :  { %v2263_v42 = vadd.f32 1e-05, %v2259_v34  ;;  %vm2283_vm5 = vmor %vm2281_vm3, %vm2282_vm2 }
 0x19e   :  { %v2261_v15 = vadd.f32 1e-05, %v2257_v39  ;;  %v2277_v55 = vmul.f32 %v13394_v47, %v2276_v50 }
 0x19f   :  { %13395 = vrsqrt.f32 %v2263_v42  ;;  %vm2291_vm6 = vweird.f32 %v2263_v42 }
 0x1a0   :  { %13397 = vrsqrt.f32 %v2261_v15  ;;  %v2278_v58 = vmul.f32 0.5, %v2277_v55  ;;  %vm2271_vm12 = vweird.f32 %v2261_v15 }
 0x1a5   :  { %v13396_v48 = vpop.eup %13395 }
 0x1a6   :  { %vm2292_vm4 = vweird.f32 %v13396_v48 }
 0x1a7   :  { %vm2293_vm9 = vmor %vm2291_vm6, %vm2292_vm4 }
 0x1ab   :  { %v2136_v53 = vpop.f32.mrf.mxu0 }
 0x1ac   :  { %v2149_v54 = vpop.f32.mrf.mxu1  ;;  %v2137_v56 = vadd.f32 %v2136_v53, %v2124_v52  ;;  %v13398_v52 = vpop.eup %13397  ;;  %v2286_v53 = vmul.f32 %v13396_v48, %v2263_v42 }
 0x1ad   :  { %v2266_v9 = vmul.f32 %v13398_v52, %v2261_v15  ;;  %vm2272_vm8 = vweird.f32 %v13398_v52  ;;  %v2180_v15 = vld [vmem:[#allocation10] sm:$0xf] }
 0x1ae   :  { %v2150_v60 = vadd.f32 %v2149_v54, %v2137_v56  ;;  %v2287_v57 = vmul.f32 %v13396_v48, %v2286_v53  ;;  %vm2273_vm15 = vmor %vm2271_vm12, %vm2272_vm8 }
 0x1af   :  { %v2267_v59 = vmul.f32 %v13398_v52, %v2266_v9 }
 0x1b3   :  { %v2162_v62 = vpop.f32.mrf.mxu2  ;;  %v2138_v3 = vpop.f32.mrf.mxu0 }
 0x1b4   :  { %v2163_v0 = vadd.f32 %v2162_v62, %v2150_v60  ;;  %v2175_v1 = vpop.f32.mrf.mxu3  ;;  %v2151_v5 = vpop.f32.mrf.mxu1  ;;  %v2288_v60 = vmul.f32 0.5, %v2287_v57  ;;  %v2279_v62 = vsub.f32 1.5, %v2278_v58 }
 0x1b6   :  { %v13942_v12 = vadd.f32 %v2175_v1, %v2163_v0  ;;  %v2268_v0 = vmul.f32 0.5, %v2267_v59  ;;  %v2289_v1 = vsub.f32 1.5, %v2288_v60  ;;  %v2280_v4 = vmul.f32 %v13394_v47, %v2279_v62 }
 0x1b8   :  { %v2203_v16 = vsel %vm2181_vm0, %v13942_v12, 0.0  ;;  %v2269_v8 = vsub.f32 1.5, %v2268_v0  ;;  %v2290_v13 = vmul.f32 %v13396_v48, %v2289_v1  ;;  %v2284_v17 = vsel %vm2283_vm5, %v13394_v47, %v2280_v4 }
 0x1b9   :  { %v2204_v20 = vrot.slane %v2203_v16, 4  ;;  %v2309_v24 = vrot.slane %v2284_v17, 7 }
 0x1ba   :  { %v2270_v21 = vmul.f32 %v13398_v52, %v2269_v8 }
 0x1bb   :  { %v2205_v22 = vadd.f32 %v2204_v20, %v2203_v16  ;;  %v2164_v23 = vpop.f32.mrf.mxu2 }
 0x1bc   :  { %v2177_v25 = vpop.f32.mrf.mxu3 }
 0x1bd   :  { %v2206_v26 = vrot.slane %v2205_v22, 2 }
 0x1bf   :  { %v2207_v28 = vadd.f32 %v2206_v26, %v2205_v22  ;;  %v2294_v22 = vsel %vm2293_vm9, %v13396_v48, %v2290_v13 }
 0x1c0   :  { %v2310_v10 = vrot.slane %v2294_v22, 6 }
 0x1c1   :  { %v2208_v6 = vrot.slane %v2207_v28, 1 }
 0x1c3   :  { %v2209_v31 = vadd.f32 %v2208_v6, %v2207_v28  ;;  %v2274_v28 = vsel %vm2273_vm15, %v13398_v52, %v2270_v21 }
 0x1c4   :  { %v2313_v29 = vsel %vm2312_vm13, %v2274_v28, %v2309_v24 }
 0x1c5   :  { %v13948_v33 = vmul.f32 %v13922_v37, %v2209_v31 }
 0x1c7   :  { %v2224_v35 = vsub.f32 %v13942_v12, %v13948_v33 }
 0x1c9   :  { %v2228_v41 = vmul.f32 %v2224_v35, %v2224_v35 }
 0x1cb   :  { %v2250_v44 = vsel %vm2181_vm0, %v2228_v41, 0.0 }
 0x1cc   :  { %v2251_v45 = vrot.slane %v2250_v44, 4 }
 0x1ce   :  { %v2252_v46 = vadd.f32 %v2251_v45, %v2250_v44 }
 0x1d0   :  { %v2253_v18 = vrot.slane %v2252_v46, 2 }
 0x1d2   :  { %v2254_v19 = vadd.f32 %v2253_v18, %v2252_v46 }
 0x1d4   :  { %v2255_v49 = vrot.slane %v2254_v19, 1 }
 0x1d6   :  { %v2256_v51 = vadd.f32 %v2255_v49, %v2254_v19 }
 0x1d8   :  { %v2260_v54 = vmul.f32 %v2256_v51, %v13922_v37 }
 0x1da   :  { %v2264_v56 = vadd.f32 1e-05, %v2260_v54 }
 0x1dc   :  { %13399 = vrsqrt.f32 %v2264_v56  ;;  %vm2301_vm10 = vweird.f32 %v2264_v56 }
 0x1e2   :  { %v13400_v63 = vpop.eup %13399 }
 0x1e3   :  { %v2296_v3 = vmul.f32 %v13400_v63, %v2264_v56  ;;  %vm2302_vm7 = vweird.f32 %v13400_v63 }
 0x1e4   :  { %vm2303_vm11 = vmor %vm2301_vm10, %vm2302_vm7 }
 0x1e5   :  { %v2297_v5 = vmul.f32 %v13400_v63, %v2296_v3 }
 0x1e7   :  { %v2298_v16 = vmul.f32 0.5, %v2297_v5 }
 0x1e9   :  { %v2299_v20 = vsub.f32 1.5, %v2298_v16 }
 0x1eb   :  { %v2300_v23 = vmul.f32 %v13400_v63, %v2299_v20 }
 0x1ed   :  { %v2304_v25 = vsel %vm2303_vm11, %v13400_v63, %v2300_v23 }
 0x1ee   :  { %v2311_v26 = vrot.slane %v2304_v25, 5 }
 0x1f0   :  { %v2315_v30 = vsel %vm2314_vm14, %v2310_v10, %v2311_v26 }
 0x1f1   :  { %v2317_v6 = vsel %vm2316_vm1, %v2313_v29, %v2315_v30 }
 0x1f2   :  { %v2319_v11 = vmul.f32 %v2317_v6, %v2179_v27 }
 0x1f4   :  { %v2322_v31 = vperm.slane %v2319_v11, 1  ;;  %v2323_v7 = vperm.slane %v2319_v11, 2  ;;  %v2324_v32 = vperm.slane %v2319_v11, 3  ;;  %v2321_v34 = vperm.slane %v2319_v11, 0 }
 0x1f6   :  { %v2334_v35 = vmul.f32 %v2322_v31, %v13925_v38  ;;  %v2335_v36 = vmul.f32 %v2323_v7, %v13928_v43  ;;  %v2336_v39 = vmul.f32 %v2324_v32, %v13948_v33  ;;  %v2333_v41 = vmul.f32 %v2321_v34, %v13933_v14 }
 0x1f7   :  { %v2329_v48 = vmul.f32 %v2321_v34, %v13902_v2  ;;  %v2330_v38 = vmul.f32 %v2322_v31, %v13912_v40  ;;  %v2331_v43 = vmul.f32 %v2323_v7, %v13914_v61  ;;  %v2332_v33 = vmul.f32 %v2324_v32, %v13942_v12 }
 0x1f8   :  { %v2341_v42 = vrot.slane %v2334_v35, 7  ;;  %v2342_v44 = vrot.slane %v2335_v36, 6  ;;  %v2343_v45 = vrot.slane %v2336_v39, 5 }
 0x1fa   :  { %v2344_v46 = vsel %vm2312_vm13, %v2333_v41, %v2341_v42  ;;  %v2345_v18 = vsel %vm2314_vm14, %v2342_v44, %v2343_v45 }
 0x1fb   :  { %v2346_v47 = vsel %vm2316_vm1, %v2344_v46, %v2345_v18 }
 0x1fc   :  { %v2348_v19 = vsub.f32 %v2180_v15, %v2346_v47 }
 0x1fe   :  { %v2350_v14 = vperm.slane %v2348_v19, 0  ;;  %v2351_v49 = vperm.slane %v2348_v19, 1  ;;  %v2352_v50 = vperm.slane %v2348_v19, 2  ;;  %v2353_v51 = vperm.slane %v2348_v19, 3 }
 0x200   :  { %v2358_v52 = vadd.f32 %v2350_v14, %v2329_v48  ;;  %v2359_v53 = vadd.f32 %v2351_v49, %v2330_v38  ;;  %v2360_v54 = vadd.f32 %v2352_v50, %v2331_v43  ;;  %v2361_v55 = vadd.f32 %v2353_v51, %v2332_v33 }
 0x202   :  { %v13970_v9 = vpack.c.bf16 %v2359_v53, %v2358_v52  ;;  %v13972_v56 = vpack.c.bf16 %v2361_v55, %v2360_v54 }
 0x203   :  { %13728 = dma.done.wait [#allocation6 + $0x1], 49152 }
 0x204   :  { %13729 = vsyncadd [#allocation6 + $0x1], 4294918144  ;;  %v9712_v2 = vld [vmem:[#allocation3 + $0x4e0] sm:$0xf]  ;;  %v12704_v40 = vld [vmem:[#allocation3 + $0x4ec] sm:$0xf0] }
 0x205   :  { %v9840_v57 = vld [vmem:[#allocation3 + $0x5e0] sm:$0xf]  ;;  %v9713_v61 = vor.u32 %v12704_v40, %v9712_v2  ;;  %v12736_v58 = vld [vmem:[#allocation3 + $0x5ec] sm:$0xf0] }
 0x206   :  { %v9968_v12 = vld [vmem:[#allocation3 + $0x6e0] sm:$0xf]  ;;  %v12768_v59 = vld [vmem:[#allocation3 + $0x6ec] sm:$0xf0]  ;;  %v9841_v60 = vor.u32 %v12736_v58, %v9840_v57 }
 0x207   :  { %v9969_v62 = vor.u32 %v12768_v59, %v9968_v12  ;;  %v10096_v63 = vld [vmem:[#allocation3 + $0x7e0] sm:$0xf]  ;;  %v12800_v0 = vld [vmem:[#allocation3 + $0x7ec] sm:$0xf0]  ;;  %3150 = vmatpush.bf16.msra.mxu0 %v9713_v61 }
 0x208   :  { %v9696_v1 = vld [vmem:[#allocation3 + $0x4c0] sm:$0xf]  ;;  %v10097_v3 = vor.u32 %v12800_v0, %v10096_v63  ;;  %v12700_v4 = vld [vmem:[#allocation3 + $0x4cc] sm:$0xf0]  ;;  %3163 = vmatpush.bf16.msra.mxu1 %v9841_v60 }
 0x209   :  { %v9824_v5 = vld [vmem:[#allocation3 + $0x5c0] sm:$0xf]  ;;  %v12732_v8 = vld [vmem:[#allocation3 + $0x5cc] sm:$0xf0]  ;;  %3176 = vmatpush.bf16.msra.mxu2 %v9969_v62  ;;  %v9697_v13 = vor.u32 %v12700_v4, %v9696_v1 }
 0x20a   :  { %v9825_v16 = vor.u32 %v12732_v8, %v9824_v5  ;;  %v9952_v17 = vld [vmem:[#allocation3 + $0x6c0] sm:$0xf]  ;;  %v12764_v20 = vld [vmem:[#allocation3 + $0x6cc] sm:$0xf0]  ;;  %3189 = vmatpush.bf16.msra.mxu3 %v10097_v3 }
 0x20b   :  { %v10080_v21 = vld [vmem:[#allocation3 + $0x7c0] sm:$0xf]  ;;  %v9953_v22 = vor.u32 %v12764_v20, %v9952_v17  ;;  %v12796_v23 = vld [vmem:[#allocation3 + $0x7cc] sm:$0xf0]  ;;  %3151 = vmatpush.bf16.msra.mxu0 %v9697_v13 }
 0x20c   :  { %v9680_v24 = vld [vmem:[#allocation3 + $0x4a0] sm:$0xf]  ;;  %v12696_v25 = vld [vmem:[#allocation3 + $0x4ac] sm:$0xf0]  ;;  %v10081_v10 = vor.u32 %v12796_v23, %v10080_v21  ;;  %3164 = vmatpush.bf16.msra.mxu1 %v9825_v16 }
 0x20d   :  { %v9808_v26 = vld [vmem:[#allocation3 + $0x5a0] sm:$0xf]  ;;  %v12728_v27 = vld [vmem:[#allocation3 + $0x5ac] sm:$0xf0]  ;;  %v9681_v29 = vor.u32 %v12696_v25, %v9680_v24  ;;  %3177 = vmatpush.bf16.msra.mxu2 %v9953_v22 }
 0x20e   :  { %v9936_v28 = vld [vmem:[#allocation3 + $0x6a0] sm:$0xf]  ;;  %v12760_v30 = vld [vmem:[#allocation3 + $0x6ac] sm:$0xf0]  ;;  %v9809_v31 = vor.u32 %v12728_v27, %v9808_v26  ;;  %3190 = vmatpush.bf16.msra.mxu3 %v10081_v10 }
 0x20f   :  { %v10064_v6 = vld [vmem:[#allocation3 + $0x7a0] sm:$0xf]  ;;  %v12792_v11 = vld [vmem:[#allocation3 + $0x7ac] sm:$0xf0]  ;;  %v9937_v7 = vor.u32 %v12760_v30, %v9936_v28  ;;  %3152 = vmatpush.bf16.msra.mxu0 %v9681_v29 }
 0x210   :  { %v9664_v32 = vld [vmem:[#allocation3 + $0x480] sm:$0xf]  ;;  %v12692_v34 = vld [vmem:[#allocation3 + $0x48c] sm:$0xf0]  ;;  %v10065_v36 = vor.u32 %v12792_v11, %v10064_v6  ;;  %3165 = vmatpush.bf16.msra.mxu1 %v9809_v31  ;;  %v12702_v6 = vld [vmem:[#allocation3 + $0x4e4] sm:$0xf] }
 0x211   :  { %v9792_v35 = vld [vmem:[#allocation3 + $0x580] sm:$0xf]  ;;  %v12724_v39 = vld [vmem:[#allocation3 + $0x58c] sm:$0xf0]  ;;  %v9665_v15 = vor.u32 %v12692_v34, %v9664_v32  ;;  %3178 = vmatpush.bf16.msra.mxu2 %v9937_v7  ;;  %v9714_v11 = vld [vmem:[#allocation3 + $0x4f0] sm:$0xf0] }
 0x212   :  { %v9920_v41 = vld [vmem:[#allocation3 + $0x680] sm:$0xf]  ;;  %v12756_v42 = vld [vmem:[#allocation3 + $0x68c] sm:$0xf0]  ;;  %v9793_v46 = vor.u32 %v12724_v39, %v9792_v35  ;;  %3191 = vmatpush.bf16.msra.mxu3 %v10065_v36  ;;  %v12734_v31 = vld [vmem:[#allocation3 + $0x5e4] sm:$0xf]  ;;  %v2500_v36 = vunpack.c.l.b16 %v13972_v56 }
 0x213   :  { %v10048_v44 = vld [vmem:[#allocation3 + $0x780] sm:$0xf]  ;;  %v12788_v45 = vld [vmem:[#allocation3 + $0x78c] sm:$0xf0]  ;;  %v9921_v18 = vor.u32 %v12756_v42, %v9920_v41  ;;  %3153 = vmatpush.bf16.msra.mxu0 %v9665_v15  ;;  %v9842_v32 = vld [vmem:[#allocation3 + $0x5f0] sm:$0xf0]  ;;  %v2498_v15 = vunpack.c.l.b16 %v13970_v9 }
 0x214   :  { %v9648_v47 = vld [vmem:[#allocation3 + $0x460] sm:$0xf]  ;;  %v12688_v19 = vld [vmem:[#allocation3 + $0x46c] sm:$0xf0]  ;;  %v10049_v38 = vor.u32 %v12788_v45, %v10048_v44  ;;  %3166 = vmatpush.bf16.msra.mxu1 %v9793_v46  ;;  %v12766_v34 = vld [vmem:[#allocation3 + $0x6e4] sm:$0xf]  ;;  %v2501_v45 = vunpack.c.h.b16 %v13972_v56 }
 0x215   :  { %v9776_v48 = vld [vmem:[#allocation3 + $0x560] sm:$0xf]  ;;  %v12720_v43 = vld [vmem:[#allocation3 + $0x56c] sm:$0xf0]  ;;  %v9649_v51 = vor.u32 %v12688_v19, %v9648_v47  ;;  %3179 = vmatpush.bf16.msra.mxu2 %v9921_v18  ;;  %v9970_v35 = vld [vmem:[#allocation3 + $0x6f0] sm:$0xf0]  ;;  %v9717_v18 = vor.u32 %v12702_v6, %v9714_v11  ;;  %v2499_v47 = vunpack.c.h.b16 %v13970_v9  ;;  %v9845_v19 = vor.u32 %v12734_v31, %v9842_v32 }
 0x216   :  { %v9904_v33 = vld [vmem:[#allocation3 + $0x660] sm:$0xf]  ;;  %v12752_v14 = vld [vmem:[#allocation3 + $0x66c] sm:$0xf0]  ;;  %v9777_v52 = vor.u32 %v12720_v43, %v9776_v48  ;;  %3192 = vmatpush.bf16.msra.mxu3 %v10049_v38  ;;  %v12798_v42 = vld [vmem:[#allocation3 + $0x7e4] sm:$0xf]  ;;  %v9973_v48 = vor.u32 %v12766_v34, %v9970_v35 }
 0x217   :  { %v10032_v49 = vld [vmem:[#allocation3 + $0x760] sm:$0xf]  ;;  %v12784_v50 = vld [vmem:[#allocation3 + $0x76c] sm:$0xf0]  ;;  %v9905_v53 = vor.u32 %v12752_v14, %v9904_v33  ;;  %3154 = vmatpush.bf16.msra.mxu0 %v9649_v51  ;;  %v10098_v44 = vld [vmem:[#allocation3 + $0x7f0] sm:$0xf0] }
 0x218   :  { %v9632_v54 = vld [vmem:[#allocation3 + $0x440] sm:$0xf]  ;;  %v12684_v55 = vld [vmem:[#allocation3 + $0x44c] sm:$0xf0]  ;;  %v10033_v40 = vor.u32 %v12784_v50, %v10032_v49  ;;  %3167 = vmatpush.bf16.msra.mxu1 %v9777_v52  ;;  %v12698_v38 = vld [vmem:[#allocation3 + $0x4c4] sm:$0xf]  ;;  %v10101_v14 = vor.u32 %v12798_v42, %v10098_v44  ;;  %v13978_v52 = vpack.c.b16 %v2500_v36, %v2500_v36 }
 0x219   :  { %v9760_v2 = vld [vmem:[#allocation3 + $0x540] sm:$0xf]  ;;  %v12716_v57 = vld [vmem:[#allocation3 + $0x54c] sm:$0xf0]  ;;  %v9633_v60 = vor.u32 %v12684_v55, %v9632_v54  ;;  %3180 = vmatpush.bf16.msra.mxu2 %v9905_v53  ;;  %v9698_v43 = vld [vmem:[#allocation3 + $0x4d0] sm:$0xf0]  ;;  %v13980_v54 = vpack.c.b16 %v2501_v45, %v2501_v45  ;;  %v13982_v55 = vpack.c.b16 %v2498_v15, %v2498_v15 }
 0x21a   :  { %v9888_v61 = vld [vmem:[#allocation3 + $0x640] sm:$0xf]  ;;  %v12748_v58 = vld [vmem:[#allocation3 + $0x64c] sm:$0xf0]  ;;  %v9761_v62 = vor.u32 %v12716_v57, %v9760_v2  ;;  %3193 = vmatpush.bf16.msra.mxu3 %v10033_v40  ;;  %v12730_v33 = vld [vmem:[#allocation3 + $0x5c4] sm:$0xf]  ;;  %v9701_v9 = vor.u32 %v12698_v38, %v9698_v43  ;;  %v13984_v2 = vpack.c.b16 %v2499_v47, %v2499_v47 }
 0x21b   :  { %v10016_v12 = vld [vmem:[#allocation3 + $0x740] sm:$0xf]  ;;  %v12780_v59 = vld [vmem:[#allocation3 + $0x74c] sm:$0xf0]  ;;  %v9889_v63 = vor.u32 %v12748_v58, %v9888_v61  ;;  %3155 = vmatpush.bf16.msra.mxu0 %v9633_v60  ;;  %v9826_v49 = vld [vmem:[#allocation3 + $0x5d0] sm:$0xf0] }
 0x21c   :  { %v9616_v0 = vld [vmem:[#allocation3 + $0x420] sm:$0xf]  ;;  %v12680_v1 = vld [vmem:[#allocation3 + $0x42c] sm:$0xf0]  ;;  %v10017_v4 = vor.u32 %v12780_v59, %v10016_v12  ;;  %3168 = vmatpush.bf16.msra.mxu1 %v9761_v62  ;;  %v12762_v50 = vld [vmem:[#allocation3 + $0x6c4] sm:$0xf]  ;;  %v9829_v40 = vor.u32 %v12730_v33, %v9826_v49 }
 0x21d   :  { %v9744_v3 = vld [vmem:[#allocation3 + $0x520] sm:$0xf]  ;;  %v12712_v5 = vld [vmem:[#allocation3 + $0x52c] sm:$0xf0]  ;;  %v9617_v20 = vor.u32 %v12680_v1, %v9616_v0  ;;  %3181 = vmatpush.bf16.msra.mxu2 %v9889_v63  ;;  %v9954_v51 = vld [vmem:[#allocation3 + $0x6d0] sm:$0xf0] }
 0x21e   :  { %v9872_v8 = vld [vmem:[#allocation3 + $0x620] sm:$0xf]  ;;  %v12744_v13 = vld [vmem:[#allocation3 + $0x62c] sm:$0xf0]  ;;  %v9745_v23 = vor.u32 %v12712_v5, %v9744_v3  ;;  %3194 = vmatpush.bf16.msra.mxu3 %v10017_v4  ;;  %v12794_v56 = vld [vmem:[#allocation3 + $0x7c4] sm:$0xf]  ;;  %v9957_v57 = vor.u32 %v12762_v50, %v9954_v51 }
 0x21f   :  { %v10000_v16 = vld [vmem:[#allocation3 + $0x720] sm:$0xf]  ;;  %v12776_v17 = vld [vmem:[#allocation3 + $0x72c] sm:$0xf0]  ;;  %v9873_v24 = vor.u32 %v12744_v13, %v9872_v8  ;;  %3156 = vmatpush.bf16.msra.mxu0 %v9617_v20  ;;  %v10082_v53 = vld [vmem:[#allocation3 + $0x7d0] sm:$0xf0] }
 0x220   :  { %v9600_v21 = vld [vmem:[#allocation3 + $0x400] sm:$0xf]  ;;  %v12676_v22 = vld [vmem:[#allocation3 + $0x40c] sm:$0xf0]  ;;  %v10001_v27 = vor.u32 %v12776_v17, %v10000_v16  ;;  %3169 = vmatpush.bf16.msra.mxu1 %v9745_v23  ;;  %v12694_v61 = vld [vmem:[#allocation3 + $0x4a4] sm:$0xf]  ;;  %v10085_v59 = vor.u32 %v12794_v56, %v10082_v53 }
 0x221   :  { %v9728_v25 = vld [vmem:[#allocation3 + $0x500] sm:$0xf]  ;;  %v12708_v10 = vld [vmem:[#allocation3 + $0x50c] sm:$0xf0]  ;;  %v9601_v7 = vor.u32 %v12676_v22, %v9600_v21  ;;  %3182 = vmatpush.bf16.msra.mxu2 %v9873_v24  ;;  %v9682_v58 = vld [vmem:[#allocation3 + $0x4b0] sm:$0xf0] }
 0x222   :  { %v9856_v26 = vld [vmem:[#allocation3 + $0x600] sm:$0xf]  ;;  %v12740_v28 = vld [vmem:[#allocation3 + $0x60c] sm:$0xf0]  ;;  %v9729_v39 = vor.u32 %v12708_v10, %v9728_v25  ;;  %3195 = vmatpush.bf16.msra.mxu3 %v10001_v27  ;;  %v12726_v12 = vld [vmem:[#allocation3 + $0x5a4] sm:$0xf]  ;;  %v9685_v3 = vor.u32 %v12694_v61, %v9682_v58 }
 0x223   :  { %v9984_v29 = vld [vmem:[#allocation3 + $0x700] sm:$0xf]  ;;  %v12772_v30 = vld [vmem:[#allocation3 + $0x70c] sm:$0xf0]  ;;  %v9857_v41 = vor.u32 %v12740_v28, %v9856_v26  ;;  %3157 = vmatpush.bf16.msra.mxu0 %v9601_v7  ;;  %v9810_v60 = vld [vmem:[#allocation3 + $0x5b0] sm:$0xf0] }
 0x224   :  { %v9985_v46 = vor.u32 %v12772_v30, %v9984_v29  ;;  %3170 = vmatpush.bf16.msra.mxu1 %v9729_v39  ;;  %v12758_v62 = vld [vmem:[#allocation3 + $0x6a4] sm:$0xf]  ;;  %v9938_v63 = vld [vmem:[#allocation3 + $0x6b0] sm:$0xf0]  ;;  %v9813_v4 = vor.u32 %v12726_v12, %v9810_v60 }
 0x225   :  { %3183 = vmatpush.bf16.msra.mxu2 %v9857_v41  ;;  %v12790_v0 = vld [vmem:[#allocation3 + $0x7a4] sm:$0xf]  ;;  %v10066_v1 = vld [vmem:[#allocation3 + $0x7b0] sm:$0xf0]  ;;  %v9941_v5 = vor.u32 %v12758_v62, %v9938_v63 }
 0x226   :  { %3196 = vmatpush.bf16.msra.mxu3 %v9985_v46  ;;  %3158 = vmatmul.bf16.vlgmr.msra.gmra.mxu0 %v13982_v55  ;;  %v12690_v8 = vld [vmem:[#allocation3 + $0x484] sm:$0xf]  ;;  %v9666_v13 = vld [vmem:[#allocation3 + $0x490] sm:$0xf0]  ;;  %v10069_v17 = vor.u32 %v12790_v0, %v10066_v1 }
 0x227   :  { %3202 = vmatpush.bf16.msrb.mxu0 %v9717_v18  ;;  %3171 = vmatmul.bf16.vlgmr.msra.gmra.mxu1 %v13984_v2  ;;  %v12722_v16 = vld [vmem:[#allocation3 + $0x584] sm:$0xf]  ;;  %v9794_v20 = vld [vmem:[#allocation3 + $0x590] sm:$0xf0]  ;;  %v9669_v25 = vor.u32 %v12690_v8, %v9666_v13  ;;  %v9848_v8 = vld [vmem:[#allocation3 + $0x5e8] sm:$0xf] }
 0x228   :  { %3215 = vmatpush.bf16.msrb.mxu1 %v9845_v19  ;;  %3184 = vmatmul.bf16.vlgmr.msra.gmra.mxu2 %v13978_v52  ;;  %v12754_v21 = vld [vmem:[#allocation3 + $0x684] sm:$0xf]  ;;  %v9922_v22 = vld [vmem:[#allocation3 + $0x690] sm:$0xf0]  ;;  %v9797_v10 = vor.u32 %v12722_v16, %v9794_v20  ;;  %v12737_v16 = vld [vmem:[#allocation3 + $0x5f4] sm:$0xf0] }
 0x229   :  { %3228 = vmatpush.bf16.msrb.mxu2 %v9973_v48  ;;  %3197 = vmatmul.bf16.vlgmr.msra.gmra.mxu3 %v13980_v54  ;;  %v12786_v23 = vld [vmem:[#allocation3 + $0x784] sm:$0xf]  ;;  %v10050_v24 = vld [vmem:[#allocation3 + $0x790] sm:$0xf0]  ;;  %v9925_v26 = vor.u32 %v12754_v21, %v9922_v22  ;;  %v12769_v20 = vld [vmem:[#allocation3 + $0x6f4] sm:$0xf0] }
 0x22a   :  { %3241 = vmatpush.bf16.msrb.mxu3 %v10101_v14  ;;  %v12686_v27 = vld [vmem:[#allocation3 + $0x464] sm:$0xf]  ;;  %v9650_v28 = vld [vmem:[#allocation3 + $0x470] sm:$0xf0]  ;;  %v10053_v30 = vor.u32 %v12786_v23, %v10050_v24  ;;  %v10104_v23 = vld [vmem:[#allocation3 + $0x7e8] sm:$0xf] }
 0x22b   :  { %3203 = vmatpush.bf16.msrb.mxu0 %v9701_v9  ;;  %v12718_v29 = vld [vmem:[#allocation3 + $0x564] sm:$0xf]  ;;  %v9778_v6 = vld [vmem:[#allocation3 + $0x570] sm:$0xf0]  ;;  %v9653_v34 = vor.u32 %v12686_v27, %v9650_v28  ;;  %v12801_v24 = vld [vmem:[#allocation3 + $0x7f4] sm:$0xf0] }
 0x22c   :  { %3216 = vmatpush.bf16.msrb.mxu1 %v9829_v40  ;;  %v12750_v11 = vld [vmem:[#allocation3 + $0x664] sm:$0xf]  ;;  %v9906_v31 = vld [vmem:[#allocation3 + $0x670] sm:$0xf0]  ;;  %v9781_v35 = vor.u32 %v12718_v29, %v9778_v6  ;;  %v9704_v28 = vld [vmem:[#allocation3 + $0x4c8] sm:$0xf]  ;;  %v10105_v6 = vor.u32 %v12801_v24, %v10104_v23 }
 0x22d   :  { %3229 = vmatpush.bf16.msrb.mxu2 %v9957_v57  ;;  %v12782_v7 = vld [vmem:[#allocation3 + $0x764] sm:$0xf]  ;;  %v10034_v32 = vld [vmem:[#allocation3 + $0x770] sm:$0xf0]  ;;  %v9909_v36 = vor.u32 %v12750_v11, %v9906_v31  ;;  %v12701_v29 = vld [vmem:[#allocation3 + $0x4d4] sm:$0xf0] }
 0x22e   :  { %3242 = vmatpush.bf16.msrb.mxu3 %v10085_v59  ;;  %v12682_v39 = vld [vmem:[#allocation3 + $0x444] sm:$0xf]  ;;  %v9634_v41 = vld [vmem:[#allocation3 + $0x450] sm:$0xf0]  ;;  %v10037_v44 = vor.u32 %v12782_v7, %v10034_v32  ;;  %v12733_v11 = vld [vmem:[#allocation3 + $0x5d4] sm:$0xf0] }
 0x22f   :  { %3204 = vmatpush.bf16.msrb.mxu0 %v9685_v3  ;;  %v12714_v42 = vld [vmem:[#allocation3 + $0x544] sm:$0xf]  ;;  %v9762_v45 = vld [vmem:[#allocation3 + $0x550] sm:$0xf0]  ;;  %v9637_v19 = vor.u32 %v12682_v39, %v9634_v41  ;;  %v9960_v31 = vld [vmem:[#allocation3 + $0x6c8] sm:$0xf] }
 0x230   :  { %3217 = vmatpush.bf16.msrb.mxu1 %v9813_v4  ;;  %v12746_v15 = vld [vmem:[#allocation3 + $0x644] sm:$0xf]  ;;  %v9890_v46 = vld [vmem:[#allocation3 + $0x650] sm:$0xf0]  ;;  %v9765_v48 = vor.u32 %v12714_v42, %v9762_v45  ;;  %v9720_v4 = vld [vmem:[#allocation3 + $0x4e8] sm:$0xf] }
 0x231   :  { %3230 = vmatpush.bf16.msrb.mxu2 %v9941_v5  ;;  %v12778_v18 = vld [vmem:[#allocation3 + $0x744] sm:$0xf]  ;;  %v10018_v47 = vld [vmem:[#allocation3 + $0x750] sm:$0xf0]  ;;  %v9893_v38 = vor.u32 %v12746_v15, %v9890_v46  ;;  %v12705_v5 = vld [vmem:[#allocation3 + $0x4f4] sm:$0xf0] }
 0x232   :  { %3243 = vmatpush.bf16.msrb.mxu3 %v10069_v17  ;;  %v12678_v43 = vld [vmem:[#allocation3 + $0x424] sm:$0xf]  ;;  %v9618_v33 = vld [vmem:[#allocation3 + $0x430] sm:$0xf0]  ;;  %v10021_v49 = vor.u32 %v12778_v18, %v10018_v47  ;;  %v9976_v17 = vld [vmem:[#allocation3 + $0x6e8] sm:$0xf] }
 0x233   :  { %3205 = vmatpush.bf16.msrb.mxu0 %v9669_v25  ;;  %v12710_v14 = vld [vmem:[#allocation3 + $0x524] sm:$0xf]  ;;  %v9746_v50 = vld [vmem:[#allocation3 + $0x530] sm:$0xf0]  ;;  %v9621_v40 = vor.u32 %v12678_v43, %v9618_v33  ;;  %v9977_v27 = vor.u32 %v12769_v20, %v9976_v17  ;;  %v12765_v7 = vld [vmem:[#allocation3 + $0x6d4] sm:$0xf0] }
 0x234   :  { %3218 = vmatpush.bf16.msrb.mxu1 %v9797_v10  ;;  %v12742_v51 = vld [vmem:[#allocation3 + $0x624] sm:$0xf]  ;;  %v9874_v56 = vld [vmem:[#allocation3 + $0x630] sm:$0xf0]  ;;  %v9749_v58 = vor.u32 %v12710_v14, %v9746_v50  ;;  %v9721_v10 = vor.u32 %v12705_v5, %v9720_v4  ;;  %v10088_v32 = vld [vmem:[#allocation3 + $0x7c8] sm:$0xf]  ;;  %v9961_v39 = vor.u32 %v12765_v7, %v9960_v31 }
 0x235   :  { %3231 = vmatpush.bf16.msrb.mxu2 %v9925_v26  ;;  %v12774_v53 = vld [vmem:[#allocation3 + $0x724] sm:$0xf]  ;;  %v10002_v9 = vld [vmem:[#allocation3 + $0x730] sm:$0xf0]  ;;  %v9877_v12 = vor.u32 %v12742_v51, %v9874_v56  ;;  %v9849_v26 = vor.u32 %v12737_v16, %v9848_v8  ;;  %v9688_v41 = vld [vmem:[#allocation3 + $0x4a8] sm:$0xf] }
 0x236   :  { %3244 = vmatpush.bf16.msrb.mxu3 %v10053_v30  ;;  %v12674_v57 = vld [vmem:[#allocation3 + $0x404] sm:$0xf]  ;;  %v9602_v61 = vld [vmem:[#allocation3 + $0x410] sm:$0xf0]  ;;  %v10005_v63 = vor.u32 %v12774_v53, %v10002_v9  ;;  %v9832_v30 = vld [vmem:[#allocation3 + $0x5c8] sm:$0xf] }
 0x237   :  { %3206 = vmatpush.bf16.msrb.mxu0 %v9653_v34  ;;  %v12706_v59 = vld [vmem:[#allocation3 + $0x504] sm:$0xf]  ;;  %v9730_v60 = vld [vmem:[#allocation3 + $0x510] sm:$0xf0]  ;;  %v9605_v13 = vor.u32 %v12674_v57, %v9602_v61  ;;  %v12797_v34 = vld [vmem:[#allocation3 + $0x7d4] sm:$0xf0] }
 0x238   :  { %3219 = vmatpush.bf16.msrb.mxu1 %v9781_v35  ;;  %v12738_v62 = vld [vmem:[#allocation3 + $0x604] sm:$0xf]  ;;  %v9858_v0 = vld [vmem:[#allocation3 + $0x610] sm:$0xf0]  ;;  %v9733_v21 = vor.u32 %v12706_v59, %v9730_v60  ;;  %v9705_v35 = vor.u32 %v12701_v29, %v9704_v28  ;;  %v12697_v42 = vld [vmem:[#allocation3 + $0x4b4] sm:$0xf0]  ;;  %v10089_v45 = vor.u32 %v12797_v34, %v10088_v32 }
 0x239   :  { %3232 = vmatpush.bf16.msrb.mxu2 %v9909_v36  ;;  %v12770_v1 = vld [vmem:[#allocation3 + $0x704] sm:$0xf]  ;;  %v9986_v3 = vld [vmem:[#allocation3 + $0x710] sm:$0xf0]  ;;  %v9861_v22 = vor.u32 %v12738_v62, %v9858_v0  ;;  %v9833_v36 = vor.u32 %v12733_v11, %v9832_v30  ;;  %v12729_v15 = vld [vmem:[#allocation3 + $0x5b4] sm:$0xf0] }
 0x23a   :  { %3245 = vmatpush.bf16.msrb.mxu3 %v10037_v44  ;;  %v9989_v25 = vor.u32 %v12770_v1, %v9986_v3  ;;  %v9816_v44 = vld [vmem:[#allocation3 + $0x5a8] sm:$0xf]  ;;  %v12761_v18 = vld [vmem:[#allocation3 + $0x6b4] sm:$0xf0] }
 0x23b   :  { %3207 = vmatpush.bf16.msrb.mxu0 %v9637_v19  ;;  %v9944_v46 = vld [vmem:[#allocation3 + $0x6a8] sm:$0xf]  ;;  %v12793_v19 = vld [vmem:[#allocation3 + $0x7b4] sm:$0xf0] }
 0x23c   :  { %3220 = vmatpush.bf16.msrb.mxu1 %v9765_v48  ;;  %v10072_v47 = vld [vmem:[#allocation3 + $0x7a8] sm:$0xf]  ;;  %v9689_v48 = vor.u32 %v12697_v42, %v9688_v41  ;;  %v9945_v43 = vor.u32 %v12761_v18, %v9944_v46  ;;  %v12693_v14 = vld [vmem:[#allocation3 + $0x494] sm:$0xf0] }
 0x23d   :  { %3233 = vmatpush.bf16.msrb.mxu2 %v9893_v38  ;;  %v9817_v38 = vor.u32 %v12729_v15, %v9816_v44  ;;  %v9672_v33 = vld [vmem:[#allocation3 + $0x488] sm:$0xf]  ;;  %v10073_v50 = vor.u32 %v12793_v19, %v10072_v47  ;;  %v12725_v51 = vld [vmem:[#allocation3 + $0x594] sm:$0xf0] }
 0x23e   :  { %3246 = vmatpush.bf16.msrb.mxu3 %v10021_v49  ;;  %v9800_v49 = vld [vmem:[#allocation3 + $0x588] sm:$0xf]  ;;  %v12757_v53 = vld [vmem:[#allocation3 + $0x694] sm:$0xf0]  ;;  %v9673_v57 = vor.u32 %v12693_v14, %v9672_v33  ;;  %v12735_v33 = vld [vmem:[#allocation3 + $0x5ec] sm:$0xf] }
 0x23f   :  { %3208 = vmatpush.bf16.msrb.mxu0 %v9621_v40  ;;  %v9928_v56 = vld [vmem:[#allocation3 + $0x688] sm:$0xf]  ;;  %v12789_v40 = vld [vmem:[#allocation3 + $0x794] sm:$0xf0]  ;;  %v9801_v61 = vor.u32 %v12725_v51, %v9800_v49  ;;  %v9850_v49 = vld [vmem:[#allocation3 + $0x5f8] sm:$0xf0] }
 0x240   :  { %3221 = vmatpush.bf16.msrb.mxu1 %v9749_v58  ;;  %v10056_v9 = vld [vmem:[#allocation3 + $0x788] sm:$0xf]  ;;  %v9929_v58 = vor.u32 %v12757_v53, %v9928_v56  ;;  %v12689_v59 = vld [vmem:[#allocation3 + $0x474] sm:$0xf0]  ;;  %v9978_v51 = vld [vmem:[#allocation3 + $0x6f8] sm:$0xf0] }
 0x241   :  { %3234 = vmatpush.bf16.msrb.mxu2 %v9877_v12  ;;  %v9656_v12 = vld [vmem:[#allocation3 + $0x468] sm:$0xf]  ;;  %v10057_v62 = vor.u32 %v12789_v40, %v10056_v9  ;;  %v12753_v1 = vld [vmem:[#allocation3 + $0x674] sm:$0xf0]  ;;  %v12799_v9 = vld [vmem:[#allocation3 + $0x7ec] sm:$0xf] }
 0x242   :  { %3247 = vmatpush.bf16.msrb.mxu3 %v10005_v63  ;;  %v9784_v60 = vld [vmem:[#allocation3 + $0x568] sm:$0xf]  ;;  %v12721_v63 = vld [vmem:[#allocation3 + $0x574] sm:$0xf0]  ;;  %v9657_v5 = vor.u32 %v12689_v59, %v9656_v12  ;;  %v10106_v40 = vld [vmem:[#allocation3 + $0x7f8] sm:$0xf0] }
 0x243   :  { %3209 = vmatpush.bf16.msrb.mxu0 %v9605_v13  ;;  %v9912_v0 = vld [vmem:[#allocation3 + $0x668] sm:$0xf]  ;;  %v12785_v4 = vld [vmem:[#allocation3 + $0x774] sm:$0xf0]  ;;  %v9785_v8 = vor.u32 %v12721_v63, %v9784_v60  ;;  %v12699_v59 = vld [vmem:[#allocation3 + $0x4cc] sm:$0xf]  ;;  %v10109_v63 = vor.u32 %v12799_v9, %v10106_v40 }
 0x244   :  { %3222 = vmatpush.bf16.msrb.mxu1 %v9733_v21  ;;  %v10040_v3 = vld [vmem:[#allocation3 + $0x768] sm:$0xf]  ;;  %v9913_v13 = vor.u32 %v12753_v1, %v9912_v0  ;;  %v12685_v17 = vld [vmem:[#allocation3 + $0x454] sm:$0xf0]  ;;  %v9706_v60 = vld [vmem:[#allocation3 + $0x4d8] sm:$0xf0] }
 0x245   :  { %3235 = vmatpush.bf16.msrb.mxu2 %v9861_v22  ;;  %v9640_v16 = vld [vmem:[#allocation3 + $0x448] sm:$0xf]  ;;  %v10041_v21 = vor.u32 %v12785_v4, %v10040_v3  ;;  %v12717_v22 = vld [vmem:[#allocation3 + $0x554] sm:$0xf0]  ;;  %v9834_v0 = vld [vmem:[#allocation3 + $0x5d8] sm:$0xf0] }
 0x246   :  { %3248 = vmatpush.bf16.msrb.mxu3 %v9989_v25  ;;  %3210 = vmatmul.bf16.vlgmr.msrb.gmra.mxu0 %v13982_v55  ;;  %v9768_v20 = vld [vmem:[#allocation3 + $0x548] sm:$0xf]  ;;  %v12749_v24 = vld [vmem:[#allocation3 + $0x654] sm:$0xf0]  ;;  %v12763_v1 = vld [vmem:[#allocation3 + $0x6cc] sm:$0xf] }
 0x247   :  { %3254 = vmatpush.bf16.msra.mxu0 %v9721_v10  ;;  %3223 = vmatmul.bf16.vlgmr.msrb.gmra.mxu1 %v13984_v2  ;;  %v9896_v23 = vld [vmem:[#allocation3 + $0x648] sm:$0xf]  ;;  %v12781_v10 = vld [vmem:[#allocation3 + $0x754] sm:$0xf0]  ;;  %v9962_v3 = vld [vmem:[#allocation3 + $0x6d8] sm:$0xf0] }
 0x248   :  { %3267 = vmatpush.bf16.msra.mxu1 %v9849_v26  ;;  %3236 = vmatmul.bf16.vlgmr.msrb.gmra.mxu2 %v13978_v52  ;;  %v10024_v25 = vld [vmem:[#allocation3 + $0x748] sm:$0xf]  ;;  %v9641_v26 = vor.u32 %v12685_v17, %v9640_v16  ;;  %v9897_v28 = vor.u32 %v12749_v24, %v9896_v23  ;;  %v12681_v30 = vld [vmem:[#allocation3 + $0x434] sm:$0xf0]  ;;  %v12795_v4 = vld [vmem:[#allocation3 + $0x7cc] sm:$0xf]  ;;  %v9965_v16 = vor.u32 %v12763_v1, %v9962_v3 }
 0x249   :  { %3280 = vmatpush.bf16.msra.mxu2 %v9977_v27  ;;  %3249 = vmatmul.bf16.vlgmr.msrb.gmra.mxu3 %v13980_v54  ;;  %v9769_v27 = vor.u32 %v12717_v22, %v9768_v20  ;;  %v9624_v29 = vld [vmem:[#allocation3 + $0x428] sm:$0xf]  ;;  %v10025_v11 = vor.u32 %v12781_v10, %v10024_v25  ;;  %v12713_v31 = vld [vmem:[#allocation3 + $0x534] sm:$0xf0]  ;;  %v12695_v17 = vld [vmem:[#allocation3 + $0x4ac] sm:$0xf] }
 0x24a   :  { %3293 = vmatpush.bf16.msra.mxu3 %v10105_v6  ;;  %v9752_v6 = vld [vmem:[#allocation3 + $0x528] sm:$0xf]  ;;  %v12745_v32 = vld [vmem:[#allocation3 + $0x634] sm:$0xf0]  ;;  %v9690_v20 = vld [vmem:[#allocation3 + $0x4b8] sm:$0xf0] }
 0x24b   :  { %3255 = vmatpush.bf16.msra.mxu0 %v9705_v35  ;;  %v9880_v7 = vld [vmem:[#allocation3 + $0x628] sm:$0xf]  ;;  %v12777_v35 = vld [vmem:[#allocation3 + $0x734] sm:$0xf0]  ;;  %v9753_v42 = vor.u32 %v12713_v31, %v9752_v6  ;;  %v9818_v23 = vld [vmem:[#allocation3 + $0x5b8] sm:$0xf0] }
 0x24c   :  { %3268 = vmatpush.bf16.msra.mxu1 %v9833_v36  ;;  %v10008_v34 = vld [vmem:[#allocation3 + $0x728] sm:$0xf]  ;;  %v9625_v36 = vor.u32 %v12681_v30, %v9624_v29  ;;  %v12677_v41 = vld [vmem:[#allocation3 + $0x414] sm:$0xf0]  ;;  %v9881_v44 = vor.u32 %v12745_v32, %v9880_v7  ;;  %v12759_v24 = vld [vmem:[#allocation3 + $0x6ac] sm:$0xf] }
 0x24d   :  { %3281 = vmatpush.bf16.msra.mxu2 %v9961_v39  ;;  %v9608_v39 = vld [vmem:[#allocation3 + $0x408] sm:$0xf]  ;;  %v12709_v15 = vld [vmem:[#allocation3 + $0x514] sm:$0xf0]  ;;  %v10009_v18 = vor.u32 %v12777_v35, %v10008_v34  ;;  %v9946_v25 = vld [vmem:[#allocation3 + $0x6b8] sm:$0xf0] }
 0x24e   :  { %3294 = vmatpush.bf16.msra.mxu3 %v10089_v45  ;;  %v9736_v45 = vld [vmem:[#allocation3 + $0x508] sm:$0xf]  ;;  %v12741_v47 = vld [vmem:[#allocation3 + $0x614] sm:$0xf0]  ;;  %v9609_v14 = vor.u32 %v12677_v41, %v9608_v39  ;;  %v12791_v10 = vld [vmem:[#allocation3 + $0x7ac] sm:$0xf]  ;;  %v9949_v29 = vor.u32 %v12759_v24, %v9946_v25 }
 0x24f   :  { %3256 = vmatpush.bf16.msra.mxu0 %v9689_v48  ;;  %v9864_v46 = vld [vmem:[#allocation3 + $0x608] sm:$0xf]  ;;  %v12773_v48 = vld [vmem:[#allocation3 + $0x714] sm:$0xf0]  ;;  %v9737_v56 = vor.u32 %v12709_v15, %v9736_v45  ;;  %v12691_v30 = vld [vmem:[#allocation3 + $0x48c] sm:$0xf] }
 0x250   :  { %3269 = vmatpush.bf16.msra.mxu1 %v9817_v38  ;;  %v9992_v19 = vld [vmem:[#allocation3 + $0x708] sm:$0xf]  ;;  %v12703_v38 = vld [vmem:[#allocation3 + $0x4ec] sm:$0xf]  ;;  %v9865_v53 = vor.u32 %v12741_v47, %v9864_v46  ;;  %v9674_v6 = vld [vmem:[#allocation3 + $0x498] sm:$0xf0] }
 0x251   :  { %3282 = vmatpush.bf16.msra.mxu2 %v9945_v43  ;;  %v9722_v43 = vld [vmem:[#allocation3 + $0x4f8] sm:$0xf0]  ;;  %v12755_v32 = vld [vmem:[#allocation3 + $0x68c] sm:$0xf]  ;;  %v9677_v39 = vor.u32 %v12691_v30, %v9674_v6  ;;  %v10352_v30 = vld [vmem:[#allocation3 + $0x9e0] sm:$0xf] }
 0x252   :  { %3295 = vmatpush.bf16.msra.mxu3 %v10073_v50  ;;  %v12767_v50 = vld [vmem:[#allocation3 + $0x6ec] sm:$0xf]  ;;  %v9802_v7 = vld [vmem:[#allocation3 + $0x598] sm:$0xf0] }
 0x253   :  { %3257 = vmatpush.bf16.msra.mxu0 %v9673_v57  ;;  %v9993_v57 = vor.u32 %v12773_v48, %v9992_v19  ;;  %v9981_v12 = vor.u32 %v12767_v50, %v9978_v51  ;;  %v9930_v34 = vld [vmem:[#allocation3 + $0x698] sm:$0xf0]  ;;  %v12787_v35 = vld [vmem:[#allocation3 + $0x78c] sm:$0xf] }
 0x254   :  { %3270 = vmatpush.bf16.msra.mxu1 %v9801_v61  ;;  %v9725_v61 = vor.u32 %v12703_v38, %v9722_v43  ;;  %v9658_v45 = vld [vmem:[#allocation3 + $0x478] sm:$0xf0]  ;;  %v12719_v15 = vld [vmem:[#allocation3 + $0x56c] sm:$0xf] }
 0x255   :  { %3283 = vmatpush.bf16.msra.mxu2 %v9929_v58  ;;  %v9853_v58 = vor.u32 %v12735_v33, %v9850_v49  ;;  %v12751_v47 = vld [vmem:[#allocation3 + $0x66c] sm:$0xf]  ;;  %v9914_v19 = vld [vmem:[#allocation3 + $0x678] sm:$0xf0] }
 0x256   :  { %3296 = vmatpush.bf16.msra.mxu3 %v10057_v62  ;;  %v12731_v62 = vld [vmem:[#allocation3 + $0x5cc] sm:$0xf]  ;;  %v10042_v38 = vld [vmem:[#allocation3 + $0x778] sm:$0xf0] }
 0x257   :  { %3258 = vmatpush.bf16.msra.mxu0 %v9657_v5  ;;  %v10090_v5 = vld [vmem:[#allocation3 + $0x7d8] sm:$0xf0]  ;;  %v12783_v48 = vld [vmem:[#allocation3 + $0x76c] sm:$0xf] }
 0x258   :  { %3271 = vmatpush.bf16.msra.mxu1 %v9785_v8  ;;  %v9709_v8 = vor.u32 %v12699_v59, %v9706_v60  ;;  %v10093_v22 = vor.u32 %v12795_v4, %v10090_v5  ;;  %v12683_v49 = vld [vmem:[#allocation3 + $0x44c] sm:$0xf]  ;;  %v9642_v50 = vld [vmem:[#allocation3 + $0x458] sm:$0xf0] }
 0x259   :  { %3284 = vmatpush.bf16.msra.mxu2 %v9913_v13  ;;  %v9837_v13 = vor.u32 %v12731_v62, %v9834_v0  ;;  %v12715_v51 = vld [vmem:[#allocation3 + $0x54c] sm:$0xf]  ;;  %v9898_v40 = vld [vmem:[#allocation3 + $0x658] sm:$0xf0] }
 0x25a   :  { %3297 = vmatpush.bf16.msra.mxu3 %v10041_v21  ;;  %v12727_v21 = vld [vmem:[#allocation3 + $0x5ac] sm:$0xf]  ;;  %v9626_v62 = vld [vmem:[#allocation3 + $0x438] sm:$0xf0] }
 0x25b   :  { %3259 = vmatpush.bf16.msra.mxu0 %v9641_v26  ;;  %v10074_v26 = vld [vmem:[#allocation3 + $0x7b8] sm:$0xf0]  ;;  %v12747_v9 = vld [vmem:[#allocation3 + $0x64c] sm:$0xf] }
 0x25c   :  { %3272 = vmatpush.bf16.msra.mxu1 %v9769_v27  ;;  %v9693_v27 = vor.u32 %v12695_v17, %v9690_v20  ;;  %v10077_v31 = vor.u32 %v12791_v10, %v10074_v26  ;;  %v9901_v59 = vor.u32 %v12747_v9, %v9898_v40  ;;  %v12679_v60 = vld [vmem:[#allocation3 + $0x42c] sm:$0xf]  ;;  %v9754_v1 = vld [vmem:[#allocation3 + $0x538] sm:$0xf0]  ;;  %v12856_v9 = vld [vmem:[#allocation3 + $0x9ac] sm:$0xf0] }
 0x25d   :  { %3285 = vmatpush.bf16.msra.mxu2 %v9897_v28  ;;  %v9821_v28 = vor.u32 %v12727_v21, %v9818_v23  ;;  %v12743_v3 = vld [vmem:[#allocation3 + $0x62c] sm:$0xf]  ;;  %v9882_v4 = vld [vmem:[#allocation3 + $0x638] sm:$0xf0]  ;;  %v10448_v40 = vld [vmem:[#allocation3 + $0xaa0] sm:$0xf] }
 0x25e   :  { %3298 = vmatpush.bf16.msra.mxu3 %v10025_v11  ;;  %v12723_v11 = vld [vmem:[#allocation3 + $0x58c] sm:$0xf]  ;;  %v9610_v17 = vld [vmem:[#allocation3 + $0x418] sm:$0xf0]  ;;  %v9885_v21 = vor.u32 %v12743_v3, %v9882_v4  ;;  %v12852_v3 = vld [vmem:[#allocation3 + $0x98c] sm:$0xf0] }
 0x25f   :  { %3260 = vmatpush.bf16.msra.mxu0 %v9625_v36  ;;  %v10058_v36 = vld [vmem:[#allocation3 + $0x798] sm:$0xf0]  ;;  %v9805_v41 = vor.u32 %v12723_v11, %v9802_v7  ;;  %v12775_v5 = vld [vmem:[#allocation3 + $0x72c] sm:$0xf]  ;;  %v12864_v11 = vld [vmem:[#allocation3 + $0x9ec] sm:$0xf0] }
 0x260   :  { %3273 = vmatpush.bf16.msra.mxu1 %v9753_v42  ;;  %v9933_v42 = vor.u32 %v12755_v32, %v9930_v34  ;;  %v10061_v46 = vor.u32 %v12787_v35, %v10058_v36  ;;  %v9738_v23 = vld [vmem:[#allocation3 + $0x518] sm:$0xf0]  ;;  %v12739_v24 = vld [vmem:[#allocation3 + $0x60c] sm:$0xf]  ;;  %v12896_v7 = vld [vmem:[#allocation3 + $0xaec] sm:$0xf0] }
 0x261   :  { %3286 = vmatpush.bf16.msra.mxu2 %v9881_v44  ;;  %v12687_v44 = vld [vmem:[#allocation3 + $0x46c] sm:$0xf]  ;;  %v9866_v10 = vld [vmem:[#allocation3 + $0x618] sm:$0xf0]  ;;  %v10608_v35 = vld [vmem:[#allocation3 + $0xbe0] sm:$0xf] }
 0x262   :  { %3299 = vmatpush.bf16.msra.mxu3 %v10009_v18  ;;  %v9786_v18 = vld [vmem:[#allocation3 + $0x578] sm:$0xf0]  ;;  %v9661_v43 = vor.u32 %v12687_v44, %v9658_v45  ;;  %v12771_v26 = vld [vmem:[#allocation3 + $0x70c] sm:$0xf]  ;;  %v9869_v34 = vor.u32 %v12739_v24, %v9866_v10  ;;  %v12928_v36 = vld [vmem:[#allocation3 + $0xbec] sm:$0xf0] }
 0x263   :  { %3261 = vmatpush.bf16.msra.mxu0 %v9609_v14  ;;  %v9789_v33 = vor.u32 %v12719_v15, %v9786_v18  ;;  %v9917_v14 = vor.u32 %v12751_v47, %v9914_v19  ;;  %v10208_v45 = vld [vmem:[#allocation3 + $0x8c0] sm:$0xf]  ;;  %v12828_v15 = vld [vmem:[#allocation3 + $0x8cc] sm:$0xf0]  ;;  %v10609_v18 = vor.u32 %v12928_v36, %v10608_v35 }
 0x264   :  { %3274 = vmatpush.bf16.msra.mxu1 %v9737_v56  ;;  %v10045_v56 = vor.u32 %v12783_v48, %v10042_v38  ;;  %v12860_v47 = vld [vmem:[#allocation3 + $0x9cc] sm:$0xf0]  ;;  %v10464_v19 = vld [vmem:[#allocation3 + $0xac0] sm:$0xf] }
 0x265   :  { %3287 = vmatpush.bf16.msra.mxu2 %v9865_v53  ;;  %v9770_v53 = vld [vmem:[#allocation3 + $0x558] sm:$0xf0]  ;;  %v12892_v48 = vld [vmem:[#allocation3 + $0xacc] sm:$0xf0]  ;;  %v10592_v38 = vld [vmem:[#allocation3 + $0xbc0] sm:$0xf] }
 0x266   :  { %3300 = vmatpush.bf16.msra.mxu3 %v9993_v57  ;;  %3262 = vmatmul.bf16.vlgmr.msra.gmra.mxu0 %v13982_v55  ;;  %v12779_v57 = vld [vmem:[#allocation3 + $0x74c] sm:$0xf]  ;;  %v10432_v4 = vld [vmem:[#allocation3 + $0xa80] sm:$0xf]  ;;  %v12876_v36 = vld [vmem:[#allocation3 + $0xa4c] sm:$0xf0] }
 0x267   :  { %3306 = vmatpush.bf16.msrb.mxu0 %v9725_v61  ;;  %3275 = vmatmul.bf16.vlgmr.msra.gmra.mxu1 %v13984_v2  ;;  %v10026_v61 = vld [vmem:[#allocation3 + $0x758] sm:$0xf0]  ;;  %v10416_v10 = vld [vmem:[#allocation3 + $0xa60] sm:$0xf] }
 0x268   :  { %3319 = vmatpush.bf16.msrb.mxu1 %v9853_v58  ;;  %3288 = vmatmul.bf16.vlgmr.msra.gmra.mxu2 %v13978_v52  ;;  %v9645_v58 = vor.u32 %v12683_v49, %v9642_v50  ;;  %v10029_v0 = vor.u32 %v12779_v57, %v10026_v61  ;;  %v10465_v49 = vor.u32 %v12892_v48, %v10464_v19  ;;  %v10192_v50 = vld [vmem:[#allocation3 + $0x8a0] sm:$0xf]  ;;  %v12888_v57 = vld [vmem:[#allocation3 + $0xaac] sm:$0xf0] }
 0x269   :  { %3332 = vmatpush.bf16.msrb.mxu2 %v9981_v12  ;;  %3301 = vmatmul.bf16.vlgmr.msra.gmra.mxu3 %v13980_v54  ;;  %v9773_v12 = vor.u32 %v12715_v51, %v9770_v53  ;;  %v12824_v51 = vld [vmem:[#allocation3 + $0x8ac] sm:$0xf0]  ;;  %v10576_v61 = vld [vmem:[#allocation3 + $0xba0] sm:$0xf] }
 0x26a   :  { %3345 = vmatpush.bf16.msrb.mxu3 %v10109_v63  ;;  %v12711_v63 = vld [vmem:[#allocation3 + $0x52c] sm:$0xf]  ;;  %v10400_v35 = vld [vmem:[#allocation3 + $0xa40] sm:$0xf]  ;;  %v12840_v19 = vld [vmem:[#allocation3 + $0x92c] sm:$0xf0] }
 0x26b   :  { %3307 = vmatpush.bf16.msrb.mxu0 %v9709_v8  ;;  %v10010_v8 = vld [vmem:[#allocation3 + $0x738] sm:$0xf0]  ;;  %v9757_v20 = vor.u32 %v12711_v63, %v9754_v1  ;;  %v12820_v63 = vld [vmem:[#allocation3 + $0x88c] sm:$0xf0]  ;;  %v10384_v48 = vld [vmem:[#allocation3 + $0xa20] sm:$0xf] }
 0x26c   :  { %3320 = vmatpush.bf16.msrb.mxu1 %v9837_v13  ;;  %v9629_v13 = vor.u32 %v12679_v60, %v9626_v62  ;;  %v10013_v25 = vor.u32 %v12775_v5, %v10010_v8  ;;  %v10449_v60 = vor.u32 %v12888_v57, %v10448_v40  ;;  %v10176_v62 = vld [vmem:[#allocation3 + $0x880] sm:$0xf]  ;;  %v12884_v5 = vld [vmem:[#allocation3 + $0xa8c] sm:$0xf0] }
 0x26d   :  { %3333 = vmatpush.bf16.msrb.mxu2 %v9965_v16  ;;  %v12675_v16 = vld [vmem:[#allocation3 + $0x40c] sm:$0xf]  ;;  %v10560_v8 = vld [vmem:[#allocation3 + $0xb80] sm:$0xf] }
 0x26e   :  { %3346 = vmatpush.bf16.msrb.mxu3 %v10093_v22  ;;  %v12707_v22 = vld [vmem:[#allocation3 + $0x50c] sm:$0xf]  ;;  %v9613_v6 = vor.u32 %v12675_v16, %v9610_v17  ;;  %v10177_v16 = vor.u32 %v12820_v63, %v10176_v62  ;;  %v10368_v40 = vld [vmem:[#allocation3 + $0xa00] sm:$0xf]  ;;  %v12862_v62 = vld [vmem:[#allocation3 + $0x9e4] sm:$0xf] }
 0x26f   :  { %3308 = vmatpush.bf16.msrb.mxu0 %v9693_v27  ;;  %v9994_v27 = vld [vmem:[#allocation3 + $0x718] sm:$0xf0]  ;;  %v9741_v32 = vor.u32 %v12707_v22, %v9738_v23  ;;  %v12816_v22 = vld [vmem:[#allocation3 + $0x86c] sm:$0xf0]  ;;  %v10288_v23 = vld [vmem:[#allocation3 + $0x960] sm:$0xf] }
 0x270   :  { %3321 = vmatpush.bf16.msrb.mxu1 %v9821_v28  ;;  %v10224_v28 = vld [vmem:[#allocation3 + $0x8e0] sm:$0xf] }
 0x271   :  { %3334 = vmatpush.bf16.msrb.mxu2 %v9949_v29  ;;  %v12832_v29 = vld [vmem:[#allocation3 + $0x8ec] sm:$0xf0] }
 0x272   :  { %3347 = vmatpush.bf16.msrb.mxu3 %v10077_v31  ;;  %v10480_v31 = vld [vmem:[#allocation3 + $0xae0] sm:$0xf] }
 0x273   :  { %3309 = vmatpush.bf16.msrb.mxu0 %v9677_v39  ;;  %v9997_v39 = vor.u32 %v12771_v26, %v9994_v27  ;;  %v10481_v44 = vor.u32 %v12896_v7, %v10480_v31  ;;  %v12880_v26 = vld [vmem:[#allocation3 + $0xa6c] sm:$0xf0]  ;;  %v10544_v27 = vld [vmem:[#allocation3 + $0xb60] sm:$0xf] }
 0x274   :  { %3322 = vmatpush.bf16.msrb.mxu1 %v9805_v41  ;;  %v10225_v41 = vor.u32 %v12832_v29, %v10224_v28  ;;  %v12912_v28 = vld [vmem:[#allocation3 + $0xb6c] sm:$0xf0]  ;;  %v10272_v7 = vld [vmem:[#allocation3 + $0x940] sm:$0xf] }
 0x275   :  { %3335 = vmatpush.bf16.msrb.mxu2 %v9933_v42  ;;  %v10353_v42 = vor.u32 %v12864_v11, %v10352_v30  ;;  %v10144_v11 = vld [vmem:[#allocation3 + $0x840] sm:$0xf]  ;;  %v12812_v31 = vld [vmem:[#allocation3 + $0x84c] sm:$0xf0] }
 0x276   :  { %3348 = vmatpush.bf16.msrb.mxu3 %v10061_v46  ;;  %v10336_v46 = vld [vmem:[#allocation3 + $0x9c0] sm:$0xf] }
 0x277   :  { %3310 = vmatpush.bf16.msrb.mxu0 %v9661_v43  ;;  %v12924_v43 = vld [vmem:[#allocation3 + $0xbcc] sm:$0xf0] }
 0x278   :  { %3323 = vmatpush.bf16.msrb.mxu1 %v9789_v33  ;;  %v10209_v33 = vor.u32 %v12828_v15, %v10208_v45  ;;  %v10593_v53 = vor.u32 %v12924_v43, %v10592_v38  ;;  %v10401_v45 = vor.u32 %v12876_v36, %v10400_v35  ;;  %v10128_v15 = vld [vmem:[#allocation3 + $0x820] sm:$0xf]  ;;  %v12872_v38 = vld [vmem:[#allocation3 + $0xa2c] sm:$0xf0]  ;;  %v12822_v35 = vld [vmem:[#allocation3 + $0x8a4] sm:$0xf] }
 0x279   :  { %3336 = vmatpush.bf16.msrb.mxu2 %v9917_v14  ;;  %v10337_v14 = vor.u32 %v12860_v47, %v10336_v46  ;;  %v12808_v46 = vld [vmem:[#allocation3 + $0x82c] sm:$0xf0]  ;;  %v10512_v43 = vld [vmem:[#allocation3 + $0xb20] sm:$0xf]  ;;  %v10194_v36 = vld [vmem:[#allocation3 + $0x8b0] sm:$0xf0] }
 0x27a   :  { %3349 = vmatpush.bf16.msrb.mxu3 %v10045_v56  ;;  %v10320_v56 = vld [vmem:[#allocation3 + $0x9a0] sm:$0xf] }
 0x27b   :  { %3311 = vmatpush.bf16.msrb.mxu0 %v9645_v58  ;;  %v12920_v58 = vld [vmem:[#allocation3 + $0xbac] sm:$0xf0] }
 0x27c   :  { %3324 = vmatpush.bf16.msrb.mxu1 %v9773_v12  ;;  %v10193_v12 = vor.u32 %v12824_v51, %v10192_v50  ;;  %v10577_v1 = vor.u32 %v12920_v58, %v10576_v61  ;;  %v12804_v50 = vld [vmem:[#allocation3 + $0x80c] sm:$0xf0]  ;;  %v10496_v58 = vld [vmem:[#allocation3 + $0xb00] sm:$0xf] }
 0x27d   :  { %3337 = vmatpush.bf16.msrb.mxu2 %v9901_v59  ;;  %v10321_v59 = vor.u32 %v12856_v9, %v10320_v56  ;;  %v10385_v56 = vor.u32 %v12872_v38, %v10384_v48  ;;  %v12836_v9 = vld [vmem:[#allocation3 + $0x90c] sm:$0xf0]  ;;  %v12818_v48 = vld [vmem:[#allocation3 + $0x884] sm:$0xf]  ;;  %v10178_v38 = vld [vmem:[#allocation3 + $0x890] sm:$0xf0] }
 0x27e   :  { %3350 = vmatpush.bf16.msrb.mxu3 %v10029_v0  ;;  %v10304_v0 = vld [vmem:[#allocation3 + $0x980] sm:$0xf]  ;;  %v12868_v61 = vld [vmem:[#allocation3 + $0xa0c] sm:$0xf0] }
 0x27f   :  { %3312 = vmatpush.bf16.msrb.mxu0 %v9629_v13  ;;  %v12916_v13 = vld [vmem:[#allocation3 + $0xb8c] sm:$0xf0]  ;;  %v10305_v17 = vor.u32 %v12852_v3, %v10304_v0  ;;  %v10354_v0 = vld [vmem:[#allocation3 + $0x9f0] sm:$0xf0] }
 0x280   :  { %3325 = vmatpush.bf16.msrb.mxu1 %v9757_v20  ;;  %v10433_v20 = vor.u32 %v12884_v5, %v10432_v4  ;;  %v10561_v24 = vor.u32 %v12916_v13, %v10560_v8  ;;  %v10482_v3 = vld [vmem:[#allocation3 + $0xaf0] sm:$0xf0]  ;;  %v10369_v5 = vor.u32 %v12868_v61, %v10368_v40  ;;  %v12926_v8 = vld [vmem:[#allocation3 + $0xbe4] sm:$0xf] }
 0x281   :  { %3338 = vmatpush.bf16.msrb.mxu2 %v9885_v21  ;;  %v10160_v21 = vld [vmem:[#allocation3 + $0x860] sm:$0xf]  ;;  %v10610_v13 = vld [vmem:[#allocation3 + $0xbf0] sm:$0xf0]  ;;  %v12814_v61 = vld [vmem:[#allocation3 + $0x864] sm:$0xf] }
 0x282   :  { %3351 = vmatpush.bf16.msrb.mxu3 %v10013_v25  ;;  %v12848_v25 = vld [vmem:[#allocation3 + $0x96c] sm:$0xf0]  ;;  %v10161_v29 = vor.u32 %v12816_v22, %v10160_v21  ;;  %v10357_v21 = vor.u32 %v12862_v62, %v10354_v0  ;;  %v10290_v62 = vld [vmem:[#allocation3 + $0x970] sm:$0xf0] }
 0x283   :  { %3313 = vmatpush.bf16.msrb.mxu0 %v9613_v6  ;;  %v10289_v30 = vor.u32 %v12848_v25, %v10288_v23  ;;  %v10417_v6 = vor.u32 %v12880_v26, %v10416_v10  ;;  %v12826_v23 = vld [vmem:[#allocation3 + $0x8c4] sm:$0xf]  ;;  %v10613_v10 = vor.u32 %v12926_v8, %v10610_v13  ;;  %v10338_v26 = vld [vmem:[#allocation3 + $0x9d0] sm:$0xf0] }
 0x284   :  { %3326 = vmatpush.bf16.msrb.mxu1 %v9741_v32  ;;  %v10545_v32 = vor.u32 %v12912_v28, %v10544_v27  ;;  %v12858_v25 = vld [vmem:[#allocation3 + $0x9c4] sm:$0xf]  ;;  %v10466_v28 = vld [vmem:[#allocation3 + $0xad0] sm:$0xf0] }
 0x285   :  { %3339 = vmatpush.bf16.msrb.mxu2 %v9869_v34  ;;  %v12844_v34 = vld [vmem:[#allocation3 + $0x94c] sm:$0xf0]  ;;  %v12890_v27 = vld [vmem:[#allocation3 + $0xac4] sm:$0xf]  ;;  %v10418_v0 = vld [vmem:[#allocation3 + $0xa70] sm:$0xf0] }
 0x286   :  { %3352 = vmatpush.bf16.msrb.mxu3 %v9997_v39  ;;  %3314 = vmatmul.bf16.vlgmr.msrb.gmra.mxu0 %v13982_v55  ;;  %v10528_v39 = vld [vmem:[#allocation3 + $0xb40] sm:$0xf] }
 0x287   :  { %4134 = vmatpush.bf16.msra.mxu0 %v10225_v41  ;;  %3327 = vmatmul.bf16.vlgmr.msrb.gmra.mxu1 %v13984_v2  ;;  %v12908_v41 = vld [vmem:[#allocation3 + $0xb4c] sm:$0xf0] }
 0x288   :  { %4147 = vmatpush.bf16.msra.mxu1 %v10353_v42  ;;  %3340 = vmatmul.bf16.vlgmr.msrb.gmra.mxu2 %v13978_v52  ;;  %v10145_v42 = vor.u32 %v12812_v31, %v10144_v11  ;;  %v10529_v47 = vor.u32 %v12908_v41, %v10528_v39  ;;  %v14009_v11 = vrot.slane %v13982_v55, 1  ;;  %v12854_v39 = vld [vmem:[#allocation3 + $0x9a4] sm:$0xf] }
 0x289   :  { %4160 = vmatpush.bf16.msra.mxu2 %v10481_v44  ;;  %3353 = vmatmul.bf16.vlgmr.msrb.gmra.mxu3 %v13980_v54  ;;  %v10273_v44 = vor.u32 %v12844_v34, %v10272_v7  ;;  %v14012_v7 = vrot.slane %v13984_v2, 1  ;;  %v10469_v34 = vor.u32 %v12890_v27, %v10466_v28  ;;  %v12906_v28 = vld [vmem:[#allocation3 + $0xb44] sm:$0xf] }
 0x28a   :  { %4173 = vmatpush.bf16.msra.mxu3 %v10609_v18  ;;  %v10256_v18 = vld [vmem:[#allocation3 + $0x920] sm:$0xf] }
 0x28b   :  { %4135 = vmatpush.bf16.msra.mxu0 %v10209_v33  ;;  %v12904_v33 = vld [vmem:[#allocation3 + $0xb2c] sm:$0xf0]  ;;  %v10257_v51 = vor.u32 %v12840_v19, %v10256_v18  ;;  %v10197_v18 = vor.u32 %v12822_v35, %v10194_v36  ;;  %v12806_v36 = vld [vmem:[#allocation3 + $0x824] sm:$0xf] }
 0x28c   :  { %4148 = vmatpush.bf16.msra.mxu1 %v10337_v14  ;;  %v10129_v14 = vor.u32 %v12808_v46, %v10128_v15  ;;  %v10513_v57 = vor.u32 %v12904_v33, %v10512_v43  ;;  %v12918_v15 = vld [vmem:[#allocation3 + $0xba4] sm:$0xf]  ;;  %v10578_v46 = vld [vmem:[#allocation3 + $0xbb0] sm:$0xf0] }
 0x28d   :  { %4161 = vmatpush.bf16.msra.mxu2 %v10465_v49  ;;  %v10112_v49 = vld [vmem:[#allocation3 + $0x800] sm:$0xf]  ;;  %v12850_v43 = vld [vmem:[#allocation3 + $0x984] sm:$0xf]  ;;  %v10581_v33 = vor.u32 %v12918_v15, %v10578_v46  ;;  %v10386_v46 = vld [vmem:[#allocation3 + $0xa30] sm:$0xf0] }
 0x28e   :  { %4174 = vmatpush.bf16.msra.mxu3 %v10593_v53  ;;  %v10240_v53 = vld [vmem:[#allocation3 + $0x900] sm:$0xf]  ;;  %v10113_v63 = vor.u32 %v12804_v50, %v10112_v49  ;;  %v12882_v49 = vld [vmem:[#allocation3 + $0xa84] sm:$0xf]  ;;  %v10434_v50 = vld [vmem:[#allocation3 + $0xa90] sm:$0xf0] }
 0x28f   :  { %4136 = vmatpush.bf16.msra.mxu0 %v10193_v12  ;;  %v12900_v12 = vld [vmem:[#allocation3 + $0xb0c] sm:$0xf0]  ;;  %v10241_v4 = vor.u32 %v12836_v9, %v10240_v53  ;;  %v10181_v53 = vor.u32 %v12818_v48, %v10178_v38  ;;  %v12870_v15 = vld [vmem:[#allocation3 + $0xa24] sm:$0xf]  ;;  %v10114_v38 = vld [vmem:[#allocation3 + $0x810] sm:$0xf0] }
 0x290   :  { %4149 = vmatpush.bf16.msra.mxu1 %v10321_v59  ;;  %v12830_v59 = vld [vmem:[#allocation3 + $0x8e4] sm:$0xf] }
 0x291   :  { %4162 = vmatpush.bf16.msra.mxu2 %v10449_v60  ;;  %v10226_v60 = vld [vmem:[#allocation3 + $0x8f0] sm:$0xf0]  ;;  %v12802_v48 = vld [vmem:[#allocation3 + $0x804] sm:$0xf] }
 0x292   :  { %4175 = vmatpush.bf16.msra.mxu3 %v10577_v1  ;;  %v12894_v1 = vld [vmem:[#allocation3 + $0xae4] sm:$0xf] }
 0x293   :  { %4137 = vmatpush.bf16.msra.mxu0 %v10177_v16  ;;  %v10497_v16 = vor.u32 %v12900_v12, %v10496_v58  ;;  %v10485_v22 = vor.u32 %v12894_v1, %v10482_v3  ;;  %v10162_v58 = vld [vmem:[#allocation3 + $0x870] sm:$0xf0]  ;;  %v12846_v12 = vld [vmem:[#allocation3 + $0x964] sm:$0xf] }
 0x294   :  { %4150 = vmatpush.bf16.msra.mxu1 %v10305_v17  ;;  %v10229_v17 = vor.u32 %v12830_v59, %v10226_v60  ;;  %v12910_v3 = vld [vmem:[#allocation3 + $0xb64] sm:$0xf]  ;;  %v10293_v8 = vor.u32 %v12846_v12, %v10290_v62  ;;  %v10360_v12 = vld [vmem:[#allocation3 + $0x9e8] sm:$0xf] }
 0x295   :  { %4163 = vmatpush.bf16.msra.mxu2 %v10433_v20  ;;  %v14003_v20 = vrot.slane %v13978_v52, 1  ;;  %v10488_v62 = vld [vmem:[#allocation3 + $0xae8] sm:$0xf] }
 0x296   :  { %4176 = vmatpush.bf16.msra.mxu3 %v10561_v24  ;;  %v10210_v24 = vld [vmem:[#allocation3 + $0x8d0] sm:$0xf0] }
 0x297   :  { %4138 = vmatpush.bf16.msra.mxu0 %v10161_v29  ;;  %v14006_v29 = vrot.slane %v13980_v54, 1  ;;  %v10213_v31 = vor.u32 %v12826_v23, %v10210_v24  ;;  %v10274_v24 = vld [vmem:[#allocation3 + $0x950] sm:$0xf0] }
 0x298   :  { %4151 = vmatpush.bf16.msra.mxu1 %v10289_v30  ;;  %v12922_v30 = vld [vmem:[#allocation3 + $0xbc4] sm:$0xf] }
 0x299   :  { %4164 = vmatpush.bf16.msra.mxu2 %v10417_v6  ;;  %v10594_v6 = vld [vmem:[#allocation3 + $0xbd0] sm:$0xf0] }
 0x29a   :  { %4177 = vmatpush.bf16.msra.mxu3 %v10545_v32  ;;  %v10341_v32 = vor.u32 %v12858_v25, %v10338_v26  ;;  %v10597_v41 = vor.u32 %v12922_v30, %v10594_v6  ;;  %v12874_v25 = vld [vmem:[#allocation3 + $0xa44] sm:$0xf]  ;;  %v10530_v30 = vld [vmem:[#allocation3 + $0xb50] sm:$0xf0] }
 0x29b   :  { %4139 = vmatpush.bf16.msra.mxu0 %v10145_v42  ;;  %v10322_v42 = vld [vmem:[#allocation3 + $0x9b0] sm:$0xf0] }
 0x29c   :  { %4152 = vmatpush.bf16.msra.mxu1 %v10273_v44  ;;  %v12886_v44 = vld [vmem:[#allocation3 + $0xaa4] sm:$0xf] }
 0x29d   :  { %4165 = vmatpush.bf16.msra.mxu2 %v10401_v45  ;;  %v10450_v45 = vld [vmem:[#allocation3 + $0xab0] sm:$0xf0] }
 0x29e   :  { %4178 = vmatpush.bf16.msra.mxu3 %v10529_v47  ;;  %v10325_v47 = vor.u32 %v12854_v39, %v10322_v42  ;;  %v10453_v19 = vor.u32 %v12886_v44, %v10450_v45  ;;  %v10130_v39 = vld [vmem:[#allocation3 + $0x830] sm:$0xf0]  ;;  %v10533_v44 = vor.u32 %v12906_v28, %v10530_v30 }
 0x29f   :  { %4140 = vmatpush.bf16.msra.mxu0 %v10129_v14  ;;  %v10306_v14 = vld [vmem:[#allocation3 + $0x990] sm:$0xf0] }
 0x2a0   :  { %4153 = vmatpush.bf16.msra.mxu1 %v10257_v51  ;;  %v12914_v51 = vld [vmem:[#allocation3 + $0xb84] sm:$0xf]  ;;  %v10309_v40 = vor.u32 %v12850_v43, %v10306_v14  ;;  %v10258_v45 = vld [vmem:[#allocation3 + $0x930] sm:$0xf0] }
 0x2a1   :  { %4166 = vmatpush.bf16.msra.mxu2 %v10385_v56  ;;  %v10562_v56 = vld [vmem:[#allocation3 + $0xb90] sm:$0xf0]  ;;  %v12834_v14 = vld [vmem:[#allocation3 + $0x904] sm:$0xf] }
 0x2a2   :  { %4179 = vmatpush.bf16.msra.mxu3 %v10513_v57  ;;  %v10437_v57 = vor.u32 %v12882_v49, %v10434_v50  ;;  %v10565_v60 = vor.u32 %v12914_v51, %v10562_v56  ;;  %v10242_v49 = vld [vmem:[#allocation3 + $0x910] sm:$0xf0]  ;;  %v12866_v50 = vld [vmem:[#allocation3 + $0xa04] sm:$0xf] }
 0x2a3   :  { %4141 = vmatpush.bf16.msra.mxu0 %v10113_v63  ;;  %v3159_v9 = vpop.f32.mrf.mxu0  ;;  %v12878_v63 = vld [vmem:[#allocation3 + $0xa64] sm:$0xf] }
 0x2a4   :  { %4154 = vmatpush.bf16.msra.mxu1 %v10241_v4  ;;  %v3172_v59 = vpop.f32.mrf.mxu1  ;;  %v10546_v4 = vld [vmem:[#allocation3 + $0xb70] sm:$0xf0]  ;;  %v10421_v13 = vor.u32 %v12878_v63, %v10418_v0  ;;  %v12897_v63 = vld [vmem:[#allocation3 + $0xaf4] sm:$0xf0]  ;;  %v10245_v0 = vor.u32 %v12834_v14, %v10242_v49  ;;  %v10568_v49 = vld [vmem:[#allocation3 + $0xb88] sm:$0xf] }
 0x2a5   :  { %4167 = vmatpush.bf16.msra.mxu2 %v10369_v5  ;;  %v3173_v1 = vadd.f32 %v3172_v59, %v3159_v9  ;;  %v10165_v5 = vor.u32 %v12814_v61, %v10162_v58  ;;  %v10549_v23 = vor.u32 %v12910_v3, %v10546_v4  ;;  %v12898_v9 = vld [vmem:[#allocation3 + $0xb04] sm:$0xf]  ;;  %v10232_v61 = vld [vmem:[#allocation3 + $0x8e8] sm:$0xf]  ;;  %v12833_v58 = vld [vmem:[#allocation3 + $0x8f4] sm:$0xf0]  ;;  %v10117_v59 = vor.u32 %v12802_v48, %v10114_v38 }
 0x2a6   :  { %4180 = vmatpush.bf16.msra.mxu3 %v10497_v16  ;;  %4142 = vmatmul.bf16.vlgmr.msra.gmra.mxu0 %v14009_v11  ;;  %v12810_v16 = vld [vmem:[#allocation3 + $0x844] sm:$0xf]  ;;  %v10616_v3 = vld [vmem:[#allocation3 + $0xbe8] sm:$0xf]  ;;  %v12929_v4 = vld [vmem:[#allocation3 + $0xbf4] sm:$0xf0] }
 0x2a7   :  { %4186 = vmatpush.bf16.msrb.mxu0 %v10229_v17  ;;  %4155 = vmatmul.bf16.vlgmr.msra.gmra.mxu1 %v14012_v7  ;;  %v10146_v17 = vld [vmem:[#allocation3 + $0x850] sm:$0xf0]  ;;  %v10312_v48 = vld [vmem:[#allocation3 + $0x988] sm:$0xf]  ;;  %v12885_v14 = vld [vmem:[#allocation3 + $0xa94] sm:$0xf0] }
 0x2a8   :  { %4199 = vmatpush.bf16.msrb.mxu1 %v10357_v21  ;;  %4168 = vmatmul.bf16.vlgmr.msra.gmra.mxu2 %v14003_v20  ;;  %v12842_v21 = vld [vmem:[#allocation3 + $0x944] sm:$0xf]  ;;  %v10149_v6 = vor.u32 %v12810_v16, %v10146_v17  ;;  %v10489_v16 = vor.u32 %v12897_v63, %v10488_v62  ;;  %v10216_v17 = vld [vmem:[#allocation3 + $0x8c8] sm:$0xf]  ;;  %v12881_v62 = vld [vmem:[#allocation3 + $0xa74] sm:$0xf0] }
 0x2a9   :  { %4212 = vmatpush.bf16.msrb.mxu2 %v10485_v22  ;;  %4181 = vmatmul.bf16.vlgmr.msra.gmra.mxu3 %v14006_v29 }
 0x2aa   :  { %4225 = vmatpush.bf16.msrb.mxu3 %v10613_v10  ;;  %v10402_v10 = vld [vmem:[#allocation3 + $0xa50] sm:$0xf0] }
 0x2ab   :  { %4187 = vmatpush.bf16.msrb.mxu0 %v10213_v31  ;;  %v3185_v22 = vpop.f32.mrf.mxu2  ;;  %v10405_v35 = vor.u32 %v12874_v25, %v10402_v10  ;;  %v10472_v25 = vld [vmem:[#allocation3 + $0xac8] sm:$0xf]  ;;  %v12893_v10 = vld [vmem:[#allocation3 + $0xad4] sm:$0xf0] }
 0x2ac   :  { %4200 = vmatpush.bf16.msrb.mxu1 %v10341_v32  ;;  %v3186_v26 = vadd.f32 %v3185_v22, %v3173_v1  ;;  %v3198_v27 = vpop.f32.mrf.mxu3  ;;  %v3161_v32 = vpop.f32.mrf.mxu0  ;;  %v10344_v22 = vld [vmem:[#allocation3 + $0x9c8] sm:$0xf] }
 0x2ad   :  { %4213 = vmatpush.bf16.msrb.mxu2 %v10469_v34  ;;  %v10277_v34 = vor.u32 %v12842_v21, %v10274_v24  ;;  %v3174_v42 = vpop.f32.mrf.mxu1  ;;  %v12829_v21 = vld [vmem:[#allocation3 + $0x8d4] sm:$0xf0]  ;;  %v10200_v32 = vld [vmem:[#allocation3 + $0x8a8] sm:$0xf] }
 0x2ae   :  { %4226 = vmatpush.bf16.msrb.mxu3 %v10597_v41  ;;  %v14018_v31 = vadd.f32 %v3198_v27, %v3186_v26  ;;  %v12838_v41 = vld [vmem:[#allocation3 + $0x924] sm:$0xf]  ;;  %v12861_v24 = vld [vmem:[#allocation3 + $0x9d4] sm:$0xf0]  ;;  %v10600_v26 = vld [vmem:[#allocation3 + $0xbc8] sm:$0xf]  ;;  %v10217_v28 = vor.u32 %v12829_v21, %v10216_v17 }
 0x2af   :  { %4188 = vmatpush.bf16.msrb.mxu0 %v10197_v18  ;;  %v12902_v18 = vld [vmem:[#allocation3 + $0xb24] sm:$0xf]  ;;  %v10261_v43 = vor.u32 %v12838_v41, %v10258_v45  ;;  %v12925_v27 = vld [vmem:[#allocation3 + $0xbd4] sm:$0xf0]  ;;  %v10345_v30 = vor.u32 %v12861_v24, %v10344_v22  ;;  %v10456_v41 = vld [vmem:[#allocation3 + $0xaa8] sm:$0xf] }
 0x2b0   :  { %4201 = vmatpush.bf16.msrb.mxu1 %v10325_v47  ;;  %v10514_v47 = vld [vmem:[#allocation3 + $0xb30] sm:$0xf0]  ;;  %v12889_v42 = vld [vmem:[#allocation3 + $0xab4] sm:$0xf0] }
 0x2b1   :  { %4214 = vmatpush.bf16.msrb.mxu2 %v10453_v19  ;;  %v10133_v19 = vor.u32 %v12806_v36, %v10130_v39  ;;  %v10517_v56 = vor.u32 %v12902_v18, %v10514_v47  ;;  %v10601_v36 = vor.u32 %v12925_v27, %v10600_v26  ;;  %v12857_v39 = vld [vmem:[#allocation3 + $0x9b4] sm:$0xf0]  ;;  %v10457_v18 = vor.u32 %v12889_v42, %v10456_v41  ;;  %v10184_v47 = vld [vmem:[#allocation3 + $0x888] sm:$0xf] }
 0x2b2   :  { %4227 = vmatpush.bf16.msrb.mxu3 %v10581_v33  ;;  %v10389_v33 = vor.u32 %v12870_v15, %v10386_v46  ;;  %v12921_v45 = vld [vmem:[#allocation3 + $0xbb4] sm:$0xf0]  ;;  %v10536_v26 = vld [vmem:[#allocation3 + $0xb48] sm:$0xf] }
 0x2b3   :  { %4189 = vmatpush.bf16.msrb.mxu0 %v10181_v53  ;;  %v3187_v51 = vpop.f32.mrf.mxu2  ;;  %v10370_v53 = vld [vmem:[#allocation3 + $0xa10] sm:$0xf0]  ;;  %v12845_v22 = vld [vmem:[#allocation3 + $0x954] sm:$0xf0] }
 0x2b4   :  { %4202 = vmatpush.bf16.msrb.mxu1 %v10309_v40  ;;  %v10498_v40 = vld [vmem:[#allocation3 + $0xb10] sm:$0xf0]  ;;  %v10373_v1 = vor.u32 %v12866_v50, %v10370_v53  ;;  %v12917_v50 = vld [vmem:[#allocation3 + $0xb94] sm:$0xf0] }
 0x2b5   :  { %4215 = vmatpush.bf16.msrb.mxu2 %v10437_v57  ;;  %v3200_v57 = vpop.f32.mrf.mxu3  ;;  %v12877_v24 = vld [vmem:[#allocation3 + $0xa54] sm:$0xf0] }
 0x2b6   :  { %4228 = vmatpush.bf16.msrb.mxu3 %v10565_v60  ;;  %v12865_v60 = vld [vmem:[#allocation3 + $0x9f4] sm:$0xf0] }
 0x2b7   :  { %4190 = vmatpush.bf16.msrb.mxu0 %v10165_v5  ;;  %v10501_v5 = vor.u32 %v12898_v9, %v10498_v40  ;;  %v10168_v40 = vld [vmem:[#allocation3 + $0x868] sm:$0xf]  ;;  %v12817_v57 = vld [vmem:[#allocation3 + $0x874] sm:$0xf0] }
 0x2b8   :  { %4203 = vmatpush.bf16.msrb.mxu1 %v10293_v8  ;;  %v10233_v8 = vor.u32 %v12833_v58, %v10232_v61  ;;  %v10296_v61 = vld [vmem:[#allocation3 + $0x968] sm:$0xf]  ;;  %v12909_v27 = vld [vmem:[#allocation3 + $0xb54] sm:$0xf0] }
 0x2b9   :  { %4216 = vmatpush.bf16.msrb.mxu2 %v10421_v13  ;;  %v10361_v13 = vor.u32 %v12865_v60, %v10360_v12  ;;  %v10569_v12 = vor.u32 %v12917_v50, %v10568_v49  ;;  %v10424_v60 = vld [vmem:[#allocation3 + $0xa68] sm:$0xf]  ;;  %v10537_v42 = vor.u32 %v12909_v27, %v10536_v26  ;;  %v10602_v26 = vld [vmem:[#allocation3 + $0xbd8] sm:$0xf0] }
 0x2ba   :  { %4229 = vmatpush.bf16.msrb.mxu3 %v10549_v23  ;;  %v10617_v23 = vor.u32 %v12929_v4, %v10616_v3  ;;  %v10169_v3 = vor.u32 %v12817_v57, %v10168_v40  ;;  %v10376_v49 = vld [vmem:[#allocation3 + $0xa08] sm:$0xf]  ;;  %v12831_v57 = vld [vmem:[#allocation3 + $0x8ec] sm:$0xf] }
 0x2bb   :  { %4191 = vmatpush.bf16.msrb.mxu0 %v10149_v6  ;;  %v10473_v6 = vor.u32 %v12893_v10, %v10472_v25 }
 0x2bc   :  { %4204 = vmatpush.bf16.msrb.mxu1 %v10277_v34  ;;  %v12825_v34 = vld [vmem:[#allocation3 + $0x8b4] sm:$0xf0] }
 0x2bd   :  { %4217 = vmatpush.bf16.msrb.mxu2 %v10405_v35  ;;  %v10328_v35 = vld [vmem:[#allocation3 + $0x9a8] sm:$0xf]  ;;  %v10201_v15 = vor.u32 %v12825_v34, %v10200_v32 }
 0x2be   :  { %4230 = vmatpush.bf16.msrb.mxu3 %v10533_v44  ;;  %v10584_v44 = vld [vmem:[#allocation3 + $0xba8] sm:$0xf]  ;;  %v10329_v46 = vor.u32 %v12857_v39, %v10328_v35 }
 0x2bf   :  { %4192 = vmatpush.bf16.msrb.mxu0 %v10133_v19  ;;  %v12821_v19 = vld [vmem:[#allocation3 + $0x894] sm:$0xf0]  ;;  %v10585_v38 = vor.u32 %v12921_v45, %v10584_v44  ;;  %v10136_v35 = vld [vmem:[#allocation3 + $0x828] sm:$0xf] }
 0x2c0   :  { %4205 = vmatpush.bf16.msrb.mxu1 %v10261_v43  ;;  %v12853_v43 = vld [vmem:[#allocation3 + $0x994] sm:$0xf0]  ;;  %v10185_v51 = vor.u32 %v12821_v19, %v10184_v47  ;;  %v10264_v39 = vld [vmem:[#allocation3 + $0x928] sm:$0xf] }
 0x2c1   :  { %4218 = vmatpush.bf16.msrb.mxu2 %v10389_v33  ;;  %v10440_v33 = vld [vmem:[#allocation3 + $0xa88] sm:$0xf]  ;;  %v10313_v53 = vor.u32 %v12853_v43, %v10312_v48  ;;  %v12841_v44 = vld [vmem:[#allocation3 + $0x934] sm:$0xf0] }
 0x2c2   :  { %4231 = vmatpush.bf16.msrb.mxu3 %v10517_v56  ;;  %v10441_v9 = vor.u32 %v12885_v14, %v10440_v33  ;;  %v10392_v45 = vld [vmem:[#allocation3 + $0xa28] sm:$0xf]  ;;  %v12805_v48 = vld [vmem:[#allocation3 + $0x814] sm:$0xf0] }
 0x2c3   :  { %4193 = vmatpush.bf16.msrb.mxu0 %v10117_v59  ;;  %v3211_v56 = vpop.f32.mrf.mxu0  ;;  %v12849_v59 = vld [vmem:[#allocation3 + $0x974] sm:$0xf0]  ;;  %v10120_v19 = vld [vmem:[#allocation3 + $0x808] sm:$0xf] }
 0x2c4   :  { %4206 = vmatpush.bf16.msrb.mxu1 %v10245_v0  ;;  %v3224_v58 = vpop.f32.mrf.mxu1  ;;  %v10552_v0 = vld [vmem:[#allocation3 + $0xb68] sm:$0xf]  ;;  %v10297_v4 = vor.u32 %v12849_v59, %v10296_v61  ;;  %v12837_v14 = vld [vmem:[#allocation3 + $0x914] sm:$0xf0]  ;;  %v10234_v61 = vld [vmem:[#allocation3 + $0x8f8] sm:$0xf0] }
 0x2c5   :  { %4219 = vmatpush.bf16.msrb.mxu2 %v10373_v1  ;;  %v3225_v63 = vadd.f32 %v3224_v58, %v3211_v56  ;;  %v12913_v1 = vld [vmem:[#allocation3 + $0xb74] sm:$0xf0]  ;;  %v10248_v33 = vld [vmem:[#allocation3 + $0x908] sm:$0xf]  ;;  %v12863_v58 = vld [vmem:[#allocation3 + $0x9ec] sm:$0xf] }
 0x2c6   :  { %4232 = vmatpush.bf16.msrb.mxu3 %v10501_v5  ;;  %4194 = vmatmul.bf16.vlgmr.msrb.gmra.mxu0 %v14009_v11  ;;  %v10425_v5 = vor.u32 %v12881_v62, %v10424_v60  ;;  %v10553_v21 = vor.u32 %v12913_v1, %v10552_v0  ;;  %v12869_v56 = vld [vmem:[#allocation3 + $0xa14] sm:$0xf0]  ;;  %v10362_v59 = vld [vmem:[#allocation3 + $0x9f8] sm:$0xf0]  ;;  %v12895_v60 = vld [vmem:[#allocation3 + $0xaec] sm:$0xf] }
 0x2c7   :  { %4238 = vmatpush.bf16.msra.mxu0 %v10233_v8  ;;  %4207 = vmatmul.bf16.vlgmr.msrb.gmra.mxu1 %v14012_v7  ;;  %v10152_v8 = vld [vmem:[#allocation3 + $0x848] sm:$0xf]  ;;  %v10490_v62 = vld [vmem:[#allocation3 + $0xaf8] sm:$0xf0]  ;;  %v10377_v0 = vor.u32 %v12869_v56, %v10376_v49  ;;  %v12927_v1 = vld [vmem:[#allocation3 + $0xbec] sm:$0xf] }
 0x2c8   :  { %4251 = vmatpush.bf16.msra.mxu1 %v10361_v13  ;;  %4220 = vmatmul.bf16.vlgmr.msrb.gmra.mxu2 %v14003_v20  ;;  %v12813_v13 = vld [vmem:[#allocation3 + $0x854] sm:$0xf0]  ;;  %v12915_v49 = vld [vmem:[#allocation3 + $0xb8c] sm:$0xf] }
 0x2c9   :  { %4264 = vmatpush.bf16.msra.mxu2 %v10489_v16  ;;  %4233 = vmatmul.bf16.vlgmr.msrb.gmra.mxu3 %v14006_v29  ;;  %v10280_v16 = vld [vmem:[#allocation3 + $0x948] sm:$0xf] }
 0x2ca   :  { %4277 = vmatpush.bf16.msra.mxu3 %v10617_v23  ;;  %v10408_v23 = vld [vmem:[#allocation3 + $0xa48] sm:$0xf]  ;;  %v10281_v32 = vor.u32 %v12845_v22, %v10280_v16  ;;  %v12827_v16 = vld [vmem:[#allocation3 + $0x8cc] sm:$0xf] }
 0x2cb   :  { %4239 = vmatpush.bf16.msra.mxu0 %v10217_v28  ;;  %v3237_v17 = vpop.f32.mrf.mxu2  ;;  %v10153_v28 = vor.u32 %v12813_v13, %v10152_v8  ;;  %v10409_v34 = vor.u32 %v12877_v24, %v10408_v23  ;;  %v10365_v8 = vor.u32 %v12863_v58, %v10362_v59  ;;  %v10493_v13 = vor.u32 %v12895_v60, %v10490_v62  ;;  %v10346_v23 = vld [vmem:[#allocation3 + $0x9d8] sm:$0xf0]  ;;  %v12891_v24 = vld [vmem:[#allocation3 + $0xacc] sm:$0xf] }
 0x2cc   :  { %4252 = vmatpush.bf16.msra.mxu1 %v10345_v30  ;;  %v3238_v25 = vadd.f32 %v3237_v17, %v3225_v63  ;;  %v3250_v10 = vpop.f32.mrf.mxu3  ;;  %v3226_v41 = vpop.f32.mrf.mxu1  ;;  %v10249_v63 = vor.u32 %v12837_v14, %v10248_v33  ;;  %v10218_v17 = vld [vmem:[#allocation3 + $0x8d8] sm:$0xf0]  ;;  %v12883_v33 = vld [vmem:[#allocation3 + $0xa8c] sm:$0xf] }
 0x2cd   :  { %4265 = vmatpush.bf16.msra.mxu2 %v10473_v6  ;;  %v3213_v6 = vpop.f32.mrf.mxu0  ;;  %v10221_v27 = vor.u32 %v12827_v16, %v10218_v17  ;;  %v12887_v41 = vld [vmem:[#allocation3 + $0xaac] sm:$0xf]  ;;  %v10442_v14 = vld [vmem:[#allocation3 + $0xa98] sm:$0xf0] }
 0x2ce   :  { %4278 = vmatpush.bf16.msra.mxu3 %v10601_v36  ;;  %v14024_v30 = vadd.f32 %v3250_v10, %v3238_v25  ;;  %v12809_v36 = vld [vmem:[#allocation3 + $0x834] sm:$0xf0]  ;;  %v10474_v25 = vld [vmem:[#allocation3 + $0xad8] sm:$0xf0]  ;;  %v12923_v10 = vld [vmem:[#allocation3 + $0xbcc] sm:$0xf] }
 0x2cf   :  { %4240 = vmatpush.bf16.msra.mxu0 %v10201_v15  ;;  %v12873_v15 = vld [vmem:[#allocation3 + $0xa34] sm:$0xf0]  ;;  %v10137_v47 = vor.u32 %v12809_v36, %v10136_v35  ;;  %v10477_v6 = vor.u32 %v12891_v24, %v10474_v25  ;;  %v12855_v35 = vld [vmem:[#allocation3 + $0x9ac] sm:$0xf]  ;;  %v10605_v36 = vor.u32 %v12923_v10, %v10602_v26  ;;  %v10298_v59 = vld [vmem:[#allocation3 + $0x978] sm:$0xf0] }
 0x2d0   :  { %4253 = vmatpush.bf16.msra.mxu1 %v10329_v46  ;;  %v10520_v46 = vld [vmem:[#allocation3 + $0xb28] sm:$0xf]  ;;  %v10393_v43 = vor.u32 %v12873_v15, %v10392_v45  ;;  %v10586_v45 = vld [vmem:[#allocation3 + $0xbb8] sm:$0xf0]  ;;  %v12879_v60 = vld [vmem:[#allocation3 + $0xa6c] sm:$0xf] }
 0x2d1   :  { %4266 = vmatpush.bf16.msra.mxu2 %v10457_v18  ;;  %v12905_v18 = vld [vmem:[#allocation3 + $0xb34] sm:$0xf0]  ;;  %v10426_v62 = vld [vmem:[#allocation3 + $0xa78] sm:$0xf0]  ;;  %v12843_v16 = vld [vmem:[#allocation3 + $0x94c] sm:$0xf] }
 0x2d2   :  { %4279 = vmatpush.bf16.msra.mxu3 %v10585_v38  ;;  %v10265_v38 = vor.u32 %v12841_v44, %v10264_v39  ;;  %v10330_v39 = vld [vmem:[#allocation3 + $0x9b8] sm:$0xf0]  ;;  %v12919_v44 = vld [vmem:[#allocation3 + $0xbac] sm:$0xf] }
 0x2d3   :  { %4241 = vmatpush.bf16.msra.mxu0 %v10185_v51  ;;  %v3239_v50 = vpop.f32.mrf.mxu2  ;;  %v10521_v51 = vor.u32 %v12905_v18, %v10520_v46  ;;  %v10333_v46 = vor.u32 %v12855_v35, %v10330_v39  ;;  %v10410_v24 = vld [vmem:[#allocation3 + $0xa58] sm:$0xf0]  ;;  %v12907_v26 = vld [vmem:[#allocation3 + $0xb4c] sm:$0xf] }
 0x2d4   :  { %4254 = vmatpush.bf16.msra.mxu1 %v10313_v53  ;;  %v10504_v53 = vld [vmem:[#allocation3 + $0xb08] sm:$0xf]  ;;  %v3252_v40 = vpop.f32.mrf.mxu3  ;;  %v10570_v50 = vld [vmem:[#allocation3 + $0xb98] sm:$0xf0] }
 0x2d5   :  { %4267 = vmatpush.bf16.msra.mxu2 %v10441_v9  ;;  %v12901_v9 = vld [vmem:[#allocation3 + $0xb14] sm:$0xf0]  ;;  %v12815_v40 = vld [vmem:[#allocation3 + $0x86c] sm:$0xf]  ;;  %v10138_v39 = vld [vmem:[#allocation3 + $0x838] sm:$0xf0] }
 0x2d6   :  { %4280 = vmatpush.bf16.msra.mxu3 %v10569_v12  ;;  %v10121_v12 = vor.u32 %v12805_v48, %v10120_v19  ;;  %v10186_v19 = vld [vmem:[#allocation3 + $0x898] sm:$0xf0]  ;;  %v12851_v48 = vld [vmem:[#allocation3 + $0x98c] sm:$0xf] }
 0x2d7   :  { %4242 = vmatpush.bf16.msra.mxu0 %v10169_v3  ;;  %v10618_v3 = vld [vmem:[#allocation3 + $0xbf8] sm:$0xf0] }
 0x2d8   :  { %4255 = vmatpush.bf16.msra.mxu1 %v10297_v4  ;;  %v10505_v4 = vor.u32 %v12901_v9, %v10504_v53  ;;  %v10621_v22 = vor.u32 %v12927_v1, %v10618_v3  ;;  %v10445_v9 = vor.u32 %v12883_v33, %v10442_v14  ;;  %v10554_v1 = vld [vmem:[#allocation3 + $0xb78] sm:$0xf0]  ;;  %v12835_v14 = vld [vmem:[#allocation3 + $0x90c] sm:$0xf] }
 0x2d9   :  { %4268 = vmatpush.bf16.msra.mxu2 %v10425_v5  ;;  %v10237_v5 = vor.u32 %v12831_v57, %v10234_v61  ;;  %v10170_v57 = vld [vmem:[#allocation3 + $0x878] sm:$0xf0]  ;;  %v12847_v61 = vld [vmem:[#allocation3 + $0x96c] sm:$0xf] }
 0x2da   :  { %4281 = vmatpush.bf16.msra.mxu3 %v10553_v21  ;;  %v12859_v21 = vld [vmem:[#allocation3 + $0x9cc] sm:$0xf]  ;;  %v10173_v3 = vor.u32 %v12815_v40, %v10170_v57  ;;  %v10506_v40 = vld [vmem:[#allocation3 + $0xb18] sm:$0xf0] }
 0x2db   :  { %4243 = vmatpush.bf16.msra.mxu0 %v10153_v28  ;;  %v10349_v28 = vor.u32 %v12859_v21, %v10346_v23  ;;  %v12875_v23 = vld [vmem:[#allocation3 + $0xa4c] sm:$0xf] }
 0x2dc   :  { %4256 = vmatpush.bf16.msra.mxu1 %v10281_v32  ;;  %v12823_v32 = vld [vmem:[#allocation3 + $0x8ac] sm:$0xf]  ;;  %v10413_v35 = vor.u32 %v12875_v23, %v10410_v24  ;;  %v12988_v24 = vld [vmem:[#allocation3 + $0x1cc] sm:$0xf0] }
 0x2dd   :  { %4269 = vmatpush.bf16.msra.mxu2 %v10409_v34  ;;  %v10202_v34 = vld [vmem:[#allocation3 + $0x8b8] sm:$0xf0] }
 0x2de   :  { %4282 = vmatpush.bf16.msra.mxu3 %v10537_v42  ;;  %v10458_v42 = vld [vmem:[#allocation3 + $0xab8] sm:$0xf0]  ;;  %v10205_v15 = vor.u32 %v12823_v32, %v10202_v34 }
 0x2df   :  { %4244 = vmatpush.bf16.msra.mxu0 %v10137_v47  ;;  %v10461_v18 = vor.u32 %v12887_v41, %v10458_v42  ;;  %v12819_v47 = vld [vmem:[#allocation3 + $0x88c] sm:$0xf] }
 0x2e0   :  { %4257 = vmatpush.bf16.msra.mxu1 %v10265_v38  ;;  %v10589_v38 = vor.u32 %v12919_v44, %v10586_v45  ;;  %v12839_v41 = vld [vmem:[#allocation3 + $0x92c] sm:$0xf]  ;;  %v10266_v45 = vld [vmem:[#allocation3 + $0x938] sm:$0xf0] }
 0x2e1   :  { %4270 = vmatpush.bf16.msra.mxu2 %v10393_v43  ;;  %v10314_v43 = vld [vmem:[#allocation3 + $0x998] sm:$0xf0] }
 0x2e2   :  { %4283 = vmatpush.bf16.msra.mxu3 %v10521_v51  ;;  %v10189_v51 = vor.u32 %v12819_v47, %v10186_v19  ;;  %v10317_v53 = vor.u32 %v12851_v48, %v10314_v43  ;;  %v10522_v47 = vld [vmem:[#allocation3 + $0xb38] sm:$0xf0]  ;;  %v12803_v48 = vld [vmem:[#allocation3 + $0x80c] sm:$0xf]  ;;  %v10269_v43 = vor.u32 %v12839_v41, %v10266_v45  ;;  %v13016_v45 = vld [vmem:[#allocation3 + $0x2ac] sm:$0xf0] }
 0x2e3   :  { %4245 = vmatpush.bf16.msra.mxu0 %v10121_v12  ;;  %v3263_v56 = vpop.f32.mrf.mxu0  ;;  %v10573_v12 = vor.u32 %v12915_v49, %v10570_v50  ;;  %v10250_v49 = vld [vmem:[#allocation3 + $0x918] sm:$0xf0]  ;;  %v12867_v50 = vld [vmem:[#allocation3 + $0xa0c] sm:$0xf] }
 0x2e4   :  { %4258 = vmatpush.bf16.msra.mxu1 %v10249_v63  ;;  %v3276_v58 = vpop.f32.mrf.mxu1 }
 0x2e5   :  { %4271 = vmatpush.bf16.msra.mxu2 %v10377_v0  ;;  %v3277_v63 = vadd.f32 %v3276_v58, %v3263_v56  ;;  %v12911_v0 = vld [vmem:[#allocation3 + $0xb6c] sm:$0xf]  ;;  %v12960_v58 = vld [vmem:[#allocation3 + $0xec] sm:$0xf0] }
 0x2e6   :  { %4284 = vmatpush.bf16.msra.mxu3 %v10505_v4  ;;  %4246 = vmatmul.bf16.vlgmr.msra.gmra.mxu0 %v14009_v11  ;;  %v10301_v4 = vor.u32 %v12847_v61, %v10298_v59  ;;  %v10557_v21 = vor.u32 %v12911_v0, %v10554_v1  ;;  %v10736_v61 = vld [vmem:[#allocation3 + $0xe0] sm:$0xf]  ;;  %v10253_v0 = vor.u32 %v12835_v14, %v10250_v49 }
 0x2e7   :  { %4290 = vmatpush.bf16.msrb.mxu0 %v10237_v5  ;;  %4259 = vmatmul.bf16.vlgmr.msra.gmra.mxu1 %v14012_v7  ;;  %v10429_v5 = vor.u32 %v12879_v60, %v10426_v62  ;;  %v12992_v60 = vld [vmem:[#allocation3 + $0x1ec] sm:$0xf0]  ;;  %v10992_v62 = vld [vmem:[#allocation3 + $0x2e0] sm:$0xf] }
 0x2e8   :  { %4303 = vmatpush.bf16.msrb.mxu1 %v10365_v8  ;;  %4272 = vmatmul.bf16.vlgmr.msra.gmra.mxu2 %v14003_v20  ;;  %v12811_v8 = vld [vmem:[#allocation3 + $0x84c] sm:$0xf]  ;;  %v10944_v14 = vld [vmem:[#allocation3 + $0x280] sm:$0xf] }
 0x2e9   :  { %4316 = vmatpush.bf16.msrb.mxu2 %v10493_v13  ;;  %4285 = vmatmul.bf16.vlgmr.msra.gmra.mxu3 %v14006_v29  ;;  %v10154_v13 = vld [vmem:[#allocation3 + $0x858] sm:$0xf0]  ;;  %v11072_v49 = vld [vmem:[#allocation3 + $0x380] sm:$0xf] }
 0x2ea   :  { %4329 = vmatpush.bf16.msrb.mxu3 %v10621_v22  ;;  %v10282_v22 = vld [vmem:[#allocation3 + $0x958] sm:$0xf0] }
 0x2eb   :  { %4291 = vmatpush.bf16.msrb.mxu0 %v10221_v27  ;;  %v3289_v17 = vpop.f32.mrf.mxu2  ;;  %v10538_v27 = vld [vmem:[#allocation3 + $0xb58] sm:$0xf0]  ;;  %v3265_v32 = vpop.f32.mrf.mxu0  ;;  %v10285_v34 = vor.u32 %v12843_v16, %v10282_v22  ;;  %v10848_v22 = vld [vmem:[#allocation3 + $0x1c0] sm:$0xf] }
 0x2ec   :  { %4304 = vmatpush.bf16.msrb.mxu1 %v10349_v28  ;;  %v3290_v25 = vadd.f32 %v3289_v17, %v3277_v63  ;;  %v3302_v10 = vpop.f32.mrf.mxu3  ;;  %v10157_v28 = vor.u32 %v12811_v8, %v10154_v13  ;;  %v3278_v42 = vpop.f32.mrf.mxu1  ;;  %v10541_v44 = vor.u32 %v12907_v26, %v10538_v27  ;;  %v13024_v63 = vld [vmem:[#allocation3 + $0x2ec] sm:$0xf0]  ;;  %v10737_v8 = vor.u32 %v12960_v58, %v10736_v61  ;;  %v10720_v17 = vld [vmem:[#allocation3 + $0xc0] sm:$0xf] }
 0x2ed   :  { %4317 = vmatpush.bf16.msrb.mxu2 %v10477_v6  ;;  %v10993_v16 = vor.u32 %v13024_v63, %v10992_v62  ;;  %v11104_v26 = vld [vmem:[#allocation3 + $0x3c0] sm:$0xf]  ;;  %v13052_v27 = vld [vmem:[#allocation3 + $0x3cc] sm:$0xf0]  ;;  %v10849_v32 = vor.u32 %v12988_v24, %v10848_v22 }
 0x2ee   :  { %4330 = vmatpush.bf16.msrb.mxu3 %v10605_v36  ;;  %v14030_v6 = vadd.f32 %v3302_v10, %v3290_v25  ;;  %v12807_v36 = vld [vmem:[#allocation3 + $0x82c] sm:$0xf]  ;;  %v10976_v25 = vld [vmem:[#allocation3 + $0x2c0] sm:$0xf]  ;;  %v13020_v10 = vld [vmem:[#allocation3 + $0x2cc] sm:$0xf0]  ;;  %v11105_v41 = vor.u32 %v13052_v27, %v11104_v26 }
 0x2ef   :  { %4292 = vmatpush.bf16.msrb.mxu0 %v10205_v15  ;;  %v12871_v15 = vld [vmem:[#allocation3 + $0xa2c] sm:$0xf]  ;;  %v10141_v19 = vor.u32 %v12807_v36, %v10138_v39  ;;  %v12952_v36 = vld [vmem:[#allocation3 + $0xac] sm:$0xf0]  ;;  %v10832_v39 = vld [vmem:[#allocation3 + $0x1a0] sm:$0xf] }
 0x2f0   :  { %4305 = vmatpush.bf16.msrb.mxu1 %v10333_v46  ;;  %v10394_v46 = vld [vmem:[#allocation3 + $0xa38] sm:$0xf0]  ;;  %v12984_v42 = vld [vmem:[#allocation3 + $0x1ac] sm:$0xf0]  ;;  %v11056_v62 = vld [vmem:[#allocation3 + $0x360] sm:$0xf] }
 0x2f1   :  { %4318 = vmatpush.bf16.msrb.mxu2 %v10461_v18  ;;  %v12903_v18 = vld [vmem:[#allocation3 + $0xb2c] sm:$0xf]  ;;  %v10397_v33 = vor.u32 %v12871_v15, %v10394_v46  ;;  %v11088_v15 = vld [vmem:[#allocation3 + $0x3a0] sm:$0xf]  ;;  %v13048_v46 = vld [vmem:[#allocation3 + $0x3ac] sm:$0xf0] }
 0x2f2   :  { %4331 = vmatpush.bf16.msrb.mxu3 %v10589_v38  ;;  %v10122_v38 = vld [vmem:[#allocation3 + $0x818] sm:$0xf0]  ;;  %v10525_v56 = vor.u32 %v12903_v18, %v10522_v47  ;;  %v10833_v47 = vor.u32 %v12984_v42, %v10832_v39  ;;  %v12976_v58 = vld [vmem:[#allocation3 + $0x16c] sm:$0xf0]  ;;  %v10768_v39 = vld [vmem:[#allocation3 + $0x120] sm:$0xf] }
 0x2f3   :  { %4293 = vmatpush.bf16.msrb.mxu0 %v10189_v51  ;;  %v3291_v51 = vpop.f32.mrf.mxu2  ;;  %v10125_v59 = vor.u32 %v12803_v48, %v10122_v38  ;;  %v10688_v48 = vld [vmem:[#allocation3 + $0x80] sm:$0xf]  ;;  %v13040_v63 = vld [vmem:[#allocation3 + $0x36c] sm:$0xf0] }
 0x2f4   :  { %4306 = vmatpush.bf16.msrb.mxu1 %v10317_v53  ;;  %v10378_v53 = vld [vmem:[#allocation3 + $0xa18] sm:$0xf0]  ;;  %v3304_v57 = vpop.f32.mrf.mxu3  ;;  %v10816_v38 = vld [vmem:[#allocation3 + $0x180] sm:$0xf]  ;;  %v13004_v22 = vld [vmem:[#allocation3 + $0x24c] sm:$0xf0] }
 0x2f5   :  { %4319 = vmatpush.bf16.msrb.mxu2 %v10445_v9  ;;  %v12899_v9 = vld [vmem:[#allocation3 + $0xb0c] sm:$0xf]  ;;  %v10381_v1 = vor.u32 %v12867_v50, %v10378_v53  ;;  %v10672_v53 = vld [vmem:[#allocation3 + $0x60] sm:$0xf] }
 0x2f6   :  { %4332 = vmatpush.bf16.msrb.mxu3 %v10573_v12  ;;  %v10864_v12 = vld [vmem:[#allocation3 + $0x1e0] sm:$0xf] }
 0x2f7   :  { %4294 = vmatpush.bf16.msrb.mxu0 %v10173_v3  ;;  %v11120_v3 = vld [vmem:[#allocation3 + $0x3e0] sm:$0xf]  ;;  %v10865_v13 = vor.u32 %v12992_v60, %v10864_v12 }
 0x2f8   :  { %4307 = vmatpush.bf16.msrb.mxu1 %v10301_v4  ;;  %v13056_v4 = vld [vmem:[#allocation3 + $0x3ec] sm:$0xf0]  ;;  %v10928_v12 = vld [vmem:[#allocation3 + $0x260] sm:$0xf] }
 0x2f9   :  { %4320 = vmatpush.bf16.msrb.mxu2 %v10429_v5  ;;  %v10509_v5 = vor.u32 %v12899_v9, %v10506_v40  ;;  %v11121_v23 = vor.u32 %v13056_v4, %v11120_v3  ;;  %v12944_v9 = vld [vmem:[#allocation3 + $0x6c] sm:$0xf0]  ;;  %v10800_v40 = vld [vmem:[#allocation3 + $0x160] sm:$0xf] }
 0x2fa   :  { %4333 = vmatpush.bf16.msrb.mxu3 %v10557_v21  ;;  %v12956_v21 = vld [vmem:[#allocation3 + $0xcc] sm:$0xf0]  ;;  %v10656_v4 = vld [vmem:[#allocation3 + $0x40] sm:$0xf] }
 0x2fb   :  { %4295 = vmatpush.bf16.msrb.mxu0 %v10157_v28  ;;  %v10721_v28 = vor.u32 %v12956_v21, %v10720_v17  ;;  %v12972_v17 = vld [vmem:[#allocation3 + $0x14c] sm:$0xf0]  ;;  %v10912_v21 = vld [vmem:[#allocation3 + $0x240] sm:$0xf] }
 0x2fc   :  { %4308 = vmatpush.bf16.msrb.mxu1 %v10285_v34  ;;  %v10977_v34 = vor.u32 %v13020_v10, %v10976_v25  ;;  %v11040_v25 = vld [vmem:[#allocation3 + $0x340] sm:$0xf]  ;;  %v13036_v10 = vld [vmem:[#allocation3 + $0x34c] sm:$0xf0] }
 0x2fd   :  { %4321 = vmatpush.bf16.msrb.mxu2 %v10413_v35  ;;  %v10704_v35 = vld [vmem:[#allocation3 + $0xa0] sm:$0xf]  ;;  %v11041_v42 = vor.u32 %v13036_v10, %v11040_v25 }
 0x2fe   :  { %4334 = vmatpush.bf16.msrb.mxu3 %v10541_v44  ;;  %v10960_v44 = vld [vmem:[#allocation3 + $0x2a0] sm:$0xf]  ;;  %v10705_v18 = vor.u32 %v12952_v36, %v10704_v35  ;;  %v12936_v36 = vld [vmem:[#allocation3 + $0x2c] sm:$0xf0] }
 0x2ff   :  { %4296 = vmatpush.bf16.msrb.mxu0 %v10141_v19  ;;  %v10961_v19 = vor.u32 %v13016_v45, %v10960_v44  ;;  %v10640_v35 = vld [vmem:[#allocation3 + $0x20] sm:$0xf]  ;;  %v12968_v44 = vld [vmem:[#allocation3 + $0x12c] sm:$0xf0] }
 0x300   :  { %4309 = vmatpush.bf16.msrb.mxu1 %v10269_v43  ;;  %v11089_v43 = vor.u32 %v13048_v46, %v11088_v15  ;;  %v10896_v45 = vld [vmem:[#allocation3 + $0x220] sm:$0xf]  ;;  %v13000_v15 = vld [vmem:[#allocation3 + $0x22c] sm:$0xf0] }
 0x301   :  { %4322 = vmatpush.bf16.msrb.mxu2 %v10397_v33  ;;  %v12980_v33 = vld [vmem:[#allocation3 + $0x18c] sm:$0xf0]  ;;  %v11024_v46 = vld [vmem:[#allocation3 + $0x320] sm:$0xf] }
 0x302   :  { %4335 = vmatpush.bf16.msrb.mxu3 %v10525_v56 }
 0x303   :  { %4297 = vmatpush.bf16.msrb.mxu0 %v10125_v59  ;;  %v3315_v51 = vpop.f32.mrf.mxu0  ;;  %v13008_v59 = vld [vmem:[#allocation3 + $0x26c] sm:$0xf0] }
 0x304   :  { %4310 = vmatpush.bf16.msrb.mxu1 %v10253_v0  ;;  %v3328_v57 = vpop.f32.mrf.mxu1  ;;  %v10673_v0 = vor.u32 %v12944_v9, %v10672_v53  ;;  %v10929_v3 = vor.u32 %v13008_v59, %v10928_v12  ;;  %v10738_v53 = vld [vmem:[#allocation3 + $0xf0] sm:$0xf0]  ;;  %v12990_v9 = vld [vmem:[#allocation3 + $0x1e4] sm:$0xf] }
 0x305   :  { %4323 = vmatpush.bf16.msrb.mxu2 %v10381_v1  ;;  %v3329_v60 = vadd.f32 %v3328_v57, %v3315_v51  ;;  %v10801_v1 = vor.u32 %v12976_v58, %v10800_v40  ;;  %v13028_v51 = vld [vmem:[#allocation3 + $0x30c] sm:$0xf0]  ;;  %v10866_v57 = vld [vmem:[#allocation3 + $0x1f0] sm:$0xf0] }
 0x306   :  { %4336 = vmatpush.bf16.msrb.mxu3 %v10509_v5  ;;  %4298 = vmatmul.bf16.vlgmr.msrb.gmra.mxu0 %v14009_v11  ;;  %v13044_v11 = vld [vmem:[#allocation3 + $0x38c] sm:$0xf0]  ;;  %v10994_v58 = vld [vmem:[#allocation3 + $0x2f0] sm:$0xf0] }
 0x307   :  { %5114 = vmatpush.bf16.msra.mxu0 %v10737_v8  ;;  %4311 = vmatmul.bf16.vlgmr.msrb.gmra.mxu1 %v14012_v7  ;;  %v10817_v7 = vor.u32 %v12980_v33, %v10816_v38  ;;  %v11073_v61 = vor.u32 %v13044_v11, %v11072_v49  ;;  %v12940_v5 = vld [vmem:[#allocation3 + $0x4c] sm:$0xf0]  ;;  %v10784_v8 = vld [vmem:[#allocation3 + $0x140] sm:$0xf]  ;;  %v10897_v38 = vor.u32 %v13000_v15, %v10896_v45 }
 0x308   :  { %5127 = vmatpush.bf16.msra.mxu1 %v10865_v13  ;;  %4324 = vmatmul.bf16.vlgmr.msrb.gmra.mxu2 %v14003_v20  ;;  %v12948_v20 = vld [vmem:[#allocation3 + $0x8c] sm:$0xf0]  ;;  %v10657_v26 = vor.u32 %v12940_v5, %v10656_v4  ;;  %v12954_v4 = vld [vmem:[#allocation3 + $0xc4] sm:$0xf]  ;;  %v10722_v5 = vld [vmem:[#allocation3 + $0xd0] sm:$0xf0] }
 0x309   :  { %5140 = vmatpush.bf16.msra.mxu2 %v10993_v16  ;;  %4337 = vmatmul.bf16.vlgmr.msrb.gmra.mxu3 %v14006_v29  ;;  %v13012_v29 = vld [vmem:[#allocation3 + $0x28c] sm:$0xf0]  ;;  %v10689_v50 = vor.u32 %v12948_v20, %v10688_v48  ;;  %v11057_v16 = vor.u32 %v13040_v63, %v11056_v62  ;;  %v10769_v20 = vor.u32 %v12968_v44, %v10768_v39  ;;  %v11122_v62 = vld [vmem:[#allocation3 + $0x3f0] sm:$0xf0] }
 0x30a   :  { %5153 = vmatpush.bf16.msra.mxu3 %v11121_v23  ;;  %v10945_v56 = vor.u32 %v13012_v29, %v10944_v14  ;;  %v12932_v48 = vld [vmem:[#allocation3 + $0xc] sm:$0xf0]  ;;  %v10880_v14 = vld [vmem:[#allocation3 + $0x200] sm:$0xf]  ;;  %v10962_v39 = vld [vmem:[#allocation3 + $0x2b0] sm:$0xf0] }
 0x30b   :  { %5115 = vmatpush.bf16.msra.mxu0 %v10721_v28  ;;  %v3341_v13 = vpop.f32.mrf.mxu2  ;;  %v3317_v28 = vpop.f32.mrf.mxu0  ;;  %v12964_v33 = vld [vmem:[#allocation3 + $0x10c] sm:$0xf0] }
 0x30c   :  { %5128 = vmatpush.bf16.msra.mxu1 %v10849_v32  ;;  %v3342_v23 = vadd.f32 %v3341_v13, %v3329_v60  ;;  %v3354_v24 = vpop.f32.mrf.mxu3  ;;  %v10785_v32 = vor.u32 %v12972_v17, %v10784_v8  ;;  %v12996_v11 = vld [vmem:[#allocation3 + $0x20c] sm:$0xf0]  ;;  %v13054_v60 = vld [vmem:[#allocation3 + $0x3e4] sm:$0xf]  ;;  %v10706_v28 = vld [vmem:[#allocation3 + $0xb0] sm:$0xf0] }
 0x30d   :  { %5141 = vmatpush.bf16.msra.mxu2 %v10977_v34  ;;  %v10913_v34 = vor.u32 %v13004_v22, %v10912_v21  ;;  %v10881_v59 = vor.u32 %v12996_v11, %v10880_v14  ;;  %v12986_v8 = vld [vmem:[#allocation3 + $0x1c4] sm:$0xf]  ;;  %v11125_v13 = vor.u32 %v13054_v60, %v11122_v62  ;;  %v10978_v21 = vld [vmem:[#allocation3 + $0x2d0] sm:$0xf0] }
 0x30e   :  { %5154 = vmatpush.bf16.msra.mxu3 %v11105_v41  ;;  %v14036_v27 = vadd.f32 %v3354_v24, %v3342_v23  ;;  %v3330_v41 = vpop.f32.mrf.mxu1  ;;  %v13018_v17 = vld [vmem:[#allocation3 + $0x2c4] sm:$0xf]  ;;  %v11106_v23 = vld [vmem:[#allocation3 + $0x3d0] sm:$0xf0]  ;;  %v10725_v24 = vor.u32 %v12954_v4, %v10722_v5 }
 0x30f   :  { %5116 = vmatpush.bf16.msra.mxu0 %v10705_v18  ;;  %v13032_v18 = vld [vmem:[#allocation3 + $0x32c] sm:$0xf0]  ;;  %v13050_v22 = vld [vmem:[#allocation3 + $0x3c4] sm:$0xf]  ;;  %v10981_v10 = vor.u32 %v13018_v17, %v10978_v21  ;;  %v10914_v17 = vld [vmem:[#allocation3 + $0x250] sm:$0xf0] }
 0x310   :  { %5129 = vmatpush.bf16.msra.mxu1 %v10833_v47  ;;  %v10641_v47 = vor.u32 %v12936_v36, %v10640_v35  ;;  %v11025_v49 = vor.u32 %v13032_v18, %v11024_v46  ;;  %v10834_v35 = vld [vmem:[#allocation3 + $0x1b0] sm:$0xf0]  ;;  %v13014_v36 = vld [vmem:[#allocation3 + $0x2a4] sm:$0xf] }
 0x311   :  { %5142 = vmatpush.bf16.msra.mxu2 %v10961_v19  ;;  %v10624_v19 = vld [vmem:[#allocation3] sm:$0xf]  ;;  %v13046_v41 = vld [vmem:[#allocation3 + $0x3a4] sm:$0xf]  ;;  %v10965_v15 = vor.u32 %v13014_v36, %v10962_v39  ;;  %v10690_v18 = vld [vmem:[#allocation3 + $0x90] sm:$0xf0] }
 0x312   :  { %5155 = vmatpush.bf16.msra.mxu3 %v11089_v43  ;;  %v10752_v43 = vld [vmem:[#allocation3 + $0x100] sm:$0xf]  ;;  %v10625_v40 = vor.u32 %v12932_v48, %v10624_v19  ;;  %v12946_v46 = vld [vmem:[#allocation3 + $0x84] sm:$0xf]  ;;  %v10818_v48 = vld [vmem:[#allocation3 + $0x190] sm:$0xf0] }
 0x313   :  { %5117 = vmatpush.bf16.msra.mxu0 %v10689_v50  ;;  %v3343_v29 = vpop.f32.mrf.mxu2  ;;  %v11008_v50 = vld [vmem:[#allocation3 + $0x300] sm:$0xf]  ;;  %v10753_v12 = vor.u32 %v12964_v33, %v10752_v43  ;;  %v13042_v43 = vld [vmem:[#allocation3 + $0x384] sm:$0xf]  ;;  %v11074_v33 = vld [vmem:[#allocation3 + $0x390] sm:$0xf0]  ;;  %v10693_v14 = vor.u32 %v12946_v46, %v10690_v18 }
 0x314   :  { %5130 = vmatpush.bf16.msra.mxu1 %v10817_v7  ;;  %v3356_v7 = vpop.f32.mrf.mxu3  ;;  %v11009_v63 = vor.u32 %v13028_v51, %v11008_v50  ;;  %v12942_v51 = vld [vmem:[#allocation3 + $0x64] sm:$0xf] }
 0x315   :  { %5143 = vmatpush.bf16.msra.mxu2 %v10945_v56  ;;  %v12958_v56 = vld [vmem:[#allocation3 + $0xe4] sm:$0xf]  ;;  %v10674_v7 = vld [vmem:[#allocation3 + $0x70] sm:$0xf0] }
 0x316   :  { %5156 = vmatpush.bf16.msra.mxu3 %v11073_v61  ;;  %v13022_v61 = vld [vmem:[#allocation3 + $0x2e4] sm:$0xf] }
 0x317   :  { %5118 = vmatpush.bf16.msra.mxu0 %v10673_v0  ;;  %v10741_v0 = vor.u32 %v12958_v56, %v10738_v53  ;;  %v12974_v56 = vld [vmem:[#allocation3 + $0x164] sm:$0xf]  ;;  %v11077_v53 = vor.u32 %v13042_v43, %v11074_v33 }
 0x318   :  { %5131 = vmatpush.bf16.msra.mxu1 %v10801_v1  ;;  %v10869_v1 = vor.u32 %v12990_v9, %v10866_v57  ;;  %v13006_v57 = vld [vmem:[#allocation3 + $0x264] sm:$0xf] }
 0x319   :  { %5144 = vmatpush.bf16.msra.mxu2 %v10929_v3  ;;  %v10997_v3 = vor.u32 %v13022_v61, %v10994_v58  ;;  %v10930_v61 = vld [vmem:[#allocation3 + $0x270] sm:$0xf0]  ;;  %v13038_v58 = vld [vmem:[#allocation3 + $0x364] sm:$0xf] }
 0x31a   :  { %5157 = vmatpush.bf16.msra.mxu3 %v11057_v16  ;;  %v10850_v16 = vld [vmem:[#allocation3 + $0x1d0] sm:$0xf0]  ;;  %v10933_v62 = vor.u32 %v13006_v57, %v10930_v61  ;;  %v13034_v21 = vld [vmem:[#allocation3 + $0x344] sm:$0xf]  ;;  %v13025_v57 = vld [vmem:[#allocation3 + $0x2f4] sm:$0xf0] }
 0x31b   :  { %5119 = vmatpush.bf16.msra.mxu0 %v10657_v26  ;;  %v10853_v25 = vor.u32 %v12986_v8, %v10850_v16  ;;  %v12950_v26 = vld [vmem:[#allocation3 + $0xa4] sm:$0xf] }
 0x31c   :  { %5132 = vmatpush.bf16.msra.mxu1 %v10785_v32  ;;  %v12982_v32 = vld [vmem:[#allocation3 + $0x1a4] sm:$0xf]  ;;  %v10709_v44 = vor.u32 %v12950_v26, %v10706_v28 }
 0x31d   :  { %5145 = vmatpush.bf16.msra.mxu2 %v10913_v34  ;;  %v11109_v34 = vor.u32 %v13050_v22, %v11106_v23  ;;  %v10837_v45 = vor.u32 %v12982_v32, %v10834_v35  ;;  %v13002_v16 = vld [vmem:[#allocation3 + $0x244] sm:$0xf]  ;;  %v11042_v22 = vld [vmem:[#allocation3 + $0x350] sm:$0xf0] }
 0x31e   :  { %5158 = vmatpush.bf16.msra.mxu3 %v11041_v42  ;;  %v11090_v42 = vld [vmem:[#allocation3 + $0x3b0] sm:$0xf0]  ;;  %v10917_v26 = vor.u32 %v13002_v16, %v10914_v17  ;;  %v12934_v28 = vld [vmem:[#allocation3 + $0x24] sm:$0xf]  ;;  %v11045_v39 = vor.u32 %v13034_v21, %v11042_v22  ;;  %v13021_v16 = vld [vmem:[#allocation3 + $0x2d4] sm:$0xf0] }
 0x31f   :  { %5120 = vmatpush.bf16.msra.mxu0 %v10641_v47  ;;  %v12978_v47 = vld [vmem:[#allocation3 + $0x184] sm:$0xf]  ;;  %v11093_v19 = vor.u32 %v13046_v41, %v11090_v42  ;;  %v10642_v32 = vld [vmem:[#allocation3 + $0x30] sm:$0xf0]  ;;  %v11112_v17 = vld [vmem:[#allocation3 + $0x3c8] sm:$0xf] }
 0x320   :  { %5133 = vmatpush.bf16.msra.mxu1 %v10769_v20  ;;  %v13010_v20 = vld [vmem:[#allocation3 + $0x284] sm:$0xf]  ;;  %v10770_v41 = vld [vmem:[#allocation3 + $0x130] sm:$0xf0]  ;;  %v10645_v46 = vor.u32 %v12934_v28, %v10642_v32  ;;  %v13053_v21 = vld [vmem:[#allocation3 + $0x3d4] sm:$0xf0] }
 0x321   :  { %5146 = vmatpush.bf16.msra.mxu2 %v10897_v38  ;;  %v10946_v38 = vld [vmem:[#allocation3 + $0x290] sm:$0xf0]  ;;  %v12998_v42 = vld [vmem:[#allocation3 + $0x224] sm:$0xf]  ;;  %v11113_v28 = vor.u32 %v13053_v21, %v11112_v17  ;;  %v12985_v32 = vld [vmem:[#allocation3 + $0x1b4] sm:$0xf0] }
 0x322   :  { %5159 = vmatpush.bf16.msra.mxu3 %v11025_v49  ;;  %v10821_v49 = vor.u32 %v12978_v47, %v10818_v48  ;;  %v10949_v11 = vor.u32 %v13010_v20, %v10946_v38  ;;  %v12930_v18 = vld [vmem:[#allocation3 + $0x4] sm:$0xf]  ;;  %v10626_v47 = vld [vmem:[#allocation3 + $0x10] sm:$0xf0]  ;;  %v11048_v17 = vld [vmem:[#allocation3 + $0x348] sm:$0xf] }
 0x323   :  { %5121 = vmatpush.bf16.msra.mxu0 %v10625_v40  ;;  %v4143_v29 = vpop.f32.mrf.mxu0  ;;  %v10802_v40 = vld [vmem:[#allocation3 + $0x170] sm:$0xf0]  ;;  %v12962_v20 = vld [vmem:[#allocation3 + $0x104] sm:$0xf]  ;;  %v13037_v21 = vld [vmem:[#allocation3 + $0x354] sm:$0xf0] }
 0x324   :  { %5134 = vmatpush.bf16.msra.mxu1 %v10753_v12  ;;  %v4156_v50 = vpop.f32.mrf.mxu1  ;;  %v11058_v12 = vld [vmem:[#allocation3 + $0x370] sm:$0xf0]  ;;  %v10805_v60 = vor.u32 %v12974_v56, %v10802_v40  ;;  %v12994_v43 = vld [vmem:[#allocation3 + $0x204] sm:$0xf]  ;;  %v10872_v56 = vld [vmem:[#allocation3 + $0x1e8] sm:$0xf] }
 0x325   :  { %5147 = vmatpush.bf16.msra.mxu2 %v10881_v59  ;;  %v4157_v9 = vadd.f32 %v4156_v50, %v4143_v29  ;;  %v10677_v59 = vor.u32 %v12942_v51, %v10674_v7  ;;  %v11061_v4 = vor.u32 %v13038_v58, %v11058_v12  ;;  %v10754_v38 = vld [vmem:[#allocation3 + $0x110] sm:$0xf0]  ;;  %v10744_v51 = vld [vmem:[#allocation3 + $0xe8] sm:$0xf]  ;;  %v12961_v7 = vld [vmem:[#allocation3 + $0xf4] sm:$0xf0] }
 0x326   :  { %5160 = vmatpush.bf16.msra.mxu3 %v11009_v63  ;;  %5122 = vmatmul.bf16.vlgmr.msra.gmra.mxu0 %v13982_v55  ;;  %v10882_v29 = vld [vmem:[#allocation3 + $0x210] sm:$0xf0]  ;;  %v11000_v40 = vld [vmem:[#allocation3 + $0x2e8] sm:$0xf]  ;;  %v10757_v61 = vor.u32 %v12962_v20, %v10754_v38  ;;  %v13013_v20 = vld [vmem:[#allocation3 + $0x294] sm:$0xf0] }
 0x327   :  { %5166 = vmatpush.bf16.msrb.mxu0 %v10741_v0  ;;  %5135 = vmatmul.bf16.vlgmr.msra.gmra.mxu1 %v13984_v2  ;;  %v12938_v0 = vld [vmem:[#allocation3 + $0x44] sm:$0xf]  ;;  %v10885_v58 = vor.u32 %v12994_v43, %v10882_v29  ;;  %v11128_v12 = vld [vmem:[#allocation3 + $0x3e8] sm:$0xf]  ;;  %v13045_v43 = vld [vmem:[#allocation3 + $0x394] sm:$0xf0] }
 0x328   :  { %5179 = vmatpush.bf16.msrb.mxu1 %v10869_v1  ;;  %5148 = vmatmul.bf16.vlgmr.msra.gmra.mxu2 %v13978_v52  ;;  %v10658_v1 = vld [vmem:[#allocation3 + $0x50] sm:$0xf0]  ;;  %v11080_v38 = vld [vmem:[#allocation3 + $0x388] sm:$0xf] }
 0x329   :  { %5192 = vmatpush.bf16.msrb.mxu2 %v10997_v3  ;;  %5161 = vmatmul.bf16.vlgmr.msra.gmra.mxu3 %v13980_v54  ;;  %v12970_v3 = vld [vmem:[#allocation3 + $0x144] sm:$0xf] }
 0x32a   :  { %5205 = vmatpush.bf16.msrb.mxu3 %v11125_v13  ;;  %v10786_v13 = vld [vmem:[#allocation3 + $0x150] sm:$0xf0] }
 0x32b   :  { %5167 = vmatpush.bf16.msrb.mxu0 %v10725_v24  ;;  %v4169_v63 = vpop.f32.mrf.mxu2  ;;  %v10661_v24 = vor.u32 %v12938_v0, %v10658_v1  ;;  %v11001_v0 = vor.u32 %v13025_v57, %v11000_v40  ;;  %v10728_v1 = vld [vmem:[#allocation3 + $0xc8] sm:$0xf]  ;;  %v13009_v57 = vld [vmem:[#allocation3 + $0x274] sm:$0xf0] }
 0x32c   :  { %5180 = vmatpush.bf16.msrb.mxu1 %v10853_v25  ;;  %v4170_v5 = vadd.f32 %v4169_v63, %v4157_v9  ;;  %v4182_v8 = vpop.f32.mrf.mxu3  ;;  %v4145_v25 = vpop.f32.mrf.mxu0  ;;  %v12993_v9 = vld [vmem:[#allocation3 + $0x1f4] sm:$0xf0]  ;;  %v10936_v40 = vld [vmem:[#allocation3 + $0x268] sm:$0xf] }
 0x32d   :  { %5193 = vmatpush.bf16.msrb.mxu2 %v10981_v10  ;;  %v10789_v10 = vor.u32 %v12970_v3, %v10786_v13  ;;  %v4158_v35 = vpop.f32.mrf.mxu1  ;;  %v10873_v63 = vor.u32 %v12993_v9, %v10872_v56  ;;  %v12957_v3 = vld [vmem:[#allocation3 + $0xd4] sm:$0xf0]  ;;  %v10984_v13 = vld [vmem:[#allocation3 + $0x2c8] sm:$0xf]  ;;  %v11081_v56 = vor.u32 %v13045_v43, %v11080_v38 }
 0x32e   :  { %5206 = vmatpush.bf16.msrb.mxu3 %v11109_v34  ;;  %v4183_v23 = vadd.f32 %v4182_v8, %v4170_v5  ;;  %v12966_v34 = vld [vmem:[#allocation3 + $0x124] sm:$0xf]  ;;  %v12989_v8 = vld [vmem:[#allocation3 + $0x1d4] sm:$0xf0]  ;;  %v10729_v22 = vor.u32 %v12957_v3, %v10728_v1  ;;  %v10712_v25 = vld [vmem:[#allocation3 + $0xa8] sm:$0xf] }
 0x32f   :  { %5168 = vmatpush.bf16.msrb.mxu0 %v10709_v44  ;;  %v10898_v44 = vld [vmem:[#allocation3 + $0x230] sm:$0xf0]  ;;  %v13017_v35 = vld [vmem:[#allocation3 + $0x2b4] sm:$0xf0]  ;;  %v10792_v1 = vld [vmem:[#allocation3 + $0x148] sm:$0xf] }
 0x330   :  { %5181 = vmatpush.bf16.msrb.mxu1 %v10837_v45  ;;  %v14043_v36 = vadd.f32 %v4183_v23, %v14018_v31  ;;  %v13030_v45 = vld [vmem:[#allocation3 + $0x324] sm:$0xf]  ;;  %v10901_v48 = vor.u32 %v12998_v42, %v10898_v44  ;;  %v12977_v9 = vld [vmem:[#allocation3 + $0x174] sm:$0xf0]  ;;  %v10888_v43 = vld [vmem:[#allocation3 + $0x208] sm:$0xf] }
 0x331   :  { %5194 = vmatpush.bf16.msrb.mxu2 %v10965_v15  ;;  %v11026_v15 = vld [vmem:[#allocation3 + $0x330] sm:$0xf0]  ;;  %v12965_v38 = vld [vmem:[#allocation3 + $0x114] sm:$0xf0] }
 0x332   :  { %5207 = vmatpush.bf16.msrb.mxu3 %v11093_v19  ;;  %v10773_v19 = vor.u32 %v12966_v34, %v10770_v41  ;;  %v10968_v34 = vld [vmem:[#allocation3 + $0x2a8] sm:$0xf]  ;;  %v13049_v41 = vld [vmem:[#allocation3 + $0x3b4] sm:$0xf0] }
 0x333   :  { %5169 = vmatpush.bf16.msrb.mxu0 %v10693_v14  ;;  %v4171_v33 = vpop.f32.mrf.mxu2  ;;  %v11029_v14 = vor.u32 %v13030_v45, %v11026_v15  ;;  %v10969_v45 = vor.u32 %v13017_v35, %v10968_v34  ;;  %v10696_v15 = vld [vmem:[#allocation3 + $0x88] sm:$0xf] }
 0x334   :  { %5182 = vmatpush.bf16.msrb.mxu1 %v10821_v49  ;;  %v13026_v49 = vld [vmem:[#allocation3 + $0x304] sm:$0xf]  ;;  %v4184_v50 = vpop.f32.mrf.mxu3 }
 0x335   :  { %5195 = vmatpush.bf16.msrb.mxu2 %v10949_v11  ;;  %v11010_v11 = vld [vmem:[#allocation3 + $0x310] sm:$0xf0]  ;;  %v10680_v50 = vld [vmem:[#allocation3 + $0x68] sm:$0xf] }
 0x336   :  { %5208 = vmatpush.bf16.msrb.mxu3 %v11077_v53  ;;  %v10629_v53 = vor.u32 %v12930_v18, %v10626_v47  ;;  %v10824_v18 = vld [vmem:[#allocation3 + $0x188] sm:$0xf] }
 0x337   :  { %5170 = vmatpush.bf16.msrb.mxu0 %v10677_v59  ;;  %v13057_v59 = vld [vmem:[#allocation3 + $0x3f4] sm:$0xf0] }
 0x338   :  { %5183 = vmatpush.bf16.msrb.mxu1 %v10805_v60  ;;  %v11013_v60 = vor.u32 %v13026_v49, %v11010_v11  ;;  %v11129_v5 = vor.u32 %v13057_v59, %v11128_v12 }
 0x339   :  { %5196 = vmatpush.bf16.msrb.mxu2 %v10933_v62  ;;  %v10745_v62 = vor.u32 %v12961_v7, %v10744_v51  ;;  %v12945_v51 = vld [vmem:[#allocation3 + $0x74] sm:$0xf0]  ;;  %v10808_v7 = vld [vmem:[#allocation3 + $0x168] sm:$0xf] }
 0x33a   :  { %5209 = vmatpush.bf16.msrb.mxu3 %v11061_v4  ;;  %v10856_v4 = vld [vmem:[#allocation3 + $0x1c8] sm:$0xf]  ;;  %v10681_v12 = vor.u32 %v12945_v51, %v10680_v50  ;;  %v10809_v59 = vor.u32 %v12977_v9, %v10808_v7  ;;  %v12959_v51 = vld [vmem:[#allocation3 + $0xec] sm:$0xf]  ;;  %v10746_v7 = vld [vmem:[#allocation3 + $0xf8] sm:$0xf0] }
 0x33b   :  { %5171 = vmatpush.bf16.msrb.mxu0 %v10661_v24  ;;  %v10857_v23 = vor.u32 %v12989_v8, %v10856_v4  ;;  %v10985_v24 = vor.u32 %v13021_v16, %v10984_v13  ;;  %v12973_v8 = vld [vmem:[#allocation3 + $0x154] sm:$0xf0]  ;;  %v10920_v13 = vld [vmem:[#allocation3 + $0x248] sm:$0xf]  ;;  %v10874_v9 = vld [vmem:[#allocation3 + $0x1f8] sm:$0xf0] }
 0x33c   :  { %5184 = vmatpush.bf16.msrb.mxu1 %v10789_v10  ;;  %v12953_v10 = vld [vmem:[#allocation3 + $0xb4] sm:$0xf0] }
 0x33d   :  { %5197 = vmatpush.bf16.msrb.mxu2 %v10917_v26  ;;  %v10840_v26 = vld [vmem:[#allocation3 + $0x1a8] sm:$0xf]  ;;  %v10713_v42 = vor.u32 %v12953_v10, %v10712_v25  ;;  %v13005_v16 = vld [vmem:[#allocation3 + $0x254] sm:$0xf0]  ;;  %v10793_v25 = vor.u32 %v12973_v8, %v10792_v1  ;;  %v12955_v1 = vld [vmem:[#allocation3 + $0xcc] sm:$0xf] }
 0x33e   :  { %5210 = vmatpush.bf16.msrb.mxu3 %v11045_v39  ;;  %v11096_v39 = vld [vmem:[#allocation3 + $0x3a8] sm:$0xf]  ;;  %v10841_v44 = vor.u32 %v12985_v32, %v10840_v26  ;;  %v10921_v10 = vor.u32 %v13005_v16, %v10920_v13  ;;  %v10858_v8 = vld [vmem:[#allocation3 + $0x1d8] sm:$0xf0]  ;;  %v13019_v13 = vld [vmem:[#allocation3 + $0x2cc] sm:$0xf] }
 0x33f   :  { %5172 = vmatpush.bf16.msrb.mxu0 %v10645_v46  ;;  %v12949_v46 = vld [vmem:[#allocation3 + $0x94] sm:$0xf0]  ;;  %v11097_v47 = vor.u32 %v13049_v41, %v11096_v39  ;;  %v10648_v26 = vld [vmem:[#allocation3 + $0x28] sm:$0xf]  ;;  %v11049_v39 = vor.u32 %v13037_v21, %v11048_v17  ;;  %v10986_v16 = vld [vmem:[#allocation3 + $0x2d8] sm:$0xf0] }
 0x340   :  { %5185 = vmatpush.bf16.msrb.mxu1 %v10773_v19  ;;  %v12981_v19 = vld [vmem:[#allocation3 + $0x194] sm:$0xf0]  ;;  %v10697_v33 = vor.u32 %v12949_v46, %v10696_v15  ;;  %v10776_v32 = vld [vmem:[#allocation3 + $0x128] sm:$0xf]  ;;  %v13051_v17 = vld [vmem:[#allocation3 + $0x3cc] sm:$0xf] }
 0x341   :  { %5198 = vmatpush.bf16.msrb.mxu2 %v10901_v48  ;;  %v10952_v48 = vld [vmem:[#allocation3 + $0x288] sm:$0xf]  ;;  %v10825_v29 = vor.u32 %v12981_v19, %v10824_v18  ;;  %v12969_v41 = vld [vmem:[#allocation3 + $0x134] sm:$0xf0]  ;;  %v11114_v21 = vld [vmem:[#allocation3 + $0x3d8] sm:$0xf0] }
 0x342   :  { %5211 = vmatpush.bf16.msrb.mxu3 %v11029_v14  ;;  %v10953_v49 = vor.u32 %v13013_v20, %v10952_v48  ;;  %v13033_v15 = vld [vmem:[#allocation3 + $0x334] sm:$0xf0]  ;;  %v10632_v18 = vld [vmem:[#allocation3 + $0x8] sm:$0xf]  ;;  %v10777_v19 = vor.u32 %v12969_v41, %v10776_v32  ;;  %v10842_v32 = vld [vmem:[#allocation3 + $0x1b8] sm:$0xf0] }
 0x343   :  { %5173 = vmatpush.bf16.msrb.mxu0 %v10629_v53  ;;  %v4195_v14 = vpop.f32.mrf.mxu0  ;;  %v10760_v20 = vld [vmem:[#allocation3 + $0x108] sm:$0xf]  ;;  %v13047_v41 = vld [vmem:[#allocation3 + $0x3ac] sm:$0xf] }
 0x344   :  { %5186 = vmatpush.bf16.msrb.mxu1 %v10757_v61  ;;  %v4208_v11 = vpop.f32.mrf.mxu1  ;;  %v11064_v61 = vld [vmem:[#allocation3 + $0x368] sm:$0xf] }
 0x345   :  { %5199 = vmatpush.bf16.msrb.mxu2 %v10885_v58  ;;  %v4209_v53 = vadd.f32 %v4208_v11, %v4195_v14  ;;  %v13041_v58 = vld [vmem:[#allocation3 + $0x374] sm:$0xf0] }
 0x346   :  { %5212 = vmatpush.bf16.msrb.mxu3 %v11013_v60  ;;  %5174 = vmatmul.bf16.vlgmr.msrb.gmra.mxu0 %v13982_v55  ;;  %v10937_v60 = vor.u32 %v13009_v57, %v10936_v40  ;;  %v11065_v3 = vor.u32 %v13041_v58, %v11064_v61  ;;  %v13029_v11 = vld [vmem:[#allocation3 + $0x314] sm:$0xf0]  ;;  %v13023_v40 = vld [vmem:[#allocation3 + $0x2ec] sm:$0xf]  ;;  %v11002_v57 = vld [vmem:[#allocation3 + $0x2f8] sm:$0xf0]  ;;  %v10761_v61 = vor.u32 %v12965_v38, %v10760_v20 }
 0x347   :  { %5218 = vmatpush.bf16.msra.mxu0 %v10745_v62  ;;  %5187 = vmatmul.bf16.vlgmr.msrb.gmra.mxu1 %v13984_v2  ;;  %v13011_v20 = vld [vmem:[#allocation3 + $0x28c] sm:$0xf]  ;;  %v10954_v38 = vld [vmem:[#allocation3 + $0x298] sm:$0xf0] }
 0x348   :  { %5231 = vmatpush.bf16.msra.mxu1 %v10873_v63  ;;  %5200 = vmatmul.bf16.vlgmr.msrb.gmra.mxu2 %v13978_v52  ;;  %v10664_v63 = vld [vmem:[#allocation3 + $0x48] sm:$0xf] }
 0x349   :  { %5244 = vmatpush.bf16.msra.mxu2 %v11001_v0  ;;  %5213 = vmatmul.bf16.vlgmr.msrb.gmra.mxu3 %v13980_v54  ;;  %v12941_v0 = vld [vmem:[#allocation3 + $0x54] sm:$0xf0] }
 0x34a   :  { %5257 = vmatpush.bf16.msra.mxu3 %v11129_v5 }
 0x34b   :  { %5219 = vmatpush.bf16.msra.mxu0 %v10729_v22  ;;  %v4221_v62 = vpop.f32.mrf.mxu2 }
 0x34c   :  { %5232 = vmatpush.bf16.msra.mxu1 %v10857_v23  ;;  %v4222_v4 = vadd.f32 %v4221_v62, %v4209_v53  ;;  %v4234_v5 = vpop.f32.mrf.mxu3  ;;  %v10665_v23 = vor.u32 %v12941_v0, %v10664_v63  ;;  %v4210_v34 = vpop.f32.mrf.mxu1  ;;  %v10749_v62 = vor.u32 %v12959_v51, %v10746_v7  ;;  %v11005_v0 = vor.u32 %v13023_v40, %v11002_v57  ;;  %v12943_v51 = vld [vmem:[#allocation3 + $0x6c] sm:$0xf]  ;;  %v10682_v7 = vld [vmem:[#allocation3 + $0x78] sm:$0xf0] }
 0x34d   :  { %5245 = vmatpush.bf16.msra.mxu2 %v10985_v24  ;;  %v4197_v24 = vpop.f32.mrf.mxu0  ;;  %v13015_v34 = vld [vmem:[#allocation3 + $0x2ac] sm:$0xf]  ;;  %v10810_v40 = vld [vmem:[#allocation3 + $0x178] sm:$0xf0] }
 0x34e   :  { %5258 = vmatpush.bf16.msra.mxu3 %v11113_v28  ;;  %v4235_v22 = vadd.f32 %v4234_v5, %v4222_v4  ;;  %v12937_v28 = vld [vmem:[#allocation3 + $0x34] sm:$0xf0]  ;;  %v12987_v4 = vld [vmem:[#allocation3 + $0x1cc] sm:$0xf]  ;;  %v10989_v24 = vor.u32 %v13019_v13, %v10986_v16  ;;  %v10794_v13 = vld [vmem:[#allocation3 + $0x158] sm:$0xf0] }
 0x34f   :  { %5220 = vmatpush.bf16.msra.mxu0 %v10713_v42  ;;  %v10904_v42 = vld [vmem:[#allocation3 + $0x228] sm:$0xf]  ;;  %v10649_v46 = vor.u32 %v12937_v28, %v10648_v26  ;;  %v12983_v26 = vld [vmem:[#allocation3 + $0x1ac] sm:$0xf]  ;;  %v11117_v28 = vor.u32 %v13051_v17, %v11114_v21  ;;  %v10922_v17 = vld [vmem:[#allocation3 + $0x258] sm:$0xf0] }
 0x350   :  { %5233 = vmatpush.bf16.msra.mxu1 %v10841_v44  ;;  %v14050_v35 = vadd.f32 %v4235_v22, %v14024_v30  ;;  %v13001_v44 = vld [vmem:[#allocation3 + $0x234] sm:$0xf0]  ;;  %v13007_v57 = vld [vmem:[#allocation3 + $0x26c] sm:$0xf] }
 0x351   :  { %5246 = vmatpush.bf16.msra.mxu2 %v10969_v45  ;;  %v11032_v45 = vld [vmem:[#allocation3 + $0x328] sm:$0xf]  ;;  %v10905_v48 = vor.u32 %v13001_v44, %v10904_v42  ;;  %v11098_v42 = vld [vmem:[#allocation3 + $0x3b8] sm:$0xf0]  ;;  %v13003_v16 = vld [vmem:[#allocation3 + $0x24c] sm:$0xf] }
 0x352   :  { %5259 = vmatpush.bf16.msra.mxu3 %v11097_v47  ;;  %v12933_v47 = vld [vmem:[#allocation3 + $0x14] sm:$0xf0]  ;;  %v11033_v14 = vor.u32 %v13033_v15, %v11032_v45  ;;  %v10845_v45 = vor.u32 %v12983_v26, %v10842_v32  ;;  %v13035_v21 = vld [vmem:[#allocation3 + $0x34c] sm:$0xf]  ;;  %v10925_v26 = vor.u32 %v13003_v16, %v10922_v17  ;;  %v10650_v32 = vld [vmem:[#allocation3 + $0x38] sm:$0xf0] }
 0x353   :  { %5221 = vmatpush.bf16.msra.mxu0 %v10697_v33  ;;  %v4223_v33 = vpop.f32.mrf.mxu2  ;;  %v10633_v53 = vor.u32 %v12933_v47, %v10632_v18  ;;  %v10698_v18 = vld [vmem:[#allocation3 + $0x98] sm:$0xf0]  ;;  %v12979_v47 = vld [vmem:[#allocation3 + $0x18c] sm:$0xf] }
 0x354   :  { %5234 = vmatpush.bf16.msra.mxu1 %v10825_v29  ;;  %v12997_v29 = vld [vmem:[#allocation3 + $0x214] sm:$0xf0]  ;;  %v4236_v50 = vpop.f32.mrf.mxu3  ;;  %v11082_v33 = vld [vmem:[#allocation3 + $0x398] sm:$0xf0] }
 0x355   :  { %5247 = vmatpush.bf16.msra.mxu2 %v10953_v49  ;;  %v11016_v49 = vld [vmem:[#allocation3 + $0x308] sm:$0xf]  ;;  %v10889_v58 = vor.u32 %v12997_v29, %v10888_v43  ;;  %v13043_v43 = vld [vmem:[#allocation3 + $0x38c] sm:$0xf] }
 0x356   :  { %5260 = vmatpush.bf16.msra.mxu3 %v11081_v56  ;;  %v12991_v56 = vld [vmem:[#allocation3 + $0x1ec] sm:$0xf] }
 0x357   :  { %5222 = vmatpush.bf16.msra.mxu0 %v10681_v12  ;;  %v13055_v12 = vld [vmem:[#allocation3 + $0x3ec] sm:$0xf]  ;;  %v10877_v63 = vor.u32 %v12991_v56, %v10874_v9 }
 0x358   :  { %5235 = vmatpush.bf16.msra.mxu1 %v10809_v59  ;;  %v11130_v59 = vld [vmem:[#allocation3 + $0x3f8] sm:$0xf0]  ;;  %v12975_v56 = vld [vmem:[#allocation3 + $0x16c] sm:$0xf] }
 0x359   :  { %5248 = vmatpush.bf16.msra.mxu2 %v10937_v60  ;;  %v11017_v60 = vor.u32 %v13029_v11, %v11016_v49  ;;  %v11133_v5 = vor.u32 %v13055_v12, %v11130_v59  ;;  %v10957_v11 = vor.u32 %v13011_v20, %v10954_v38  ;;  %v11066_v12 = vld [vmem:[#allocation3 + $0x378] sm:$0xf0]  ;;  %v10685_v59 = vor.u32 %v12943_v51, %v10682_v7  ;;  %v12931_v20 = vld [vmem:[#allocation3 + $0xc] sm:$0xf] }
 0x35a   :  { %5261 = vmatpush.bf16.msra.mxu3 %v11065_v3  ;;  %v10730_v3 = vld [vmem:[#allocation3 + $0xd8] sm:$0xf0]  ;;  %v13027_v51 = vld [vmem:[#allocation3 + $0x30c] sm:$0xf] }
 0x35b   :  { %5223 = vmatpush.bf16.msra.mxu0 %v10665_v23  ;;  %v10733_v22 = vor.u32 %v12955_v1, %v10730_v3  ;;  %v10861_v23 = vor.u32 %v12987_v4, %v10858_v8  ;;  %v10666_v1 = vld [vmem:[#allocation3 + $0x58] sm:$0xf0]  ;;  %v12971_v3 = vld [vmem:[#allocation3 + $0x14c] sm:$0xf] }
 0x35c   :  { %5236 = vmatpush.bf16.msra.mxu1 %v10793_v25  ;;  %v12951_v25 = vld [vmem:[#allocation3 + $0xac] sm:$0xf]  ;;  %v10634_v38 = vld [vmem:[#allocation3 + $0x18] sm:$0xf0] }
 0x35d   :  { %5249 = vmatpush.bf16.msra.mxu2 %v10921_v10  ;;  %v10714_v10 = vld [vmem:[#allocation3 + $0xb8] sm:$0xf0] }
 0x35e   :  { %5262 = vmatpush.bf16.msra.mxu3 %v11049_v39  ;;  %v10970_v39 = vld [vmem:[#allocation3 + $0x2b8] sm:$0xf0]  ;;  %v10717_v44 = vor.u32 %v12951_v25, %v10714_v10  ;;  %v10797_v10 = vor.u32 %v12971_v3, %v10794_v13 }
 0x35f   :  { %5224 = vmatpush.bf16.msra.mxu0 %v10649_v46  ;;  %v10973_v15 = vor.u32 %v13015_v34, %v10970_v39  ;;  %v12947_v46 = vld [vmem:[#allocation3 + $0x8c] sm:$0xf]  ;;  %v11018_v7 = vld [vmem:[#allocation3 + $0x318] sm:$0xf0] }
 0x360   :  { %5237 = vmatpush.bf16.msra.mxu1 %v10777_v19  ;;  %v11101_v19 = vor.u32 %v13047_v41, %v11098_v42  ;;  %v12967_v34 = vld [vmem:[#allocation3 + $0x12c] sm:$0xf] }
 0x361   :  { %5250 = vmatpush.bf16.msra.mxu2 %v10905_v48  ;;  %v10826_v48 = vld [vmem:[#allocation3 + $0x198] sm:$0xf0] }
 0x362   :  { %5263 = vmatpush.bf16.msra.mxu3 %v11033_v14  ;;  %v10701_v14 = vor.u32 %v12947_v46, %v10698_v18  ;;  %v10829_v49 = vor.u32 %v12979_v47, %v10826_v48  ;;  %v13031_v46 = vld [vmem:[#allocation3 + $0x32c] sm:$0xf]  ;;  %v11034_v18 = vld [vmem:[#allocation3 + $0x338] sm:$0xf0] }
 0x363   :  { %5225 = vmatpush.bf16.msra.mxu0 %v10633_v53  ;;  %v4247_v29 = vpop.f32.mrf.mxu0  ;;  %v11085_v53 = vor.u32 %v13043_v43, %v11082_v33  ;;  %v12963_v43 = vld [vmem:[#allocation3 + $0x10c] sm:$0xf] }
 0x364   :  { %5238 = vmatpush.bf16.msra.mxu1 %v10761_v61  ;;  %v4260_v50 = vpop.f32.mrf.mxu1  ;;  %v10938_v61 = vld [vmem:[#allocation3 + $0x278] sm:$0xf0] }
 0x365   :  { %5251 = vmatpush.bf16.msra.mxu2 %v10889_v58  ;;  %v4261_v9 = vadd.f32 %v4260_v50, %v4247_v29  ;;  %v13039_v58 = vld [vmem:[#allocation3 + $0x36c] sm:$0xf]  ;;  %v10762_v29 = vld [vmem:[#allocation3 + $0x118] sm:$0xf0] }
 0x366   :  { %5264 = vmatpush.bf16.msra.mxu3 %v11017_v60  ;;  %5226 = vmatmul.bf16.vlgmr.msra.gmra.mxu0 %v13982_v55  ;;  %v10813_v60 = vor.u32 %v12975_v56, %v10810_v40  ;;  %v11069_v4 = vor.u32 %v13039_v58, %v11066_v12  ;;  %v10637_v56 = vor.u32 %v12931_v20, %v10634_v38 }
 0x367   :  { %5270 = vmatpush.bf16.msrb.mxu0 %v10749_v62  ;;  %5239 = vmatmul.bf16.vlgmr.msra.gmra.mxu1 %v13984_v2  ;;  %v10941_v62 = vor.u32 %v13007_v57, %v10938_v61  ;;  %v11021_v40 = vor.u32 %v13027_v51, %v11018_v7 }
 0x368   :  { %5283 = vmatpush.bf16.msrb.mxu1 %v10877_v63  ;;  %5252 = vmatmul.bf16.vlgmr.msra.gmra.mxu2 %v13978_v52 }
 0x369   :  { %5296 = vmatpush.bf16.msrb.mxu2 %v11005_v0  ;;  %5265 = vmatmul.bf16.vlgmr.msra.gmra.mxu3 %v13980_v54  ;;  %v12939_v0 = vld [vmem:[#allocation3 + $0x4c] sm:$0xf] }
 0x36a   :  { %5309 = vmatpush.bf16.msrb.mxu3 %v11133_v5 }
 0x36b   :  { %5271 = vmatpush.bf16.msrb.mxu0 %v10733_v22  ;;  %v4273_v63 = vpop.f32.mrf.mxu2  ;;  %v11050_v22 = vld [vmem:[#allocation3 + $0x358] sm:$0xf0]  ;;  %v4249_v25 = vpop.f32.mrf.mxu0 }
 0x36c   :  { %5284 = vmatpush.bf16.msrb.mxu1 %v10861_v23  ;;  %v4274_v5 = vadd.f32 %v4273_v63, %v4261_v9  ;;  %v4286_v8 = vpop.f32.mrf.mxu3  ;;  %v4262_v39 = vpop.f32.mrf.mxu1  ;;  %v11053_v42 = vor.u32 %v13035_v21, %v11050_v22 }
 0x36d   :  { %5297 = vmatpush.bf16.msrb.mxu2 %v10989_v24  ;;  %v10669_v24 = vor.u32 %v12939_v0, %v10666_v1 }
 0x36e   :  { %5310 = vmatpush.bf16.msrb.mxu3 %v11117_v28  ;;  %v4287_v23 = vadd.f32 %v4286_v8, %v4274_v5  ;;  %v12935_v28 = vld [vmem:[#allocation3 + $0x2c] sm:$0xf] }
 0x36f   :  { %5272 = vmatpush.bf16.msrb.mxu0 %v10717_v44  ;;  %v10778_v44 = vld [vmem:[#allocation3 + $0x138] sm:$0xf0]  ;;  %v10653_v47 = vor.u32 %v12935_v28, %v10650_v32 }
 0x370   :  { %5285 = vmatpush.bf16.msrb.mxu1 %v10845_v45  ;;  %v14057_v41 = vadd.f32 %v4287_v23, %v14030_v6  ;;  %v12999_v45 = vld [vmem:[#allocation3 + $0x22c] sm:$0xf] }
 0x371   :  { %5298 = vmatpush.bf16.msrb.mxu2 %v10973_v15  ;;  %v10906_v15 = vld [vmem:[#allocation3 + $0x238] sm:$0xf0] }
 0x372   :  { %5311 = vmatpush.bf16.msrb.mxu3 %v11101_v19  ;;  %v10781_v19 = vor.u32 %v12967_v34, %v10778_v44  ;;  %v10909_v48 = vor.u32 %v12999_v45, %v10906_v15 }
 0x373   :  { %5273 = vmatpush.bf16.msrb.mxu0 %v10701_v14  ;;  %v4275_v33 = vpop.f32.mrf.mxu2  ;;  %v11037_v14 = vor.u32 %v13031_v46, %v11034_v18 }
 0x374   :  { %5286 = vmatpush.bf16.msrb.mxu1 %v10829_v49  ;;  %v12995_v49 = vld [vmem:[#allocation3 + $0x20c] sm:$0xf]  ;;  %v4288_v50 = vpop.f32.mrf.mxu3 }
 0x375   :  { %5299 = vmatpush.bf16.msrb.mxu2 %v10957_v11  ;;  %v10890_v11 = vld [vmem:[#allocation3 + $0x218] sm:$0xf0] }
 0x376   :  { %5312 = vmatpush.bf16.msrb.mxu3 %v11085_v53  ;;  %v10765_v53 = vor.u32 %v12963_v43, %v10762_v29  ;;  %v10893_v9 = vor.u32 %v12995_v49, %v10890_v11 }
 0x377   :  { %5274 = vmatpush.bf16.msrb.mxu0 %v10685_v59 }
 0x378   :  { %5287 = vmatpush.bf16.msrb.mxu1 %v10813_v60 }
 0x379   :  { %5300 = vmatpush.bf16.msrb.mxu2 %v10941_v62 }
 0x37a   :  { %5313 = vmatpush.bf16.msrb.mxu3 %v11069_v4 }
 0x37b   :  { %5275 = vmatpush.bf16.msrb.mxu0 %v10669_v24 }
 0x37c   :  { %5288 = vmatpush.bf16.msrb.mxu1 %v10797_v10 }
 0x37d   :  { %5301 = vmatpush.bf16.msrb.mxu2 %v10925_v26 }
 0x37e   :  { %5314 = vmatpush.bf16.msrb.mxu3 %v11053_v42 }
 0x37f   :  { %5276 = vmatpush.bf16.msrb.mxu0 %v10653_v47 }
 0x380   :  { %5289 = vmatpush.bf16.msrb.mxu1 %v10781_v19 }
 0x381   :  { %5302 = vmatpush.bf16.msrb.mxu2 %v10909_v48 }
 0x382   :  { %5315 = vmatpush.bf16.msrb.mxu3 %v11037_v14 }
 0x383   :  { %5277 = vmatpush.bf16.msrb.mxu0 %v10637_v56  ;;  %v4299_v57 = vpop.f32.mrf.mxu0 }
 0x384   :  { %5290 = vmatpush.bf16.msrb.mxu1 %v10765_v53  ;;  %v4312_v61 = vpop.f32.mrf.mxu1 }
 0x385   :  { %5303 = vmatpush.bf16.msrb.mxu2 %v10893_v9  ;;  %v4313_v58 = vadd.f32 %v4312_v61, %v4299_v57 }
 0x386   :  { %5316 = vmatpush.bf16.msrb.mxu3 %v11021_v40  ;;  %5278 = vmatmul.bf16.vlgmr.msrb.gmra.mxu0 %v13982_v55 }
 0x387   :  { %5291 = vmatmul.bf16.vlgmr.msrb.gmra.mxu1 %v13984_v2 }
 0x388   :  { %5304 = vmatmul.bf16.vlgmr.msrb.gmra.mxu2 %v13978_v52 }
 0x389   :  { %5317 = vmatmul.bf16.vlgmr.msrb.gmra.mxu3 %v13980_v54 }
 0x38b   :  { %v4325_v12 = vpop.f32.mrf.mxu2  ;;  %v4301_v63 = vpop.f32.mrf.mxu0 }
 0x38c   :  { %v4326_v59 = vadd.f32 %v4325_v12, %v4313_v58  ;;  %v4338_v60 = vpop.f32.mrf.mxu3  ;;  %v4314_v0 = vpop.f32.mrf.mxu1 }
 0x38e   :  { %v4339_v62 = vadd.f32 %v4338_v60, %v4326_v59 }
 0x390   :  { %v14064_v1 = vadd.f32 %v4339_v62, %v14036_v27 }
 0x393   :  { %v4327_v3 = vpop.f32.mrf.mxu2 }
 0x394   :  { %v4340_v55 = vpop.f32.mrf.mxu3 }
 0x3a3   :  { %v5123_v4 = vpop.f32.mrf.mxu0 }
 0x3a4   :  { %v5136_v2 = vpop.f32.mrf.mxu1 }
 0x3a5   :  { %v5137_v5 = vadd.f32 %v5136_v2, %v5123_v4 }
 0x3ab   :  { %v5149_v52 = vpop.f32.mrf.mxu2  ;;  %v5125_v16 = vpop.f32.mrf.mxu0 }
 0x3ac   :  { %v5150_v8 = vadd.f32 %v5149_v52, %v5137_v5  ;;  %v5162_v54 = vpop.f32.mrf.mxu3  ;;  %v5138_v17 = vpop.f32.mrf.mxu1 }
 0x3ae   :  { %v5163_v13 = vadd.f32 %v5162_v54, %v5150_v8 }
 0x3b0   :  { %v5326_v21 = vrot.slane %v5163_v13, 6 }
 0x3b2   :  { %v5334_v22 = vadd.f32 %v5326_v21, %v14018_v31 }
 0x3b3   :  { %v5151_v23 = vpop.f32.mrf.mxu2 }
 0x3b4   :  { %v14069_v24 = vsel %vm2316_vm1, %v14043_v36, %v5334_v22  ;;  %v5164_v25 = vpop.f32.mrf.mxu3 }
 0x3b5   :  { %v5344_v48 = vsel %vm2181_vm0, %v14069_v24, 0.0 }
 0x3b6   :  { %v5345_v38 = vrot.slane %v5344_v48, 4 }
 0x3c3   :  { %v5175_v10 = vpop.f32.mrf.mxu0 }
 0x3c4   :  { %v5188_v26 = vpop.f32.mrf.mxu1 }
 0x3c5   :  { %v5189_v28 = vadd.f32 %v5188_v26, %v5175_v10 }
 0x3cb   :  { %v5201_v32 = vpop.f32.mrf.mxu2  ;;  %v5177_v44 = vpop.f32.mrf.mxu0 }
 0x3cc   :  { %v5202_v34 = vadd.f32 %v5201_v32, %v5189_v28  ;;  %v5214_v39 = vpop.f32.mrf.mxu3  ;;  %v5190_v45 = vpop.f32.mrf.mxu1 }
 0x3ce   :  { %v5215_v42 = vadd.f32 %v5214_v39, %v5202_v34 }
 0x3d0   :  { %v5327_v15 = vrot.slane %v5215_v42, 6 }
 0x3d2   :  { %v5335_v46 = vadd.f32 %v5327_v15, %v14024_v30  ;;  %v5346_v30 = vadd.f32 %v5345_v38, %v5344_v48 }
 0x3d3   :  { %v5203_v18 = vpop.f32.mrf.mxu2 }
 0x3d4   :  { %v14074_v31 = vsel %vm2316_vm1, %v14050_v35, %v5335_v46  ;;  %v5216_v36 = vpop.f32.mrf.mxu3  ;;  %v5347_v51 = vrot.slane %v5346_v30, 2 }
 0x3d5   :  { %v5351_v47 = vsel %vm2181_vm0, %v14074_v31, 0.0 }
 0x3d6   :  { %v5352_v19 = vrot.slane %v5351_v47, 4  ;;  %v5348_v57 = vadd.f32 %v5347_v51, %v5346_v30 }
 0x3d8   :  { %v5353_v20 = vadd.f32 %v5352_v19, %v5351_v47  ;;  %v5349_v62 = vrot.slane %v5348_v57, 1 }
 0x3da   :  { %v5354_v14 = vrot.slane %v5353_v20, 2  ;;  %v5350_v4 = vadd.f32 %v5349_v62, %v5348_v57 }
 0x3dc   :  { %v5355_v11 = vadd.f32 %v5354_v14, %v5353_v20  ;;  %v14093_v52 = vmul.f32 %v5350_v4, %v13922_v37 }
 0x3de   :  { %v5356_v9 = vrot.slane %v5355_v11, 1  ;;  %v5376_v13 = vsub.f32 %v14069_v24, %v14093_v52 }
 0x3e0   :  { %v5357_v12 = vadd.f32 %v5356_v9, %v5355_v11  ;;  %v5380_v25 = vmul.f32 %v5376_v13, %v5376_v13 }
 0x3e2   :  { %v14088_v3 = vmul.f32 %v5357_v12, %v13922_v37  ;;  %v5384_v34 = vsel %vm2181_vm0, %v5380_v25, 0.0 }
 0x3e3   :  { %v5227_v43 = vpop.f32.mrf.mxu0  ;;  %v5385_v36 = vrot.slane %v5384_v34, 4 }
 0x3e4   :  { %v5240_v33 = vpop.f32.mrf.mxu1 }
 0x3e5   :  { %v5241_v29 = vadd.f32 %v5240_v33, %v5227_v43  ;;  %v5386_v38 = vadd.f32 %v5385_v36, %v5384_v34 }
 0x3eb   :  { %v5253_v49 = vpop.f32.mrf.mxu2  ;;  %v5229_v56 = vpop.f32.mrf.mxu0 }
 0x3ec   :  { %v5254_v50 = vadd.f32 %v5253_v49, %v5241_v29  ;;  %v5266_v35 = vpop.f32.mrf.mxu3  ;;  %v5242_v53 = vpop.f32.mrf.mxu1 }
 0x3ee   :  { %v5267_v7 = vadd.f32 %v5266_v35, %v5254_v50  ;;  %v5387_v50 = vrot.slane %v5386_v38, 2 }
 0x3f0   :  { %v5328_v40 = vrot.slane %v5267_v7, 6  ;;  %v5388_v53 = vadd.f32 %v5387_v50, %v5386_v38 }
 0x3f2   :  { %v5336_v61 = vadd.f32 %v5328_v40, %v14030_v6  ;;  %v5377_v6 = vsub.f32 %v14074_v31, %v14088_v3 }
 0x3f3   :  { %v5255_v58 = vpop.f32.mrf.mxu2 }
 0x3f4   :  { %v14083_v59 = vsel %vm2316_vm1, %v14057_v41, %v5336_v61  ;;  %v5268_v60 = vpop.f32.mrf.mxu3  ;;  %v5381_v8 = vmul.f32 %v5377_v6, %v5377_v6  ;;  %v5389_v61 = vrot.slane %v5388_v53, 1 }
 0x3f5   :  { %v5358_v63 = vsel %vm2181_vm0, %v14083_v59, 0.0 }
 0x3f6   :  { %v5359_v0 = vrot.slane %v5358_v63, 4  ;;  %v5391_v22 = vsel %vm2181_vm0, %v5381_v8, 0.0  ;;  %v5390_v62 = vadd.f32 %v5389_v61, %v5388_v53 }
 0x3f7   :  { %v5392_v28 = vrot.slane %v5391_v22, 4 }
 0x3f8   :  { %v5360_v55 = vadd.f32 %v5359_v0, %v5358_v63 }
 0x3f9   :  { %v5393_v46 = vadd.f32 %v5392_v28, %v5391_v22 }
 0x3fa   :  { %v5361_v2 = vrot.slane %v5360_v55, 2 }
 0x3fb   :  { %v5394_v20 = vrot.slane %v5393_v46, 2 }
 0x3fc   :  { %v5362_v5 = vadd.f32 %v5361_v2, %v5360_v55  ;;  %v5412_v2 = vmul.f32 %v5390_v62, %v13922_v37 }
 0x3fd   :  { %v5395_v49 = vadd.f32 %v5394_v20, %v5393_v46 }
 0x3fe   :  { %v5363_v41 = vrot.slane %v5362_v5, 1 }
 0x3ff   :  { %v5396_v56 = vrot.slane %v5395_v49, 1 }
 0x400   :  { %v5364_v54 = vadd.f32 %v5363_v41, %v5362_v5 }
 0x401   :  { %v5397_v57 = vadd.f32 %v5396_v56, %v5395_v49 }
 0x402   :  { %v14098_v16 = vmul.f32 %v5364_v54, %v13922_v37  ;;  %v5416_v54 = vadd.f32 1e-05, %v5412_v2 }
 0x403   :  { %v5279_v17 = vpop.f32.mrf.mxu0  ;;  %v5413_v60 = vmul.f32 %v5397_v57, %v13922_v37 }
 0x404   :  { %v5292_v21 = vpop.f32.mrf.mxu1  ;;  %v5378_v23 = vsub.f32 %v14083_v59, %v14098_v16  ;;  %vm5426_vm12 = vweird.f32 %v5416_v54 }
 0x405   :  { %v5293_v26 = vadd.f32 %v5292_v21, %v5279_v17  ;;  %v5417_v4 = vadd.f32 1e-05, %v5413_v60 }
 0x406   :  { %v5382_v10 = vmul.f32 %v5378_v23, %v5378_v23 }
 0x407   :  { %13401 = vrsqrt.f32 %v5417_v4  ;;  %vm5436_vm3 = vweird.f32 %v5417_v4 }
 0x408   :  { %v5398_v32 = vsel %vm2181_vm0, %v5382_v10, 0.0 }
 0x409   :  { %v5399_v39 = vrot.slane %v5398_v32, 4 }
 0x40b   :  { %v5305_v42 = vpop.f32.mrf.mxu2  ;;  %v5281_v15 = vpop.f32.mrf.mxu0  ;;  %v5400_v19 = vadd.f32 %v5399_v39, %v5398_v32 }
 0x40c   :  { %v5306_v44 = vadd.f32 %v5305_v42, %v5293_v26  ;;  %v5318_v45 = vpop.f32.mrf.mxu3  ;;  %v5294_v18 = vpop.f32.mrf.mxu1 }
 0x40d   :  { %v5401_v33 = vrot.slane %v5400_v19, 2  ;;  %v13402_v21 = vpop.eup %13401 }
 0x40e   :  { %v5319_v47 = vadd.f32 %v5318_v45, %v5306_v44  ;;  %v5431_v10 = vmul.f32 %v13402_v21, %v5417_v4  ;;  %vm5437_vm2 = vweird.f32 %v13402_v21 }
 0x40f   :  { %v5402_v51 = vadd.f32 %v5401_v33, %v5400_v19  ;;  %vm5438_vm5 = vmor %vm5436_vm3, %vm5437_vm2 }
 0x410   :  { %v5329_v48 = vrot.slane %v5319_v47, 6  ;;  %v5432_v39 = vmul.f32 %v13402_v21, %v5431_v10 }
 0x411   :  { %v5403_v40 = vrot.slane %v5402_v51, 1 }
 0x412   :  { %v5337_v43 = vadd.f32 %v5329_v48, %v14036_v27  ;;  %v5433_v15 = vmul.f32 0.5, %v5432_v39 }
 0x413   :  { %v5307_v14 = vpop.f32.mrf.mxu2  ;;  %v5404_v12 = vadd.f32 %v5403_v40, %v5402_v51  ;;  %v5342_v40 = vld [vmem:[#allocation12] sm:$0xf] }
 0x414   :  { %v14108_v29 = vsel %vm2316_vm1, %v14064_v1, %v5337_v43  ;;  %v5320_v30 = vpop.f32.mrf.mxu3  ;;  %v5434_v36 = vsub.f32 1.5, %v5433_v15 }
 0x415   :  { %v5365_v11 = vsel %vm2181_vm0, %v14108_v29, 0.0  ;;  %v5414_v0 = vmul.f32 %v5404_v12, %v13922_v37 }
 0x416   :  { %v5366_v35 = vrot.slane %v5365_v11, 4  ;;  %v5435_v38 = vmul.f32 %v13402_v21, %v5434_v36 }
 0x417   :  { %v5418_v5 = vadd.f32 1e-05, %v5414_v0 }
 0x418   :  { %v5367_v7 = vadd.f32 %v5366_v35, %v5365_v11  ;;  %v5439_v49 = vsel %vm5438_vm5, %v13402_v21, %v5435_v38 }
 0x419   :  { %13403 = vrsqrt.f32 %v5418_v5  ;;  %vm5446_vm6 = vweird.f32 %v5418_v5 }
 0x41a   :  { %v5368_v9 = vrot.slane %v5367_v7, 2  ;;  %13405 = vrsqrt.f32 %v5416_v54 }
 0x41c   :  { %v5369_v27 = vadd.f32 %v5368_v9, %v5367_v7  ;;  %v5464_v7 = vrot.slane %v5439_v49, 7 }
 0x41e   :  { %v5370_v58 = vrot.slane %v5369_v27, 1 }
 0x41f   :  { %v13404_v23 = vpop.eup %13403 }
 0x420   :  { %v5371_v1 = vadd.f32 %v5370_v58, %v5369_v27  ;;  %v13406_v28 = vpop.eup %13405  ;;  %v5441_v32 = vmul.f32 %v13404_v23, %v5418_v5  ;;  %vm5447_vm4 = vweird.f32 %v13404_v23 }
 0x421   :  { %v5421_v42 = vmul.f32 %v13406_v28, %v5416_v54  ;;  %vm5427_vm8 = vweird.f32 %v13406_v28  ;;  %vm5448_vm9 = vmor %vm5446_vm6, %vm5447_vm4  ;;  %v5343_v54 = vld [vmem:[#allocation13] sm:$0xf] }
 0x422   :  { %v14114_v63 = vmul.f32 %v5371_v1, %v13922_v37  ;;  %v5442_v45 = vmul.f32 %v13404_v23, %v5441_v32  ;;  %vm5428_vm15 = vmor %vm5426_vm12, %vm5427_vm8 }
 0x423   :  { %v5422_v46 = vmul.f32 %v13406_v28, %v5421_v42 }
 0x424   :  { %v5379_v55 = vsub.f32 %v14108_v29, %v14114_v63  ;;  %v5443_v18 = vmul.f32 0.5, %v5442_v45 }
 0x425   :  { %v5423_v19 = vmul.f32 0.5, %v5422_v46 }
 0x426   :  { %v5383_v6 = vmul.f32 %v5379_v55, %v5379_v55  ;;  %v5444_v48 = vsub.f32 1.5, %v5443_v18 }
 0x427   :  { %v5424_v33 = vsub.f32 1.5, %v5423_v19 }
 0x428   :  { %v5405_v41 = vsel %vm2181_vm0, %v5383_v6, 0.0  ;;  %v5445_v14 = vmul.f32 %v13404_v23, %v5444_v48 }
 0x429   :  { %v5406_v8 = vrot.slane %v5405_v41, 4  ;;  %v5425_v50 = vmul.f32 %v13406_v28, %v5424_v33 }
 0x42a   :  { %v5449_v35 = vsel %vm5448_vm9, %v13404_v23, %v5445_v14 }
 0x42b   :  { %v5407_v13 = vadd.f32 %v5406_v8, %v5405_v41  ;;  %v5465_v53 = vrot.slane %v5449_v35, 6  ;;  %v5429_v27 = vsel %vm5428_vm15, %v13406_v28, %v5425_v50 }
 0x42c   :  { %v5467_v57 = vsel %vm2312_vm13, %v5429_v27, %v5464_v7 }
 0x42d   :  { %v5408_v17 = vrot.slane %v5407_v13, 2 }
 0x42f   :  { %v5409_v22 = vadd.f32 %v5408_v17, %v5407_v13 }
 0x431   :  { %v5410_v25 = vrot.slane %v5409_v22, 1 }
 0x433   :  { %v5411_v26 = vadd.f32 %v5410_v25, %v5409_v22 }
 0x435   :  { %v5415_v34 = vmul.f32 %v5411_v26, %v13922_v37 }
 0x437   :  { %v5419_v44 = vadd.f32 1e-05, %v5415_v34 }
 0x439   :  { %13407 = vrsqrt.f32 %v5419_v44  ;;  %vm5456_vm10 = vweird.f32 %v5419_v44 }
 0x43f   :  { %v13408_v47 = vpop.eup %13407 }
 0x440   :  { %v5451_v20 = vmul.f32 %v13408_v47, %v5419_v44  ;;  %vm5457_vm7 = vweird.f32 %v13408_v47 }
 0x441   :  { %vm5458_vm11 = vmor %vm5456_vm10, %vm5457_vm7 }
 0x442   :  { %v5452_v43 = vmul.f32 %v13408_v47, %v5451_v20 }
 0x444   :  { %v5453_v30 = vmul.f32 0.5, %v5452_v43 }
 0x446   :  { %v5454_v11 = vsub.f32 1.5, %v5453_v30 }
 0x448   :  { %v5455_v51 = vmul.f32 %v13408_v47, %v5454_v11 }
 0x44a   :  { %v5459_v56 = vsel %vm5458_vm11, %v13408_v47, %v5455_v51 }
 0x44b   :  { %v5466_v9 = vrot.slane %v5459_v56, 5 }
 0x44d   :  { %v5468_v61 = vsel %vm2314_vm14, %v5465_v53, %v5466_v9 }
 0x44e   :  { %v5469_v58 = vsel %vm2316_vm1, %v5467_v57, %v5468_v61 }
 0x44f   :  { %v5471_v12 = vmul.f32 %v5469_v58, %v5342_v40 }
 0x451   :  { %v5474_v1 = vperm.slane %v5471_v12, 1  ;;  %v5475_v60 = vperm.slane %v5471_v12, 2  ;;  %v5476_v62 = vperm.slane %v5471_v12, 3  ;;  %v5473_v0 = vperm.slane %v5471_v12, 0 }
 0x453   :  { %v5486_v55 = vmul.f32 %v5474_v1, %v14088_v3  ;;  %v5487_v4 = vmul.f32 %v5475_v60, %v14098_v16  ;;  %v5488_v2 = vmul.f32 %v5476_v62, %v14114_v63  ;;  %v5485_v6 = vmul.f32 %v5473_v0, %v14093_v52 }
 0x454   :  { %v5481_v23 = vmul.f32 %v5473_v0, %v14069_v24  ;;  %v5482_v3 = vmul.f32 %v5474_v1, %v14074_v31  ;;  %v5483_v16 = vmul.f32 %v5475_v60, %v14083_v59  ;;  %v5484_v63 = vmul.f32 %v5476_v62, %v14108_v29 }
 0x455   :  { %v5493_v5 = vrot.slane %v5486_v55, 7  ;;  %v5494_v41 = vrot.slane %v5487_v4, 6  ;;  %v5495_v8 = vrot.slane %v5488_v2, 5 }
 0x457   :  { %v5496_v13 = vsel %vm2312_vm13, %v5485_v6, %v5493_v5  ;;  %v5497_v17 = vsel %vm2314_vm14, %v5494_v41, %v5495_v8 }
 0x458   :  { %v5498_v21 = vsel %vm2316_vm1, %v5496_v13, %v5497_v17 }
 0x459   :  { %v5500_v22 = vsub.f32 %v5343_v54, %v5498_v21 }
 0x45b   :  { %v5502_v52 = vperm.slane %v5500_v22, 0  ;;  %v5503_v25 = vperm.slane %v5500_v22, 1  ;;  %v5504_v10 = vperm.slane %v5500_v22, 2  ;;  %v5505_v26 = vperm.slane %v5500_v22, 3 }
 0x45d   :  { %v5510_v28 = vadd.f32 %v5502_v52, %v5481_v23  ;;  %v5511_v32 = vadd.f32 %v5503_v25, %v5482_v3  ;;  %v5512_v34 = vadd.f32 %v5504_v10, %v5483_v16  ;;  %v5513_v39 = vadd.f32 %v5505_v26, %v5484_v63 }
 0x45f   :  { %v14136_v42 = vpack.c.bf16 %v5510_v28, %v5510_v28  ;;  %v14138_v44 = vpack.c.bf16 %v5511_v32, %v5511_v32  ;;  %v14140_v45 = vpack.c.bf16 %v5512_v34, %v5512_v34  ;;  %v14142_v24 = vpack.c.bf16 %v5513_v39, %v5513_v39 }
 0x460   :  { %13730 = dma.done.wait [#allocation6 + $0x2], 32768 }
 0x461   :  { %13731 = vsyncadd [#allocation6 + $0x2], 4294934528  ;;  %v11360_v31 = vld [vmem:[#allocation4 + $0x1c0] sm:$0xf] }
 0x462   :  { %v13118_v59 = vld [vmem:[#allocation4 + $0x1dc] sm:$0xf0] }
 0x463   :  { %v11616_v29 = vld [vmem:[#allocation4 + $0x3c0] sm:$0xf]  ;;  %v11361_v15 = vor.u32 %v13118_v59, %v11360_v31 }
 0x464   :  { %v13182_v46 = vld [vmem:[#allocation4 + $0x3dc] sm:$0xf0] }
 0x465   :  { %v11872_v18 = vld [vmem:[#allocation4 + $0x5c0] sm:$0xf]  ;;  %v11617_v47 = vor.u32 %v13182_v46, %v11616_v29  ;;  %7058 = vmatpush.bf16.msra.mxu0 %v11361_v15 }
 0x466   :  { %v13246_v36 = vld [vmem:[#allocation4 + $0x5dc] sm:$0xf0] }
 0x467   :  { %v11873_v19 = vor.u32 %v13246_v36, %v11872_v18  ;;  %v12128_v48 = vld [vmem:[#allocation4 + $0x7c0] sm:$0xf]  ;;  %7071 = vmatpush.bf16.msra.mxu1 %v11617_v47 }
 0x468   :  { %v13310_v20 = vld [vmem:[#allocation4 + $0x7dc] sm:$0xf0] }
 0x469   :  { %v11328_v38 = vld [vmem:[#allocation4 + $0x180] sm:$0xf]  ;;  %v12129_v43 = vor.u32 %v13310_v20, %v12128_v48  ;;  %7084 = vmatpush.bf16.msra.mxu2 %v11873_v19 }
 0x46a   :  { %v13110_v33 = vld [vmem:[#allocation4 + $0x19c] sm:$0xf0] }
 0x46b   :  { %v11584_v14 = vld [vmem:[#allocation4 + $0x380] sm:$0xf]  ;;  %v11329_v49 = vor.u32 %v13110_v33, %v11328_v38  ;;  %7097 = vmatpush.bf16.msra.mxu3 %v12129_v43 }
 0x46c   :  { %v13174_v30 = vld [vmem:[#allocation4 + $0x39c] sm:$0xf0] }
 0x46d   :  { %v11585_v11 = vor.u32 %v13174_v30, %v11584_v14  ;;  %v11840_v50 = vld [vmem:[#allocation4 + $0x580] sm:$0xf]  ;;  %7059 = vmatpush.bf16.msra.mxu0 %v11329_v49 }
 0x46e   :  { %v13238_v35 = vld [vmem:[#allocation4 + $0x59c] sm:$0xf0] }
 0x46f   :  { %v12096_v51 = vld [vmem:[#allocation4 + $0x780] sm:$0xf]  ;;  %v11841_v7 = vor.u32 %v13238_v35, %v11840_v50  ;;  %7072 = vmatpush.bf16.msra.mxu1 %v11585_v11 }
 0x470   :  { %v13302_v56 = vld [vmem:[#allocation4 + $0x79c] sm:$0xf0] }
 0x471   :  { %v11296_v53 = vld [vmem:[#allocation4 + $0x140] sm:$0xf]  ;;  %v12097_v40 = vor.u32 %v13302_v56, %v12096_v51  ;;  %7085 = vmatpush.bf16.msra.mxu2 %v11841_v7 }
 0x472   :  { %v13102_v9 = vld [vmem:[#allocation4 + $0x15c] sm:$0xf0] }
 0x473   :  { %v11552_v27 = vld [vmem:[#allocation4 + $0x340] sm:$0xf]  ;;  %v11297_v58 = vor.u32 %v13102_v9, %v11296_v53  ;;  %7098 = vmatpush.bf16.msra.mxu3 %v12097_v40 }
 0x474   :  { %v13166_v57 = vld [vmem:[#allocation4 + $0x35c] sm:$0xf0] }
 0x475   :  { %v11808_v61 = vld [vmem:[#allocation4 + $0x540] sm:$0xf]  ;;  %v11553_v62 = vor.u32 %v13166_v57, %v11552_v27  ;;  %7060 = vmatpush.bf16.msra.mxu0 %v11297_v58 }
 0x476   :  { %v13230_v12 = vld [vmem:[#allocation4 + $0x55c] sm:$0xf0] }
 0x477   :  { %v12064_v1 = vld [vmem:[#allocation4 + $0x740] sm:$0xf]  ;;  %v11809_v0 = vor.u32 %v13230_v12, %v11808_v61  ;;  %7073 = vmatpush.bf16.msra.mxu1 %v11553_v62  ;;  %v13114_v62 = vld [vmem:[#allocation4 + $0x1c4] sm:$0xf] }
 0x478   :  { %v13294_v60 = vld [vmem:[#allocation4 + $0x75c] sm:$0xf0] }
 0x479   :  { %v11264_v55 = vld [vmem:[#allocation4 + $0x100] sm:$0xf]  ;;  %v12065_v6 = vor.u32 %v13294_v60, %v12064_v1  ;;  %7086 = vmatpush.bf16.msra.mxu2 %v11809_v0  ;;  %v11362_v0 = vld [vmem:[#allocation4 + $0x1e0] sm:$0xf0] }
 0x47a   :  { %v13094_v4 = vld [vmem:[#allocation4 + $0x11c] sm:$0xf0] }
 0x47b   :  { %v11520_v2 = vld [vmem:[#allocation4 + $0x300] sm:$0xf]  ;;  %v11265_v17 = vor.u32 %v13094_v4, %v11264_v55  ;;  %7099 = vmatpush.bf16.msra.mxu3 %v12065_v6  ;;  %v13178_v55 = vld [vmem:[#allocation4 + $0x3c4] sm:$0xf] }
 0x47c   :  { %v13158_v5 = vld [vmem:[#allocation4 + $0x31c] sm:$0xf0]  ;;  %v13242_v6 = vld [vmem:[#allocation4 + $0x5c4] sm:$0xf] }
 0x47d   :  { %v11776_v41 = vld [vmem:[#allocation4 + $0x500] sm:$0xf]  ;;  %v11521_v21 = vor.u32 %v13158_v5, %v11520_v2  ;;  %7061 = vmatpush.bf16.msra.mxu0 %v11265_v17  ;;  %v11618_v2 = vld [vmem:[#allocation4 + $0x3e0] sm:$0xf0] }
 0x47e   :  { %v13222_v8 = vld [vmem:[#allocation4 + $0x51c] sm:$0xf0]  ;;  %v11874_v5 = vld [vmem:[#allocation4 + $0x5e0] sm:$0xf0] }
 0x47f   :  { %v12032_v54 = vld [vmem:[#allocation4 + $0x700] sm:$0xf]  ;;  %v11777_v22 = vor.u32 %v13222_v8, %v11776_v41  ;;  %7074 = vmatpush.bf16.msra.mxu1 %v11521_v21  ;;  %v11365_v21 = vor.u32 %v13114_v62, %v11362_v0  ;;  %v12002_v62 = vld [vmem:[#allocation4 + $0x6e0] sm:$0xf0] }
 0x480   :  { %v13286_v13 = vld [vmem:[#allocation4 + $0x71c] sm:$0xf0] }
 0x481   :  { %v11232_v23 = vld [vmem:[#allocation4 + $0xc0] sm:$0xf]  ;;  %v12033_v63 = vor.u32 %v13286_v13, %v12032_v54  ;;  %7087 = vmatpush.bf16.msra.mxu2 %v11777_v22  ;;  %v13306_v54 = vld [vmem:[#allocation4 + $0x7c4] sm:$0xf]  ;;  %v11621_v22 = vor.u32 %v13178_v55, %v11618_v2 }
 0x482   :  { %v13086_v3 = vld [vmem:[#allocation4 + $0xdc] sm:$0xf0]  ;;  %v12130_v13 = vld [vmem:[#allocation4 + $0x7e0] sm:$0xf0] }
 0x483   :  { %v11488_v16 = vld [vmem:[#allocation4 + $0x2c0] sm:$0xf]  ;;  %v11233_v32 = vor.u32 %v13086_v3, %v11232_v23  ;;  %7100 = vmatpush.bf16.msra.mxu3 %v12033_v63  ;;  %v11877_v23 = vor.u32 %v13242_v6, %v11874_v5  ;;  %v13106_v3 = vld [vmem:[#allocation4 + $0x184] sm:$0xf] }
 0x484   :  { %v13150_v52 = vld [vmem:[#allocation4 + $0x2dc] sm:$0xf0]  ;;  %v13170_v63 = vld [vmem:[#allocation4 + $0x384] sm:$0xf] }
 0x485   :  { %v11744_v25 = vld [vmem:[#allocation4 + $0x4c0] sm:$0xf]  ;;  %v11489_v34 = vor.u32 %v13150_v52, %v11488_v16  ;;  %7062 = vmatpush.bf16.msra.mxu0 %v11233_v32  ;;  %v11330_v16 = vld [vmem:[#allocation4 + $0x1a0] sm:$0xf0]  ;;  %v12133_v52 = vor.u32 %v13306_v54, %v12130_v13 }
 0x486   :  { %v13214_v10 = vld [vmem:[#allocation4 + $0x4dc] sm:$0xf0]  ;;  %v12098_v32 = vld [vmem:[#allocation4 + $0x7a0] sm:$0xf0] }
 0x487   :  { %v12000_v26 = vld [vmem:[#allocation4 + $0x6c0] sm:$0xf]  ;;  %v11745_v39 = vor.u32 %v13214_v10, %v11744_v25  ;;  %7075 = vmatpush.bf16.msra.mxu1 %v11489_v34  ;;  %v11586_v25 = vld [vmem:[#allocation4 + $0x3a0] sm:$0xf0]  ;;  %v11333_v34 = vor.u32 %v13106_v3, %v11330_v16 }
 0x488   :  { %v13278_v28 = vld [vmem:[#allocation4 + $0x6dc] sm:$0xf0]  ;;  %v13234_v10 = vld [vmem:[#allocation4 + $0x584] sm:$0xf] }
 0x489   :  { %v11200_v31 = vld [vmem:[#allocation4 + $0x80] sm:$0xf]  ;;  %v12001_v15 = vor.u32 %v13278_v28, %v12000_v26  ;;  %7088 = vmatpush.bf16.msra.mxu2 %v11745_v39  ;;  %v11842_v26 = vld [vmem:[#allocation4 + $0x5a0] sm:$0xf0]  ;;  %v11589_v39 = vor.u32 %v13170_v63, %v11586_v25 }
 0x48a   :  { %v13078_v59 = vld [vmem:[#allocation4 + $0x9c] sm:$0xf0]  ;;  %v13298_v28 = vld [vmem:[#allocation4 + $0x784] sm:$0xf] }
 0x48b   :  { %v11456_v29 = vld [vmem:[#allocation4 + $0x280] sm:$0xf]  ;;  %v11201_v48 = vor.u32 %v13078_v59, %v11200_v31  ;;  %7101 = vmatpush.bf16.msra.mxu3 %v12001_v15  ;;  %v11845_v31 = vor.u32 %v13234_v10, %v11842_v26  ;;  %v13098_v59 = vld [vmem:[#allocation4 + $0x144] sm:$0xf] }
 0x48c   :  { %v13142_v46 = vld [vmem:[#allocation4 + $0x29c] sm:$0xf0]  ;;  %v13162_v15 = vld [vmem:[#allocation4 + $0x344] sm:$0xf] }
 0x48d   :  { %v11712_v18 = vld [vmem:[#allocation4 + $0x480] sm:$0xf]  ;;  %v11457_v20 = vor.u32 %v13142_v46, %v11456_v29  ;;  %7063 = vmatpush.bf16.msra.mxu0 %v11201_v48  ;;  %v11298_v29 = vld [vmem:[#allocation4 + $0x160] sm:$0xf0]  ;;  %v12101_v46 = vor.u32 %v13298_v28, %v12098_v32 }
 0x48e   :  { %v13206_v36 = vld [vmem:[#allocation4 + $0x49c] sm:$0xf0]  ;;  %v12066_v48 = vld [vmem:[#allocation4 + $0x760] sm:$0xf0] }
 0x48f   :  { %v11968_v47 = vld [vmem:[#allocation4 + $0x680] sm:$0xf]  ;;  %v11713_v38 = vor.u32 %v13206_v36, %v11712_v18  ;;  %7076 = vmatpush.bf16.msra.mxu1 %v11457_v20  ;;  %v11554_v18 = vld [vmem:[#allocation4 + $0x360] sm:$0xf0]  ;;  %v11301_v20 = vor.u32 %v13098_v59, %v11298_v29 }
 0x490   :  { %v13270_v19 = vld [vmem:[#allocation4 + $0x69c] sm:$0xf0]  ;;  %v13226_v36 = vld [vmem:[#allocation4 + $0x544] sm:$0xf] }
 0x491   :  { %v11168_v43 = vld [vmem:[#allocation4 + $0x40] sm:$0xf]  ;;  %v11969_v30 = vor.u32 %v13270_v19, %v11968_v47  ;;  %7089 = vmatpush.bf16.msra.mxu2 %v11713_v38  ;;  %v11810_v47 = vld [vmem:[#allocation4 + $0x560] sm:$0xf0]  ;;  %v11557_v38 = vor.u32 %v13162_v15, %v11554_v18 }
 0x492   :  { %v13070_v33 = vld [vmem:[#allocation4 + $0x5c] sm:$0xf0]  ;;  %v13290_v19 = vld [vmem:[#allocation4 + $0x744] sm:$0xf] }
 0x493   :  { %v11424_v14 = vld [vmem:[#allocation4 + $0x240] sm:$0xf]  ;;  %v11169_v7 = vor.u32 %v13070_v33, %v11168_v43  ;;  %7102 = vmatpush.bf16.msra.mxu3 %v11969_v30  ;;  %v11813_v43 = vor.u32 %v13226_v36, %v11810_v47  ;;  %v13090_v33 = vld [vmem:[#allocation4 + $0x104] sm:$0xf] }
 0x494   :  { %v13134_v49 = vld [vmem:[#allocation4 + $0x25c] sm:$0xf0]  ;;  %v13154_v30 = vld [vmem:[#allocation4 + $0x304] sm:$0xf] }
 0x495   :  { %v11680_v11 = vld [vmem:[#allocation4 + $0x440] sm:$0xf]  ;;  %v11425_v9 = vor.u32 %v13134_v49, %v11424_v14  ;;  %7064 = vmatpush.bf16.msra.mxu0 %v11169_v7  ;;  %v11266_v14 = vld [vmem:[#allocation4 + $0x120] sm:$0xf0]  ;;  %v12069_v49 = vor.u32 %v13290_v19, %v12066_v48 }
 0x496   :  { %v13198_v50 = vld [vmem:[#allocation4 + $0x45c] sm:$0xf0]  ;;  %v12034_v7 = vld [vmem:[#allocation4 + $0x720] sm:$0xf0] }
 0x497   :  { %v11936_v35 = vld [vmem:[#allocation4 + $0x640] sm:$0xf]  ;;  %v11681_v40 = vor.u32 %v13198_v50, %v11680_v11  ;;  %7077 = vmatpush.bf16.msra.mxu1 %v11425_v9  ;;  %v11522_v11 = vld [vmem:[#allocation4 + $0x320] sm:$0xf0] }
 0x498   :  { %v13262_v51 = vld [vmem:[#allocation4 + $0x65c] sm:$0xf0]  ;;  %v13218_v50 = vld [vmem:[#allocation4 + $0x504] sm:$0xf] }
 0x499   :  { %v11136_v56 = vld [vmem:[#allocation4] sm:$0xf]  ;;  %v11937_v58 = vor.u32 %v13262_v51, %v11936_v35  ;;  %7090 = vmatpush.bf16.msra.mxu2 %v11681_v40  ;;  %v11778_v35 = vld [vmem:[#allocation4 + $0x520] sm:$0xf0] }
 0x49a   :  { %v13062_v53 = vld [vmem:[#allocation4 + $0x1c] sm:$0xf0]  ;;  %v13282_v51 = vld [vmem:[#allocation4 + $0x704] sm:$0xf]  ;;  %v11781_v9 = vor.u32 %v13218_v50, %v11778_v35 }
 0x49b   :  { %v11392_v27 = vld [vmem:[#allocation4 + $0x200] sm:$0xf]  ;;  %v11137_v4 = vor.u32 %v13062_v53, %v11136_v56  ;;  %7103 = vmatpush.bf16.msra.mxu3 %v11937_v58  ;;  %v11269_v56 = vor.u32 %v13090_v33, %v11266_v14  ;;  %v11525_v53 = vor.u32 %v13154_v30, %v11522_v11  ;;  %v13082_v40 = vld [vmem:[#allocation4 + $0xc4] sm:$0xf]  ;;  %v11624_v33 = vld [vmem:[#allocation4 + $0x3c8] sm:$0xf] }
 0x49c   :  { %v13126_v57 = vld [vmem:[#allocation4 + $0x21c] sm:$0xf0]  ;;  %v11490_v58 = vld [vmem:[#allocation4 + $0x2e0] sm:$0xf0]  ;;  %v13183_v30 = vld [vmem:[#allocation4 + $0x3e4] sm:$0xf0] }
 0x49d   :  { %v11648_v61 = vld [vmem:[#allocation4 + $0x400] sm:$0xf]  ;;  %v11393_v41 = vor.u32 %v13126_v57, %v11392_v27  ;;  %7065 = vmatpush.bf16.msra.mxu0 %v11137_v4  ;;  %v11234_v27 = vld [vmem:[#allocation4 + $0xe0] sm:$0xf0]  ;;  %v13247_v11 = vld [vmem:[#allocation4 + $0x5e4] sm:$0xf0] }
 0x49e   :  { %v13190_v12 = vld [vmem:[#allocation4 + $0x41c] sm:$0xf0]  ;;  %v13146_v57 = vld [vmem:[#allocation4 + $0x2c4] sm:$0xf]  ;;  %v11237_v0 = vor.u32 %v13082_v40, %v11234_v27  ;;  %v11336_v27 = vld [vmem:[#allocation4 + $0x188] sm:$0xf] }
 0x49f   :  { %v11904_v1 = vld [vmem:[#allocation4 + $0x600] sm:$0xf]  ;;  %v11649_v8 = vor.u32 %v13190_v12, %v11648_v61  ;;  %7078 = vmatpush.bf16.msra.mxu1 %v11393_v41  ;;  %v12037_v61 = vor.u32 %v13282_v51, %v12034_v7  ;;  %v13210_v12 = vld [vmem:[#allocation4 + $0x4c4] sm:$0xf]  ;;  %v11493_v55 = vor.u32 %v13146_v57, %v11490_v58  ;;  %v12136_v51 = vld [vmem:[#allocation4 + $0x7c8] sm:$0xf] }
 0x4a0   :  { %v13254_v60 = vld [vmem:[#allocation4 + $0x61c] sm:$0xf0]  ;;  %7066 = vmatmul.bf16.vlgmr.msra.gmra.mxu0 %v14136_v42  ;;  %v13074_v2 = vld [vmem:[#allocation4 + $0x84] sm:$0xf]  ;;  %v13311_v7 = vld [vmem:[#allocation4 + $0x7e4] sm:$0xf0] }
 0x4a1   :  { %v11905_v17 = vor.u32 %v13254_v60, %v11904_v1  ;;  %7091 = vmatpush.bf16.msra.mxu2 %v11649_v8  ;;  %7110 = vmatpush.bf16.msrb.mxu0 %v11365_v21  ;;  %v11746_v1 = vld [vmem:[#allocation4 + $0x4e0] sm:$0xf0]  ;;  %v13111_v57 = vld [vmem:[#allocation4 + $0x1a4] sm:$0xf0]  ;;  %v12137_v58 = vor.u32 %v13311_v7, %v12136_v51 }
 0x4a2   :  { %7079 = vmatmul.bf16.vlgmr.msra.gmra.mxu1 %v14138_v44  ;;  %v13274_v60 = vld [vmem:[#allocation4 + $0x6c4] sm:$0xf]  ;;  %v11749_v4 = vor.u32 %v13210_v12, %v11746_v1  ;;  %v13175_v12 = vld [vmem:[#allocation4 + $0x3a4] sm:$0xf0] }
 0x4a3   :  { %7104 = vmatpush.bf16.msra.mxu3 %v11905_v17  ;;  %7123 = vmatpush.bf16.msrb.mxu1 %v11621_v22  ;;  %v11202_v6 = vld [vmem:[#allocation4 + $0xa0] sm:$0xf0]  ;;  %v12005_v41 = vor.u32 %v13274_v60, %v12002_v62  ;;  %v11848_v1 = vld [vmem:[#allocation4 + $0x588] sm:$0xf] }
 0x4a4   :  { %7092 = vmatmul.bf16.vlgmr.msra.gmra.mxu2 %v14140_v45  ;;  %v13138_v5 = vld [vmem:[#allocation4 + $0x284] sm:$0xf]  ;;  %v11205_v22 = vor.u32 %v13074_v2, %v11202_v6  ;;  %v13239_v60 = vld [vmem:[#allocation4 + $0x5a4] sm:$0xf0] }
 0x4a5   :  { %7136 = vmatpush.bf16.msrb.mxu2 %v11877_v23  ;;  %7111 = vmatpush.bf16.msrb.mxu0 %v11333_v34  ;;  %v11458_v8 = vld [vmem:[#allocation4 + $0x2a0] sm:$0xf0]  ;;  %v12104_v62 = vld [vmem:[#allocation4 + $0x788] sm:$0xf]  ;;  %v11849_v2 = vor.u32 %v13239_v60, %v11848_v1 }
 0x4a6   :  { %7105 = vmatmul.bf16.vlgmr.msra.gmra.mxu3 %v14142_v24  ;;  %v13202_v54 = vld [vmem:[#allocation4 + $0x484] sm:$0xf]  ;;  %v11461_v23 = vor.u32 %v13138_v5, %v11458_v8  ;;  %v11304_v6 = vld [vmem:[#allocation4 + $0x148] sm:$0xf] }
 0x4a7   :  { %7149 = vmatpush.bf16.msrb.mxu3 %v12133_v52  ;;  %7124 = vmatpush.bf16.msrb.mxu1 %v11589_v39  ;;  %v11714_v13 = vld [vmem:[#allocation4 + $0x4a0] sm:$0xf0]  ;;  %v13103_v5 = vld [vmem:[#allocation4 + $0x164] sm:$0xf0] }
 0x4a8   :  { %v13266_v17 = vld [vmem:[#allocation4 + $0x684] sm:$0xf]  ;;  %v11717_v3 = vor.u32 %v13202_v54, %v11714_v13  ;;  %v13167_v54 = vld [vmem:[#allocation4 + $0x364] sm:$0xf0] }
 0x4a9   :  { %7137 = vmatpush.bf16.msrb.mxu2 %v11845_v31  ;;  %7112 = vmatpush.bf16.msrb.mxu0 %v11301_v20  ;;  %v11970_v21 = vld [vmem:[#allocation4 + $0x6a0] sm:$0xf0]  ;;  %v11816_v13 = vld [vmem:[#allocation4 + $0x548] sm:$0xf] }
 0x4aa   :  { %v13066_v16 = vld [vmem:[#allocation4 + $0x44] sm:$0xf]  ;;  %v11973_v25 = vor.u32 %v13266_v17, %v11970_v21  ;;  %v13231_v17 = vld [vmem:[#allocation4 + $0x564] sm:$0xf0] }
 0x4ab   :  { %7150 = vmatpush.bf16.msrb.mxu3 %v12101_v46  ;;  %7125 = vmatpush.bf16.msrb.mxu1 %v11557_v38  ;;  %v11170_v63 = vld [vmem:[#allocation4 + $0x60] sm:$0xf0]  ;;  %v11368_v38 = vld [vmem:[#allocation4 + $0x1c8] sm:$0xf] }
 0x4ac   :  { %v13130_v52 = vld [vmem:[#allocation4 + $0x244] sm:$0xf]  ;;  %v11173_v39 = vor.u32 %v13066_v16, %v11170_v63  ;;  %v12072_v21 = vld [vmem:[#allocation4 + $0x748] sm:$0xf]  ;;  %v11817_v16 = vor.u32 %v13231_v17, %v11816_v13 }
 0x4ad   :  { %7138 = vmatpush.bf16.msrb.mxu2 %v11813_v43  ;;  %7113 = vmatpush.bf16.msrb.mxu0 %v11269_v56  ;;  %v11426_v10 = vld [vmem:[#allocation4 + $0x260] sm:$0xf0]  ;;  %v13119_v43 = vld [vmem:[#allocation4 + $0x1e4] sm:$0xf0] }
 0x4ae   :  { %v13194_v26 = vld [vmem:[#allocation4 + $0x444] sm:$0xf]  ;;  %v11429_v29 = vor.u32 %v13130_v52, %v11426_v10  ;;  %v11272_v63 = vld [vmem:[#allocation4 + $0x108] sm:$0xf] }
 0x4af   :  { %7151 = vmatpush.bf16.msrb.mxu3 %v12069_v49  ;;  %7126 = vmatpush.bf16.msrb.mxu1 %v11525_v53  ;;  %v11682_v28 = vld [vmem:[#allocation4 + $0x460] sm:$0xf0]  ;;  %v11880_v49 = vld [vmem:[#allocation4 + $0x5c8] sm:$0xf]  ;;  %v11369_v53 = vor.u32 %v13119_v43, %v11368_v38 }
 0x4b0   :  { %v13258_v32 = vld [vmem:[#allocation4 + $0x644] sm:$0xf]  ;;  %v11685_v15 = vor.u32 %v13194_v26, %v11682_v28  ;;  %v11881_v40 = vor.u32 %v13247_v11, %v11880_v49  ;;  %v13095_v52 = vld [vmem:[#allocation4 + $0x124] sm:$0xf0] }
 0x4b1   :  { %7139 = vmatpush.bf16.msrb.mxu2 %v11781_v9  ;;  %7114 = vmatpush.bf16.msrb.mxu0 %v11237_v0  ;;  %v11938_v34 = vld [vmem:[#allocation4 + $0x660] sm:$0xf0]  ;;  %v11625_v9 = vor.u32 %v13183_v30, %v11624_v33  ;;  %v13303_v0 = vld [vmem:[#allocation4 + $0x7a4] sm:$0xf0] }
 0x4b2   :  { %v13058_v31 = vld [vmem:[#allocation4 + $0x4] sm:$0xf]  ;;  %v11941_v47 = vor.u32 %v13258_v32, %v11938_v34  ;;  %v12105_v8 = vor.u32 %v13303_v0, %v12104_v62  ;;  %v13159_v26 = vld [vmem:[#allocation4 + $0x324] sm:$0xf0] }
 0x4b3   :  { %7152 = vmatpush.bf16.msrb.mxu3 %v12037_v61  ;;  %7127 = vmatpush.bf16.msrb.mxu1 %v11493_v55  ;;  %v11138_v59 = vld [vmem:[#allocation4 + $0x20] sm:$0xf0]  ;;  %v11592_v61 = vld [vmem:[#allocation4 + $0x388] sm:$0xf]  ;;  %v11337_v55 = vor.u32 %v13111_v57, %v11336_v27 }
 0x4b4   :  { %v13122_v46 = vld [vmem:[#allocation4 + $0x204] sm:$0xf]  ;;  %v11141_v14 = vor.u32 %v13058_v31, %v11138_v59  ;;  %v11784_v28 = vld [vmem:[#allocation4 + $0x508] sm:$0xf]  ;;  %v11273_v31 = vor.u32 %v13095_v52, %v11272_v63  ;;  %v13179_v63 = vld [vmem:[#allocation4 + $0x3cc] sm:$0xf] }
 0x4b5   :  { %7140 = vmatpush.bf16.msrb.mxu2 %v11749_v4  ;;  %7115 = vmatpush.bf16.msrb.mxu0 %v11205_v22  ;;  %v11394_v18 = vld [vmem:[#allocation4 + $0x220] sm:$0xf0]  ;;  %v11593_v4 = vor.u32 %v13175_v12, %v11592_v61  ;;  %v13295_v22 = vld [vmem:[#allocation4 + $0x764] sm:$0xf0] }
 0x4b6   :  { %v13186_v36 = vld [vmem:[#allocation4 + $0x404] sm:$0xf]  ;;  %v11397_v50 = vor.u32 %v13122_v46, %v11394_v18  ;;  %v12073_v10 = vor.u32 %v13295_v22, %v12072_v21  ;;  %v13223_v32 = vld [vmem:[#allocation4 + $0x524] sm:$0xf0] }
 0x4b7   :  { %7153 = vmatpush.bf16.msrb.mxu3 %v12005_v41  ;;  %7128 = vmatpush.bf16.msrb.mxu1 %v11461_v23  ;;  %v11650_v19 = vld [vmem:[#allocation4 + $0x420] sm:$0xf0]  ;;  %v11560_v41 = vld [vmem:[#allocation4 + $0x348] sm:$0xf]  ;;  %v11305_v23 = vor.u32 %v13103_v5, %v11304_v6 }
 0x4b8   :  { %v13250_v48 = vld [vmem:[#allocation4 + $0x604] sm:$0xf]  ;;  %v11653_v35 = vor.u32 %v13186_v36, %v11650_v19  ;;  %v12040_v34 = vld [vmem:[#allocation4 + $0x708] sm:$0xf] }
 0x4b9   :  { %7141 = vmatpush.bf16.msrb.mxu2 %v11717_v3  ;;  %v11906_v20 = vld [vmem:[#allocation4 + $0x620] sm:$0xf0]  ;;  %7116 = vmatpush.bf16.msrb.mxu0 %v11173_v39  ;;  %v11561_v3 = vor.u32 %v13167_v54, %v11560_v41  ;;  %v13287_v39 = vld [vmem:[#allocation4 + $0x724] sm:$0xf0] }
 0x4ba   :  { %v11909_v56 = vor.u32 %v13250_v48, %v11906_v20  ;;  %v13087_v46 = vld [vmem:[#allocation4 + $0xe4] sm:$0xf0]  ;;  %v12041_v36 = vor.u32 %v13287_v39, %v12040_v34  ;;  %v13307_v34 = vld [vmem:[#allocation4 + $0x7cc] sm:$0xf] }
 0x4bb   :  { %7154 = vmatpush.bf16.msrb.mxu3 %v11973_v25  ;;  %7129 = vmatpush.bf16.msrb.mxu1 %v11429_v29  ;;  %v11528_v25 = vld [vmem:[#allocation4 + $0x308] sm:$0xf]  ;;  %v11785_v29 = vor.u32 %v13223_v32, %v11784_v28  ;;  %v12138_v39 = vld [vmem:[#allocation4 + $0x7e8] sm:$0xf0] }
 0x4bc   :  { %v11529_v59 = vor.u32 %v13159_v26, %v11528_v25  ;;  %v11496_v18 = vld [vmem:[#allocation4 + $0x2c8] sm:$0xf]  ;;  %v11626_v25 = vld [vmem:[#allocation4 + $0x3e8] sm:$0xf0] }
 0x4bd   :  { %7142 = vmatpush.bf16.msrb.mxu2 %v11685_v15  ;;  %7117 = vmatpush.bf16.msrb.mxu0 %v11141_v14  ;;  %v11240_v15 = vld [vmem:[#allocation4 + $0xc8] sm:$0xf]  ;;  %v11882_v26 = vld [vmem:[#allocation4 + $0x5e8] sm:$0xf0] }
 0x4be   :  { %v11752_v19 = vld [vmem:[#allocation4 + $0x4c8] sm:$0xf]  ;;  %v11241_v43 = vor.u32 %v13087_v46, %v11240_v15  ;;  %v13107_v46 = vld [vmem:[#allocation4 + $0x18c] sm:$0xf] }
 0x4bf   :  { %7155 = vmatpush.bf16.msrb.mxu3 %v11941_v47  ;;  %7130 = vmatpush.bf16.msrb.mxu1 %v11397_v50  ;;  %v13151_v47 = vld [vmem:[#allocation4 + $0x2e4] sm:$0xf0] }
 0x4c0   :  { %7118 = vmatmul.bf16.vlgmr.msrb.gmra.mxu0 %v14136_v42  ;;  %v13215_v48 = vld [vmem:[#allocation4 + $0x4e4] sm:$0xf0]  ;;  %v11497_v33 = vor.u32 %v13151_v47, %v11496_v18  ;;  %v11338_v18 = vld [vmem:[#allocation4 + $0x1a8] sm:$0xf0]  ;;  %v12141_v47 = vor.u32 %v13307_v34, %v12138_v39 }
 0x4c1   :  { %7143 = vmatpush.bf16.msrb.mxu2 %v11653_v35  ;;  %7162 = vmatpush.bf16.msra.mxu0 %v11369_v53  ;;  %v12008_v20 = vld [vmem:[#allocation4 + $0x6c8] sm:$0xf]  ;;  %v11753_v14 = vor.u32 %v13215_v48, %v11752_v19  ;;  %v11594_v19 = vld [vmem:[#allocation4 + $0x3a8] sm:$0xf0] }
 0x4c2   :  { %7131 = vmatmul.bf16.vlgmr.msrb.gmra.mxu1 %v14138_v44  ;;  %v13279_v38 = vld [vmem:[#allocation4 + $0x6e4] sm:$0xf0]  ;;  %v13235_v48 = vld [vmem:[#allocation4 + $0x58c] sm:$0xf] }
 0x4c3   :  { %7156 = vmatpush.bf16.msrb.mxu3 %v11909_v56  ;;  %7175 = vmatpush.bf16.msra.mxu1 %v11625_v9  ;;  %v11208_v30 = vld [vmem:[#allocation4 + $0x88] sm:$0xf]  ;;  %v12009_v50 = vor.u32 %v13279_v38, %v12008_v20  ;;  %v11850_v20 = vld [vmem:[#allocation4 + $0x5a8] sm:$0xf0] }
 0x4c4   :  { %7144 = vmatmul.bf16.vlgmr.msrb.gmra.mxu2 %v14140_v45  ;;  %v13079_v49 = vld [vmem:[#allocation4 + $0xa4] sm:$0xf0]  ;;  %v13299_v38 = vld [vmem:[#allocation4 + $0x78c] sm:$0xf] }
 0x4c5   :  { %7188 = vmatpush.bf16.msra.mxu2 %v11881_v40  ;;  %7163 = vmatpush.bf16.msra.mxu0 %v11337_v55  ;;  %v11464_v11 = vld [vmem:[#allocation4 + $0x288] sm:$0xf]  ;;  %v11209_v9 = vor.u32 %v13079_v49, %v11208_v30  ;;  %v11853_v30 = vor.u32 %v13235_v48, %v11850_v20  ;;  %v13099_v49 = vld [vmem:[#allocation4 + $0x14c] sm:$0xf] }
 0x4c6   :  { %7157 = vmatmul.bf16.vlgmr.msrb.gmra.mxu3 %v14142_v24  ;;  %v13143_v35 = vld [vmem:[#allocation4 + $0x2a4] sm:$0xf0]  ;;  %v13203_v34 = vld [vmem:[#allocation4 + $0x48c] sm:$0xf] }
 0x4c7   :  { %7201 = vmatpush.bf16.msra.mxu3 %v12137_v58  ;;  %7176 = vmatpush.bf16.msra.mxu1 %v11593_v4  ;;  %v11720_v51 = vld [vmem:[#allocation4 + $0x488] sm:$0xf]  ;;  %v11465_v40 = vor.u32 %v13143_v35, %v11464_v11  ;;  %v11306_v11 = vld [vmem:[#allocation4 + $0x168] sm:$0xf0] }
 0x4c8   :  { %v13207_v7 = vld [vmem:[#allocation4 + $0x4a4] sm:$0xf0]  ;;  %v11722_v39 = vld [vmem:[#allocation4 + $0x4a8] sm:$0xf0] }
 0x4c9   :  { %7189 = vmatpush.bf16.msra.mxu2 %v11849_v2  ;;  %7164 = vmatpush.bf16.msra.mxu0 %v11305_v23  ;;  %v11976_v56 = vld [vmem:[#allocation4 + $0x688] sm:$0xf]  ;;  %v11721_v27 = vor.u32 %v13207_v7, %v11720_v51  ;;  %v11562_v51 = vld [vmem:[#allocation4 + $0x368] sm:$0xf0] }
 0x4ca   :  { %v13271_v53 = vld [vmem:[#allocation4 + $0x6a4] sm:$0xf0]  ;;  %v13227_v7 = vld [vmem:[#allocation4 + $0x54c] sm:$0xf] }
 0x4cb   :  { %7202 = vmatpush.bf16.msra.mxu3 %v12105_v8  ;;  %7177 = vmatpush.bf16.msra.mxu1 %v11561_v3  ;;  %v11176_v57 = vld [vmem:[#allocation4 + $0x48] sm:$0xf]  ;;  %v11977_v12 = vor.u32 %v13271_v53, %v11976_v56  ;;  %v13115_v3 = vld [vmem:[#allocation4 + $0x1cc] sm:$0xf] }
 0x4cc   :  { %v13071_v61 = vld [vmem:[#allocation4 + $0x64] sm:$0xf0]  ;;  %v11818_v56 = vld [vmem:[#allocation4 + $0x568] sm:$0xf0] }
 0x4cd   :  { %7190 = vmatpush.bf16.msra.mxu2 %v11817_v16  ;;  %7165 = vmatpush.bf16.msra.mxu0 %v11273_v31  ;;  %v11432_v58 = vld [vmem:[#allocation4 + $0x248] sm:$0xf]  ;;  %v11177_v4 = vor.u32 %v13071_v61, %v11176_v57  ;;  %v11370_v16 = vld [vmem:[#allocation4 + $0x1e8] sm:$0xf0]  ;;  %v11821_v57 = vor.u32 %v13227_v7, %v11818_v56 }
 0x4ce   :  { %v13135_v1 = vld [vmem:[#allocation4 + $0x264] sm:$0xf0]  ;;  %v13291_v53 = vld [vmem:[#allocation4 + $0x74c] sm:$0xf] }
 0x4cf   :  { %7203 = vmatpush.bf16.msra.mxu3 %v12073_v10  ;;  %7178 = vmatpush.bf16.msra.mxu1 %v11529_v59  ;;  %v11688_v60 = vld [vmem:[#allocation4 + $0x448] sm:$0xf]  ;;  %v11433_v5 = vor.u32 %v13135_v1, %v11432_v58  ;;  %v13243_v10 = vld [vmem:[#allocation4 + $0x5cc] sm:$0xf]  ;;  %v11373_v59 = vor.u32 %v13115_v3, %v11370_v16 }
 0x4d0   :  { %v13199_v62 = vld [vmem:[#allocation4 + $0x464] sm:$0xf0]  ;;  %v11885_v15 = vor.u32 %v13243_v10, %v11882_v26  ;;  %v13091_v61 = vld [vmem:[#allocation4 + $0x10c] sm:$0xf] }
 0x4d1   :  { %7191 = vmatpush.bf16.msra.mxu2 %v11785_v29  ;;  %7166 = vmatpush.bf16.msra.mxu0 %v11241_v43  ;;  %v11944_v0 = vld [vmem:[#allocation4 + $0x648] sm:$0xf]  ;;  %v11689_v41 = vor.u32 %v13199_v62, %v11688_v60  ;;  %v11629_v29 = vor.u32 %v13179_v63, %v11626_v25  ;;  %v12106_v43 = vld [vmem:[#allocation4 + $0x7a8] sm:$0xf0] }
 0x4d2   :  { %v13263_v55 = vld [vmem:[#allocation4 + $0x664] sm:$0xf0]  ;;  %v12109_v35 = vor.u32 %v13299_v38, %v12106_v43  ;;  %v11274_v58 = vld [vmem:[#allocation4 + $0x128] sm:$0xf0] }
 0x4d3   :  { %7204 = vmatpush.bf16.msra.mxu3 %v12041_v36  ;;  %7179 = vmatpush.bf16.msra.mxu1 %v11497_v33  ;;  %v11144_v2 = vld [vmem:[#allocation4 + $0x8] sm:$0xf]  ;;  %v11945_v17 = vor.u32 %v13263_v55, %v11944_v0  ;;  %v13171_v36 = vld [vmem:[#allocation4 + $0x38c] sm:$0xf]  ;;  %v11341_v33 = vor.u32 %v13107_v46, %v11338_v18  ;;  %v11725_v46 = vor.u32 %v13203_v34, %v11722_v39  ;;  %v13168_v34 = vld [vmem:[#allocation4 + $0x36c] sm:$0xf0] }
 0x4d4   :  { %v13063_v6 = vld [vmem:[#allocation4 + $0x24] sm:$0xf0]  ;;  %v11530_v60 = vld [vmem:[#allocation4 + $0x328] sm:$0xf0]  ;;  %v11824_v39 = vld [vmem:[#allocation4 + $0x550] sm:$0xf] }
 0x4d5   :  { %7192 = vmatpush.bf16.msra.mxu2 %v11753_v14  ;;  %7167 = vmatpush.bf16.msra.mxu0 %v11209_v9  ;;  %v11400_v8 = vld [vmem:[#allocation4 + $0x208] sm:$0xf]  ;;  %v11145_v52 = vor.u32 %v13063_v6, %v11144_v2  ;;  %v11597_v14 = vor.u32 %v13171_v36, %v11594_v19  ;;  %v12074_v9 = vld [vmem:[#allocation4 + $0x768] sm:$0xf0]  ;;  %v11277_v2 = vor.u32 %v13091_v61, %v11274_v58  ;;  %v11632_v61 = vld [vmem:[#allocation4 + $0x3d0] sm:$0xf] }
 0x4d6   :  { %v13127_v54 = vld [vmem:[#allocation4 + $0x224] sm:$0xf0]  ;;  %v12077_v1 = vor.u32 %v13291_v53, %v12074_v9  ;;  %v13219_v62 = vld [vmem:[#allocation4 + $0x50c] sm:$0xf] }
 0x4d7   :  { %7205 = vmatpush.bf16.msra.mxu3 %v12009_v50  ;;  %7180 = vmatpush.bf16.msra.mxu1 %v11465_v40  ;;  %v11656_v13 = vld [vmem:[#allocation4 + $0x408] sm:$0xf]  ;;  %v11401_v28 = vor.u32 %v13127_v54, %v11400_v8  ;;  %v13163_v50 = vld [vmem:[#allocation4 + $0x34c] sm:$0xf]  ;;  %v11309_v40 = vor.u32 %v13099_v49, %v11306_v11 }
 0x4d8   :  { %v13191_v21 = vld [vmem:[#allocation4 + $0x424] sm:$0xf0]  ;;  %v11786_v0 = vld [vmem:[#allocation4 + $0x528] sm:$0xf0] }
 0x4d9   :  { %7193 = vmatpush.bf16.msra.mxu2 %v11721_v27  ;;  %v11912_v22 = vld [vmem:[#allocation4 + $0x608] sm:$0xf]  ;;  %7168 = vmatpush.bf16.msra.mxu0 %v11177_v4  ;;  %v11657_v32 = vor.u32 %v13191_v21, %v11656_v13  ;;  %v11565_v27 = vor.u32 %v13163_v50, %v11562_v51  ;;  %v13283_v55 = vld [vmem:[#allocation4 + $0x70c] sm:$0xf] }
 0x4da   :  { %v13255_v23 = vld [vmem:[#allocation4 + $0x624] sm:$0xf0]  ;;  %v12042_v4 = vld [vmem:[#allocation4 + $0x728] sm:$0xf0] }
 0x4db   :  { %7206 = vmatpush.bf16.msra.mxu3 %v11977_v12  ;;  %7181 = vmatpush.bf16.msra.mxu1 %v11433_v5  ;;  %v11913_v31 = vor.u32 %v13255_v23, %v11912_v22  ;;  %v13155_v12 = vld [vmem:[#allocation4 + $0x30c] sm:$0xf]  ;;  %v11789_v5 = vor.u32 %v13219_v62, %v11786_v0  ;;  %v12045_v13 = vor.u32 %v13283_v55, %v12042_v4  ;;  %v12144_v55 = vld [vmem:[#allocation4 + $0x7d0] sm:$0xf] }
 0x4dc   :  { %v11533_v6 = vor.u32 %v13155_v12, %v11530_v60  ;;  %v11242_v8 = vld [vmem:[#allocation4 + $0xe8] sm:$0xf0]  ;;  %v13184_v12 = vld [vmem:[#allocation4 + $0x3ec] sm:$0xf0] }
 0x4dd   :  { %7194 = vmatpush.bf16.msra.mxu2 %v11689_v41  ;;  %7169 = vmatpush.bf16.msra.mxu0 %v11145_v52  ;;  %v13083_v41 = vld [vmem:[#allocation4 + $0xcc] sm:$0xf]  ;;  %v13248_v60 = vld [vmem:[#allocation4 + $0x5ec] sm:$0xf0] }
 0x4de   :  { %v13147_v54 = vld [vmem:[#allocation4 + $0x2cc] sm:$0xf]  ;;  %v11245_v16 = vor.u32 %v13083_v41, %v11242_v8  ;;  %v13312_v4 = vld [vmem:[#allocation4 + $0x7ec] sm:$0xf0] }
 0x4df   :  { %7207 = vmatpush.bf16.msra.mxu3 %v11945_v17  ;;  %7182 = vmatpush.bf16.msra.mxu1 %v11401_v28  ;;  %v11498_v17 = vld [vmem:[#allocation4 + $0x2e8] sm:$0xf0]  ;;  %v11344_v8 = vld [vmem:[#allocation4 + $0x190] sm:$0xf] }
 0x4e0   :  { %7170 = vmatmul.bf16.vlgmr.msra.gmra.mxu0 %v14136_v42  ;;  %v13211_v21 = vld [vmem:[#allocation4 + $0x4cc] sm:$0xf]  ;;  %v11501_v63 = vor.u32 %v13147_v54, %v11498_v17  ;;  %v13112_v54 = vld [vmem:[#allocation4 + $0x1ac] sm:$0xf0]  ;;  %v12145_v17 = vor.u32 %v13312_v4, %v12144_v55 }
 0x4e1   :  { %7195 = vmatpush.bf16.msra.mxu2 %v11657_v32  ;;  %7214 = vmatpush.bf16.msrb.mxu0 %v11373_v59  ;;  %v11754_v22 = vld [vmem:[#allocation4 + $0x4e8] sm:$0xf0]  ;;  %v11728_v55 = vld [vmem:[#allocation4 + $0x490] sm:$0xf] }
 0x4e2   :  { %7183 = vmatmul.bf16.vlgmr.msra.gmra.mxu1 %v14138_v44  ;;  %v13275_v23 = vld [vmem:[#allocation4 + $0x6cc] sm:$0xf]  ;;  %v11757_v52 = vor.u32 %v13211_v21, %v11754_v22  ;;  %v13176_v21 = vld [vmem:[#allocation4 + $0x3ac] sm:$0xf0] }
 0x4e3   :  { %7208 = vmatpush.bf16.msra.mxu3 %v11913_v31  ;;  %7227 = vmatpush.bf16.msrb.mxu1 %v11629_v29  ;;  %v12010_v3 = vld [vmem:[#allocation4 + $0x6e8] sm:$0xf0]  ;;  %v11856_v22 = vld [vmem:[#allocation4 + $0x590] sm:$0xf] }
 0x4e4   :  { %7196 = vmatmul.bf16.vlgmr.msra.gmra.mxu2 %v14140_v45  ;;  %v13075_v25 = vld [vmem:[#allocation4 + $0x8c] sm:$0xf]  ;;  %v12013_v28 = vor.u32 %v13275_v23, %v12010_v3  ;;  %v13240_v23 = vld [vmem:[#allocation4 + $0x5ac] sm:$0xf0] }
 0x4e5   :  { %7240 = vmatpush.bf16.msrb.mxu2 %v11885_v15  ;;  %7215 = vmatpush.bf16.msrb.mxu0 %v11341_v33  ;;  %v11210_v10 = vld [vmem:[#allocation4 + $0xa8] sm:$0xf0]  ;;  %v12112_v3 = vld [vmem:[#allocation4 + $0x790] sm:$0xf] }
 0x4e6   :  { %7209 = vmatmul.bf16.vlgmr.msra.gmra.mxu3 %v14142_v24  ;;  %v13139_v26 = vld [vmem:[#allocation4 + $0x28c] sm:$0xf]  ;;  %v11213_v29 = vor.u32 %v13075_v25, %v11210_v10  ;;  %v11857_v25 = vor.u32 %v13240_v23, %v11856_v22  ;;  %v11312_v10 = vld [vmem:[#allocation4 + $0x150] sm:$0xf] }
 0x4e7   :  { %7253 = vmatpush.bf16.msrb.mxu3 %v12141_v47  ;;  %7228 = vmatpush.bf16.msrb.mxu1 %v11597_v14  ;;  %v11466_v32 = vld [vmem:[#allocation4 + $0x2a8] sm:$0xf0]  ;;  %v13208_v4 = vld [vmem:[#allocation4 + $0x4ac] sm:$0xf0] }
 0x4e8   :  { %v13267_v31 = vld [vmem:[#allocation4 + $0x68c] sm:$0xf]  ;;  %v11469_v15 = vor.u32 %v13139_v26, %v11466_v32  ;;  %v13104_v26 = vld [vmem:[#allocation4 + $0x16c] sm:$0xf0] }
 0x4e9   :  { %7241 = vmatpush.bf16.msrb.mxu2 %v11853_v30  ;;  %7216 = vmatpush.bf16.msrb.mxu0 %v11309_v40  ;;  %v11978_v59 = vld [vmem:[#allocation4 + $0x6a8] sm:$0xf0]  ;;  %v13136_v22 = vld [vmem:[#allocation4 + $0x26c] sm:$0xf0] }
 0x4ea   :  { %v13067_v18 = vld [vmem:[#allocation4 + $0x4c] sm:$0xf]  ;;  %v11981_v19 = vor.u32 %v13267_v31, %v11978_v59  ;;  %v13232_v31 = vld [vmem:[#allocation4 + $0x56c] sm:$0xf0] }
 0x4eb   :  { %7254 = vmatpush.bf16.msrb.mxu3 %v12109_v35  ;;  %7229 = vmatpush.bf16.msrb.mxu1 %v11565_v27  ;;  %v11178_v36 = vld [vmem:[#allocation4 + $0x68] sm:$0xf0]  ;;  %v11376_v27 = vld [vmem:[#allocation4 + $0x1d0] sm:$0xf] }
 0x4ec   :  { %v13131_v47 = vld [vmem:[#allocation4 + $0x24c] sm:$0xf]  ;;  %v11181_v14 = vor.u32 %v13067_v18, %v11178_v36  ;;  %v12080_v59 = vld [vmem:[#allocation4 + $0x750] sm:$0xf]  ;;  %v11825_v18 = vor.u32 %v13232_v31, %v11824_v39 }
 0x4ed   :  { %7242 = vmatpush.bf16.msrb.mxu2 %v11821_v57  ;;  %7217 = vmatpush.bf16.msrb.mxu0 %v11277_v2  ;;  %v11434_v48 = vld [vmem:[#allocation4 + $0x268] sm:$0xf0]  ;;  %v13120_v57 = vld [vmem:[#allocation4 + $0x1ec] sm:$0xf0] }
 0x4ee   :  { %v13195_v20 = vld [vmem:[#allocation4 + $0x44c] sm:$0xf]  ;;  %v11437_v11 = vor.u32 %v13131_v47, %v11434_v48  ;;  %v11280_v36 = vld [vmem:[#allocation4 + $0x110] sm:$0xf] }
 0x4ef   :  { %7255 = vmatpush.bf16.msrb.mxu3 %v12077_v1  ;;  %7230 = vmatpush.bf16.msrb.mxu1 %v11533_v6  ;;  %v11690_v38 = vld [vmem:[#allocation4 + $0x468] sm:$0xf0]  ;;  %v11888_v1 = vld [vmem:[#allocation4 + $0x5d0] sm:$0xf]  ;;  %v11377_v6 = vor.u32 %v13120_v57, %v11376_v27 }
 0x4f0   :  { %v13259_v43 = vld [vmem:[#allocation4 + $0x64c] sm:$0xf]  ;;  %v11693_v50 = vor.u32 %v13195_v20, %v11690_v38  ;;  %v11889_v41 = vor.u32 %v13248_v60, %v11888_v1  ;;  %v13096_v47 = vld [vmem:[#allocation4 + $0x12c] sm:$0xf0] }
 0x4f1   :  { %7243 = vmatpush.bf16.msrb.mxu2 %v11789_v5  ;;  %7218 = vmatpush.bf16.msrb.mxu0 %v11245_v16  ;;  %v11946_v33 = vld [vmem:[#allocation4 + $0x668] sm:$0xf0]  ;;  %v11633_v5 = vor.u32 %v13184_v12, %v11632_v61  ;;  %v13304_v16 = vld [vmem:[#allocation4 + $0x7ac] sm:$0xf0] }
 0x4f2   :  { %v13059_v30 = vld [vmem:[#allocation4 + $0xc] sm:$0xf]  ;;  %v11949_v56 = vor.u32 %v13259_v43, %v11946_v33  ;;  %v12113_v32 = vor.u32 %v13304_v16, %v12112_v3  ;;  %v13160_v20 = vld [vmem:[#allocation4 + $0x32c] sm:$0xf0] }
 0x4f3   :  { %7256 = vmatpush.bf16.msrb.mxu3 %v12045_v13  ;;  %7231 = vmatpush.bf16.msrb.mxu1 %v11501_v63  ;;  %v11146_v49 = vld [vmem:[#allocation4 + $0x28] sm:$0xf0]  ;;  %v11600_v13 = vld [vmem:[#allocation4 + $0x390] sm:$0xf]  ;;  %v11345_v63 = vor.u32 %v13112_v54, %v11344_v8  ;;  %v11729_v8 = vor.u32 %v13208_v4, %v11728_v55  ;;  %v11570_v55 = vld [vmem:[#allocation4 + $0x370] sm:$0xf0] }
 0x4f4   :  { %v13123_v35 = vld [vmem:[#allocation4 + $0x20c] sm:$0xf]  ;;  %v11149_v58 = vor.u32 %v13059_v30, %v11146_v49  ;;  %v11792_v38 = vld [vmem:[#allocation4 + $0x510] sm:$0xf]  ;;  %v11281_v30 = vor.u32 %v13096_v47, %v11280_v36  ;;  %v13180_v36 = vld [vmem:[#allocation4 + $0x3d4] sm:$0xf] }
 0x4f5   :  { %7244 = vmatpush.bf16.msrb.mxu2 %v11757_v52  ;;  %7219 = vmatpush.bf16.msrb.mxu0 %v11213_v29  ;;  %v11402_v51 = vld [vmem:[#allocation4 + $0x228] sm:$0xf0]  ;;  %v11601_v52 = vor.u32 %v13176_v21, %v11600_v13  ;;  %v13296_v29 = vld [vmem:[#allocation4 + $0x76c] sm:$0xf0]  ;;  %v13228_v4 = vld [vmem:[#allocation4 + $0x554] sm:$0xf] }
 0x4f6   :  { %v13187_v7 = vld [vmem:[#allocation4 + $0x40c] sm:$0xf]  ;;  %v11405_v62 = vor.u32 %v13123_v35, %v11402_v51  ;;  %v12081_v48 = vor.u32 %v13296_v29, %v12080_v59  ;;  %v13224_v43 = vld [vmem:[#allocation4 + $0x52c] sm:$0xf0] }
 0x4f7   :  { %7257 = vmatpush.bf16.msrb.mxu3 %v12013_v28  ;;  %7232 = vmatpush.bf16.msrb.mxu1 %v11469_v15  ;;  %v11658_v53 = vld [vmem:[#allocation4 + $0x428] sm:$0xf0]  ;;  %v11568_v28 = vld [vmem:[#allocation4 + $0x350] sm:$0xf]  ;;  %v11313_v15 = vor.u32 %v13104_v26, %v11312_v10 }
 0x4f8   :  { %v13251_v9 = vld [vmem:[#allocation4 + $0x60c] sm:$0xf]  ;;  %v11661_v0 = vor.u32 %v13187_v7, %v11658_v53  ;;  %v12048_v33 = vld [vmem:[#allocation4 + $0x710] sm:$0xf] }
 0x4f9   :  { %7245 = vmatpush.bf16.msrb.mxu2 %v11725_v46  ;;  %v11914_v40 = vld [vmem:[#allocation4 + $0x628] sm:$0xf0]  ;;  %7220 = vmatpush.bf16.msrb.mxu0 %v11181_v14  ;;  %v11569_v46 = vor.u32 %v13168_v34, %v11568_v28  ;;  %v13288_v14 = vld [vmem:[#allocation4 + $0x72c] sm:$0xf0] }
 0x4fa   :  { %v11917_v2 = vor.u32 %v13251_v9, %v11914_v40  ;;  %v13088_v35 = vld [vmem:[#allocation4 + $0xec] sm:$0xf0]  ;;  %v12049_v7 = vor.u32 %v13288_v14, %v12048_v33  ;;  %v13308_v33 = vld [vmem:[#allocation4 + $0x7d4] sm:$0xf] }
 0x4fb   :  { %7258 = vmatpush.bf16.msrb.mxu3 %v11981_v19  ;;  %7233 = vmatpush.bf16.msrb.mxu1 %v11437_v11  ;;  %v11536_v19 = vld [vmem:[#allocation4 + $0x310] sm:$0xf]  ;;  %v11793_v11 = vor.u32 %v13224_v43, %v11792_v38  ;;  %v12146_v14 = vld [vmem:[#allocation4 + $0x7f0] sm:$0xf0] }
 0x4fc   :  { %v11537_v49 = vor.u32 %v13160_v20, %v11536_v19  ;;  %v11504_v51 = vld [vmem:[#allocation4 + $0x2d0] sm:$0xf]  ;;  %v11634_v19 = vld [vmem:[#allocation4 + $0x3f0] sm:$0xf0] }
 0x4fd   :  { %7246 = vmatpush.bf16.msrb.mxu2 %v11693_v50  ;;  %7221 = vmatpush.bf16.msrb.mxu0 %v11149_v58  ;;  %v11248_v50 = vld [vmem:[#allocation4 + $0xd0] sm:$0xf]  ;;  %v11890_v20 = vld [vmem:[#allocation4 + $0x5f0] sm:$0xf0] }
 0x4fe   :  { %v11760_v53 = vld [vmem:[#allocation4 + $0x4d0] sm:$0xf]  ;;  %v11249_v57 = vor.u32 %v13088_v35, %v11248_v50  ;;  %v13108_v35 = vld [vmem:[#allocation4 + $0x194] sm:$0xf] }
 0x4ff   :  { %7259 = vmatpush.bf16.msrb.mxu3 %v11949_v56  ;;  %7234 = vmatpush.bf16.msrb.mxu1 %v11405_v62  ;;  %v13152_v56 = vld [vmem:[#allocation4 + $0x2ec] sm:$0xf0] }
 0x500   :  { %7222 = vmatmul.bf16.vlgmr.msrb.gmra.mxu0 %v14136_v42  ;;  %v13216_v9 = vld [vmem:[#allocation4 + $0x4ec] sm:$0xf0]  ;;  %v11505_v61 = vor.u32 %v13152_v56, %v11504_v51  ;;  %v11346_v51 = vld [vmem:[#allocation4 + $0x1b0] sm:$0xf0]  ;;  %v12149_v56 = vor.u32 %v13308_v33, %v12146_v14 }
 0x501   :  { %7247 = vmatpush.bf16.msrb.mxu2 %v11661_v0  ;;  %7266 = vmatpush.bf16.msra.mxu0 %v11377_v6  ;;  %v12016_v40 = vld [vmem:[#allocation4 + $0x6d0] sm:$0xf]  ;;  %v11761_v58 = vor.u32 %v13216_v9, %v11760_v53  ;;  %v11602_v53 = vld [vmem:[#allocation4 + $0x3b0] sm:$0xf0] }
 0x502   :  { %7235 = vmatmul.bf16.vlgmr.msrb.gmra.mxu1 %v14138_v44  ;;  %v13280_v27 = vld [vmem:[#allocation4 + $0x6ec] sm:$0xf0]  ;;  %v13236_v9 = vld [vmem:[#allocation4 + $0x594] sm:$0xf] }
 0x503   :  { %7260 = vmatpush.bf16.msrb.mxu3 %v11917_v2  ;;  %7279 = vmatpush.bf16.msra.mxu1 %v11633_v5  ;;  %v11216_v12 = vld [vmem:[#allocation4 + $0x90] sm:$0xf]  ;;  %v12017_v62 = vor.u32 %v13280_v27, %v12016_v40  ;;  %v11858_v40 = vld [vmem:[#allocation4 + $0x5b0] sm:$0xf0] }
 0x504   :  { %7248 = vmatmul.bf16.vlgmr.msrb.gmra.mxu2 %v14140_v45  ;;  %v13080_v1 = vld [vmem:[#allocation4 + $0xac] sm:$0xf0]  ;;  %v13300_v27 = vld [vmem:[#allocation4 + $0x794] sm:$0xf] }
 0x505   :  { %7292 = vmatpush.bf16.msra.mxu2 %v11889_v41  ;;  %7267 = vmatpush.bf16.msra.mxu0 %v11345_v63  ;;  %v11472_v60 = vld [vmem:[#allocation4 + $0x290] sm:$0xf]  ;;  %v11217_v5 = vor.u32 %v13080_v1, %v11216_v12  ;;  %v11861_v12 = vor.u32 %v13236_v9, %v11858_v40  ;;  %v13100_v1 = vld [vmem:[#allocation4 + $0x154] sm:$0xf] }
 0x506   :  { %7261 = vmatmul.bf16.vlgmr.msrb.gmra.mxu3 %v14142_v24  ;;  %v13144_v0 = vld [vmem:[#allocation4 + $0x2ac] sm:$0xf0]  ;;  %v11218_v33 = vld [vmem:[#allocation4 + $0xb0] sm:$0xf0] }
 0x507   :  { %7305 = vmatpush.bf16.msra.mxu3 %v12145_v17  ;;  %7280 = vmatpush.bf16.msra.mxu1 %v11601_v52  ;;  %v11984_v2 = vld [vmem:[#allocation4 + $0x690] sm:$0xf]  ;;  %v11473_v41 = vor.u32 %v13144_v0, %v11472_v60  ;;  %v11314_v60 = vld [vmem:[#allocation4 + $0x170] sm:$0xf0] }
 0x508   :  { %v13272_v6 = vld [vmem:[#allocation4 + $0x6ac] sm:$0xf0]  ;;  %v13140_v14 = vld [vmem:[#allocation4 + $0x294] sm:$0xf] }
 0x509   :  { %7293 = vmatpush.bf16.msra.mxu2 %v11857_v25  ;;  %7268 = vmatpush.bf16.msra.mxu0 %v11313_v15  ;;  %v11184_v54 = vld [vmem:[#allocation4 + $0x50] sm:$0xf]  ;;  %v11985_v21 = vor.u32 %v13272_v6, %v11984_v2  ;;  %v11826_v2 = vld [vmem:[#allocation4 + $0x570] sm:$0xf0] }
 0x50a   :  { %v13072_v13 = vld [vmem:[#allocation4 + $0x6c] sm:$0xf0]  ;;  %v13292_v6 = vld [vmem:[#allocation4 + $0x754] sm:$0xf] }
 0x50b   :  { %7306 = vmatpush.bf16.msra.mxu3 %v12113_v32  ;;  %7281 = vmatpush.bf16.msra.mxu1 %v11569_v46  ;;  %v11440_v17 = vld [vmem:[#allocation4 + $0x250] sm:$0xf]  ;;  %v11185_v52 = vor.u32 %v13072_v13, %v11184_v54  ;;  %v13116_v46 = vld [vmem:[#allocation4 + $0x1d4] sm:$0xf]  ;;  %v11829_v54 = vor.u32 %v13228_v4, %v11826_v2 }
 0x50c   :  { %v11696_v23 = vld [vmem:[#allocation4 + $0x450] sm:$0xf]  ;;  %v11441_v26 = vor.u32 %v13136_v22, %v11440_v17  ;;  %v13092_v13 = vld [vmem:[#allocation4 + $0x114] sm:$0xf] }
 0x50d   :  { %7294 = vmatpush.bf16.msra.mxu2 %v11825_v18  ;;  %7269 = vmatpush.bf16.msra.mxu0 %v11281_v30  ;;  %v13200_v3 = vld [vmem:[#allocation4 + $0x46c] sm:$0xf0]  ;;  %v11378_v18 = vld [vmem:[#allocation4 + $0x1f0] sm:$0xf0] }
 0x50e   :  { %v11952_v16 = vld [vmem:[#allocation4 + $0x650] sm:$0xf]  ;;  %v11697_v28 = vor.u32 %v13200_v3, %v11696_v23  ;;  %v11282_v17 = vld [vmem:[#allocation4 + $0x130] sm:$0xf0] }
 0x50f   :  { %7307 = vmatpush.bf16.msra.mxu3 %v12081_v48  ;;  %7282 = vmatpush.bf16.msra.mxu1 %v11537_v49  ;;  %v13264_v63 = vld [vmem:[#allocation4 + $0x66c] sm:$0xf0]  ;;  %v13244_v48 = vld [vmem:[#allocation4 + $0x5d4] sm:$0xf]  ;;  %v11381_v49 = vor.u32 %v13116_v46, %v11378_v18 }
 0x510   :  { %v11152_v25 = vld [vmem:[#allocation4 + $0x10] sm:$0xf]  ;;  %v11953_v31 = vor.u32 %v13264_v63, %v11952_v16  ;;  %v11893_v50 = vor.u32 %v13244_v48, %v11890_v20  ;;  %v11538_v23 = vld [vmem:[#allocation4 + $0x330] sm:$0xf0] }
 0x511   :  { %7295 = vmatpush.bf16.msra.mxu2 %v11793_v11  ;;  %7270 = vmatpush.bf16.msra.mxu0 %v11249_v57  ;;  %v13064_v10 = vld [vmem:[#allocation4 + $0x2c] sm:$0xf0]  ;;  %v11637_v11 = vor.u32 %v13180_v36, %v11634_v19  ;;  %v12114_v57 = vld [vmem:[#allocation4 + $0x7b0] sm:$0xf0] }
 0x512   :  { %v11408_v32 = vld [vmem:[#allocation4 + $0x210] sm:$0xf]  ;;  %v11153_v47 = vor.u32 %v13064_v10, %v11152_v25  ;;  %v12117_v0 = vor.u32 %v13300_v27, %v12114_v57  ;;  %v13220_v3 = vld [vmem:[#allocation4 + $0x514] sm:$0xf]  ;;  %v11285_v25 = vor.u32 %v13092_v13, %v11282_v17 }
 0x513   :  { %7308 = vmatpush.bf16.msra.mxu3 %v12049_v7  ;;  %7283 = vmatpush.bf16.msra.mxu1 %v11505_v61  ;;  %v13128_v34 = vld [vmem:[#allocation4 + $0x22c] sm:$0xf0]  ;;  %v13172_v7 = vld [vmem:[#allocation4 + $0x394] sm:$0xf]  ;;  %v11349_v61 = vor.u32 %v13108_v35, %v11346_v51 }
 0x514   :  { %v11664_v39 = vld [vmem:[#allocation4 + $0x410] sm:$0xf]  ;;  %v11409_v38 = vor.u32 %v13128_v34, %v11408_v32  ;;  %v11794_v16 = vld [vmem:[#allocation4 + $0x530] sm:$0xf0] }
 0x515   :  { %7296 = vmatpush.bf16.msra.mxu2 %v11761_v58  ;;  %7271 = vmatpush.bf16.msra.mxu0 %v11217_v5  ;;  %v13192_v59 = vld [vmem:[#allocation4 + $0x42c] sm:$0xf0]  ;;  %v11605_v58 = vor.u32 %v13172_v7, %v11602_v53  ;;  %v12082_v5 = vld [vmem:[#allocation4 + $0x770] sm:$0xf0] }
 0x516   :  { %v11920_v29 = vld [vmem:[#allocation4 + $0x610] sm:$0xf]  ;;  %v11665_v43 = vor.u32 %v13192_v59, %v11664_v39  ;;  %v12085_v22 = vor.u32 %v13292_v6, %v12082_v5  ;;  %v13284_v63 = vld [vmem:[#allocation4 + $0x714] sm:$0xf] }
 0x517   :  { %7309 = vmatpush.bf16.msra.mxu3 %v12017_v62  ;;  %7284 = vmatpush.bf16.msra.mxu1 %v11473_v41  ;;  %v13256_v15 = vld [vmem:[#allocation4 + $0x62c] sm:$0xf0]  ;;  %v13164_v62 = vld [vmem:[#allocation4 + $0x354] sm:$0xf]  ;;  %v11317_v41 = vor.u32 %v13100_v1, %v11314_v60 }
 0x518   :  { %v11921_v30 = vor.u32 %v13256_v15, %v11920_v29  ;;  %v13084_v34 = vld [vmem:[#allocation4 + $0xd4] sm:$0xf] }
 0x519   :  { %7297 = vmatpush.bf16.msra.mxu2 %v11729_v8  ;;  %7272 = vmatpush.bf16.msra.mxu0 %v11185_v52  ;;  %v11573_v8 = vor.u32 %v13164_v62, %v11570_v55  ;;  %v12050_v52 = vld [vmem:[#allocation4 + $0x730] sm:$0xf0] }
 0x51a   :  { %v11250_v39 = vld [vmem:[#allocation4 + $0xf0] sm:$0xf0]  ;;  %v12053_v59 = vor.u32 %v13284_v63, %v12050_v52 }
 0x51b   :  { %7310 = vmatpush.bf16.msra.mxu3 %v11985_v21  ;;  %7285 = vmatpush.bf16.msra.mxu1 %v11441_v26  ;;  %v13156_v21 = vld [vmem:[#allocation4 + $0x314] sm:$0xf]  ;;  %v11253_v19 = vor.u32 %v13084_v34, %v11250_v39  ;;  %v11896_v34 = vld [vmem:[#allocation4 + $0x5d8] sm:$0xf] }
 0x51c   :  { %v11541_v26 = vor.u32 %v13156_v21, %v11538_v23  ;;  %v11506_v15 = vld [vmem:[#allocation4 + $0x2f0] sm:$0xf0]  ;;  %v13249_v39 = vld [vmem:[#allocation4 + $0x5f4] sm:$0xf0] }
 0x51d   :  { %7298 = vmatpush.bf16.msra.mxu2 %v11697_v28  ;;  %7273 = vmatpush.bf16.msra.mxu0 %v11153_v47  ;;  %v7067_v10 = vpop.f32.mrf.mxu0  ;;  %v11797_v28 = vor.u32 %v13220_v3, %v11794_v16  ;;  %v13212_v46 = vld [vmem:[#allocation4 + $0x4d4] sm:$0xf] }
 0x51e   :  { %v11762_v18 = vld [vmem:[#allocation4 + $0x4f0] sm:$0xf0] }
 0x51f   :  { %7311 = vmatpush.bf16.msra.mxu3 %v11953_v31  ;;  %7286 = vmatpush.bf16.msra.mxu1 %v11409_v38  ;;  %v7080_v32 = vpop.f32.mrf.mxu1  ;;  %v13148_v31 = vld [vmem:[#allocation4 + $0x2d4] sm:$0xf]  ;;  %v11765_v20 = vor.u32 %v13212_v46, %v11762_v18 }
 0x520   :  { %7274 = vmatmul.bf16.vlgmr.msra.gmra.mxu0 %v14136_v42  ;;  %v7081_v29 = vadd.f32 %v7080_v32, %v7067_v10  ;;  %v13276_v36 = vld [vmem:[#allocation4 + $0x6d4] sm:$0xf]  ;;  %v11509_v48 = vor.u32 %v13148_v31, %v11506_v15  ;;  %v13121_v10 = vld [vmem:[#allocation4 + $0x1f4] sm:$0xf0] }
 0x521   :  { %7299 = vmatpush.bf16.msra.mxu2 %v11665_v43  ;;  %7318 = vmatpush.bf16.msrb.mxu0 %v11381_v49  ;;  %v12018_v47 = vld [vmem:[#allocation4 + $0x6f0] sm:$0xf0]  ;;  %v13185_v32 = vld [vmem:[#allocation4 + $0x3f4] sm:$0xf0] }
 0x522   :  { %7287 = vmatmul.bf16.vlgmr.msra.gmra.mxu1 %v14138_v44  ;;  %v13076_v43 = vld [vmem:[#allocation4 + $0x94] sm:$0xf]  ;;  %v13313_v15 = vld [vmem:[#allocation4 + $0x7f4] sm:$0xf0] }
 0x523   :  { %7312 = vmatpush.bf16.msra.mxu3 %v11921_v30  ;;  %7331 = vmatpush.bf16.msrb.mxu1 %v11637_v11  ;;  %v12021_v30 = vor.u32 %v13276_v36, %v12018_v47  ;;  %v13204_v35 = vld [vmem:[#allocation4 + $0x494] sm:$0xf]  ;;  %v11221_v9 = vor.u32 %v13076_v43, %v11218_v33  ;;  %v11897_v47 = vor.u32 %v13249_v39, %v11896_v34  ;;  %v13177_v43 = vld [vmem:[#allocation4 + $0x3b4] sm:$0xf0] }
 0x524   :  { %7300 = vmatmul.bf16.vlgmr.msra.gmra.mxu2 %v14140_v45  ;;  %v11730_v51 = vld [vmem:[#allocation4 + $0x4b0] sm:$0xf0]  ;;  %v11864_v33 = vld [vmem:[#allocation4 + $0x598] sm:$0xf] }
 0x525   :  { %7344 = vmatpush.bf16.msrb.mxu2 %v11893_v50  ;;  %7319 = vmatpush.bf16.msrb.mxu0 %v11349_v61  ;;  %v11474_v50 = vld [vmem:[#allocation4 + $0x2b0] sm:$0xf0]  ;;  %v7069_v40 = vpop.f32.mrf.mxu0  ;;  %v11733_v57 = vor.u32 %v13204_v35, %v11730_v51  ;;  %v11320_v51 = vld [vmem:[#allocation4 + $0x158] sm:$0xf] }
 0x526   :  { %7313 = vmatmul.bf16.vlgmr.msra.gmra.mxu3 %v14142_v24  ;;  %v13268_v7 = vld [vmem:[#allocation4 + $0x694] sm:$0xf]  ;;  %v11477_v27 = vor.u32 %v13140_v14, %v11474_v50  ;;  %v13241_v14 = vld [vmem:[#allocation4 + $0x5b4] sm:$0xf0] }
 0x527   :  { %7357 = vmatpush.bf16.msrb.mxu3 %v12149_v56  ;;  %7332 = vmatpush.bf16.msrb.mxu1 %v11605_v58  ;;  %v7093_v38 = vpop.f32.mrf.mxu2  ;;  %v11986_v56 = vld [vmem:[#allocation4 + $0x6b0] sm:$0xf0]  ;;  %v7082_v1 = vpop.f32.mrf.mxu1  ;;  %v11865_v35 = vor.u32 %v13241_v14, %v11864_v33  ;;  %v13169_v40 = vld [vmem:[#allocation4 + $0x374] sm:$0xf0] }
 0x528   :  { %v7094_v49 = vadd.f32 %v7093_v38, %v7081_v29  ;;  %v13068_v61 = vld [vmem:[#allocation4 + $0x54] sm:$0xf]  ;;  %v11989_v60 = vor.u32 %v13268_v7, %v11986_v56  ;;  %v12152_v29 = vld [vmem:[#allocation4 + $0x7d8] sm:$0xf] }
 0x529   :  { %7345 = vmatpush.bf16.msrb.mxu2 %v11861_v12  ;;  %7320 = vmatpush.bf16.msrb.mxu0 %v11317_v41  ;;  %v7106_v11 = vpop.f32.mrf.mxu3  ;;  %v11186_v58 = vld [vmem:[#allocation4 + $0x70] sm:$0xf0]  ;;  %v12153_v38 = vor.u32 %v13313_v15, %v12152_v29  ;;  %v13105_v7 = vld [vmem:[#allocation4 + $0x174] sm:$0xf0] }
 0x52a   :  { %v14164_v53 = vadd.f32 %v7106_v11, %v7094_v49  ;;  %v13132_v12 = vld [vmem:[#allocation4 + $0x254] sm:$0xf]  ;;  %v11189_v6 = vor.u32 %v13068_v61, %v11186_v58  ;;  %v13305_v49 = vld [vmem:[#allocation4 + $0x7b4] sm:$0xf0] }
 0x52b   :  { %7358 = vmatpush.bf16.msrb.mxu3 %v12117_v0  ;;  %7333 = vmatpush.bf16.msrb.mxu1 %v11573_v8  ;;  %v11442_v62 = vld [vmem:[#allocation4 + $0x270] sm:$0xf0]  ;;  %v11576_v56 = vld [vmem:[#allocation4 + $0x358] sm:$0xf] }
 0x52c   :  { %v13196_v0 = vld [vmem:[#allocation4 + $0x454] sm:$0xf]  ;;  %v11445_v8 = vor.u32 %v13132_v12, %v11442_v62  ;;  %v12088_v61 = vld [vmem:[#allocation4 + $0x758] sm:$0xf]  ;;  %v11321_v12 = vor.u32 %v13105_v7, %v11320_v51  ;;  %v11577_v1 = vor.u32 %v13169_v40, %v11576_v56 }
 0x52d   :  { %7346 = vmatpush.bf16.msrb.mxu2 %v11829_v54  ;;  %7321 = vmatpush.bf16.msrb.mxu0 %v11285_v25  ;;  %v11698_v55 = vld [vmem:[#allocation4 + $0x470] sm:$0xf0]  ;;  %v11384_v25 = vld [vmem:[#allocation4 + $0x1d8] sm:$0xf] }
 0x52e   :  { %v13260_v4 = vld [vmem:[#allocation4 + $0x654] sm:$0xf]  ;;  %v11701_v54 = vor.u32 %v13196_v0, %v11698_v55  ;;  %v11385_v18 = vor.u32 %v13121_v10, %v11384_v25  ;;  %v13297_v58 = vld [vmem:[#allocation4 + $0x774] sm:$0xf0] }
 0x52f   :  { %7359 = vmatpush.bf16.msrb.mxu3 %v12085_v22  ;;  %7334 = vmatpush.bf16.msrb.mxu1 %v11541_v26  ;;  %v11954_v2 = vld [vmem:[#allocation4 + $0x670] sm:$0xf0]  ;;  %v7095_v22 = vpop.f32.mrf.mxu2  ;;  %v11640_v26 = vld [vmem:[#allocation4 + $0x3d8] sm:$0xf] }
 0x530   :  { %v13060_v5 = vld [vmem:[#allocation4 + $0x14] sm:$0xf]  ;;  %v11957_v23 = vor.u32 %v13260_v4, %v11954_v2  ;;  %v11641_v36 = vor.u32 %v13185_v32, %v11640_v26  ;;  %v11288_v62 = vld [vmem:[#allocation4 + $0x118] sm:$0xf]  ;;  %v12089_v4 = vor.u32 %v13297_v58, %v12088_v61 }
 0x531   :  { %7347 = vmatpush.bf16.msrb.mxu2 %v11797_v28  ;;  %7322 = vmatpush.bf16.msrb.mxu0 %v11253_v19  ;;  %v11154_v41 = vld [vmem:[#allocation4 + $0x30] sm:$0xf0]  ;;  %v7108_v52 = vpop.f32.mrf.mxu3  ;;  %v11352_v19 = vld [vmem:[#allocation4 + $0x198] sm:$0xf] }
 0x532   :  { %v13124_v13 = vld [vmem:[#allocation4 + $0x214] sm:$0xf]  ;;  %v11157_v28 = vor.u32 %v13060_v5, %v11154_v41  ;;  %v13097_v0 = vld [vmem:[#allocation4 + $0x134] sm:$0xf0] }
 0x533   :  { %7360 = vmatpush.bf16.msrb.mxu3 %v12053_v59  ;;  %7335 = vmatpush.bf16.msrb.mxu1 %v11509_v48  ;;  %v11410_v17 = vld [vmem:[#allocation4 + $0x230] sm:$0xf0]  ;;  %v13113_v48 = vld [vmem:[#allocation4 + $0x1b4] sm:$0xf0] }
 0x534   :  { %v13188_v21 = vld [vmem:[#allocation4 + $0x414] sm:$0xf]  ;;  %v11413_v31 = vor.u32 %v13124_v13, %v11410_v17  ;;  %v11353_v11 = vor.u32 %v13113_v48, %v11352_v19  ;;  %v11544_v55 = vld [vmem:[#allocation4 + $0x318] sm:$0xf] }
 0x535   :  { %7348 = vmatpush.bf16.msrb.mxu2 %v11765_v20  ;;  %7323 = vmatpush.bf16.msrb.mxu0 %v11221_v9  ;;  %v11666_v3 = vld [vmem:[#allocation4 + $0x430] sm:$0xf0]  ;;  %v11608_v20 = vld [vmem:[#allocation4 + $0x398] sm:$0xf] }
 0x536   :  { %v13252_v16 = vld [vmem:[#allocation4 + $0x614] sm:$0xf]  ;;  %v11669_v59 = vor.u32 %v13188_v21, %v11666_v3  ;;  %v11609_v50 = vor.u32 %v13177_v43, %v11608_v20  ;;  %v13161_v2 = vld [vmem:[#allocation4 + $0x334] sm:$0xf0] }
 0x537   :  { %7361 = vmatpush.bf16.msrb.mxu3 %v12021_v30  ;;  %7336 = vmatpush.bf16.msrb.mxu1 %v11477_v27  ;;  %v11922_v63 = vld [vmem:[#allocation4 + $0x630] sm:$0xf0]  ;;  %v12120_v30 = vld [vmem:[#allocation4 + $0x798] sm:$0xf]  ;;  %v11545_v17 = vor.u32 %v13161_v2, %v11544_v55 }
 0x538   :  { %v11925_v46 = vor.u32 %v13252_v16, %v11922_v63  ;;  %v12121_v9 = vor.u32 %v13305_v49, %v12120_v30  ;;  %v11832_v27 = vld [vmem:[#allocation4 + $0x558] sm:$0xf] }
 0x539   :  { %7349 = vmatpush.bf16.msrb.mxu2 %v11733_v57  ;;  %7324 = vmatpush.bf16.msrb.mxu0 %v11189_v6  ;;  %v13233_v57 = vld [vmem:[#allocation4 + $0x574] sm:$0xf0] }
 0x53a   :  { %v11800_v6 = vld [vmem:[#allocation4 + $0x518] sm:$0xf] }
 0x53b   :  { %7362 = vmatpush.bf16.msrb.mxu3 %v11989_v60  ;;  %7337 = vmatpush.bf16.msrb.mxu1 %v11445_v8  ;;  %v11833_v60 = vor.u32 %v13233_v57, %v11832_v27  ;;  %v13225_v5 = vld [vmem:[#allocation4 + $0x534] sm:$0xf0] }
 0x53c   :  { %v12056_v41 = vld [vmem:[#allocation4 + $0x718] sm:$0xf]  ;;  %v11801_v21 = vor.u32 %v13225_v5, %v11800_v6 }
 0x53d   :  { %7350 = vmatpush.bf16.msrb.mxu2 %v11701_v54  ;;  %7325 = vmatpush.bf16.msrb.mxu0 %v11157_v28  ;;  %v13289_v8 = vld [vmem:[#allocation4 + $0x734] sm:$0xf0]  ;;  %v11289_v54 = vor.u32 %v13097_v0, %v11288_v62  ;;  %v7119_v13 = vpop.f32.mrf.mxu0 }
 0x53e   :  { %v13089_v3 = vld [vmem:[#allocation4 + $0xf4] sm:$0xf0]  ;;  %v12057_v63 = vor.u32 %v13289_v8, %v12056_v41 }
 0x53f   :  { %7363 = vmatpush.bf16.msrb.mxu3 %v11957_v23  ;;  %7338 = vmatpush.bf16.msrb.mxu1 %v11413_v31  ;;  %v7132_v22 = vpop.f32.mrf.mxu1  ;;  %v11256_v23 = vld [vmem:[#allocation4 + $0xd8] sm:$0xf] }
 0x540   :  { %7326 = vmatmul.bf16.vlgmr.msrb.gmra.mxu0 %v14136_v42  ;;  %v11512_v16 = vld [vmem:[#allocation4 + $0x2d8] sm:$0xf]  ;;  %v7133_v52 = vadd.f32 %v7132_v22, %v7119_v13  ;;  %v11257_v34 = vor.u32 %v13089_v3, %v11256_v23  ;;  %v13117_v13 = vld [vmem:[#allocation4 + $0x1dc] sm:$0xf] }
 0x541   :  { %7351 = vmatpush.bf16.msrb.mxu2 %v11669_v59  ;;  %7370 = vmatpush.bf16.msra.mxu0 %v11385_v18  ;;  %v13153_v25 = vld [vmem:[#allocation4 + $0x2f4] sm:$0xf0]  ;;  %v11642_v23 = vld [vmem:[#allocation4 + $0x3f8] sm:$0xf0] }
 0x542   :  { %7339 = vmatmul.bf16.vlgmr.msrb.gmra.mxu1 %v14138_v44  ;;  %v11768_v10 = vld [vmem:[#allocation4 + $0x4d8] sm:$0xf]  ;;  %v11513_v39 = vor.u32 %v13153_v25, %v11512_v16  ;;  %v13245_v3 = vld [vmem:[#allocation4 + $0x5dc] sm:$0xf] }
 0x543   :  { %7364 = vmatpush.bf16.msrb.mxu3 %v11925_v46  ;;  %7383 = vmatpush.bf16.msra.mxu1 %v11641_v36  ;;  %v13217_v26 = vld [vmem:[#allocation4 + $0x4f4] sm:$0xf0]  ;;  %v11898_v16 = vld [vmem:[#allocation4 + $0x5f8] sm:$0xf0] }
 0x544   :  { %7352 = vmatmul.bf16.vlgmr.msrb.gmra.mxu2 %v14140_v45  ;;  %v12024_v28 = vld [vmem:[#allocation4 + $0x6d8] sm:$0xf]  ;;  %v11769_v31 = vor.u32 %v13217_v26, %v11768_v10  ;;  %v13309_v25 = vld [vmem:[#allocation4 + $0x7dc] sm:$0xf] }
 0x545   :  { %7396 = vmatpush.bf16.msra.mxu2 %v11897_v47  ;;  %7371 = vmatpush.bf16.msra.mxu0 %v11353_v11  ;;  %v13281_v32 = vld [vmem:[#allocation4 + $0x6f4] sm:$0xf0]  ;;  %v7121_v30 = vpop.f32.mrf.mxu0  ;;  %v12154_v10 = vld [vmem:[#allocation4 + $0x7f8] sm:$0xf0] }
 0x546   :  { %7365 = vmatmul.bf16.vlgmr.msrb.gmra.mxu3 %v14142_v24  ;;  %v11224_v29 = vld [vmem:[#allocation4 + $0x98] sm:$0xf]  ;;  %v12025_v18 = vor.u32 %v13281_v32, %v12024_v28 }
 0x547   :  { %7409 = vmatpush.bf16.msra.mxu3 %v12153_v38  ;;  %7384 = vmatpush.bf16.msra.mxu1 %v11609_v50  ;;  %v7145_v59 = vpop.f32.mrf.mxu2  ;;  %v13081_v15 = vld [vmem:[#allocation4 + $0xb4] sm:$0xf0]  ;;  %v7134_v7 = vpop.f32.mrf.mxu1 }
 0x548   :  { %v11480_v46 = vld [vmem:[#allocation4 + $0x298] sm:$0xf]  ;;  %v7146_v36 = vadd.f32 %v7145_v59, %v7133_v52  ;;  %v11225_v14 = vor.u32 %v13081_v15, %v11224_v29  ;;  %v13173_v59 = vld [vmem:[#allocation4 + $0x39c] sm:$0xf]  ;;  %v12157_v29 = vor.u32 %v13309_v25, %v12154_v10 }
 0x549   :  { %7397 = vmatpush.bf16.msra.mxu2 %v11865_v35  ;;  %7372 = vmatpush.bf16.msra.mxu0 %v11321_v12  ;;  %v7158_v47 = vpop.f32.mrf.mxu3  ;;  %v13145_v19 = vld [vmem:[#allocation4 + $0x2b4] sm:$0xf0]  ;;  %v11610_v15 = vld [vmem:[#allocation4 + $0x3b8] sm:$0xf0] }
 0x54a   :  { %v11736_v48 = vld [vmem:[#allocation4 + $0x498] sm:$0xf]  ;;  %v14170_v33 = vadd.f32 %v7158_v47, %v7146_v36  ;;  %v11481_v49 = vor.u32 %v13145_v19, %v11480_v46  ;;  %v13237_v46 = vld [vmem:[#allocation4 + $0x59c] sm:$0xf] }
 0x54b   :  { %7410 = vmatpush.bf16.msra.mxu3 %v12121_v9  ;;  %7385 = vmatpush.bf16.msra.mxu1 %v11577_v1  ;;  %v13209_v20 = vld [vmem:[#allocation4 + $0x4b4] sm:$0xf0]  ;;  %v13301_v36 = vld [vmem:[#allocation4 + $0x79c] sm:$0xf] }
 0x54c   :  { %v11992_v38 = vld [vmem:[#allocation4 + $0x698] sm:$0xf]  ;;  %v11737_v11 = vor.u32 %v13209_v20, %v11736_v48  ;;  %v12122_v47 = vld [vmem:[#allocation4 + $0x7b8] sm:$0xf0]  ;;  %v11613_v48 = vor.u32 %v13173_v59, %v11610_v15 }
 0x54d   :  { %7398 = vmatpush.bf16.msra.mxu2 %v11833_v60  ;;  %7373 = vmatpush.bf16.msra.mxu0 %v11289_v54  ;;  %v13273_v43 = vld [vmem:[#allocation4 + $0x6b4] sm:$0xf0]  ;;  %v12125_v30 = vor.u32 %v13301_v36, %v12122_v47  ;;  %v13077_v10 = vld [vmem:[#allocation4 + $0x9c] sm:$0xf] }
 0x54e   :  { %v11192_v50 = vld [vmem:[#allocation4 + $0x58] sm:$0xf]  ;;  %v11993_v56 = vor.u32 %v13273_v43, %v11992_v38  ;;  %v13101_v38 = vld [vmem:[#allocation4 + $0x15c] sm:$0xf] }
 0x54f   :  { %7411 = vmatpush.bf16.msra.mxu3 %v12089_v4  ;;  %7386 = vmatpush.bf16.msra.mxu1 %v11545_v17  ;;  %v13073_v35 = vld [vmem:[#allocation4 + $0x74] sm:$0xf0]  ;;  %v7147_v2 = vpop.f32.mrf.mxu2  ;;  %v11386_v17 = vld [vmem:[#allocation4 + $0x1f8] sm:$0xf0] }
 0x550   :  { %v11448_v51 = vld [vmem:[#allocation4 + $0x258] sm:$0xf]  ;;  %v11193_v58 = vor.u32 %v13073_v35, %v11192_v50  ;;  %v11389_v28 = vor.u32 %v13117_v13, %v11386_v17  ;;  %v11322_v43 = vld [vmem:[#allocation4 + $0x178] sm:$0xf0] }
 0x551   :  { %7399 = vmatpush.bf16.msra.mxu2 %v11801_v21  ;;  %7374 = vmatpush.bf16.msra.mxu0 %v11257_v34  ;;  %v13137_v9 = vld [vmem:[#allocation4 + $0x274] sm:$0xf0]  ;;  %v7160_v54 = vpop.f32.mrf.mxu3  ;;  %v13181_v21 = vld [vmem:[#allocation4 + $0x3dc] sm:$0xf]  ;;  %v11901_v34 = vor.u32 %v13245_v3, %v11898_v16  ;;  %v11325_v7 = vor.u32 %v13101_v38, %v11322_v43 }
 0x552   :  { %v11704_v40 = vld [vmem:[#allocation4 + $0x458] sm:$0xf]  ;;  %v11449_v60 = vor.u32 %v13137_v9, %v11448_v51  ;;  %v11645_v32 = vor.u32 %v13181_v21, %v11642_v23  ;;  %v11834_v50 = vld [vmem:[#allocation4 + $0x578] sm:$0xf0] }
 0x553   :  { %7412 = vmatpush.bf16.msra.mxu3 %v12057_v63  ;;  %7387 = vmatpush.bf16.msra.mxu1 %v11513_v39  ;;  %v13201_v27 = vld [vmem:[#allocation4 + $0x474] sm:$0xf0]  ;;  %v13109_v39 = vld [vmem:[#allocation4 + $0x19c] sm:$0xf] }
 0x554   :  { %v11960_v57 = vld [vmem:[#allocation4 + $0x658] sm:$0xf]  ;;  %v11705_v62 = vor.u32 %v13201_v27, %v11704_v40  ;;  %v13293_v35 = vld [vmem:[#allocation4 + $0x75c] sm:$0xf] }
 0x555   :  { %7400 = vmatpush.bf16.msra.mxu2 %v11769_v31  ;;  %v13265_v61 = vld [vmem:[#allocation4 + $0x674] sm:$0xf0]  ;;  %7375 = vmatpush.bf16.msra.mxu0 %v11225_v14  ;;  %v11354_v31 = vld [vmem:[#allocation4 + $0x1b8] sm:$0xf0] }
 0x556   :  { %v11160_v12 = vld [vmem:[#allocation4 + $0x18] sm:$0xf]  ;;  %v11961_v6 = vor.u32 %v13265_v61, %v11960_v57  ;;  %v11357_v19 = vor.u32 %v13109_v39, %v11354_v31  ;;  %v13165_v14 = vld [vmem:[#allocation4 + $0x35c] sm:$0xf] }
 0x557   :  { %7413 = vmatpush.bf16.msra.mxu3 %v12025_v18  ;;  %v13065_v1 = vld [vmem:[#allocation4 + $0x34] sm:$0xf0]  ;;  %7388 = vmatpush.bf16.msra.mxu1 %v11481_v49  ;;  %v11866_v18 = vld [vmem:[#allocation4 + $0x5b8] sm:$0xf0] }
 0x558   :  { %v11416_v0 = vld [vmem:[#allocation4 + $0x218] sm:$0xf]  ;;  %v11161_v22 = vor.u32 %v13065_v1, %v11160_v12  ;;  %v11869_v20 = vor.u32 %v13237_v46, %v11866_v18  ;;  %v11578_v49 = vld [vmem:[#allocation4 + $0x378] sm:$0xf0] }
 0x559   :  { %7401 = vmatpush.bf16.msra.mxu2 %v11737_v11  ;;  %v13129_v55 = vld [vmem:[#allocation4 + $0x234] sm:$0xf0]  ;;  %7376 = vmatpush.bf16.msra.mxu0 %v11193_v58  ;;  %v13229_v11 = vld [vmem:[#allocation4 + $0x55c] sm:$0xf] }
 0x55a   :  { %v11672_v4 = vld [vmem:[#allocation4 + $0x418] sm:$0xf]  ;;  %v11417_v63 = vor.u32 %v13129_v55, %v11416_v0  ;;  %v12090_v51 = vld [vmem:[#allocation4 + $0x778] sm:$0xf0]  ;;  %v11837_v9 = vor.u32 %v13229_v11, %v11834_v50 }
 0x55b   :  { %7414 = vmatpush.bf16.msra.mxu3 %v11993_v56  ;;  %v13193_v5 = vld [vmem:[#allocation4 + $0x434] sm:$0xf0]  ;;  %7389 = vmatpush.bf16.msra.mxu1 %v11449_v60  ;;  %v11581_v56 = vor.u32 %v13165_v14, %v11578_v49  ;;  %v13093_v40 = vld [vmem:[#allocation4 + $0x11c] sm:$0xf]  ;;  %v12093_v61 = vor.u32 %v13293_v35, %v12090_v51 }
 0x55c   :  { %v11928_v41 = vld [vmem:[#allocation4 + $0x618] sm:$0xf]  ;;  %v11673_v52 = vor.u32 %v13193_v5, %v11672_v4  ;;  %v11290_v27 = vld [vmem:[#allocation4 + $0x138] sm:$0xf0] }
 0x55d   :  { %v13257_v8 = vld [vmem:[#allocation4 + $0x634] sm:$0xf0]  ;;  %7402 = vmatpush.bf16.msra.mxu2 %v11705_v62  ;;  %7377 = vmatpush.bf16.msra.mxu0 %v11161_v22  ;;  %v13157_v57 = vld [vmem:[#allocation4 + $0x31c] sm:$0xf]  ;;  %v11293_v0 = vor.u32 %v13093_v40, %v11290_v27  ;;  %v7171_v55 = vpop.f32.mrf.mxu0 }
 0x55e   :  { %v11929_v26 = vor.u32 %v13257_v8, %v11928_v41  ;;  %v11546_v58 = vld [vmem:[#allocation4 + $0x338] sm:$0xf0] }
 0x55f   :  { %7415 = vmatpush.bf16.msra.mxu3 %v11961_v6  ;;  %7390 = vmatpush.bf16.msra.mxu1 %v11417_v63  ;;  %v13221_v12 = vld [vmem:[#allocation4 + $0x51c] sm:$0xf]  ;;  %v11549_v4 = vor.u32 %v13157_v57, %v11546_v58  ;;  %v7184_v6 = vpop.f32.mrf.mxu1 }
 0x560   :  { %7378 = vmatmul.bf16.vlgmr.msra.gmra.mxu0 %v14136_v42  ;;  %v11802_v1 = vld [vmem:[#allocation4 + $0x538] sm:$0xf0]  ;;  %v7185_v13 = vadd.f32 %v7184_v6, %v7171_v55 }
 0x561   :  { %7403 = vmatpush.bf16.msra.mxu2 %v11673_v52  ;;  %7422 = vmatpush.bf16.msrb.mxu0 %v11389_v28  ;;  %v13285_v60 = vld [vmem:[#allocation4 + $0x71c] sm:$0xf]  ;;  %v11805_v2 = vor.u32 %v13221_v12, %v11802_v1 }
 0x562   :  { %7391 = vmatmul.bf16.vlgmr.msra.gmra.mxu1 %v14138_v44  ;;  %v12058_v62 = vld [vmem:[#allocation4 + $0x738] sm:$0xf0] }
 0x563   :  { %7416 = vmatpush.bf16.msra.mxu3 %v11929_v26  ;;  %7435 = vmatpush.bf16.msrb.mxu1 %v11645_v32  ;;  %v13085_v5 = vld [vmem:[#allocation4 + $0xdc] sm:$0xf]  ;;  %v12061_v54 = vor.u32 %v13285_v60, %v12058_v62 }
 0x564   :  { %7404 = vmatmul.bf16.vlgmr.msra.gmra.mxu2 %v14140_v45  ;;  %v11258_v41 = vld [vmem:[#allocation4 + $0xf8] sm:$0xf0] }
 0x565   :  { %7448 = vmatpush.bf16.msrb.mxu2 %v11901_v34  ;;  %7423 = vmatpush.bf16.msrb.mxu0 %v11357_v19  ;;  %v13149_v8 = vld [vmem:[#allocation4 + $0x2dc] sm:$0xf]  ;;  %v11261_v16 = vor.u32 %v13085_v5, %v11258_v41  ;;  %v7173_v47 = vpop.f32.mrf.mxu0 }
 0x566   :  { %7417 = vmatmul.bf16.vlgmr.msra.gmra.mxu3 %v14142_v24  ;;  %v11514_v17 = vld [vmem:[#allocation4 + $0x2f8] sm:$0xf0] }
 0x567   :  { %7461 = vmatpush.bf16.msrb.mxu3 %v12157_v29  ;;  %7436 = vmatpush.bf16.msrb.mxu1 %v11613_v48  ;;  %v13213_v21 = vld [vmem:[#allocation4 + $0x4dc] sm:$0xf]  ;;  %v11517_v63 = vor.u32 %v13149_v8, %v11514_v17  ;;  %v7197_v25 = vpop.f32.mrf.mxu2  ;;  %v7186_v14 = vpop.f32.mrf.mxu1 }
 0x568   :  { %v11770_v22 = vld [vmem:[#allocation4 + $0x4f8] sm:$0xf0]  ;;  %v7198_v34 = vadd.f32 %v7197_v25, %v7185_v13  ;;  %v7483_v14 = vsel %vm2181_vm0, %v14170_v33, 0.0 }
 0x569   :  { %7449 = vmatpush.bf16.msrb.mxu2 %v11869_v20  ;;  %7424 = vmatpush.bf16.msrb.mxu0 %v11325_v7  ;;  %v13277_v23 = vld [vmem:[#allocation4 + $0x6dc] sm:$0xf]  ;;  %v11773_v52 = vor.u32 %v13213_v21, %v11770_v22  ;;  %v7210_v39 = vpop.f32.mrf.mxu3 }
 0x56a   :  { %v12026_v3 = vld [vmem:[#allocation4 + $0x6f8] sm:$0xf0]  ;;  %v14176_v18 = vadd.f32 %v7210_v39, %v7198_v34 }
 0x56b   :  { %7462 = vmatpush.bf16.msrb.mxu3 %v12125_v30  ;;  %7437 = vmatpush.bf16.msrb.mxu1 %v11581_v56  ;;  %v11226_v26 = vld [vmem:[#allocation4 + $0xb8] sm:$0xf0]  ;;  %v12029_v32 = vor.u32 %v13277_v23, %v12026_v3 }
 0x56c   :  { %v13141_v28 = vld [vmem:[#allocation4 + $0x29c] sm:$0xf]  ;;  %v11229_v36 = vor.u32 %v13077_v10, %v11226_v26 }
 0x56d   :  { %7450 = vmatpush.bf16.msrb.mxu2 %v11837_v9  ;;  %7425 = vmatpush.bf16.msrb.mxu0 %v11293_v0  ;;  %v11482_v31 = vld [vmem:[#allocation4 + $0x2b8] sm:$0xf0] }
 0x56e   :  { %v13205_v59 = vld [vmem:[#allocation4 + $0x49c] sm:$0xf]  ;;  %v11485_v19 = vor.u32 %v13141_v28, %v11482_v31 }
 0x56f   :  { %7463 = vmatpush.bf16.msrb.mxu3 %v12093_v61  ;;  %7438 = vmatpush.bf16.msrb.mxu1 %v11549_v4  ;;  %v11738_v29 = vld [vmem:[#allocation4 + $0x4b8] sm:$0xf0]  ;;  %v7199_v61 = vpop.f32.mrf.mxu2 }
 0x570   :  { %v13269_v15 = vld [vmem:[#allocation4 + $0x69c] sm:$0xf]  ;;  %v11741_v48 = vor.u32 %v13205_v59, %v11738_v29 }
 0x571   :  { %7451 = vmatpush.bf16.msrb.mxu2 %v11805_v2  ;;  %v11994_v46 = vld [vmem:[#allocation4 + $0x6b8] sm:$0xf0]  ;;  %7426 = vmatpush.bf16.msrb.mxu0 %v11261_v16  ;;  %v7212_v62 = vpop.f32.mrf.mxu3 }
 0x572   :  { %v13069_v20 = vld [vmem:[#allocation4 + $0x5c] sm:$0xf]  ;;  %v11997_v30 = vor.u32 %v13269_v15, %v11994_v46 }
 0x573   :  { %7464 = vmatpush.bf16.msrb.mxu3 %v12061_v54  ;;  %7439 = vmatpush.bf16.msrb.mxu1 %v11517_v63  ;;  %v11194_v38 = vld [vmem:[#allocation4 + $0x78] sm:$0xf0] }
 0x574   :  { %v13133_v43 = vld [vmem:[#allocation4 + $0x25c] sm:$0xf]  ;;  %v11197_v7 = vor.u32 %v13069_v20, %v11194_v38  ;;  %v7490_v20 = vsel %vm2181_vm0, %v14176_v18, 0.0 }
 0x575   :  { %7452 = vmatpush.bf16.msrb.mxu2 %v11773_v52  ;;  %v11450_v49 = vld [vmem:[#allocation4 + $0x278] sm:$0xf0]  ;;  %7427 = vmatpush.bf16.msrb.mxu0 %v11229_v36 }
 0x576   :  { %v13197_v11 = vld [vmem:[#allocation4 + $0x45c] sm:$0xf]  ;;  %v11453_v56 = vor.u32 %v13133_v43, %v11450_v49  ;;  %v7491_v49 = vrot.slane %v7490_v20, 4 }
 0x577   :  { %7465 = vmatpush.bf16.msrb.mxu3 %v12029_v32  ;;  %v11706_v50 = vld [vmem:[#allocation4 + $0x478] sm:$0xf0]  ;;  %7440 = vmatpush.bf16.msrb.mxu1 %v11485_v19 }
 0x578   :  { %v13261_v35 = vld [vmem:[#allocation4 + $0x65c] sm:$0xf]  ;;  %v11709_v9 = vor.u32 %v13197_v11, %v11706_v50 }
 0x579   :  { %v11962_v51 = vld [vmem:[#allocation4 + $0x678] sm:$0xf0]  ;;  %7453 = vmatpush.bf16.msrb.mxu2 %v11741_v48  ;;  %7428 = vmatpush.bf16.msrb.mxu0 %v11197_v7 }
 0x57a   :  { %v13061_v40 = vld [vmem:[#allocation4 + $0x1c] sm:$0xf]  ;;  %v11965_v58 = vor.u32 %v13261_v35, %v11962_v51  ;;  %v7484_v35 = vrot.slane %v7483_v14, 4  ;;  %v7476_v51 = vsel %vm2181_vm0, %v14164_v53, 0.0 }
 0x57b   :  { %v11162_v27 = vld [vmem:[#allocation4 + $0x38] sm:$0xf0]  ;;  %7466 = vmatpush.bf16.msrb.mxu3 %v11997_v30  ;;  %7441 = vmatpush.bf16.msrb.mxu1 %v11453_v56 }
 0x57c   :  { %v13125_v57 = vld [vmem:[#allocation4 + $0x21c] sm:$0xf]  ;;  %v11165_v4 = vor.u32 %v13061_v40, %v11162_v27  ;;  %v7477_v27 = vrot.slane %v7476_v51, 4 }
 0x57d   :  { %v11418_v12 = vld [vmem:[#allocation4 + $0x238] sm:$0xf0]  ;;  %7454 = vmatpush.bf16.msrb.mxu2 %v11709_v9  ;;  %v7223_v41 = vpop.f32.mrf.mxu0  ;;  %v7492_v9 = vadd.f32 %v7491_v49, %v7490_v20 }
 0x57e   :  { %v13189_v1 = vld [vmem:[#allocation4 + $0x41c] sm:$0xf]  ;;  %v11421_v2 = vor.u32 %v13125_v57, %v11418_v12  ;;  %7429 = vmatpush.bf16.msrb.mxu0 %v11165_v4  ;;  %v7485_v57 = vadd.f32 %v7484_v35, %v7483_v14 }
 0x57f   :  { %v11674_v60 = vld [vmem:[#allocation4 + $0x438] sm:$0xf0]  ;;  %7467 = vmatpush.bf16.msrb.mxu3 %v11965_v58  ;;  %v7236_v8 = vpop.f32.mrf.mxu1  ;;  %v7493_v12 = vrot.slane %v7492_v9, 2 }
 0x580   :  { %v13253_v0 = vld [vmem:[#allocation4 + $0x61c] sm:$0xf]  ;;  %v11677_v6 = vor.u32 %v13189_v1, %v11674_v60  ;;  %7442 = vmatpush.bf16.msrb.mxu1 %v11421_v2  ;;  %v7237_v54 = vadd.f32 %v7236_v8, %v7223_v41  ;;  %v7478_v60 = vadd.f32 %v7477_v27, %v7476_v51  ;;  %v7486_v62 = vrot.slane %v7485_v57, 2 }
 0x581   :  { %v11930_v55 = vld [vmem:[#allocation4 + $0x638] sm:$0xf0]  ;;  %7430 = vmatmul.bf16.vlgmr.msrb.gmra.mxu0 %v14136_v42  ;;  %v7494_v4 = vadd.f32 %v7493_v12, %v7492_v9 }
 0x582   :  { %v11933_v5 = vor.u32 %v13253_v0, %v11930_v55  ;;  %7455 = vmatpush.bf16.msrb.mxu2 %v11677_v6  ;;  %v7479_v6 = vrot.slane %v7478_v60, 2 }
 0x583   :  { %7443 = vmatmul.bf16.vlgmr.msrb.gmra.mxu1 %v14138_v44 }
 0x584   :  { %7468 = vmatpush.bf16.msrb.mxu3 %v11933_v5  ;;  %v7487_v5 = vadd.f32 %v7486_v62, %v7485_v57 }
 0x585   :  { %7456 = vmatmul.bf16.vlgmr.msrb.gmra.mxu2 %v14140_v45  ;;  %v7225_v23 = vpop.f32.mrf.mxu0 }
 0x587   :  { %7469 = vmatmul.bf16.vlgmr.msrb.gmra.mxu3 %v14142_v24  ;;  %v7249_v13 = vpop.f32.mrf.mxu2  ;;  %v7238_v3 = vpop.f32.mrf.mxu1 }
 0x588   :  { %v7250_v17 = vadd.f32 %v7249_v13, %v7237_v54  ;;  %v7480_v3 = vadd.f32 %v7479_v6, %v7478_v60 }
 0x589   :  { %v7262_v21 = vpop.f32.mrf.mxu3 }
 0x58a   :  { %v14182_v22 = vadd.f32 %v7262_v21, %v7250_v17  ;;  %v7495_v17 = vrot.slane %v7494_v4, 1 }
 0x58c   :  { %v7497_v48 = vsel %vm2181_vm0, %v14182_v22, 0.0 }
 0x58d   :  { %v7498_v30 = vrot.slane %v7497_v48, 4 }
 0x58f   :  { %v7251_v16 = vpop.f32.mrf.mxu2  ;;  %v7499_v7 = vadd.f32 %v7498_v30, %v7497_v48 }
 0x590   :  { %v7488_v16 = vrot.slane %v7487_v5, 1 }
 0x591   :  { %v7264_v63 = vpop.f32.mrf.mxu3  ;;  %v7500_v61 = vrot.slane %v7499_v7, 2 }
 0x593   :  { %v7501_v0 = vadd.f32 %v7500_v61, %v7499_v7 }
 0x595   :  { %v7502_v8 = vrot.slane %v7501_v0, 1 }
 0x597   :  { %v7503_v63 = vadd.f32 %v7502_v8, %v7501_v0 }
 0x59d   :  { %v7275_v52 = vpop.f32.mrf.mxu0 }
 0x59f   :  { %v7288_v42 = vpop.f32.mrf.mxu1 }
 0x5a0   :  { %v7289_v25 = vadd.f32 %v7288_v42, %v7275_v52 }
 0x5a5   :  { %v7277_v24 = vpop.f32.mrf.mxu0 }
 0x5a6   :  { %v7481_v24 = vrot.slane %v7480_v3, 1 }
 0x5a7   :  { %v7301_v44 = vpop.f32.mrf.mxu2  ;;  %v7290_v28 = vpop.f32.mrf.mxu1 }
 0x5a8   :  { %v7302_v10 = vadd.f32 %v7301_v44, %v7289_v25  ;;  %v7496_v25 = vadd.f32 %v7495_v17, %v7494_v4  ;;  %v7489_v28 = vadd.f32 %v7488_v16, %v7487_v5 }
 0x5a9   :  { %v7314_v45 = vpop.f32.mrf.mxu3 }
 0x5aa   :  { %v14184_v26 = vadd.f32 %v7314_v45, %v7302_v10  ;;  %v14211_v48 = vmul.f32 %v7489_v28, %v13922_v37 }
 0x5ac   :  { %v7504_v50 = vsel %vm2181_vm0, %v14184_v26, 0.0  ;;  %v7541_v51 = vsub.f32 %v14170_v33, %v14211_v48 }
 0x5ad   :  { %v7505_v40 = vrot.slane %v7504_v50, 4 }
 0x5af   :  { %v7303_v32 = vpop.f32.mrf.mxu2  ;;  %v7506_v1 = vadd.f32 %v7505_v40, %v7504_v50 }
 0x5b1   :  { %v7316_v34 = vpop.f32.mrf.mxu3  ;;  %v7507_v2 = vrot.slane %v7506_v1, 2 }
 0x5b3   :  { %v7508_v21 = vadd.f32 %v7507_v2, %v7506_v1 }
 0x5b5   :  { %v7509_v44 = vrot.slane %v7508_v21, 1 }
 0x5bd   :  { %v7327_v39 = vpop.f32.mrf.mxu0 }
 0x5bf   :  { %v7340_v31 = vpop.f32.mrf.mxu1 }
 0x5c0   :  { %v7341_v59 = vadd.f32 %v7340_v31, %v7327_v39  ;;  %v14203_v39 = vmul.f32 %v7503_v63, %v13922_v37 }
 0x5c2   :  { %v7543_v20 = vsub.f32 %v14182_v22, %v14203_v39 }
 0x5c4   :  { %v7551_v7 = vmul.f32 %v7543_v20, %v7543_v20 }
 0x5c5   :  { %v7329_v47 = vpop.f32.mrf.mxu0 }
 0x5c6   :  { %v7577_v12 = vsel %vm2181_vm0, %v7551_v7, 0.0 }
 0x5c7   :  { %v7353_v29 = vpop.f32.mrf.mxu2  ;;  %v7342_v19 = vpop.f32.mrf.mxu1  ;;  %v7578_v6 = vrot.slane %v7577_v12, 4 }
 0x5c8   :  { %v7354_v15 = vadd.f32 %v7353_v29, %v7341_v59  ;;  %v14206_v29 = vmul.f32 %v7496_v25, %v13922_v37  ;;  %v7482_v19 = vadd.f32 %v7481_v24, %v7480_v3 }
 0x5c9   :  { %v7366_v46 = vpop.f32.mrf.mxu3 }
 0x5ca   :  { %v14186_v36 = vadd.f32 %v7366_v46, %v7354_v15  ;;  %v7510_v15 = vadd.f32 %v7509_v44, %v7508_v21  ;;  %v7542_v30 = vsub.f32 %v14176_v18, %v14206_v29  ;;  %v14224_v35 = vmul.f32 %v7482_v19, %v13922_v37 }
 0x5cc   :  { %v7511_v11 = vsel %vm2181_vm0, %v14186_v36, 0.0  ;;  %v14221_v49 = vmul.f32 %v7510_v15, %v13922_v37  ;;  %v7550_v40 = vmul.f32 %v7542_v30, %v7542_v30  ;;  %v7540_v61 = vsub.f32 %v14164_v53, %v14224_v35 }
 0x5cd   :  { %v7512_v56 = vrot.slane %v7511_v11, 4 }
 0x5ce   :  { %v7544_v27 = vsub.f32 %v14184_v26, %v14221_v49  ;;  %v7570_v62 = vsel %vm2181_vm0, %v7550_v40, 0.0  ;;  %v7548_v4 = vmul.f32 %v7540_v61, %v7540_v61 }
 0x5cf   :  { %v7355_v38 = vpop.f32.mrf.mxu2  ;;  %v7513_v58 = vadd.f32 %v7512_v56, %v7511_v11  ;;  %v7571_v5 = vrot.slane %v7570_v62, 4 }
 0x5d0   :  { %v7552_v0 = vmul.f32 %v7544_v27, %v7544_v27  ;;  %v7556_v21 = vsel %vm2181_vm0, %v7548_v4, 0.0 }
 0x5d1   :  { %v7368_v43 = vpop.f32.mrf.mxu3  ;;  %v7514_v55 = vrot.slane %v7513_v58, 2  ;;  %v7572_v63 = vadd.f32 %v7571_v5, %v7570_v62 }
 0x5d3   :  { %v7515_v54 = vadd.f32 %v7514_v55, %v7513_v58  ;;  %v7549_v58 = vmul.f32 %v7541_v51, %v7541_v51 }
 0x5d5   :  { %v7516_v52 = vrot.slane %v7515_v54, 1  ;;  %v7563_v2 = vsel %vm2181_vm0, %v7549_v58, 0.0 }
 0x5d7   :  { %v7517_v31 = vadd.f32 %v7516_v52, %v7515_v54  ;;  %v7584_v54 = vsel %vm2181_vm0, %v7552_v0, 0.0 }
 0x5d8   :  { %v7585_v52 = vrot.slane %v7584_v54, 4 }
 0x5d9   :  { %v14216_v38 = vmul.f32 %v7517_v31, %v13922_v37  ;;  %v7573_v31 = vrot.slane %v7572_v63, 2 }
 0x5db   :  { %v7545_v56 = vsub.f32 %v14186_v36, %v14216_v38 }
 0x5dd   :  { %v7379_v41 = vpop.f32.mrf.mxu0  ;;  %v7553_v1 = vmul.f32 %v7545_v56, %v7545_v56 }
 0x5df   :  { %v7392_v13 = vpop.f32.mrf.mxu1 }
 0x5e0   :  { %v7393_v23 = vadd.f32 %v7392_v13, %v7379_v41  ;;  %v7591_v41 = vsel %vm2181_vm0, %v7553_v1, 0.0  ;;  %v7564_v13 = vrot.slane %v7563_v2, 4 }
 0x5e1   :  { %v7592_v3 = vrot.slane %v7591_v41, 4 }
 0x5e3   :  { %v7593_v28 = vadd.f32 %v7592_v3, %v7591_v41 }
 0x5e5   :  { %v7381_v34 = vpop.f32.mrf.mxu0 }
 0x5e7   :  { %v7405_v42 = vpop.f32.mrf.mxu2  ;;  %v7394_v59 = vpop.f32.mrf.mxu1 }
 0x5e8   :  { %v7406_v10 = vadd.f32 %v7405_v42, %v7393_v23  ;;  %v7579_v23 = vadd.f32 %v7578_v6, %v7577_v12  ;;  %v7586_v59 = vadd.f32 %v7585_v52, %v7584_v54 }
 0x5e9   :  { %v7418_v45 = vpop.f32.mrf.mxu3 }
 0x5ea   :  { %v14200_v32 = vadd.f32 %v7418_v45, %v7406_v10  ;;  %v7557_v10 = vrot.slane %v7556_v21, 4  ;;  %v7565_v45 = vadd.f32 %v7564_v13, %v7563_v2  ;;  %v7580_v24 = vrot.slane %v7579_v23, 2 }
 0x5eb   :  { %v7587_v51 = vrot.slane %v7586_v59, 2 }
 0x5ec   :  { %v7518_v46 = vsel %vm2181_vm0, %v14200_v32, 0.0  ;;  %v7581_v20 = vadd.f32 %v7580_v24, %v7579_v23 }
 0x5ed   :  { %v7519_v47 = vrot.slane %v7518_v46, 4  ;;  %v7588_v1 = vadd.f32 %v7587_v51, %v7586_v59 }
 0x5ef   :  { %v7520_v43 = vadd.f32 %v7519_v47, %v7518_v46  ;;  %v7407_v14 = vpop.f32.mrf.mxu2  ;;  %v7558_v46 = vadd.f32 %v7557_v10, %v7556_v21  ;;  %v7566_v47 = vrot.slane %v7565_v45, 2  ;;  %v7589_v13 = vrot.slane %v7588_v1, 1 }
 0x5f1   :  { %v7420_v11 = vpop.f32.mrf.mxu3  ;;  %v7521_v50 = vrot.slane %v7520_v43, 2  ;;  %v7559_v40 = vrot.slane %v7558_v46, 2  ;;  %v7567_v27 = vadd.f32 %v7566_v47, %v7565_v45 }
 0x5f3   :  { %v7522_v9 = vadd.f32 %v7521_v50, %v7520_v43  ;;  %v7594_v43 = vrot.slane %v7593_v28, 2  ;;  %v7574_v50 = vadd.f32 %v7573_v31, %v7572_v63  ;;  %v7560_v0 = vadd.f32 %v7559_v40, %v7558_v46 }
 0x5f4   :  { %v7568_v4 = vrot.slane %v7567_v27, 1 }
 0x5f5   :  { %v7523_v57 = vrot.slane %v7522_v9, 1  ;;  %v7595_v61 = vadd.f32 %v7594_v43, %v7593_v28  ;;  %v7575_v12 = vrot.slane %v7574_v50, 1  ;;  %v7561_v23 = vrot.slane %v7560_v0, 1 }
 0x5f6   :  { %v7569_v3 = vadd.f32 %v7568_v4, %v7567_v27 }
 0x5f7   :  { %v7524_v60 = vadd.f32 %v7523_v57, %v7522_v9  ;;  %v7582_v57 = vrot.slane %v7581_v20, 1  ;;  %v7596_v41 = vrot.slane %v7595_v61, 1  ;;  %v7576_v54 = vadd.f32 %v7575_v12, %v7574_v50 }
 0x5f8   :  { %v7562_v45 = vadd.f32 %v7561_v23, %v7560_v0  ;;  %v7613_v24 = vmul.f32 %v7569_v3, %v13922_v37 }
 0x5f9   :  { %v14237_v55 = vmul.f32 %v7524_v60, %v13922_v37  ;;  %v7583_v5 = vadd.f32 %v7582_v57, %v7581_v20  ;;  %v7597_v52 = vadd.f32 %v7596_v41, %v7595_v61 }
 0x5fa   :  { %v14264_v20 = vadd.f32 1e-05, %v7613_v24 }
 0x5fb   :  { %v7546_v8 = vsub.f32 %v14200_v32, %v14237_v55  ;;  %v7615_v63 = vmul.f32 %v7583_v5, %v13922_v37  ;;  %v7617_v31 = vmul.f32 %v7597_v52, %v13922_v37 }
 0x5fc   :  { %vm7644_vm6 = vweird.f32 %v14264_v20 }
 0x5fd   :  { %v7554_v17 = vmul.f32 %v7546_v8, %v7546_v8 }
 0x5fe   :  { %v7431_v16 = vpop.f32.mrf.mxu0 }
 0x5ff   :  { %v7598_v42 = vsel %vm2181_vm0, %v7554_v17, 0.0 }
 0x600   :  { %v7444_v25 = vpop.f32.mrf.mxu1  ;;  %v7599_v44 = vrot.slane %v7598_v42, 4 }
 0x601   :  { %v7445_v34 = vadd.f32 %v7444_v25, %v7431_v16  ;;  %v7590_v25 = vadd.f32 %v7589_v13, %v7588_v1 }
 0x602   :  { %v7600_v15 = vadd.f32 %v7599_v44, %v7598_v42  ;;  %v7614_v42 = vmul.f32 %v7576_v54, %v13922_v37 }
 0x604   :  { %v7601_v56 = vrot.slane %v7600_v15, 2  ;;  %v14256_v59 = vadd.f32 1e-05, %v7614_v42 }
 0x606   :  { %v7433_v11 = vpop.f32.mrf.mxu0  ;;  %v7602_v62 = vadd.f32 %v7601_v56, %v7600_v15  ;;  %v7616_v15 = vmul.f32 %v7590_v25, %v13922_v37  ;;  %vm7654_vm4 = vweird.f32 %v14256_v59 }
 0x608   :  { %v7457_v19 = vpop.f32.mrf.mxu2  ;;  %v7446_v7 = vpop.f32.mrf.mxu1  ;;  %v7603_v21 = vrot.slane %v7602_v62, 1 }
 0x609   :  { %v7458_v14 = vadd.f32 %v7457_v19, %v7445_v34  ;;  %v14253_v34 = vadd.f32 1e-05, %v7615_v63  ;;  %v7612_v19 = vmul.f32 %v7562_v45, %v13922_v37 }
 0x60a   :  { %v7470_v30 = vpop.f32.mrf.mxu3  ;;  %v7604_v10 = vadd.f32 %v7603_v21, %v7602_v62 }
 0x60b   :  { %v14246_v9 = vadd.f32 %v7470_v30, %v7458_v14  ;;  %13409 = vrsqrt.f32 %v14253_v34  ;;  %v14269_v14 = vadd.f32 1e-05, %v7617_v31  ;;  %v14272_v30 = vadd.f32 1e-05, %v7616_v15 }
 0x60c   :  { %v7618_v47 = vmul.f32 %v7604_v10, %v13922_v37  ;;  %13411 = vrsqrt.f32 %v14256_v59  ;;  %v14276_v51 = vadd.f32 1e-05, %v7612_v19  ;;  %vm7664_vm2 = vweird.f32 %v14253_v34 }
 0x60d   :  { %v7525_v58 = vsel %vm2181_vm0, %v14246_v9, 0.0  ;;  %13413 = vrsqrt.f32 %v14264_v20  ;;  %vm7674_vm11 = vweird.f32 %v14272_v30 }
 0x60e   :  { %v7526_v60 = vrot.slane %v7525_v58, 4  ;;  %v14274_v50 = vadd.f32 1e-05, %v7618_v47  ;;  %13415 = vrsqrt.f32 %v14269_v14 }
 0x60f   :  { %13417 = vrsqrt.f32 %v14272_v30 }
 0x610   :  { %v7527_v2 = vadd.f32 %v7526_v60, %v7525_v58  ;;  %v7459_v6 = vpop.f32.mrf.mxu2  ;;  %13419 = vrsqrt.f32 %v14274_v50 }
 0x611   :  { %v14282_v40 = vpop.eup %13409  ;;  %13421 = vrsqrt.f32 %v14276_v51 }
 0x612   :  { %v7472_v8 = vpop.f32.mrf.mxu3  ;;  %v7528_v17 = vrot.slane %v7527_v2, 2  ;;  %v14285_v57 = vpop.eup %13411  ;;  %v7659_v12 = vmul.f32 %v14282_v40, %v14253_v34  ;;  %vm7665_vm3 = vweird.f32 %v14282_v40 }
 0x613   :  { %v14288_v58 = vpop.eup %13413  ;;  %v7649_v60 = vmul.f32 %v14285_v57, %v14256_v59  ;;  %vm7655_vm5 = vweird.f32 %v14285_v57  ;;  %vm14329_vm8 = vmor %vm7664_vm2, %vm7665_vm3  ;;  %vm7684_vm2 = vweird.f32 %v14269_v14 }
 0x614   :  { %v7529_v16 = vadd.f32 %v7528_v17, %v7527_v2  ;;  %v14292_v1 = vpop.eup %13415  ;;  %v7639_v2 = vmul.f32 %v14288_v58, %v14264_v20  ;;  %v7660_v41 = vmul.f32 %v14282_v40, %v7659_v12  ;;  %vm7645_vm7 = vweird.f32 %v14288_v58  ;;  %vm14333_vm9 = vmor %vm7654_vm4, %vm7655_vm5 }
 0x615   :  { %v14296_v0 = vpop.eup %13417  ;;  %v7679_v8 = vmul.f32 %v14292_v1, %v14269_v14  ;;  %v7650_v54 = vmul.f32 %v14285_v57, %v7649_v60  ;;  %vm7685_vm10 = vweird.f32 %v14292_v1  ;;  %vm14348_vm15 = vmor %vm7644_vm6, %vm7645_vm7  ;;  %vm7694_vm6 = vweird.f32 %v14274_v50 }
 0x616   :  { %v7530_v44 = vrot.slane %v7529_v16, 1  ;;  %v14298_v4 = vpop.eup %13419  ;;  %v7669_v13 = vmul.f32 %v14296_v0, %v14272_v30  ;;  %v7640_v3 = vmul.f32 %v14288_v58, %v7639_v2  ;;  %v7661_v63 = vmul.f32 0.5, %v7660_v41  ;;  %vm14358_vm4 = vmor %vm7684_vm2, %vm7685_vm10 }
 0x617   :  { %v14302_v5 = vpop.eup %13421  ;;  %v7689_v21 = vmul.f32 %v14298_v4, %v14274_v50  ;;  %v7680_v52 = vmul.f32 %v14292_v1, %v7679_v8  ;;  %v7651_v42 = vmul.f32 0.5, %v7650_v54  ;;  %vm7675_vm12 = vweird.f32 %v14296_v0 }
 0x618   :  { %v7531_v28 = vadd.f32 %v7530_v44, %v7529_v16  ;;  %v7629_v23 = vmul.f32 %v14302_v5, %v14276_v51  ;;  %v7670_v25 = vmul.f32 %v14296_v0, %v7669_v13  ;;  %v7641_v24 = vmul.f32 0.5, %v7640_v3  ;;  %vm14362_vm5 = vmor %vm7674_vm11, %vm7675_vm12 }
 0x619   :  { %v7690_v10 = vmul.f32 %v14298_v4, %v7689_v21  ;;  %v7681_v31 = vmul.f32 0.5, %v7680_v52  ;;  %v7652_v15 = vsub.f32 1.5, %v7651_v42  ;;  %vm7695_vm3 = vweird.f32 %v14298_v4 }
 0x61a   :  { %v14260_v46 = vmul.f32 %v7531_v28, %v13922_v37  ;;  %v7630_v45 = vmul.f32 %v14302_v5, %v7629_v23  ;;  %v7662_v28 = vsub.f32 1.5, %v7661_v63  ;;  %v7671_v47 = vmul.f32 0.5, %v7670_v25  ;;  %vm7696_vm10 = vmor %vm7694_vm6, %vm7695_vm3 }
 0x61b   :  { %v7691_v19 = vmul.f32 0.5, %v7690_v10  ;;  %vm7728_vm2 = vcmask 1046534   ;;  %vm7730_vm3 = vcmask 1045508  }
 0x61c   :  { %v7547_v43 = vsub.f32 %v14246_v9, %v14260_v46 }
 0x61d   :  { %v7692_v12 = vsub.f32 1.5, %v7691_v19 }
 0x61e   :  { %v7555_v11 = vmul.f32 %v7547_v43, %v7547_v43  ;;  %v7631_v43 = vmul.f32 0.5, %v7630_v45 }
 0x620   :  { %v7605_v7 = vsel %vm2181_vm0, %v7555_v11, 0.0  ;;  %v7663_v11 = vmul.f32 %v14282_v40, %v7662_v28 }
 0x621   :  { %v7606_v56 = vrot.slane %v7605_v7, 4 }
 0x622   :  { %v7667_v59 = vsel %vm14329_vm8, %v14282_v40, %v7663_v11  ;;  %v7693_v40 = vmul.f32 %v14298_v4, %v7692_v12  ;;  %vm7634_vm8 = vweird.f32 %v14276_v51 }
 0x623   :  { %v7607_v27 = vadd.f32 %v7606_v56, %v7605_v7  ;;  %v7682_v7 = vsub.f32 1.5, %v7681_v31  ;;  %v7718_v21 = vrot.slane %v7667_v59, 5 }
 0x624   :  { %v7697_v52 = vsel %vm7696_vm10, %v14298_v4, %v7693_v40 }
 0x625   :  { %v7608_v61 = vrot.slane %v7607_v27, 2  ;;  %v7683_v41 = vmul.f32 %v14292_v1, %v7682_v7 }
 0x627   :  { %v7609_v62 = vadd.f32 %v7608_v61, %v7607_v27  ;;  %v7653_v27 = vmul.f32 %v14285_v57, %v7652_v15  ;;  %v7672_v61 = vsub.f32 1.5, %v7671_v47  ;;  %v7687_v14 = vsel %vm14358_vm4, %v14292_v1, %v7683_v41 }
 0x628   :  { %v7720_v50 = vrot.slane %v7687_v14, 3 }
 0x629   :  { %v7610_v6 = vrot.slane %v7609_v62, 1  ;;  %v7657_v20 = vsel %vm14333_vm9, %v14285_v57, %v7653_v27  ;;  %v7673_v54 = vmul.f32 %v14296_v0, %v7672_v61  ;;  %vm7635_vm9 = vweird.f32 %v14302_v5 }
 0x62a   :  { %vm7636_vm4 = vmor %vm7634_vm8, %vm7635_vm9 }
 0x62b   :  { %v7611_v17 = vadd.f32 %v7610_v6, %v7609_v62  ;;  %v7632_v62 = vsub.f32 1.5, %v7631_v43  ;;  %v7677_v63 = vsel %vm14362_vm5, %v14296_v0, %v7673_v54 }
 0x62c   :  { %v7719_v45 = vrot.slane %v7677_v63, 4 }
 0x62d   :  { %v7619_v16 = vmul.f32 %v7611_v17, %v13922_v37  ;;  %v7642_v37 = vsub.f32 1.5, %v7641_v24  ;;  %v7721_v24 = vrot.slane %v7697_v52, 2 }
 0x62f   :  { %v7627_v44 = vadd.f32 1e-05, %v7619_v16  ;;  %v7643_v2 = vmul.f32 %v14288_v58, %v7642_v37  ;;  %v7633_v16 = vmul.f32 %v14302_v5, %v7632_v62 }
 0x631   :  { %13423 = vrsqrt.f32 %v7627_v44  ;;  %v7647_v57 = vsel %vm14348_vm15, %v14288_v58, %v7643_v2  ;;  %v7717_v58 = vrot.slane %v7657_v20, 6  ;;  %vm7704_vm11 = vweird.f32 %v7627_v44 }
 0x632   :  { %v7716_v1 = vrot.slane %v7647_v57, 7  ;;  %vm7726_vm15 = vcmask 1044484   ;;  %v7637_v0 = vsel %vm7636_vm4, %v14302_v5, %v7633_v16 }
 0x633   :  { %v7724_v25 = vsel %vm2314_vm14, %v7717_v58, %v7718_v21  ;;  %v7727_v31 = vsel %vm7726_vm15, %v7719_v45, %v7720_v50 }
 0x634   :  { %v7723_v4 = vsel %vm2312_vm13, %v7637_v0, %v7716_v1 }
 0x635   :  { %v7725_v47 = vsel %vm2316_vm1, %v7723_v4, %v7724_v25 }
 0x637   :  { %v13424_v56 = vpop.eup %13423 }
 0x638   :  { %v7699_v60 = vmul.f32 %v13424_v56, %v7627_v44  ;;  %vm7705_vm7 = vweird.f32 %v13424_v56  ;;  %v7474_v44 = vld [vmem:[#allocation15] sm:$0xff] }
 0x639   :  { %vm7706_vm12 = vmor %vm7704_vm11, %vm7705_vm7 }
 0x63a   :  { %v7700_v8 = vmul.f32 %v13424_v56, %v7699_v60 }
 0x63c   :  { %v7701_v17 = vmul.f32 0.5, %v7700_v8 }
 0x63e   :  { %v7702_v3 = vsub.f32 1.5, %v7701_v17 }
 0x640   :  { %v7703_v42 = vmul.f32 %v13424_v56, %v7702_v3 }
 0x642   :  { %v7707_v10 = vsel %vm7706_vm12, %v13424_v56, %v7703_v42 }
 0x643   :  { %v7722_v28 = vrot.slane %v7707_v10, 1 }
 0x645   :  { %v7729_v15 = vsel %vm7728_vm2, %v7721_v24, %v7722_v28 }
 0x646   :  { %v7731_v19 = vsel %vm7730_vm3, %v7727_v31, %v7729_v15 }
 0x647   :  { %v7732_v51 = vsel %vm2181_vm0, %v7725_v47, %v7731_v19 }
 0x648   :  { %v7734_v43 = vmul.f32 %v7732_v51, %v7474_v44 }
 0x64a   :  { %v7737_v37 = vperm.slane %v7734_v43, 1  ;;  %v7738_v11 = vperm.slane %v7734_v43, 2  ;;  %v7739_v7 = vperm.slane %v7734_v43, 3  ;;  %v7740_v56 = vperm.slane %v7734_v43, 4 }
 0x64b   :  { %v7741_v27 = vperm.slane %v7734_v43, 5  ;;  %v7742_v5 = vperm.slane %v7734_v43, 6  ;;  %v7743_v61 = vperm.slane %v7734_v43, 7  ;;  %v7736_v12 = vperm.slane %v7734_v43, 0 }
 0x64c   :  { %v7761_v60 = vmul.f32 %v7737_v37, %v14211_v48  ;;  %v7762_v62 = vmul.f32 %v7738_v11, %v14206_v29  ;;  %v7763_v2 = vmul.f32 %v7739_v7, %v14203_v39  ;;  %v7764_v34 = vmul.f32 %v7740_v56, %v14221_v49  ;;  %v7475_v49 = vld [vmem:[#allocation16] sm:$0xff] }
 0x64d   :  { %v7765_v6 = vmul.f32 %v7741_v27, %v14216_v38  ;;  %v7766_v59 = vmul.f32 %v7742_v5, %v14237_v55  ;;  %v7767_v41 = vmul.f32 %v7743_v61, %v14260_v46  ;;  %v7760_v8 = vmul.f32 %v7736_v12, %v14224_v35 }
 0x64e   :  { %v7776_v20 = vrot.slane %v7761_v60, 7  ;;  %v7777_v54 = vrot.slane %v7762_v62, 6  ;;  %v7778_v13 = vrot.slane %v7763_v2, 5  ;;  %v7779_v40 = vrot.slane %v7764_v34, 4 }
 0x64f   :  { %v7780_v17 = vrot.slane %v7765_v6, 3  ;;  %v7781_v48 = vrot.slane %v7766_v59, 2  ;;  %v7782_v57 = vrot.slane %v7767_v41, 1  ;;  %v7752_v21 = vmul.f32 %v7736_v12, %v14164_v53 }
 0x650   :  { %v7783_v29 = vsel %vm2312_vm13, %v7760_v8, %v7776_v20  ;;  %v7784_v39 = vsel %vm2314_vm14, %v7777_v54, %v7778_v13  ;;  %v7753_v23 = vmul.f32 %v7737_v37, %v14170_v33  ;;  %v7754_v14 = vmul.f32 %v7738_v11, %v14176_v18 }
 0x651   :  { %v7785_v38 = vsel %vm2316_vm1, %v7783_v29, %v7784_v39  ;;  %v7786_v55 = vsel %vm7726_vm15, %v7779_v40, %v7780_v17  ;;  %v7787_v46 = vsel %vm7728_vm2, %v7781_v48, %v7782_v57  ;;  %v7755_v3 = vmul.f32 %v7739_v7, %v14182_v22 }
 0x652   :  { %v7788_v35 = vsel %vm7730_vm3, %v7786_v55, %v7787_v46  ;;  %v7756_v58 = vmul.f32 %v7740_v56, %v14184_v26  ;;  %v7757_v63 = vmul.f32 %v7741_v27, %v14186_v36  ;;  %v7758_v52 = vmul.f32 %v7742_v5, %v14200_v32 }
 0x653   :  { %v7789_v30 = vsel %vm2181_vm0, %v7785_v38, %v7788_v35  ;;  %v7759_v42 = vmul.f32 %v7743_v61, %v14246_v9 }
 0x654   :  { %v7791_v16 = vsub.f32 %v7475_v49, %v7789_v30 }
 0x656   :  { %v7793_v1 = vperm.slane %v7791_v16, 0  ;;  %v7794_v50 = vperm.slane %v7791_v16, 1  ;;  %v7795_v53 = vperm.slane %v7791_v16, 2  ;;  %v7796_v25 = vperm.slane %v7791_v16, 3 }
 0x657   :  { %v7797_v10 = vperm.slane %v7791_v16, 4  ;;  %v7798_v45 = vperm.slane %v7791_v16, 5  ;;  %v7799_v33 = vperm.slane %v7791_v16, 6  ;;  %v7800_v24 = vperm.slane %v7791_v16, 7 }
 0x658   :  { %v7809_v18 = vadd.f32 %v7793_v1, %v7752_v21  ;;  %v7810_v28 = vadd.f32 %v7794_v50, %v7753_v23  ;;  %v7811_v22 = vadd.f32 %v7795_v53, %v7754_v14  ;;  %v7812_v0 = vadd.f32 %v7796_v25, %v7755_v3 }
 0x659   :  { %v7813_v4 = vadd.f32 %v7797_v10, %v7756_v58  ;;  %v7814_v26 = vadd.f32 %v7798_v45, %v7757_v63  ;;  %v7815_v44 = vadd.f32 %v7799_v33, %v7758_v52  ;;  %v7816_v36 = vadd.f32 %v7800_v24, %v7759_v42 }
 0x65a   :  { %v7817_v31 = vmax.f32 %v7809_v18, 0.0  ;;  %v7818_v32 = vmax.f32 %v7810_v28, 0.0  ;;  %v7819_v15 = vmax.f32 %v7811_v22, 0.0  ;;  %v7820_v9 = vmax.f32 %v7812_v0, 0.0 }
 0x65b   :  { %v7821_v47 = vmax.f32 %v7813_v4, 0.0  ;;  %v7822_v19 = vmax.f32 %v7814_v26, 0.0  ;;  %v7823_v51 = vmax.f32 %v7815_v44, 0.0  ;;  %v7824_v43 = vmax.f32 %v7816_v36, 0.0 }
 0x65c   :  { %v7833_v37 = vrot.slane %v7817_v31, 2  ;;  %v7834_v11 = vrot.slane %v7818_v32, 2  ;;  %v7835_v7 = vrot.slane %v7819_v15, 2  ;;  %v7836_v56 = vrot.slane %v7820_v9, 2 }
 0x65d   :  { %v7837_v27 = vrot.slane %v7821_v47, 2  ;;  %v7838_v5 = vrot.slane %v7822_v19, 2  ;;  %v7839_v61 = vrot.slane %v7823_v51, 2  ;;  %v7840_v12 = vrot.slane %v7824_v43, 2 }
 0x65e   :  { %v7849_v60 = vadd.f32 %v7833_v37, %v7817_v31  ;;  %v7850_v62 = vadd.f32 %v7834_v11, %v7818_v32  ;;  %v7851_v2 = vadd.f32 %v7835_v7, %v7819_v15  ;;  %v7852_v34 = vadd.f32 %v7836_v56, %v7820_v9 }
 0x65f   :  { %v7853_v6 = vadd.f32 %v7837_v27, %v7821_v47  ;;  %v7854_v59 = vadd.f32 %v7838_v5, %v7822_v19  ;;  %v7855_v41 = vadd.f32 %v7839_v61, %v7823_v51  ;;  %v7856_v8 = vadd.f32 %v7840_v12, %v7824_v43 }
 0x660   :  { %v14410_v20 = vmul.f32 0.5, %v7849_v60  ;;  %v14412_v54 = vmul.f32 0.5, %v7850_v62  ;;  %v14414_v13 = vmul.f32 0.5, %v7851_v2  ;;  %v14416_v40 = vmul.f32 0.5, %v7852_v34 }
 0x661   :  { %v14418_v17 = vmul.f32 0.5, %v7853_v6  ;;  %v14420_v48 = vmul.f32 0.5, %v7854_v59  ;;  %v14422_v57 = vmul.f32 0.5, %v7855_v41  ;;  %v14424_v29 = vmul.f32 0.5, %v7856_v8 }
 0x662   :  { %v7865_v39 = vpack.c.bf16 %v14410_v20, %v14410_v20  ;;  %v7866_v49 = vpack.c.bf16 %v14412_v54, %v14412_v54  ;;  %v7867_v38 = vpack.c.bf16 %v14414_v13, %v14414_v13  ;;  %v7868_v55 = vpack.c.bf16 %v14416_v40, %v14416_v40 }
 0x663   :  { %v7869_v46 = vpack.c.bf16 %v14418_v17, %v14418_v17  ;;  %v7870_v35 = vpack.c.bf16 %v14420_v48, %v14420_v48  ;;  %v7871_v21 = vpack.c.bf16 %v14422_v57, %v14422_v57  ;;  %v7872_v30 = vpack.c.bf16 %v14424_v29, %v14424_v29 }
 0x664   :  { %13732 = dma.done.wait [#allocation6 + $0x3], 8192 }
 0x665   :  { %13733 = vsyncadd [#allocation6 + $0x3], 4294959104  ;;  %v13321_v23 = vld [vmem:[#allocation5 + $0x38] sm:$0xff]  ;;  %v13320_v58 = vld [vmem:[#allocation5 + $0x30] sm:$0xff]  ;;  %s13748_s0 = smov [#allocation19]   ;;  %s8534_s6 = sshll.u32 %s14483_s12, 4  ;;  %s8535_s6 = int_to_ptr.hbm [resolvable:$true] %s8534_s6 }
 0x666   :  { %v13329_v14 = vld [vmem:[#allocation5 + $0x78] sm:$0xff]  ;;  %8392 = vmatpush.bf16.msra.mxu0 %v13321_v23  ;;  %v13328_v63 = vld [vmem:[#allocation5 + $0x70] sm:$0xff]  ;;  %v13319_v1 = vld [vmem:[#allocation5 + $0x28] sm:$0xff]  ;;  %s8532_s4 = sshll.u32 %s13748_s0, 4  ;;  %vm8525_vm6 = vcmask 508928   ;;  %s8533_s4 = int_to_ptr.vmem [resolvable:$true] %s8532_s4 }
 0x667   :  { %v13337_v3 = vld [vmem:[#allocation5 + $0xb8] sm:$0xff]  ;;  %8405 = vmatpush.bf16.msra.mxu1 %v13329_v14  ;;  %v13336_v52 = vld [vmem:[#allocation5 + $0xb0] sm:$0xff]  ;;  %v13327_v50 = vld [vmem:[#allocation5 + $0x68] sm:$0xff] }
 0x668   :  { %v13345_v16 = vld [vmem:[#allocation5 + $0xf8] sm:$0xff]  ;;  %8418 = vmatpush.bf16.msra.mxu2 %v13337_v3  ;;  %v13344_v42 = vld [vmem:[#allocation5 + $0xf0] sm:$0xff]  ;;  %v13335_v53 = vld [vmem:[#allocation5 + $0xa8] sm:$0xff] }
 0x669   :  { %8431 = vmatpush.bf16.msra.mxu3 %v13345_v16  ;;  %v13343_v25 = vld [vmem:[#allocation5 + $0xe8] sm:$0xff]  ;;  %v13318_v10 = vld [vmem:[#allocation5 + $0x20] sm:$0xff]  ;;  %v13317_v18 = vld [vmem:[#allocation5 + $0x18] sm:$0xff] }
 0x66a   :  { %8393 = vmatpush.bf16.msra.mxu0 %v13320_v58  ;;  %v13326_v45 = vld [vmem:[#allocation5 + $0x60] sm:$0xff]  ;;  %v13325_v28 = vld [vmem:[#allocation5 + $0x58] sm:$0xff]  ;;  %v13316_v4 = vld [vmem:[#allocation5 + $0x10] sm:$0xff] }
 0x66b   :  { %8406 = vmatpush.bf16.msra.mxu1 %v13328_v63  ;;  %v13334_v33 = vld [vmem:[#allocation5 + $0xa0] sm:$0xff]  ;;  %v13333_v22 = vld [vmem:[#allocation5 + $0x98] sm:$0xff]  ;;  %v13324_v26 = vld [vmem:[#allocation5 + $0x50] sm:$0xff] }
 0x66c   :  { %8419 = vmatpush.bf16.msra.mxu2 %v13336_v52  ;;  %v13342_v24 = vld [vmem:[#allocation5 + $0xe0] sm:$0xff]  ;;  %v13341_v0 = vld [vmem:[#allocation5 + $0xd8] sm:$0xff]  ;;  %v13332_v44 = vld [vmem:[#allocation5 + $0x90] sm:$0xff] }
 0x66d   :  { %8432 = vmatpush.bf16.msra.mxu3 %v13344_v42  ;;  %v13340_v36 = vld [vmem:[#allocation5 + $0xd0] sm:$0xff]  ;;  %v13315_v31 = vld [vmem:[#allocation5 + $0x8] sm:$0xff]  ;;  %v13314_v47 = vld [vmem:[#allocation5] sm:$0xff] }
 0x66e   :  { %8394 = vmatpush.bf16.msra.mxu0 %v13319_v1  ;;  %v13323_v32 = vld [vmem:[#allocation5 + $0x48] sm:$0xff]  ;;  %v13322_v19 = vld [vmem:[#allocation5 + $0x40] sm:$0xff]  ;;  %v13353_v37 = vld [vmem:[#allocation5 + $0x138] sm:$0xff] }
 0x66f   :  { %8407 = vmatpush.bf16.msra.mxu1 %v13327_v50  ;;  %v13331_v15 = vld [vmem:[#allocation5 + $0x88] sm:$0xff]  ;;  %v13330_v51 = vld [vmem:[#allocation5 + $0x80] sm:$0xff]  ;;  %v13361_v11 = vld [vmem:[#allocation5 + $0x178] sm:$0xff] }
 0x670   :  { %8420 = vmatpush.bf16.msra.mxu2 %v13335_v53  ;;  %v13339_v9 = vld [vmem:[#allocation5 + $0xc8] sm:$0xff]  ;;  %v13338_v43 = vld [vmem:[#allocation5 + $0xc0] sm:$0xff]  ;;  %v13369_v7 = vld [vmem:[#allocation5 + $0x1b8] sm:$0xff] }
 0x671   :  { %8433 = vmatpush.bf16.msra.mxu3 %v13343_v25  ;;  %v13377_v56 = vld [vmem:[#allocation5 + $0x1f8] sm:$0xff]  ;;  %v13352_v27 = vld [vmem:[#allocation5 + $0x130] sm:$0xff]  ;;  %v13351_v60 = vld [vmem:[#allocation5 + $0x128] sm:$0xff] }
 0x672   :  { %8395 = vmatpush.bf16.msra.mxu0 %v13318_v10  ;;  %v13360_v5 = vld [vmem:[#allocation5 + $0x170] sm:$0xff]  ;;  %v13359_v62 = vld [vmem:[#allocation5 + $0x168] sm:$0xff]  ;;  %v13350_v6 = vld [vmem:[#allocation5 + $0x120] sm:$0xff] }
 0x673   :  { %8408 = vmatpush.bf16.msra.mxu1 %v13326_v45  ;;  %v13368_v61 = vld [vmem:[#allocation5 + $0x1b0] sm:$0xff]  ;;  %v13367_v2 = vld [vmem:[#allocation5 + $0x1a8] sm:$0xff]  ;;  %v13358_v59 = vld [vmem:[#allocation5 + $0x160] sm:$0xff] }
 0x674   :  { %8421 = vmatpush.bf16.msra.mxu2 %v13334_v33  ;;  %v13376_v12 = vld [vmem:[#allocation5 + $0x1f0] sm:$0xff]  ;;  %v13375_v34 = vld [vmem:[#allocation5 + $0x1e8] sm:$0xff]  ;;  %v13366_v41 = vld [vmem:[#allocation5 + $0x1a0] sm:$0xff] }
 0x675   :  { %8434 = vmatpush.bf16.msra.mxu3 %v13342_v24  ;;  %v13374_v8 = vld [vmem:[#allocation5 + $0x1e0] sm:$0xff]  ;;  %v13349_v20 = vld [vmem:[#allocation5 + $0x118] sm:$0xff]  ;;  %v13347_v23 = vld [vmem:[#allocation5 + $0x108] sm:$0xff] }
 0x676   :  { %8396 = vmatpush.bf16.msra.mxu0 %v13317_v18  ;;  %v13357_v54 = vld [vmem:[#allocation5 + $0x158] sm:$0xff]  ;;  %v13355_v14 = vld [vmem:[#allocation5 + $0x148] sm:$0xff]  ;;  %v13346_v58 = vld [vmem:[#allocation5 + $0x100] sm:$0xff] }
 0x677   :  { %8409 = vmatpush.bf16.msra.mxu1 %v13325_v28  ;;  %v13365_v13 = vld [vmem:[#allocation5 + $0x198] sm:$0xff]  ;;  %v13363_v3 = vld [vmem:[#allocation5 + $0x188] sm:$0xff]  ;;  %v13354_v63 = vld [vmem:[#allocation5 + $0x140] sm:$0xff] }
 0x678   :  { %8422 = vmatpush.bf16.msra.mxu2 %v13333_v22  ;;  %v13373_v40 = vld [vmem:[#allocation5 + $0x1d8] sm:$0xff]  ;;  %v13371_v16 = vld [vmem:[#allocation5 + $0x1c8] sm:$0xff]  ;;  %v13362_v52 = vld [vmem:[#allocation5 + $0x180] sm:$0xff]  ;;  %v8497_v22 = vlaneseq }
 0x679   :  { %8435 = vmatpush.bf16.msra.mxu3 %v13341_v0  ;;  %v13370_v42 = vld [vmem:[#allocation5 + $0x1c0] sm:$0xff] }
 0x67a   :  { %8397 = vmatpush.bf16.msra.mxu0 %v13316_v4  ;;  %v13425_v17 = vld [vmem:[#allocation18] ss:$0 sm:$0xff]  ;;  %v8498_v4 = vand.u32 127, %v8497_v22 }
 0x67b   :  { %8410 = vmatpush.bf16.msra.mxu1 %v13324_v26 }
 0x67c   :  { %8423 = vmatpush.bf16.msra.mxu2 %v13332_v44  ;;  %vm8499_vm0 = vcmp.lt.s32.totalorder %v8498_v4, 63 }
 0x67d   :  { %8436 = vmatpush.bf16.msra.mxu3 %v13340_v36 }
 0x67e   :  { %8398 = vmatpush.bf16.msra.mxu0 %v13315_v31 }
 0x67f   :  { %8411 = vmatpush.bf16.msra.mxu1 %v13323_v32 }
 0x680   :  { %8424 = vmatpush.bf16.msra.mxu2 %v13331_v15 }
 0x681   :  { %8437 = vmatpush.bf16.msra.mxu3 %v13339_v9 }
 0x682   :  { %8399 = vmatpush.bf16.msra.mxu0 %v13314_v47 }
 0x683   :  { %8412 = vmatpush.bf16.msra.mxu1 %v13322_v19 }
 0x684   :  { %8425 = vmatpush.bf16.msra.mxu2 %v13330_v51 }
 0x685   :  { %8438 = vmatpush.bf16.msra.mxu3 %v13338_v43  ;;  %8400 = vmatmul.bf16.vlgmr.msra.gmra.mxu0 %v7865_v39  ;;  %v13348_v39 = vld [vmem:[#allocation5 + $0x110] sm:$0xff] }
 0x686   :  { %8444 = vmatpush.bf16.msrb.mxu0 %v13353_v37  ;;  %8413 = vmatmul.bf16.vlgmr.msra.gmra.mxu1 %v7866_v49  ;;  %v13356_v49 = vld [vmem:[#allocation5 + $0x150] sm:$0xff] }
 0x687   :  { %8457 = vmatpush.bf16.msrb.mxu1 %v13361_v11  ;;  %8426 = vmatmul.bf16.vlgmr.msra.gmra.mxu2 %v7867_v38  ;;  %v13364_v38 = vld [vmem:[#allocation5 + $0x190] sm:$0xff] }
 0x688   :  { %8470 = vmatpush.bf16.msrb.mxu2 %v13369_v7  ;;  %8439 = vmatmul.bf16.vlgmr.msra.gmra.mxu3 %v7868_v55  ;;  %v13372_v55 = vld [vmem:[#allocation5 + $0x1d0] sm:$0xff] }
 0x689   :  { %8483 = vmatpush.bf16.msrb.mxu3 %v13377_v56 }
 0x68a   :  { %8445 = vmatpush.bf16.msrb.mxu0 %v13352_v27 }
 0x68b   :  { %8458 = vmatpush.bf16.msrb.mxu1 %v13360_v5 }
 0x68c   :  { %8471 = vmatpush.bf16.msrb.mxu2 %v13368_v61 }
 0x68d   :  { %8484 = vmatpush.bf16.msrb.mxu3 %v13376_v12 }
 0x68e   :  { %8446 = vmatpush.bf16.msrb.mxu0 %v13351_v60 }
 0x68f   :  { %8459 = vmatpush.bf16.msrb.mxu1 %v13359_v62 }
 0x690   :  { %8472 = vmatpush.bf16.msrb.mxu2 %v13367_v2 }
 0x691   :  { %8485 = vmatpush.bf16.msrb.mxu3 %v13375_v34 }
 0x692   :  { %8447 = vmatpush.bf16.msrb.mxu0 %v13350_v6 }
 0x693   :  { %8460 = vmatpush.bf16.msrb.mxu1 %v13358_v59 }
 0x694   :  { %8473 = vmatpush.bf16.msrb.mxu2 %v13366_v41 }
 0x695   :  { %8486 = vmatpush.bf16.msrb.mxu3 %v13374_v8 }
 0x696   :  { %8448 = vmatpush.bf16.msrb.mxu0 %v13349_v20 }
 0x697   :  { %8461 = vmatpush.bf16.msrb.mxu1 %v13357_v54 }
 0x698   :  { %8474 = vmatpush.bf16.msrb.mxu2 %v13365_v13 }
 0x699   :  { %8487 = vmatpush.bf16.msrb.mxu3 %v13373_v40 }
 0x69a   :  { %8449 = vmatpush.bf16.msrb.mxu0 %v13348_v39 }
 0x69b   :  { %8462 = vmatpush.bf16.msrb.mxu1 %v13356_v49 }
 0x69c   :  { %8475 = vmatpush.bf16.msrb.mxu2 %v13364_v38 }
 0x69d   :  { %8488 = vmatpush.bf16.msrb.mxu3 %v13372_v55 }
 0x69e   :  { %8450 = vmatpush.bf16.msrb.mxu0 %v13347_v23 }
 0x69f   :  { %8463 = vmatpush.bf16.msrb.mxu1 %v13355_v14 }
 0x6a0   :  { %8476 = vmatpush.bf16.msrb.mxu2 %v13363_v3 }
 0x6a1   :  { %8489 = vmatpush.bf16.msrb.mxu3 %v13371_v16 }
 0x6a2   :  { %8451 = vmatpush.bf16.msrb.mxu0 %v13346_v58 }
 0x6a3   :  { %8464 = vmatpush.bf16.msrb.mxu1 %v13354_v63 }
 0x6a4   :  { %8477 = vmatpush.bf16.msrb.mxu2 %v13362_v52 }
 0x6a5   :  { %8490 = vmatpush.bf16.msrb.mxu3 %v13370_v42  ;;  %8452 = vmatmul.bf16.vlgmr.msrb.gmra.mxu0 %v7869_v46 }
 0x6a6   :  { %8465 = vmatmul.bf16.vlgmr.msrb.gmra.mxu1 %v7870_v35 }
 0x6a7   :  { %8478 = vmatmul.bf16.vlgmr.msrb.gmra.mxu2 %v7871_v21 }
 0x6a8   :  { %8491 = vmatmul.bf16.vlgmr.msrb.gmra.mxu3 %v7872_v30 }
 0x702   :  { %v8401_v1 = vpop.f32.mrf.mxu0 }
 0x703   :  { %v8414_v50 = vpop.f32.mrf.mxu1  ;;  %v8402_v24 = vadd.f32 %v13425_v17, %v8401_v1 }
 0x705   :  { %v8415_v48 = vadd.f32 %v8414_v50, %v8402_v24 }
 0x70a   :  { %v8427_v53 = vpop.f32.mrf.mxu2  ;;  %v8403_v10 = vpop.f32.mrf.mxu0 }
 0x70b   :  { %v8440_v25 = vpop.f32.mrf.mxu3  ;;  %v8416_v45 = vpop.f32.mrf.mxu1  ;;  %v8428_v35 = vadd.f32 %v8427_v53, %v8415_v48 }
 0x70d   :  { %v8441_v18 = vadd.f32 %v8440_v25, %v8428_v35 }
 0x712   :  { %v8429_v46 = vpop.f32.mrf.mxu2 }
 0x713   :  { %v8442_v33 = vpop.f32.mrf.mxu3 }
 0x722   :  { %v8453_v28 = vpop.f32.mrf.mxu0 }
 0x723   :  { %v8466_v57 = vpop.f32.mrf.mxu1  ;;  %v8454_v21 = vadd.f32 %v8453_v28, %v8441_v18 }
 0x725   :  { %v8467_v0 = vadd.f32 %v8466_v57, %v8454_v21 }
 0x72a   :  { %v8479_v29 = vpop.f32.mrf.mxu2  ;;  %v8455_v44 = vpop.f32.mrf.mxu0 }
 0x72b   :  { %v8492_v30 = vpop.f32.mrf.mxu3  ;;  %v8480_v26 = vadd.f32 %v8479_v29, %v8467_v0  ;;  %v8468_v36 = vpop.f32.mrf.mxu1 }
 0x72d   :  { %v8493_v31 = vadd.f32 %v8492_v30, %v8480_v26 }
 0x72f   :  { %v8496_v32 = vmax.f32 %v8493_v31, 0.0 }
 0x731   :  { %v8500_v15 = vsel %vm8499_vm0, %v8496_v32, -1e+30 }
 0x732   :  { %v8481_v9 = vpop.f32.mrf.mxu2  ;;  %v8501_v19 = vsel %vm2316_vm1, %v8500_v15, -inf }
 0x733   :  { %v8494_v47 = vpop.f32.mrf.mxu3  ;;  %8502 = vmax.xlane.f32.xlu0 %v8501_v19 }
 0x7a6   :  { %v8503_v51 = vpop.xlane.xlu0 %8502 }
 0x7a7   :  { %v8504_v43 = vsub.f32 %v8500_v15, %v8503_v51 }
 0x7a9   :  { %v8505_v37 = vmul.f32 1.442695, %v8504_v43 }
 0x7ab   :  { %13426 = vpow2.f32 %v8505_v37 }
 0x7b1   :  { %v13427_v11 = vpop.eup %13426 }
 0x7b2   :  { %v8507_v7 = vsel %vm2316_vm1, %v13427_v11, 0.0 }
 0x7b3   :  { %8508 = vadd.xlane.f32.xlu0 %v8507_v7 }
 0x826   :  { %v8509_v56 = vpop.xlane.xlu0 %8508 }
 0x827   :  { %13428 = vrcp.f32 %v8509_v56  ;;  %v8521_v12 = vand.u32 2147483648, %v8509_v56  ;;  %v8519_v62 = vand.u32 2147483647, %v8509_v56  ;;  %vm8515_vm14 = vweird.f32 %v8509_v56 }
 0x829   :  { %v8522_v34 = vor.u32 1.1754944e-38, %v8521_v12  ;;  %vm8520_vm1 = vcmp.eq.f32.partialorder %v8519_v62, 8.507059e+37 }
 0x82d   :  { %v13429_v27 = vpop.eup %13428 }
 0x82e   :  { %v8511_v5 = vmul.f32 %v13429_v27, %v8509_v56  ;;  %vm8516_vm13 = vweird.f32 %v13429_v27 }
 0x82f   :  { %vm8517_vm5 = vmor %vm8515_vm14, %vm8516_vm13 }
 0x830   :  { %v8512_v61 = vsub.f32 1.0, %v8511_v5 }
 0x832   :  { %v8513_v60 = vmul.f32 %v13429_v27, %v8512_v61 }
 0x834   :  { %v8514_v2 = vadd.f32 %v13429_v27, %v8513_v60 }
 0x836   :  { %v8518_v6 = vsel %vm8517_vm5, %v13429_v27, %v8514_v2 }
 0x837   :  { %v8523_v59 = vsel %vm8520_vm1, %v8522_v34, %v8518_v6 }
 0x838   :  { %v8524_v41 = vmul.f32 %v13427_v11, %v8523_v59 }
 0x83a   :  { %8526 = vst.msk [vmem:[#allocation19] sm:$0x3] %vm8525_vm6, %v8524_v41 }
 0x83b   :  { %8537 = dma.vmem_to_hbm [thread:$0]  %s8533_s4, 32, %s8535_s6, [#allocation9]  }
 0x83c   :  { %13734 = dma.done.wait [#allocation9], 32  }
 0x83d   :  { %13735 = vsyncadd [#allocation9], 4294967264 }
 0x83e   :  { %8542 = vsyncpa [#allocation8], 1 }
 0x83f   :  { %8543 = vsyncpa [#allocation11], 1 }
 0x840   :  { %8544 = vsyncpa [#allocation14], 1 }
 0x841   :  { %8545 = vsyncpa [#allocation17], 1 }
 0x842   :  { %8546 = vsyncpa [#allocation9], 1 }
 0x843   :  { %8547 = vsyncmov [#allocation6] }
 0x846   :  { %s8548_s11 = vpop.sfrf %8547 }
 0x847   :  { %p12414_p0 = scmp.ne.s32.totalorder %s8548_s11, 0 }
 0x849   :  { %8552 = shalt.err (%p12414_p0)  }
 0x84a   :  { %8554 = vsyncmov [#allocation6 + $0x1] }
 0x84d   :  { %s8555_s12 = vpop.sfrf %8554 }
 0x84e   :  { %p12415_p1 = scmp.ne.s32.totalorder %s8555_s12, 0 }
 0x850   :  { %8559 = shalt.err (%p12415_p1)  }
 0x851   :  { %8561 = vsyncmov [#allocation6 + $0x2] }
 0x854   :  { %s8562_s16 = vpop.sfrf %8561 }
 0x855   :  { %p12416_p2 = scmp.ne.s32.totalorder %s8562_s16, 0 }
 0x857   :  { %8566 = shalt.err (%p12416_p2)  }
 0x858   :  { %8568 = vsyncmov [#allocation6 + $0x3] }
 0x85b   :  { %s8569_s17 = vpop.sfrf %8568 }
 0x85c   :  { %p12417_p3 = scmp.ne.s32.totalorder %s8569_s17, 0 }
 0x85e   :  { %8573 = shalt.err (%p12417_p3)  }

</bundles_post_ra>
